<compile_context>
chip_gen: v7x
topology: tpu7x:2x2x1
jax: 0.10.0
libtpu: 0.0.40
codegen_flags: <defaults>
</compile_context>

<pallas_src>
import functools

import jax
import jax.numpy as jnp
from jax import lax
from jax.experimental import pallas as pl
from jax.experimental.pallas import tpu as pltpu

BN_EPS = 1e-5


# ---------------------------------------------------------------------------
# Fused Pallas kernel
# ---------------------------------------------------------------------------
def _delta_m_kernel(x1_ref, x2_ref, wd_ref, bd_ref, wr_ref, br_ref, o_ref,
                    x2p_ref, yp_ref, acc_ref, *, B, H, W, C):
    cdt = x2p_ref.dtype          # conv_dtype (bf16 by default, f32 for strict check)
    M = B * H * W

    # ---- stage 1: y = relu(x1 + BN(dilated_conv3x3(x2)))  (BN folded into wd/bd) ---
    # Zero only the halo border strips (pad=2); the interior is fully overwritten
    # every grid step, so a full-buffer zero would be redundant store traffic.
    x2p_ref[:, 0:2, :, :] = jnp.zeros((B, 2, W + 4, C), cdt)
    x2p_ref[:, H + 2:H + 4, :, :] = jnp.zeros((B, 2, W + 4, C), cdt)
    x2p_ref[:, 2:H + 2, 0:2, :] = jnp.zeros((B, H, 2, C), cdt)
    x2p_ref[:, 2:H + 2, W + 2:W + 4, :] = jnp.zeros((B, H, 2, C), cdt)
    x2p_ref[:, 2:2 + H, 2:2 + W, :] = x2_ref[...].astype(cdt)

    # f32 VMEM accumulator initialized with bias + residual, then nine accumulating
    # (M, C) x (C, C) matmuls -- one per 3x3 tap (dilation=2) -- on the MXU.
    acc_ref[...] = x1_ref[...].reshape(M, C) + bd_ref[...]
    for t in range(9):
        dy, dx = divmod(t, 3)
        y0, x0 = dy * 2, dx * 2                       # dilation = 2
        tap = x2p_ref[:, y0:y0 + H, x0:x0 + W, :].reshape(M, C)
        acc_ref[...] += jnp.dot(tap, wd_ref[t], preferred_element_type=jnp.float32)
    y = jnp.maximum(acc_ref[...], 0.0)

    # ---- stage 2: z = RepVGGBlock(y), reparam'd into one 3x3 conv + bias + ReLU ----
    # y goes straight into an already-padded (pad=1) VMEM scratch: no HBM round-trip.
    yp_ref[:, 0:1, :, :] = jnp.zeros((B, 1, W + 2, C), cdt)
    yp_ref[:, H + 1:H + 2, :, :] = jnp.zeros((B, 1, W + 2, C), cdt)
    yp_ref[:, 1:H + 1, 0:1, :] = jnp.zeros((B, H, 1, C), cdt)
    yp_ref[:, 1:H + 1, W + 1:W + 2, :] = jnp.zeros((B, H, 1, C), cdt)
    yp_ref[:, 1:1 + H, 1:1 + W, :] = y.reshape(B, H, W, C).astype(cdt)

    acc_ref[...] = jnp.broadcast_to(br_ref[...], (M, C))
    for t in range(9):
        dy, dx = divmod(t, 3)
        tap = yp_ref[:, dy:dy + H, dx:dx + W, :].reshape(M, C)
        acc_ref[...] += jnp.dot(tap, wr_ref[t], preferred_element_type=jnp.float32)
    z = jnp.maximum(acc_ref[...], 0.0)
    o_ref[...] = z.reshape(B, H, W, C).astype(o_ref.dtype)


# ---------------------------------------------------------------------------
# Parameter folding (plain-JAX glue)
# ---------------------------------------------------------------------------
def fold_bn_conv(w_hwio, bn):
    gamma, beta, mean, var = bn
    scale = gamma / jnp.sqrt(var + BN_EPS)
    return w_hwio * scale[None, None, None, :], beta - mean * scale


def repvgg_reparam(p, C):
    w3, b3 = fold_bn_conv(p["rep_w3"], p["rep_bn3"])
    w1, b1 = fold_bn_conv(p["rep_w1"], p["rep_bn1"])
    gamma, beta, mean, var = p["rep_bnid"]
    scale = gamma / jnp.sqrt(var + BN_EPS)
    wid_center = jnp.eye(C, dtype=jnp.float32) * scale[None, :]
    wid = jnp.zeros((3, 3, C, C), jnp.float32).at[1, 1].set(wid_center)
    bid = beta - mean * scale
    w1p = jnp.pad(w1, ((1, 1), (1, 1), (0, 0), (0, 0)))
    return w3 + w1p + wid, b3 + b1 + bid


def _prep_weights(params, C, conv_dtype):
    wd, bd = fold_bn_conv(params["delta_w"], params["delta_bn"])
    wr, br = repvgg_reparam(params, C)
    # Per-tap layout (9, Cin, Cout) for the nine accumulating matmuls; MXU inputs in
    # conv_dtype (bf16 by default), biases stay f32.
    wd9 = wd.reshape(9, C, C).astype(conv_dtype)
    wr9 = wr.reshape(9, C, C).astype(conv_dtype)
    return wd9, bd.reshape(1, C).astype(jnp.float32), wr9, br.reshape(1, C).astype(jnp.float32)


# ---------------------------------------------------------------------------
# Forward wrapper (single fused pallas_call)
# ---------------------------------------------------------------------------
def _default_images_per_step(N):
    # v7x has 2 TensorCores/chip -> keep grid=(N,) "parallel" so both are fed.
    # Single-TC v5e/v6e execute the grid serially -> fold the whole batch into the
    # GEMM M dimension (one grid step, no redundant scratch re-zero / weight revisit).
    try:
        kind = jax.devices()[0].device_kind.lower()
    except Exception:
        kind = ""
    return 1 if "v7" in kind else N


def delta_m_forward(x1, x2, params, *, conv_dtype=jnp.bfloat16,
                    out_dtype=jnp.float32, images_per_step=None):
    N, H, W, C = x1.shape
    if images_per_step is None:
        images_per_step = _default_images_per_step(N)
    B = max(1, min(int(images_per_step), N))
    while N % B:
        B -= 1
    steps = N // B
    wd, bd, wr, br = _prep_weights(params, C, conv_dtype)

    # NOTE: at production frame sizes, tile the grid over H with 2-/1-row halos so the
    # padded scratches stay within the scoped VMEM limit (esp. v7x's 64 MiB VMEM).
    fn = pl.pallas_call(
        functools.partial(_delta_m_kernel, B=B, H=H, W=W, C=C),
        out_shape=jax.ShapeDtypeStruct((N, H, W, C), out_dtype),
        grid=(steps,),
        in_specs=[
            pl.BlockSpec((B, H, W, C), lambda n: (n, 0, 0, 0)),   # x1 (residual)
            pl.BlockSpec((B, H, W, C), lambda n: (n, 0, 0, 0)),   # x2 (unpadded)
            pl.BlockSpec((9, C, C), lambda n: (0, 0, 0)),         # delta weights (per-tap)
            pl.BlockSpec((1, C), lambda n: (0, 0)),               # delta bias
            pl.BlockSpec((9, C, C), lambda n: (0, 0, 0)),         # repvgg weights (per-tap)
            pl.BlockSpec((1, C), lambda n: (0, 0)),               # repvgg bias
        ],
        out_specs=pl.BlockSpec((B, H, W, C), lambda n: (n, 0, 0, 0)),
        scratch_shapes=[
            pltpu.VMEM((B, H + 4, W + 4, C), conv_dtype),   # padded x2 (dilation-2 conv)
            pltpu.VMEM((B, H + 2, W + 2, C), conv_dtype),   # padded y  (RepVGG conv)
            pltpu.VMEM((B * H * W, C), jnp.float32),        # f32 matmul accumulator
        ],
        compiler_params=pltpu.CompilerParams(dimension_semantics=("parallel",)),
    )
    return fn(x1, x2, wd, bd, wr, br)


# ---------------------------------------------------------------------------
# Deterministic parameter init + pure-JAX reference
# ---------------------------------------------------------------------------
def init_params(key, C):
    ks = jax.random.split(key, 7)

    def bn(k):
        k1, k2, k3, k4 = jax.random.split(k, 4)
        gamma = jax.random.uniform(k1, (C,), jnp.float32, 0.5, 1.5)
        beta = jax.random.normal(k2, (C,), jnp.float32) * 0.1
        mean = jax.random.normal(k3, (C,), jnp.float32) * 0.1
        var = jax.random.uniform(k4, (C,), jnp.float32, 0.5, 1.5)
        return (gamma, beta, mean, var)

    return dict(
        delta_w=jax.random.normal(ks[0], (3, 3, C, C), jnp.float32) * 0.1,
        delta_bn=bn(ks[1]),
        rep_w3=jax.random.normal(ks[2], (3, 3, C, C), jnp.float32) * 0.1,
        rep_bn3=bn(ks[3]),
        rep_w1=jax.random.normal(ks[4], (1, 1, C, C), jnp.float32) * 0.1,
        rep_bn1=bn(ks[5]),
        rep_bnid=bn(ks[6]),
    )


def ref_forward(x1, x2, p):
    def bn_apply(x, bn):
        g, b, m, v = bn
        return (x - m) * (g / jnp.sqrt(v + BN_EPS)) + b

    dn = ("NHWC", "HWIO", "NHWC")
    c = lax.conv_general_dilated(x2, p["delta_w"], (1, 1), ((2, 2), (2, 2)),
                                 rhs_dilation=(2, 2), dimension_numbers=dn)
    y = jax.nn.relu(x1 + bn_apply(c, p["delta_bn"]))
    c3 = bn_apply(lax.conv_general_dilated(y, p["rep_w3"], (1, 1), ((1, 1), (1, 1)),
                                           dimension_numbers=dn), p["rep_bn3"])
    c1 = bn_apply(lax.conv_general_dilated(y, p["rep_w1"], (1, 1), ((0, 0), (0, 0)),
                                           dimension_numbers=dn), p["rep_bn1"])
    cid = bn_apply(y, p["rep_bnid"])
    return jax.nn.relu(c3 + c1 + cid)


if __name__ == "__main__":
    key = jax.random.PRNGKey(0)
    kx1, kx2, kp = jax.random.split(key, 3)

    # Small shapes: batch=2, mid_channels=32, spatial 16x16 (NHWC).
    N, H, W, C = 2, 16, 16, 32
    x1 = jax.random.normal(kx1, (N, H, W, C), jnp.float32)
    x2 = jax.random.normal(kx2, (N, H, W, C), jnp.float32)
    params = init_params(kp, C)

    z_ref = ref_forward(x1, x2, params)

    # Strict checks of the structural math (BN folding, RepVGG reparam, in-kernel
    # halo padding, per-tap accumulating matmuls, two-stage fusion) with f32 MXU
    # inputs -- both grid layouts (per-image grid and batch-folded single step).
    z_f32_a = jax.block_until_ready(
        delta_m_forward(x1, x2, params, conv_dtype=jnp.float32, images_per_step=1))
    err_a = float(jnp.max(jnp.abs(z_f32_a - z_ref)))
    assert jnp.allclose(z_f32_a, z_ref, rtol=2e-3, atol=2e-3), f"f32/grid=N max_err={err_a}"

    z_f32_b = jax.block_until_ready(
        delta_m_forward(x1, x2, params, conv_dtype=jnp.float32, images_per_step=N))
    err_b = float(jnp.max(jnp.abs(z_f32_b - z_ref)))
    assert jnp.allclose(z_f32_b, z_ref, rtol=2e-3, atol=2e-3), f"f32/folded max_err={err_b}"

    # Default (performance) path: bf16 MXU inputs + bf16 scratches, f32 accumulation,
    # device-kind-dependent grid.  Two chained bf16 3x3 convs => loose tolerance; the
    # f32 checks above are the strict ones.
    z_bf16 = jax.block_until_ready(delta_m_forward(x1, x2, params))
    err_bf16 = float(jnp.max(jnp.abs(z_bf16 - z_ref)))
    assert jnp.allclose(z_bf16, z_ref, rtol=1e-1, atol=1e-1), f"bf16 max_err={err_bf16}"

    print("KERNEL_OK")
</pallas_src>

<mosaic_0001>
module attributes {stable_mosaic.version = 11 : i64} {
  func.func @_delta_m_kernel(%arg0: i32, %arg1: memref<1x16x16x32xf32, #tpu.memory_space<vmem>>, %arg2: memref<1x16x16x32xf32, #tpu.memory_space<vmem>>, %arg3: memref<9x32x32xf32, #tpu.memory_space<vmem>>, %arg4: memref<1x32xf32, #tpu.memory_space<vmem>>, %arg5: memref<9x32x32xf32, #tpu.memory_space<vmem>>, %arg6: memref<1x32xf32, #tpu.memory_space<vmem>>, %arg7: memref<1x16x16x32xf32, #tpu.memory_space<vmem>>, %arg8: memref<1x20x20x32xf32, #tpu.memory_space<vmem>>, %arg9: memref<1x18x18x32xf32, #tpu.memory_space<vmem>>, %arg10: memref<256x32xf32, #tpu.memory_space<vmem>>) attributes {dimension_semantics = [#tpu.dimension_semantics<parallel>], iteration_bounds = array<i64: 2>, scalar_prefetch = 0 : i64, scratch_operands = 3 : i64, tpu.core_type = #tpu.core_type<tc>, window_params = [{transform_indices = @transform_0, window_bounds = array<i64: 1, 16, 16, 32>}, {transform_indices = @transform_1, window_bounds = array<i64: 1, 16, 16, 32>}, {pipeline_mode = #tpu.pipeline_mode<synchronous>, transform_indices = @transform_2, window_bounds = array<i64: 9, 32, 32>}, {pipeline_mode = #tpu.pipeline_mode<synchronous>, transform_indices = @transform_3, window_bounds = array<i64: 1, 32>}, {pipeline_mode = #tpu.pipeline_mode<synchronous>, transform_indices = @transform_4, window_bounds = array<i64: 9, 32, 32>}, {pipeline_mode = #tpu.pipeline_mode<synchronous>, transform_indices = @transform_5, window_bounds = array<i64: 1, 32>}, {transform_indices = @transform_6, window_bounds = array<i64: 1, 16, 16, 32>}]} {
    %cst = arith.constant 0.000000e+00 : f32
    %0 = vector.broadcast %cst : f32 to vector<1x2x20x32xf32>
    %c0 = arith.constant 0 : index
    %c0_0 = arith.constant 0 : index
    %c0_1 = arith.constant 0 : index
    %c0_2 = arith.constant 0 : index
    %1 = vector.load %arg8[%c0, %c0_0, %c0_1, %c0_2] : memref<1x20x20x32xf32, #tpu.memory_space<vmem>>, vector<1x2x20x32xf32>
    tpu.vector_store %arg8[%c0, %c0_0, %c0_1, %c0_2], %0 {strides = array<i32>} : memref<1x20x20x32xf32, #tpu.memory_space<vmem>>, vector<1x2x20x32xf32>,
    %cst_3 = arith.constant 0.000000e+00 : f32
    %2 = vector.broadcast %cst_3 : f32 to vector<1x2x20x32xf32>
    %c0_4 = arith.constant 0 : index
    %c18 = arith.constant 18 : index
    %c0_5 = arith.constant 0 : index
    %c0_6 = arith.constant 0 : index
    %3 = vector.load %arg8[%c0_4, %c18, %c0_5, %c0_6] : memref<1x20x20x32xf32, #tpu.memory_space<vmem>>, vector<1x2x20x32xf32>
    tpu.vector_store %arg8[%c0_4, %c18, %c0_5, %c0_6], %2 {strides = array<i32>} : memref<1x20x20x32xf32, #tpu.memory_space<vmem>>, vector<1x2x20x32xf32>,
    %cst_7 = arith.constant 0.000000e+00 : f32
    %4 = vector.broadcast %cst_7 : f32 to vector<1x16x2x32xf32>
    %c0_8 = arith.constant 0 : index
    %c2 = arith.constant 2 : index
    %c0_9 = arith.constant 0 : index
    %c0_10 = arith.constant 0 : index
    %5 = vector.load %arg8[%c0_8, %c2, %c0_9, %c0_10] : memref<1x20x20x32xf32, #tpu.memory_space<vmem>>, vector<1x16x2x32xf32>
    tpu.vector_store %arg8[%c0_8, %c2, %c0_9, %c0_10], %4 {strides = array<i32>} : memref<1x20x20x32xf32, #tpu.memory_space<vmem>>, vector<1x16x2x32xf32>,
    %cst_11 = arith.constant 0.000000e+00 : f32
    %6 = vector.broadcast %cst_11 : f32 to vector<1x16x2x32xf32>
    %c0_12 = arith.constant 0 : index
    %c2_13 = arith.constant 2 : index
    %c18_14 = arith.constant 18 : index
    %c0_15 = arith.constant 0 : index
    %7 = vector.load %arg8[%c0_12, %c2_13, %c18_14, %c0_15] : memref<1x20x20x32xf32, #tpu.memory_space<vmem>>, vector<1x16x2x32xf32>
    tpu.vector_store %arg8[%c0_12, %c2_13, %c18_14, %c0_15], %6 {strides = array<i32>} : memref<1x20x20x32xf32, #tpu.memory_space<vmem>>, vector<1x16x2x32xf32>,
    %c0_16 = arith.constant 0 : index
    %c0_17 = arith.constant 0 : index
    %c0_18 = arith.constant 0 : index
    %c0_19 = arith.constant 0 : index
    %8 = vector.load %arg2[%c0_16, %c0_17, %c0_18, %c0_19] : memref<1x16x16x32xf32, #tpu.memory_space<vmem>>, vector<1x16x16x32xf32>
    %c0_20 = arith.constant 0 : index
    %c2_21 = arith.constant 2 : index
    %c2_22 = arith.constant 2 : index
    %c0_23 = arith.constant 0 : index
    %9 = vector.load %arg8[%c0_20, %c2_21, %c2_22, %c0_23] : memref<1x20x20x32xf32, #tpu.memory_space<vmem>>, vector<1x16x16x32xf32>
    tpu.vector_store %arg8[%c0_20, %c2_21, %c2_22, %c0_23], %8 {strides = array<i32>} : memref<1x20x20x32xf32, #tpu.memory_space<vmem>>, vector<1x16x16x32xf32>,
    %c0_24 = arith.constant 0 : index
    %c0_25 = arith.constant 0 : index
    %c0_26 = arith.constant 0 : index
    %c0_27 = arith.constant 0 : index
    %10 = vector.load %arg1[%c0_24, %c0_25, %c0_26, %c0_27] : memref<1x16x16x32xf32, #tpu.memory_space<vmem>>, vector<1x16x16x32xf32>
    %11 = vector.shape_cast %10 : vector<1x16x16x32xf32> to vector<256x32xf32>
    %c0_28 = arith.constant 0 : index
    %c0_29 = arith.constant 0 : index
    %12 = vector.load %arg4[%c0_28, %c0_29] : memref<1x32xf32, #tpu.memory_space<vmem>>, vector<1x32xf32>
    %13 = vector.broadcast %12 : vector<1x32xf32> to vector<256x32xf32>
    %14 = arith.addf %11, %13 : vector<256x32xf32>
    %c0_30 = arith.constant 0 : index
    %c0_31 = arith.constant 0 : index
    %15 = vector.load %arg10[%c0_30, %c0_31] : memref<256x32xf32, #tpu.memory_space<vmem>>, vector<256x32xf32>
    tpu.vector_store %arg10[%c0_30, %c0_31], %14 {strides = array<i32>} : memref<256x32xf32, #tpu.memory_space<vmem>>, vector<256x32xf32>,
    %c0_32 = arith.constant 0 : index
    %c0_33 = arith.constant 0 : index
    %c0_34 = arith.constant 0 : index
    %c0_35 = arith.constant 0 : index
    %16 = vector.load %arg8[%c0_32, %c0_33, %c0_34, %c0_35] : memref<1x20x20x32xf32, #tpu.memory_space<vmem>>, vector<1x16x16x32xf32>
    %17 = vector.shape_cast %16 : vector<1x16x16x32xf32> to vector<256x32xf32>
    %c0_36 = arith.constant 0 : index
    %c0_37 = arith.constant 0 : index
    %18 = vector.load %arg10[%c0_36, %c0_37] : memref<256x32xf32, #tpu.memory_space<vmem>>, vector<256x32xf32>
    %c0_38 = arith.constant 0 : index
    %c0_39 = arith.constant 0 : index
    %c0_40 = arith.constant 0 : index
    %19 = vector.load %arg3[%c0_38, %c0_39, %c0_40] : memref<9x32x32xf32, #tpu.memory_space<vmem>>, vector<1x32x32xf32>
    %20 = vector.shape_cast %19 : vector<1x32x32xf32> to vector<32x32xf32>
    %cst_41 = arith.constant dense<0.000000e+00> : vector<256x32xf32>
    %21 = tpu.matmul %17, %20, %cst_41 {dimension_numbers = #tpu.dot_dimension_numbers<[1], [0], [0], [1], [0, 0, 1, 1], [], []>} : vector<256x32xf32>, vector<32x32xf32>, vector<256x32xf32> -> vector<256x32xf32>
    %22 = arith.addf %18, %21 : vector<256x32xf32>
    %c0_42 = arith.constant 0 : index
    %c0_43 = arith.constant 0 : index
    %23 = vector.load %arg10[%c0_42, %c0_43] : memref<256x32xf32, #tpu.memory_space<vmem>>, vector<256x32xf32>
    tpu.vector_store %arg10[%c0_42, %c0_43], %22 {strides = array<i32>} : memref<256x32xf32, #tpu.memory_space<vmem>>, vector<256x32xf32>,
    %c0_44 = arith.constant 0 : index
    %c0_45 = arith.constant 0 : index
    %c2_46 = arith.constant 2 : index
    %c0_47 = arith.constant 0 : index
    %24 = vector.load %arg8[%c0_44, %c0_45, %c2_46, %c0_47] : memref<1x20x20x32xf32, #tpu.memory_space<vmem>>, vector<1x16x16x32xf32>
    %25 = vector.shape_cast %24 : vector<1x16x16x32xf32> to vector<256x32xf32>
    %c0_48 = arith.constant 0 : index
    %c0_49 = arith.constant 0 : index
    %26 = vector.load %arg10[%c0_48, %c0_49] : memref<256x32xf32, #tpu.memory_space<vmem>>, vector<256x32xf32>
    %c1 = arith.constant 1 : index
    %c0_50 = arith.constant 0 : index
    %c0_51 = arith.constant 0 : index
    %27 = vector.load %arg3[%c1, %c0_50, %c0_51] : memref<9x32x32xf32, #tpu.memory_space<vmem>>, vector<1x32x32xf32>
    %28 = vector.shape_cast %27 : vector<1x32x32xf32> to vector<32x32xf32>
    %cst_52 = arith.constant dense<0.000000e+00> : vector<256x32xf32>
    %29 = tpu.matmul %25, %28, %cst_52 {dimension_numbers = #tpu.dot_dimension_numbers<[1], [0], [0], [1], [0, 0, 1, 1], [], []>} : vector<256x32xf32>, vector<32x32xf32>, vector<256x32xf32> -> vector<256x32xf32>
    %30 = arith.addf %26, %29 : vector<256x32xf32>
    %c0_53 = arith.constant 0 : index
    %c0_54 = arith.constant 0 : index
    %31 = vector.load %arg10[%c0_53, %c0_54] : memref<256x32xf32, #tpu.memory_space<vmem>>, vector<256x32xf32>
    tpu.vector_store %arg10[%c0_53, %c0_54], %30 {strides = array<i32>} : memref<256x32xf32, #tpu.memory_space<vmem>>, vector<256x32xf32>,
    %c0_55 = arith.constant 0 : index
    %c0_56 = arith.constant 0 : index
    %c4 = arith.constant 4 : index
    %c0_57 = arith.constant 0 : index
    %32 = vector.load %arg8[%c0_55, %c0_56, %c4, %c0_57] : memref<1x20x20x32xf32, #tpu.memory_space<vmem>>, vector<1x16x16x32xf32>
    %33 = vector.shape_cast %32 : vector<1x16x16x32xf32> to vector<256x32xf32>
    %c0_58 = arith.constant 0 : index
    %c0_59 = arith.constant 0 : index
    %34 = vector.load %arg10[%c0_58, %c0_59] : memref<256x32xf32, #tpu.memory_space<vmem>>, vector<256x32xf32>
    %c2_60 = arith.constant 2 : index
    %c0_61 = arith.constant 0 : index
    %c0_62 = arith.constant 0 : index
    %35 = vector.load %arg3[%c2_60, %c0_61, %c0_62] : memref<9x32x32xf32, #tpu.memory_space<vmem>>, vector<1x32x32xf32>
    %36 = vector.shape_cast %35 : vector<1x32x32xf32> to vector<32x32xf32>
    %cst_63 = arith.constant dense<0.000000e+00> : vector<256x32xf32>
    %37 = tpu.matmul %33, %36, %cst_63 {dimension_numbers = #tpu.dot_dimension_numbers<[1], [0], [0], [1], [0, 0, 1, 1], [], []>} : vector<256x32xf32>, vector<32x32xf32>, vector<256x32xf32> -> vector<256x32xf32>
    %38 = arith.addf %34, %37 : vector<256x32xf32>
    %c0_64 = arith.constant 0 : index
    %c0_65 = arith.constant 0 : index
    %39 = vector.load %arg10[%c0_64, %c0_65] : memref<256x32xf32, #tpu.memory_space<vmem>>, vector<256x32xf32>
    tpu.vector_store %arg10[%c0_64, %c0_65], %38 {strides = array<i32>} : memref<256x32xf32, #tpu.memory_space<vmem>>, vector<256x32xf32>,
    %c0_66 = arith.constant 0 : index
    %c2_67 = arith.constant 2 : index
    %c0_68 = arith.constant 0 : index
    %c0_69 = arith.constant 0 : index
    %40 = vector.load %arg8[%c0_66, %c2_67, %c0_68, %c0_69] : memref<1x20x20x32xf32, #tpu.memory_space<vmem>>, vector<1x16x16x32xf32>
    %41 = vector.shape_cast %40 : vector<1x16x16x32xf32> to vector<256x32xf32>
    %c0_70 = arith.constant 0 : index
    %c0_71 = arith.constant 0 : index
    %42 = vector.load %arg10[%c0_70, %c0_71] : memref<256x32xf32, #tpu.memory_space<vmem>>, vector<256x32xf32>
    %c3 = arith.constant 3 : index
    %c0_72 = arith.constant 0 : index
    %c0_73 = arith.constant 0 : index
    %43 = vector.load %arg3[%c3, %c0_72, %c0_73] : memref<9x32x32xf32, #tpu.memory_space<vmem>>, vector<1x32x32xf32>
    %44 = vector.shape_cast %43 : vector<1x32x32xf32> to vector<32x32xf32>
    %cst_74 = arith.constant dense<0.000000e+00> : vector<256x32xf32>
    %45 = tpu.matmul %41, %44, %cst_74 {dimension_numbers = #tpu.dot_dimension_numbers<[1], [0], [0], [1], [0, 0, 1, 1], [], []>} : vector<256x32xf32>, vector<32x32xf32>, vector<256x32xf32> -> vector<256x32xf32>
    %46 = arith.addf %42, %45 : vector<256x32xf32>
    %c0_75 = arith.constant 0 : index
    %c0_76 = arith.constant 0 : index
    %47 = vector.load %arg10[%c0_75, %c0_76] : memref<256x32xf32, #tpu.memory_space<vmem>>, vector<256x32xf32>
    tpu.vector_store %arg10[%c0_75, %c0_76], %46 {strides = array<i32>} : memref<256x32xf32, #tpu.memory_space<vmem>>, vector<256x32xf32>,
    %c0_77 = arith.constant 0 : index
    %c2_78 = arith.constant 2 : index
    %c2_79 = arith.constant 2 : index
    %c0_80 = arith.constant 0 : index
    %48 = vector.load %arg8[%c0_77, %c2_78, %c2_79, %c0_80] : memref<1x20x20x32xf32, #tpu.memory_space<vmem>>, vector<1x16x16x32xf32>
    %49 = vector.shape_cast %48 : vector<1x16x16x32xf32> to vector<256x32xf32>
    %c0_81 = arith.constant 0 : index
    %c0_82 = arith.constant 0 : index
    %50 = vector.load %arg10[%c0_81, %c0_82] : memref<256x32xf32, #tpu.memory_space<vmem>>, vector<256x32xf32>
    %c4_83 = arith.constant 4 : index
    %c0_84 = arith.constant 0 : index
    %c0_85 = arith.constant 0 : index
    %51 = vector.load %arg3[%c4_83, %c0_84, %c0_85] : memref<9x32x32xf32, #tpu.memory_space<vmem>>, vector<1x32x32xf32>
    %52 = vector.shape_cast %51 : vector<1x32x32xf32> to vector<32x32xf32>
    %cst_86 = arith.constant dense<0.000000e+00> : vector<256x32xf32>
    %53 = tpu.matmul %49, %52, %cst_86 {dimension_numbers = #tpu.dot_dimension_numbers<[1], [0], [0], [1], [0, 0, 1, 1], [], []>} : vector<256x32xf32>, vector<32x32xf32>, vector<256x32xf32> -> vector<256x32xf32>
    %54 = arith.addf %50, %53 : vector<256x32xf32>
    %c0_87 = arith.constant 0 : index
    %c0_88 = arith.constant 0 : index
    %55 = vector.load %arg10[%c0_87, %c0_88] : memref<256x32xf32, #tpu.memory_space<vmem>>, vector<256x32xf32>
    tpu.vector_store %arg10[%c0_87, %c0_88], %54 {strides = array<i32>} : memref<256x32xf32, #tpu.memory_space<vmem>>, vector<256x32xf32>,
    %c0_89 = arith.constant 0 : index
    %c2_90 = arith.constant 2 : index
    %c4_91 = arith.constant 4 : index
    %c0_92 = arith.constant 0 : index
    %56 = vector.load %arg8[%c0_89, %c2_90, %c4_91, %c0_92] : memref<1x20x20x32xf32, #tpu.memory_space<vmem>>, vector<1x16x16x32xf32>
    %57 = vector.shape_cast %56 : vector<1x16x16x32xf32> to vector<256x32xf32>
    %c0_93 = arith.constant 0 : index
    %c0_94 = arith.constant 0 : index
    %58 = vector.load %arg10[%c0_93, %c0_94] : memref<256x32xf32, #tpu.memory_space<vmem>>, vector<256x32xf32>
    %c5 = arith.constant 5 : index
    %c0_95 = arith.constant 0 : index
    %c0_96 = arith.constant 0 : index
    %59 = vector.load %arg3[%c5, %c0_95, %c0_96] : memref<9x32x32xf32, #tpu.memory_space<vmem>>, vector<1x32x32xf32>
    %60 = vector.shape_cast %59 : vector<1x32x32xf32> to vector<32x32xf32>
    %cst_97 = arith.constant dense<0.000000e+00> : vector<256x32xf32>
    %61 = tpu.matmul %57, %60, %cst_97 {dimension_numbers = #tpu.dot_dimension_numbers<[1], [0], [0], [1], [0, 0, 1, 1], [], []>} : vector<256x32xf32>, vector<32x32xf32>, vector<256x32xf32> -> vector<256x32xf32>
    %62 = arith.addf %58, %61 : vector<256x32xf32>
    %c0_98 = arith.constant 0 : index
    %c0_99 = arith.constant 0 : index
    %63 = vector.load %arg10[%c0_98, %c0_99] : memref<256x32xf32, #tpu.memory_space<vmem>>, vector<256x32xf32>
    tpu.vector_store %arg10[%c0_98, %c0_99], %62 {strides = array<i32>} : memref<256x32xf32, #tpu.memory_space<vmem>>, vector<256x32xf32>,
    %c0_100 = arith.constant 0 : index
    %c4_101 = arith.constant 4 : index
    %c0_102 = arith.constant 0 : index
    %c0_103 = arith.constant 0 : index
    %64 = vector.load %arg8[%c0_100, %c4_101, %c0_102, %c0_103] : memref<1x20x20x32xf32, #tpu.memory_space<vmem>>, vector<1x16x16x32xf32>
    %65 = vector.shape_cast %64 : vector<1x16x16x32xf32> to vector<256x32xf32>
    %c0_104 = arith.constant 0 : index
    %c0_105 = arith.constant 0 : index
    %66 = vector.load %arg10[%c0_104, %c0_105] : memref<256x32xf32, #tpu.memory_space<vmem>>, vector<256x32xf32>
    %c6 = arith.constant 6 : index
    %c0_106 = arith.constant 0 : index
    %c0_107 = arith.constant 0 : index
    %67 = vector.load %arg3[%c6, %c0_106, %c0_107] : memref<9x32x32xf32, #tpu.memory_space<vmem>>, vector<1x32x32xf32>
    %68 = vector.shape_cast %67 : vector<1x32x32xf32> to vector<32x32xf32>
    %cst_108 = arith.constant dense<0.000000e+00> : vector<256x32xf32>
    %69 = tpu.matmul %65, %68, %cst_108 {dimension_numbers = #tpu.dot_dimension_numbers<[1], [0], [0], [1], [0, 0, 1, 1], [], []>} : vector<256x32xf32>, vector<32x32xf32>, vector<256x32xf32> -> vector<256x32xf32>
    %70 = arith.addf %66, %69 : vector<256x32xf32>
    %c0_109 = arith.constant 0 : index
    %c0_110 = arith.constant 0 : index
    %71 = vector.load %arg10[%c0_109, %c0_110] : memref<256x32xf32, #tpu.memory_space<vmem>>, vector<256x32xf32>
    tpu.vector_store %arg10[%c0_109, %c0_110], %70 {strides = array<i32>} : memref<256x32xf32, #tpu.memory_space<vmem>>, vector<256x32xf32>,
    %c0_111 = arith.constant 0 : index
    %c4_112 = arith.constant 4 : index
    %c2_113 = arith.constant 2 : index
    %c0_114 = arith.constant 0 : index
    %72 = vector.load %arg8[%c0_111, %c4_112, %c2_113, %c0_114] : memref<1x20x20x32xf32, #tpu.memory_space<vmem>>, vector<1x16x16x32xf32>
    %73 = vector.shape_cast %72 : vector<1x16x16x32xf32> to vector<256x32xf32>
    %c0_115 = arith.constant 0 : index
    %c0_116 = arith.constant 0 : index
    %74 = vector.load %arg10[%c0_115, %c0_116] : memref<256x32xf32, #tpu.memory_space<vmem>>, vector<256x32xf32>
    %c7 = arith.constant 7 : index
    %c0_117 = arith.constant 0 : index
    %c0_118 = arith.constant 0 : index
    %75 = vector.load %arg3[%c7, %c0_117, %c0_118] : memref<9x32x32xf32, #tpu.memory_space<vmem>>, vector<1x32x32xf32>
    %76 = vector.shape_cast %75 : vector<1x32x32xf32> to vector<32x32xf32>
    %cst_119 = arith.constant dense<0.000000e+00> : vector<256x32xf32>
    %77 = tpu.matmul %73, %76, %cst_119 {dimension_numbers = #tpu.dot_dimension_numbers<[1], [0], [0], [1], [0, 0, 1, 1], [], []>} : vector<256x32xf32>, vector<32x32xf32>, vector<256x32xf32> -> vector<256x32xf32>
    %78 = arith.addf %74, %77 : vector<256x32xf32>
    %c0_120 = arith.constant 0 : index
    %c0_121 = arith.constant 0 : index
    %79 = vector.load %arg10[%c0_120, %c0_121] : memref<256x32xf32, #tpu.memory_space<vmem>>, vector<256x32xf32>
    tpu.vector_store %arg10[%c0_120, %c0_121], %78 {strides = array<i32>} : memref<256x32xf32, #tpu.memory_space<vmem>>, vector<256x32xf32>,
    %c0_122 = arith.constant 0 : index
    %c4_123 = arith.constant 4 : index
    %c4_124 = arith.constant 4 : index
    %c0_125 = arith.constant 0 : index
    %80 = vector.load %arg8[%c0_122, %c4_123, %c4_124, %c0_125] : memref<1x20x20x32xf32, #tpu.memory_space<vmem>>, vector<1x16x16x32xf32>
    %81 = vector.shape_cast %80 : vector<1x16x16x32xf32> to vector<256x32xf32>
    %c0_126 = arith.constant 0 : index
    %c0_127 = arith.constant 0 : index
    %82 = vector.load %arg10[%c0_126, %c0_127] : memref<256x32xf32, #tpu.memory_space<vmem>>, vector<256x32xf32>
    %c8 = arith.constant 8 : index
    %c0_128 = arith.constant 0 : index
    %c0_129 = arith.constant 0 : index
    %83 = vector.load %arg3[%c8, %c0_128, %c0_129] : memref<9x32x32xf32, #tpu.memory_space<vmem>>, vector<1x32x32xf32>
    %84 = vector.shape_cast %83 : vector<1x32x32xf32> to vector<32x32xf32>
    %cst_130 = arith.constant dense<0.000000e+00> : vector<256x32xf32>
    %85 = tpu.matmul %81, %84, %cst_130 {dimension_numbers = #tpu.dot_dimension_numbers<[1], [0], [0], [1], [0, 0, 1, 1], [], []>} : vector<256x32xf32>, vector<32x32xf32>, vector<256x32xf32> -> vector<256x32xf32>
    %86 = arith.addf %82, %85 : vector<256x32xf32>
    %c0_131 = arith.constant 0 : index
    %c0_132 = arith.constant 0 : index
    %87 = vector.load %arg10[%c0_131, %c0_132] : memref<256x32xf32, #tpu.memory_space<vmem>>, vector<256x32xf32>
    tpu.vector_store %arg10[%c0_131, %c0_132], %86 {strides = array<i32>} : memref<256x32xf32, #tpu.memory_space<vmem>>, vector<256x32xf32>,
    %c0_133 = arith.constant 0 : index
    %c0_134 = arith.constant 0 : index
    %88 = vector.load %arg10[%c0_133, %c0_134] : memref<256x32xf32, #tpu.memory_space<vmem>>, vector<256x32xf32>
    %cst_135 = arith.constant 0.000000e+00 : f32
    %89 = vector.broadcast %cst_135 : f32 to vector<256x32xf32>
    %90 = arith.maximumf %88, %89 : vector<256x32xf32>
    %cst_136 = arith.constant 0.000000e+00 : f32
    %91 = vector.broadcast %cst_136 : f32 to vector<1x1x18x32xf32>
    %c0_137 = arith.constant 0 : index
    %c0_138 = arith.constant 0 : index
    %c0_139 = arith.constant 0 : index
    %c0_140 = arith.constant 0 : index
    %92 = vector.load %arg9[%c0_137, %c0_138, %c0_139, %c0_140] : memref<1x18x18x32xf32, #tpu.memory_space<vmem>>, vector<1x1x18x32xf32>
    tpu.vector_store %arg9[%c0_137, %c0_138, %c0_139, %c0_140], %91 {strides = array<i32>} : memref<1x18x18x32xf32, #tpu.memory_space<vmem>>, vector<1x1x18x32xf32>,
    %cst_141 = arith.constant 0.000000e+00 : f32
    %93 = vector.broadcast %cst_141 : f32 to vector<1x1x18x32xf32>
    %c0_142 = arith.constant 0 : index
    %c17 = arith.constant 17 : index
    %c0_143 = arith.constant 0 : index
    %c0_144 = arith.constant 0 : index
    %94 = vector.load %arg9[%c0_142, %c17, %c0_143, %c0_144] : memref<1x18x18x32xf32, #tpu.memory_space<vmem>>, vector<1x1x18x32xf32>
    tpu.vector_store %arg9[%c0_142, %c17, %c0_143, %c0_144], %93 {strides = array<i32>} : memref<1x18x18x32xf32, #tpu.memory_space<vmem>>, vector<1x1x18x32xf32>,
    %cst_145 = arith.constant 0.000000e+00 : f32
    %95 = vector.broadcast %cst_145 : f32 to vector<1x16x1x32xf32>
    %c0_146 = arith.constant 0 : index
    %c1_147 = arith.constant 1 : index
    %c0_148 = arith.constant 0 : index
    %c0_149 = arith.constant 0 : index
    %96 = vector.load %arg9[%c0_146, %c1_147, %c0_148, %c0_149] : memref<1x18x18x32xf32, #tpu.memory_space<vmem>>, vector<1x16x1x32xf32>
    tpu.vector_store %arg9[%c0_146, %c1_147, %c0_148, %c0_149], %95 {strides = array<i32>} : memref<1x18x18x32xf32, #tpu.memory_space<vmem>>, vector<1x16x1x32xf32>,
    %cst_150 = arith.constant 0.000000e+00 : f32
    %97 = vector.broadcast %cst_150 : f32 to vector<1x16x1x32xf32>
    %c0_151 = arith.constant 0 : index
    %c1_152 = arith.constant 1 : index
    %c17_153 = arith.constant 17 : index
    %c0_154 = arith.constant 0 : index
    %98 = vector.load %arg9[%c0_151, %c1_152, %c17_153, %c0_154] : memref<1x18x18x32xf32, #tpu.memory_space<vmem>>, vector<1x16x1x32xf32>
    tpu.vector_store %arg9[%c0_151, %c1_152, %c17_153, %c0_154], %97 {strides = array<i32>} : memref<1x18x18x32xf32, #tpu.memory_space<vmem>>, vector<1x16x1x32xf32>,
    %99 = vector.shape_cast %90 : vector<256x32xf32> to vector<1x16x16x32xf32>
    %c0_155 = arith.constant 0 : index
    %c1_156 = arith.constant 1 : index
    %c1_157 = arith.constant 1 : index
    %c0_158 = arith.constant 0 : index
    %100 = vector.load %arg9[%c0_155, %c1_156, %c1_157, %c0_158] : memref<1x18x18x32xf32, #tpu.memory_space<vmem>>, vector<1x16x16x32xf32>
    tpu.vector_store %arg9[%c0_155, %c1_156, %c1_157, %c0_158], %99 {strides = array<i32>} : memref<1x18x18x32xf32, #tpu.memory_space<vmem>>, vector<1x16x16x32xf32>,
    %c0_159 = arith.constant 0 : index
    %c0_160 = arith.constant 0 : index
    %101 = vector.load %arg6[%c0_159, %c0_160] : memref<1x32xf32, #tpu.memory_space<vmem>>, vector<1x32xf32>
    %102 = vector.shape_cast %101 : vector<1x32xf32> to vector<1x32xf32>
    %103 = vector.broadcast %102 : vector<1x32xf32> to vector<256x32xf32>
    %c0_161 = arith.constant 0 : index
    %c0_162 = arith.constant 0 : index
    %104 = vector.load %arg10[%c0_161, %c0_162] : memref<256x32xf32, #tpu.memory_space<vmem>>, vector<256x32xf32>
    tpu.vector_store %arg10[%c0_161, %c0_162], %103 {strides = array<i32>} : memref<256x32xf32, #tpu.memory_space<vmem>>, vector<256x32xf32>,
    %c0_163 = arith.constant 0 : index
    %c0_164 = arith.constant 0 : index
    %c0_165 = arith.constant 0 : index
    %c0_166 = arith.constant 0 : index
    %105 = vector.load %arg9[%c0_163, %c0_164, %c0_165, %c0_166] : memref<1x18x18x32xf32, #tpu.memory_space<vmem>>, vector<1x16x16x32xf32>
    %106 = vector.shape_cast %105 : vector<1x16x16x32xf32> to vector<256x32xf32>
    %c0_167 = arith.constant 0 : index
    %c0_168 = arith.constant 0 : index
    %107 = vector.load %arg10[%c0_167, %c0_168] : memref<256x32xf32, #tpu.memory_space<vmem>>, vector<256x32xf32>
    %c0_169 = arith.constant 0 : index
    %c0_170 = arith.constant 0 : index
    %c0_171 = arith.constant 0 : index
    %108 = vector.load %arg5[%c0_169, %c0_170, %c0_171] : memref<9x32x32xf32, #tpu.memory_space<vmem>>, vector<1x32x32xf32>
    %109 = vector.shape_cast %108 : vector<1x32x32xf32> to vector<32x32xf32>
    %cst_172 = arith.constant dense<0.000000e+00> : vector<256x32xf32>
    %110 = tpu.matmul %106, %109, %cst_172 {dimension_numbers = #tpu.dot_dimension_numbers<[1], [0], [0], [1], [0, 0, 1, 1], [], []>} : vector<256x32xf32>, vector<32x32xf32>, vector<256x32xf32> -> vector<256x32xf32>
    %111 = arith.addf %107, %110 : vector<256x32xf32>
    %c0_173 = arith.constant 0 : index
    %c0_174 = arith.constant 0 : index
    %112 = vector.load %arg10[%c0_173, %c0_174] : memref<256x32xf32, #tpu.memory_space<vmem>>, vector<256x32xf32>
    tpu.vector_store %arg10[%c0_173, %c0_174], %111 {strides = array<i32>} : memref<256x32xf32, #tpu.memory_space<vmem>>, vector<256x32xf32>,
    %c0_175 = arith.constant 0 : index
    %c0_176 = arith.constant 0 : index
    %c1_177 = arith.constant 1 : index
    %c0_178 = arith.constant 0 : index
    %113 = vector.load %arg9[%c0_175, %c0_176, %c1_177, %c0_178] : memref<1x18x18x32xf32, #tpu.memory_space<vmem>>, vector<1x16x16x32xf32>
    %114 = vector.shape_cast %113 : vector<1x16x16x32xf32> to vector<256x32xf32>
    %c0_179 = arith.constant 0 : index
    %c0_180 = arith.constant 0 : index
    %115 = vector.load %arg10[%c0_179, %c0_180] : memref<256x32xf32, #tpu.memory_space<vmem>>, vector<256x32xf32>
    %c1_181 = arith.constant 1 : index
    %c0_182 = arith.constant 0 : index
    %c0_183 = arith.constant 0 : index
    %116 = vector.load %arg5[%c1_181, %c0_182, %c0_183] : memref<9x32x32xf32, #tpu.memory_space<vmem>>, vector<1x32x32xf32>
    %117 = vector.shape_cast %116 : vector<1x32x32xf32> to vector<32x32xf32>
    %cst_184 = arith.constant dense<0.000000e+00> : vector<256x32xf32>
    %118 = tpu.matmul %114, %117, %cst_184 {dimension_numbers = #tpu.dot_dimension_numbers<[1], [0], [0], [1], [0, 0, 1, 1], [], []>} : vector<256x32xf32>, vector<32x32xf32>, vector<256x32xf32> -> vector<256x32xf32>
    %119 = arith.addf %115, %118 : vector<256x32xf32>
    %c0_185 = arith.constant 0 : index
    %c0_186 = arith.constant 0 : index
    %120 = vector.load %arg10[%c0_185, %c0_186] : memref<256x32xf32, #tpu.memory_space<vmem>>, vector<256x32xf32>
    tpu.vector_store %arg10[%c0_185, %c0_186], %119 {strides = array<i32>} : memref<256x32xf32, #tpu.memory_space<vmem>>, vector<256x32xf32>,
    %c0_187 = arith.constant 0 : index
    %c0_188 = arith.constant 0 : index
    %c2_189 = arith.constant 2 : index
    %c0_190 = arith.constant 0 : index
    %121 = vector.load %arg9[%c0_187, %c0_188, %c2_189, %c0_190] : memref<1x18x18x32xf32, #tpu.memory_space<vmem>>, vector<1x16x16x32xf32>
    %122 = vector.shape_cast %121 : vector<1x16x16x32xf32> to vector<256x32xf32>
    %c0_191 = arith.constant 0 : index
    %c0_192 = arith.constant 0 : index
    %123 = vector.load %arg10[%c0_191, %c0_192] : memref<256x32xf32, #tpu.memory_space<vmem>>, vector<256x32xf32>
    %c2_193 = arith.constant 2 : index
    %c0_194 = arith.constant 0 : index
    %c0_195 = arith.constant 0 : index
    %124 = vector.load %arg5[%c2_193, %c0_194, %c0_195] : memref<9x32x32xf32, #tpu.memory_space<vmem>>, vector<1x32x32xf32>
    %125 = vector.shape_cast %124 : vector<1x32x32xf32> to vector<32x32xf32>
    %cst_196 = arith.constant dense<0.000000e+00> : vector<256x32xf32>
    %126 = tpu.matmul %122, %125, %cst_196 {dimension_numbers = #tpu.dot_dimension_numbers<[1], [0], [0], [1], [0, 0, 1, 1], [], []>} : vector<256x32xf32>, vector<32x32xf32>, vector<256x32xf32> -> vector<256x32xf32>
    %127 = arith.addf %123, %126 : vector<256x32xf32>
    %c0_197 = arith.constant 0 : index
    %c0_198 = arith.constant 0 : index
    %128 = vector.load %arg10[%c0_197, %c0_198] : memref<256x32xf32, #tpu.memory_space<vmem>>, vector<256x32xf32>
    tpu.vector_store %arg10[%c0_197, %c0_198], %127 {strides = array<i32>} : memref<256x32xf32, #tpu.memory_space<vmem>>, vector<256x32xf32>,
    %c0_199 = arith.constant 0 : index
    %c1_200 = arith.constant 1 : index
    %c0_201 = arith.constant 0 : index
    %c0_202 = arith.constant 0 : index
    %129 = vector.load %arg9[%c0_199, %c1_200, %c0_201, %c0_202] : memref<1x18x18x32xf32, #tpu.memory_space<vmem>>, vector<1x16x16x32xf32>
    %130 = vector.shape_cast %129 : vector<1x16x16x32xf32> to vector<256x32xf32>
    %c0_203 = arith.constant 0 : index
    %c0_204 = arith.constant 0 : index
    %131 = vector.load %arg10[%c0_203, %c0_204] : memref<256x32xf32, #tpu.memory_space<vmem>>, vector<256x32xf32>
    %c3_205 = arith.constant 3 : index
    %c0_206 = arith.constant 0 : index
    %c0_207 = arith.constant 0 : index
    %132 = vector.load %arg5[%c3_205, %c0_206, %c0_207] : memref<9x32x32xf32, #tpu.memory_space<vmem>>, vector<1x32x32xf32>
    %133 = vector.shape_cast %132 : vector<1x32x32xf32> to vector<32x32xf32>
    %cst_208 = arith.constant dense<0.000000e+00> : vector<256x32xf32>
    %134 = tpu.matmul %130, %133, %cst_208 {dimension_numbers = #tpu.dot_dimension_numbers<[1], [0], [0], [1], [0, 0, 1, 1], [], []>} : vector<256x32xf32>, vector<32x32xf32>, vector<256x32xf32> -> vector<256x32xf32>
    %135 = arith.addf %131, %134 : vector<256x32xf32>
    %c0_209 = arith.constant 0 : index
    %c0_210 = arith.constant 0 : index
    %136 = vector.load %arg10[%c0_209, %c0_210] : memref<256x32xf32, #tpu.memory_space<vmem>>, vector<256x32xf32>
    tpu.vector_store %arg10[%c0_209, %c0_210], %135 {strides = array<i32>} : memref<256x32xf32, #tpu.memory_space<vmem>>, vector<256x32xf32>,
    %c0_211 = arith.constant 0 : index
    %c1_212 = arith.constant 1 : index
    %c1_213 = arith.constant 1 : index
    %c0_214 = arith.constant 0 : index
    %137 = vector.load %arg9[%c0_211, %c1_212, %c1_213, %c0_214] : memref<1x18x18x32xf32, #tpu.memory_space<vmem>>, vector<1x16x16x32xf32>
    %138 = vector.shape_cast %137 : vector<1x16x16x32xf32> to vector<256x32xf32>
    %c0_215 = arith.constant 0 : index
    %c0_216 = arith.constant 0 : index
    %139 = vector.load %arg10[%c0_215, %c0_216] : memref<256x32xf32, #tpu.memory_space<vmem>>, vector<256x32xf32>
    %c4_217 = arith.constant 4 : index
    %c0_218 = arith.constant 0 : index
    %c0_219 = arith.constant 0 : index
    %140 = vector.load %arg5[%c4_217, %c0_218, %c0_219] : memref<9x32x32xf32, #tpu.memory_space<vmem>>, vector<1x32x32xf32>
    %141 = vector.shape_cast %140 : vector<1x32x32xf32> to vector<32x32xf32>
    %cst_220 = arith.constant dense<0.000000e+00> : vector<256x32xf32>
    %142 = tpu.matmul %138, %141, %cst_220 {dimension_numbers = #tpu.dot_dimension_numbers<[1], [0], [0], [1], [0, 0, 1, 1], [], []>} : vector<256x32xf32>, vector<32x32xf32>, vector<256x32xf32> -> vector<256x32xf32>
    %143 = arith.addf %139, %142 : vector<256x32xf32>
    %c0_221 = arith.constant 0 : index
    %c0_222 = arith.constant 0 : index
    %144 = vector.load %arg10[%c0_221, %c0_222] : memref<256x32xf32, #tpu.memory_space<vmem>>, vector<256x32xf32>
    tpu.vector_store %arg10[%c0_221, %c0_222], %143 {strides = array<i32>} : memref<256x32xf32, #tpu.memory_space<vmem>>, vector<256x32xf32>,
    %c0_223 = arith.constant 0 : index
    %c1_224 = arith.constant 1 : index
    %c2_225 = arith.constant 2 : index
    %c0_226 = arith.constant 0 : index
    %145 = vector.load %arg9[%c0_223, %c1_224, %c2_225, %c0_226] : memref<1x18x18x32xf32, #tpu.memory_space<vmem>>, vector<1x16x16x32xf32>
    %146 = vector.shape_cast %145 : vector<1x16x16x32xf32> to vector<256x32xf32>
    %c0_227 = arith.constant 0 : index
    %c0_228 = arith.constant 0 : index
    %147 = vector.load %arg10[%c0_227, %c0_228] : memref<256x32xf32, #tpu.memory_space<vmem>>, vector<256x32xf32>
    %c5_229 = arith.constant 5 : index
    %c0_230 = arith.constant 0 : index
    %c0_231 = arith.constant 0 : index
    %148 = vector.load %arg5[%c5_229, %c0_230, %c0_231] : memref<9x32x32xf32, #tpu.memory_space<vmem>>, vector<1x32x32xf32>
    %149 = vector.shape_cast %148 : vector<1x32x32xf32> to vector<32x32xf32>
    %cst_232 = arith.constant dense<0.000000e+00> : vector<256x32xf32>
    %150 = tpu.matmul %146, %149, %cst_232 {dimension_numbers = #tpu.dot_dimension_numbers<[1], [0], [0], [1], [0, 0, 1, 1], [], []>} : vector<256x32xf32>, vector<32x32xf32>, vector<256x32xf32> -> vector<256x32xf32>
    %151 = arith.addf %147, %150 : vector<256x32xf32>
    %c0_233 = arith.constant 0 : index
    %c0_234 = arith.constant 0 : index
    %152 = vector.load %arg10[%c0_233, %c0_234] : memref<256x32xf32, #tpu.memory_space<vmem>>, vector<256x32xf32>
    tpu.vector_store %arg10[%c0_233, %c0_234], %151 {strides = array<i32>} : memref<256x32xf32, #tpu.memory_space<vmem>>, vector<256x32xf32>,
    %c0_235 = arith.constant 0 : index
    %c2_236 = arith.constant 2 : index
    %c0_237 = arith.constant 0 : index
    %c0_238 = arith.constant 0 : index
    %153 = vector.load %arg9[%c0_235, %c2_236, %c0_237, %c0_238] : memref<1x18x18x32xf32, #tpu.memory_space<vmem>>, vector<1x16x16x32xf32>
    %154 = vector.shape_cast %153 : vector<1x16x16x32xf32> to vector<256x32xf32>
    %c0_239 = arith.constant 0 : index
    %c0_240 = arith.constant 0 : index
    %155 = vector.load %arg10[%c0_239, %c0_240] : memref<256x32xf32, #tpu.memory_space<vmem>>, vector<256x32xf32>
    %c6_241 = arith.constant 6 : index
    %c0_242 = arith.constant 0 : index
    %c0_243 = arith.constant 0 : index
    %156 = vector.load %arg5[%c6_241, %c0_242, %c0_243] : memref<9x32x32xf32, #tpu.memory_space<vmem>>, vector<1x32x32xf32>
    %157 = vector.shape_cast %156 : vector<1x32x32xf32> to vector<32x32xf32>
    %cst_244 = arith.constant dense<0.000000e+00> : vector<256x32xf32>
    %158 = tpu.matmul %154, %157, %cst_244 {dimension_numbers = #tpu.dot_dimension_numbers<[1], [0], [0], [1], [0, 0, 1, 1], [], []>} : vector<256x32xf32>, vector<32x32xf32>, vector<256x32xf32> -> vector<256x32xf32>
    %159 = arith.addf %155, %158 : vector<256x32xf32>
    %c0_245 = arith.constant 0 : index
    %c0_246 = arith.constant 0 : index
    %160 = vector.load %arg10[%c0_245, %c0_246] : memref<256x32xf32, #tpu.memory_space<vmem>>, vector<256x32xf32>
    tpu.vector_store %arg10[%c0_245, %c0_246], %159 {strides = array<i32>} : memref<256x32xf32, #tpu.memory_space<vmem>>, vector<256x32xf32>,
    %c0_247 = arith.constant 0 : index
    %c2_248 = arith.constant 2 : index
    %c1_249 = arith.constant 1 : index
    %c0_250 = arith.constant 0 : index
    %161 = vector.load %arg9[%c0_247, %c2_248, %c1_249, %c0_250] : memref<1x18x18x32xf32, #tpu.memory_space<vmem>>, vector<1x16x16x32xf32>
    %162 = vector.shape_cast %161 : vector<1x16x16x32xf32> to vector<256x32xf32>
    %c0_251 = arith.constant 0 : index
    %c0_252 = arith.constant 0 : index
    %163 = vector.load %arg10[%c0_251, %c0_252] : memref<256x32xf32, #tpu.memory_space<vmem>>, vector<256x32xf32>
    %c7_253 = arith.constant 7 : index
    %c0_254 = arith.constant 0 : index
    %c0_255 = arith.constant 0 : index
    %164 = vector.load %arg5[%c7_253, %c0_254, %c0_255] : memref<9x32x32xf32, #tpu.memory_space<vmem>>, vector<1x32x32xf32>
    %165 = vector.shape_cast %164 : vector<1x32x32xf32> to vector<32x32xf32>
    %cst_256 = arith.constant dense<0.000000e+00> : vector<256x32xf32>
    %166 = tpu.matmul %162, %165, %cst_256 {dimension_numbers = #tpu.dot_dimension_numbers<[1], [0], [0], [1], [0, 0, 1, 1], [], []>} : vector<256x32xf32>, vector<32x32xf32>, vector<256x32xf32> -> vector<256x32xf32>
    %167 = arith.addf %163, %166 : vector<256x32xf32>
    %c0_257 = arith.constant 0 : index
    %c0_258 = arith.constant 0 : index
    %168 = vector.load %arg10[%c0_257, %c0_258] : memref<256x32xf32, #tpu.memory_space<vmem>>, vector<256x32xf32>
    tpu.vector_store %arg10[%c0_257, %c0_258], %167 {strides = array<i32>} : memref<256x32xf32, #tpu.memory_space<vmem>>, vector<256x32xf32>,
    %c0_259 = arith.constant 0 : index
    %c2_260 = arith.constant 2 : index
    %c2_261 = arith.constant 2 : index
    %c0_262 = arith.constant 0 : index
    %169 = vector.load %arg9[%c0_259, %c2_260, %c2_261, %c0_262] : memref<1x18x18x32xf32, #tpu.memory_space<vmem>>, vector<1x16x16x32xf32>
    %170 = vector.shape_cast %169 : vector<1x16x16x32xf32> to vector<256x32xf32>
    %c0_263 = arith.constant 0 : index
    %c0_264 = arith.constant 0 : index
    %171 = vector.load %arg10[%c0_263, %c0_264] : memref<256x32xf32, #tpu.memory_space<vmem>>, vector<256x32xf32>
    %c8_265 = arith.constant 8 : index
    %c0_266 = arith.constant 0 : index
    %c0_267 = arith.constant 0 : index
    %172 = vector.load %arg5[%c8_265, %c0_266, %c0_267] : memref<9x32x32xf32, #tpu.memory_space<vmem>>, vector<1x32x32xf32>
    %173 = vector.shape_cast %172 : vector<1x32x32xf32> to vector<32x32xf32>
    %cst_268 = arith.constant dense<0.000000e+00> : vector<256x32xf32>
    %174 = tpu.matmul %170, %173, %cst_268 {dimension_numbers = #tpu.dot_dimension_numbers<[1], [0], [0], [1], [0, 0, 1, 1], [], []>} : vector<256x32xf32>, vector<32x32xf32>, vector<256x32xf32> -> vector<256x32xf32>
    %175 = arith.addf %171, %174 : vector<256x32xf32>
    %c0_269 = arith.constant 0 : index
    %c0_270 = arith.constant 0 : index
    %176 = vector.load %arg10[%c0_269, %c0_270] : memref<256x32xf32, #tpu.memory_space<vmem>>, vector<256x32xf32>
    tpu.vector_store %arg10[%c0_269, %c0_270], %175 {strides = array<i32>} : memref<256x32xf32, #tpu.memory_space<vmem>>, vector<256x32xf32>,
    %c0_271 = arith.constant 0 : index
    %c0_272 = arith.constant 0 : index
    %177 = vector.load %arg10[%c0_271, %c0_272] : memref<256x32xf32, #tpu.memory_space<vmem>>, vector<256x32xf32>
    %cst_273 = arith.constant 0.000000e+00 : f32
    %178 = vector.broadcast %cst_273 : f32 to vector<256x32xf32>
    %179 = arith.maximumf %177, %178 : vector<256x32xf32>
    %180 = vector.shape_cast %179 : vector<256x32xf32> to vector<1x16x16x32xf32>
    %c0_274 = arith.constant 0 : index
    %c0_275 = arith.constant 0 : index
    %c0_276 = arith.constant 0 : index
    %c0_277 = arith.constant 0 : index
    %181 = vector.load %arg7[%c0_274, %c0_275, %c0_276, %c0_277] : memref<1x16x16x32xf32, #tpu.memory_space<vmem>>, vector<1x16x16x32xf32>
    tpu.vector_store %arg7[%c0_274, %c0_275, %c0_276, %c0_277], %180 {strides = array<i32>} : memref<1x16x16x32xf32, #tpu.memory_space<vmem>>, vector<1x16x16x32xf32>,
    return
  }
  func.func @transform_0(%arg0: i32) -> (i32, i32, i32, i32) {
    %c0_i32 = arith.constant 0 : i32
    %c0_i32_0 = arith.constant 0 : i32
    %c0_i32_1 = arith.constant 0 : i32
    %c0_i32_2 = arith.constant 0 : i32
    return %arg0, %c0_i32, %c0_i32_0, %c0_i32_1 : i32, i32, i32, i32
  }
  func.func @transform_1(%arg0: i32) -> (i32, i32, i32, i32) {
    %c0_i32 = arith.constant 0 : i32
    %c0_i32_0 = arith.constant 0 : i32
    %c0_i32_1 = arith.constant 0 : i32
    %c0_i32_2 = arith.constant 0 : i32
    return %arg0, %c0_i32, %c0_i32_0, %c0_i32_1 : i32, i32, i32, i32
  }
  func.func @transform_2(%arg0: i32) -> (i32, i32, i32) {
    %c0_i32 = arith.constant 0 : i32
    %c0_i32_0 = arith.constant 0 : i32
    %c0_i32_1 = arith.constant 0 : i32
    %c0_i32_2 = arith.constant 0 : i32
    return %c0_i32, %c0_i32_0, %c0_i32_1 : i32, i32, i32
  }
  func.func @transform_3(%arg0: i32) -> (i32, i32) {
    %c0_i32 = arith.constant 0 : i32
    %c0_i32_0 = arith.constant 0 : i32
    %c0_i32_1 = arith.constant 0 : i32
    return %c0_i32, %c0_i32_0 : i32, i32
  }
  func.func @transform_4(%arg0: i32) -> (i32, i32, i32) {
    %c0_i32 = arith.constant 0 : i32
    %c0_i32_0 = arith.constant 0 : i32
    %c0_i32_1 = arith.constant 0 : i32
    %c0_i32_2 = arith.constant 0 : i32
    return %c0_i32, %c0_i32_0, %c0_i32_1 : i32, i32, i32
  }
  func.func @transform_5(%arg0: i32) -> (i32, i32) {
    %c0_i32 = arith.constant 0 : i32
    %c0_i32_0 = arith.constant 0 : i32
    %c0_i32_1 = arith.constant 0 : i32
    return %c0_i32, %c0_i32_0 : i32, i32
  }
  func.func @transform_6(%arg0: i32) -> (i32, i32, i32, i32) {
    %c0_i32 = arith.constant 0 : i32
    %c0_i32_0 = arith.constant 0 : i32
    %c0_i32_1 = arith.constant 0 : i32
    %c0_i32_2 = arith.constant 0 : i32
    return %arg0, %c0_i32, %c0_i32_0, %c0_i32_1 : i32, i32, i32, i32
  }
}

</mosaic_0001>

<bundles_post_ra>
// kernel: tpu_custom_call.1
= control target key start
LH: loop header
LB: loop body
LE: loop exit
PB: predicated region body
PF: predicated region fallthrough
CT: control target
= control target key end

     0   :  { %s14620_s0 = inlined_call_operand.hbm [shape: f32[2,16,16,32], index: 0, kind: input, shape index: {}]   ;;  %s14621_s1 = inlined_call_operand.hbm [shape: f32[2,16,16,32], index: 1, kind: input, shape index: {}]   ;;  %s14622_s2 = inlined_call_operand.hbm [shape: f32[9,32,32], index: 2, kind: input, shape index: {}]   ;;  %s14623_s3 = inlined_call_operand.vmem [shape: f32[1,32], index: 3, kind: input, shape index: {}]   ;;  %s14624_s4 = inlined_call_operand.hbm [shape: f32[9,32,32], index: 4, kind: input, shape index: {}]   ;;  %s14625_s5 = inlined_call_operand.vmem [shape: f32[1,32], index: 5, kind: input, shape index: {}]   ;;  %s14626_s6 = inlined_call_operand.hbm [shape: f32[2,16,16,32], index: 6, kind: output, shape index: {}]  }
   0x1   :  { %14676 = sst [smem:[#allocation48_spill]] %s14620_s0 }
   0x2   :  { %14677 = sst [smem:[#allocation49_spill]] %s14622_s2 }
   0x3   :  { %14678 = sst [smem:[#allocation50_spill]] %s14624_s4 }
   0x4   :  { %11 = vsyncpa [#allocation6], 0 }
   0x5   :  { %13 = vsyncpa [#allocation6 + $0x1], 0 }
   0x6   :  { %14 = vsyncpa [#allocation9], 0 }
   0x7   :  { %16 = vsyncpa [#allocation9 + $0x1], 0 }
   0x8   :  { %17 = vsyncpa [#allocation12], 0 }
   0x9   :  { %18 = vsyncpa [#allocation7], 0 }
   0xa   :  { %20 = vsyncpa [#allocation7 + $0x1], 0  ;;  %s11849_s21 = smov 0   ;;  %s11851_s22 = smov 0  }
   0xb   :  { %s11853_s23 = smov 0   ;;  %s11855_s24 = smov 0  }
   0xc LB: > { %s11870_s25 = sadd.s32 4294967295, %s11802_s24   ;;  %s9128_s26 = sadd.s32 4294967294, %s11802_s24   ;;  %s11802_s24 = sphi %s11855_s24, %s14783_s24   ;;  %s11798_s23 = sphi %s11853_s23, %s14782_s23   ;;  %s11794_s22 = sphi %s11851_s22, %s14781_s22   ;;  %s11790_s21 = sphi %s11849_s21, %s14780_s21  }
   0xd   : > { %p46_p0 = scmp.ne.s32.totalorder %s11794_s22, %s11790_s21  ;;  %p14627_p1 = scmp.eq.s32.totalorder %s11870_s25, 0 }
   0xe   : > { %p186_p3 = scmp.eq.s32.totalorder %s9128_s26, 1  ;;  %p9129_p5 = scmp.ge.s32.totalorder %s11802_s24, 1 }
   0xf   : > { %p11879_p4 = por %p14627_p1, %p46_p0  ;;  %p193_p7 = scmp.lt.s32.totalorder %s11802_s24, 3 }
  0x10   : > { %p11884_p6 = por %p186_p3, %p46_p0  ;;  %s11804_s30 = smov [#allocation10]  }
  0x11   : > { %s14679_s27 = scalar_select %p11879_p4, 1, 0 }
  0x12   : > { %s14680_s28 = scalar_select %p11884_p6, 1, 0 }
  0x13   : > { %p11889_p8 = pnand %p9129_p5, %p193_p7  ;;  %s205_s7 = sshll.u32 %s11804_s30, 4  ;;  %s11893_s7 = int_to_ptr.vmem [resolvable:$true] %s205_s7 }
  0x14   : > { %s11805_s9 = smov [#allocation11]   ;;  %s14683_s2 = sld [smem:[#allocation49_spill]] }
  0x15   : > { %p11545_p9 = pneg %p11889_p8  ;;  %s221_s10 = sshll.u32 %s11805_s9, 4  ;;  %s11904_s10 = int_to_ptr.vmem [resolvable:$true] %s221_s10 }
  0x17   : > { %p11900_p11 = pnand %p11545_p9, %p14627_p1 }
  0x19   : > { %p11610_p13 = pneg %p11900_p11 }
  0x1a   : > { %s11608_s13 = scalar_lea.hbm %s14683_s2, 4608 }
  0x1b   : > { %p11609_p12 = scmp.ne.s32.totalorder %s14683_s2, %s11608_s13  ;;  %p11615_p5 = scmp.lt.u32.totalorder %s11608_s13, %s14683_s2 }
  0x1d   : > { %p11611_p0 = pnand %p11610_p13, %p11609_p12 }
  0x1f   : > { %p11612_p3 = pneg %p11611_p0 }
  0x21   : > { %p11617_p7 = pnand %p11615_p5, %p11612_p3 }
  0x23   : > { %11620 = shalt.err (!%p11617_p7)
}
  0x24   : > { %s11621_s18 = scalar_lea.vmem %s11893_s7, 4608  ;;  %p11629_p2 = scmp.lt.s32.totalorder %s11893_s7, %s11893_s7 }
  0x25   : > { %p11622_p9 = scmp.ne.s32.totalorder %s11893_s7, %s11621_s18  ;;  %p11630_p12 = scmp.lt.s32.totalorder %s11621_s18, %s11621_s18 }
  0x27   : > { %p11624_p10 = pnand %p11622_p9, %p11610_p13  ;;  %p11631_p0 = por %p11630_p12, %p11629_p2 }
  0x29   : > { %p11625_p1 = pneg %p11624_p10 }
  0x2b   : > { %p11632_p6 = pnand %p11631_p0, %p11625_p1 }
  0x2d   : > { %11635 = shalt.err (!%p11632_p6)
}
  0x2e   : > { %s14628_s19 = smov 128   ;;  %s14630_s20 = smov 8  }
  0x2f   : > { %11548 = dma.hbm_to_vmem [thread:$0]  (!%p11900_p11), %s14683_s2, 4608, %s11893_s7, [#allocation9], %s14628_s19, %s14628_s19, %s14630_s20  }
  0x30   : > { %s14684_s4 = sld [smem:[#allocation50_spill]] }
  0x36   : > { %s11636_s12 = scalar_lea.hbm %s14684_s4, 4608 }
  0x37   : > { %p11637_p1 = scmp.ne.s32.totalorder %s14684_s4, %s11636_s12  ;;  %p11643_p10 = scmp.lt.u32.totalorder %s11636_s12, %s14684_s4 }
  0x39   : > { %p11639_p2 = pnand %p11637_p1, %p11610_p13 }
  0x3b   : > { %p11640_p6 = pneg %p11639_p2 }
  0x3d   : > { %p11645_p3 = pnand %p11643_p10, %p11640_p6 }
  0x3f   : > { %11648 = shalt.err (!%p11645_p3)
}
  0x40   : > { %s11649_s7 = scalar_lea.vmem %s11904_s10, 4608  ;;  %p11657_p12 = scmp.lt.s32.totalorder %s11904_s10, %s11904_s10 }
  0x41   : > { %p11650_p5 = scmp.ne.s32.totalorder %s11904_s10, %s11649_s7  ;;  %p11658_p0 = scmp.lt.s32.totalorder %s11649_s7, %s11649_s7 }
  0x43   : > { %p11652_p7 = pnand %p11650_p5, %p11610_p13  ;;  %p11659_p1 = por %p11658_p0, %p11657_p12 }
  0x45   : > { %p11653_p9 = pneg %p11652_p7 }
  0x47   : > { %p11660_p2 = pnand %p11659_p1, %p11653_p9 }
  0x49   : > { %11663 = shalt.err (!%p11660_p2)
}
  0x4a   : > { %11551 = dma.hbm_to_vmem [thread:$0]  (!%p11900_p11), %s14684_s4, 4608, %s11904_s10, [#allocation12], %s14628_s19, %s14628_s19, %s14630_s20  }
  0x4b   : > { %s11965_s8 = sadd.s32 1, %s11802_s24   ;;  %s33_s26 = sadd.s32 1, %s11798_s23 }
  0x4c   : > { %s30_s30 = ssub.s32 %s11802_s24, %s11965_s8  ;;  %p40_p13 = scmp.ne.s32.totalorder %s11798_s23, %s11794_s22 }
  0x4d   : > { %p31_p6 = scmp.eq.s32.totalorder %s30_s30, 0  ;;  %p41_p10 = scmp.eq.s32.totalorder %s11802_s24, 0 }
  0x4e   : > { %p14685_p3 = scmp.eq.s32.totalorder %s11870_s25, 1  ;;  %p11565_p7 = scmp.lt.s32.totalorder %s11802_s24, 2 }
  0x4f   : > { %s11981_s11 = scalar_select %p31_p6, %s11798_s23, %s33_s26  }
  0x50   : > { %p11975_p5 = por %p14685_p3, %p40_p13  ;;  %p42_p9 = por %p41_p10, %p40_p13 }
  0x51   : > { %s238_s12 = sand.u32 1, %s11798_s23   ;;  %s9728_s10 = sshll.u32 %s11802_s24, 12 }
  0x52   : > { %s14686_s9 = scalar_select %p11975_p5, 1, 0 }
  0x53   : > { %s9133_s13 = sshll.u32 %s238_s12, 8  ;;  %s14687_s0 = sld [smem:[#allocation48_spill]] }
  0x54   : > { %s242_s7 = scalar_lea.vmem [#allocation5], %s9133_s13  ;;  %p11992_p11 = pnand %p11565_p7, %p42_p9 }
  0x55   : > { %s249_s17 = sshll.u32 %s242_s7, 4  ;;  %s11999_s14 = scalar_lea.hbm %s14621_s1, %s9728_s10  ;;  %s11990_s17 = int_to_ptr.vmem [resolvable:$true] %s249_s17 }
  0x56   : > { %s263_s15 = scalar_lea.vmem [#allocation8], %s9133_s13  ;;  %s12003_s20 = scalar_lea.sflag [#allocation6], %s238_s12 }
  0x57   : > { %s12001_s19 = sshll.u32 %s263_s15, 4  ;;  %p11666_p0 = pneg %p11992_p11  ;;  %s12035_s19 = int_to_ptr.vmem [resolvable:$true] %s12001_s19 }
  0x59   : > { %s11988_s16 = scalar_lea.hbm %s14687_s0, %s9728_s10  ;;  %s11669_s26 = scalar_lea.hbm %s14687_s0, 8192 }
  0x5a   : > { %s11664_s7 = scalar_lea.hbm %s11988_s16, 4096  ;;  %p11670_p13 = scmp.lt.u32.totalorder %s11988_s16, %s14687_s0 }
  0x5b   : > { %p11665_p12 = scmp.ne.s32.totalorder %s11988_s16, %s11664_s7  ;;  %p11671_p6 = scmp.lt.u32.totalorder %s11669_s26, %s11664_s7 }
  0x5c   : > { %p11673_p3 = scmp.lt.u32.totalorder %s11664_s7, %s11988_s16 }
  0x5d   : > { %p11667_p1 = pnand %p11666_p0, %p11665_p12  ;;  %p11672_p10 = por %p11671_p6, %p11670_p13 }
  0x5f   : > { %p11668_p2 = pneg %p11667_p1  ;;  %p11674_p7 = por %p11673_p3, %p11672_p10 }
  0x61   : > { %p11675_p9 = pnand %p11674_p7, %p11668_p2 }
  0x63   : > { %11678 = shalt.err (!%p11675_p9)
}
  0x64   : > { %s11679_s12 = scalar_lea.vmem %s11990_s17, 4096  ;;  %s11808_s2 = smov [#allocation5]  }
  0x65   : > { %p11680_p12 = scmp.ne.s32.totalorder %s11990_s17, %s11679_s12  ;;  %s11684_s4 = sshll.u32 %s11808_s2, 4  ;;  %s11685_s4 = int_to_ptr.vmem [resolvable:$false] %s11684_s4 }
  0x66   : > { %s11686_s13 = scalar_lea.vmem %s11685_s4, 8192  ;;  %p11687_p4 = scmp.lt.s32.totalorder %s11990_s17, %s11685_s4 }
  0x67   : > { %p11682_p1 = pnand %p11680_p12, %p11666_p0  ;;  %p11688_p13 = scmp.lt.s32.totalorder %s11686_s13, %s11679_s12 }
  0x69   : > { %p11683_p5 = pneg %p11682_p1  ;;  %p11689_p6 = por %p11688_p13, %p11687_p4 }
  0x6b   : > { %p11690_p10 = pnand %p11689_p6, %p11683_p5 }
  0x6d   : > { %11693 = shalt.err (!%p11690_p10)
}
  0x6e   : > { %s14689_s15 = smov 8   ;;  %s14690_s7 = smov 128  }
  0x6f   : > { %11555 = dma.hbm_to_vmem [thread:$0]  (!%p11992_p11), %s11988_s16, 4096, %s11990_s17, %s12003_s20, %s14690_s7, %s14690_s7, %s14689_s15  }
  0x70   : > { %s259_s26 = sand.u32 1, %s11802_s24   ;;  %s11694_s10 = scalar_lea.hbm %s11999_s14, 4096 }
  0x71   : > { %s12038_s30 = scalar_lea.sflag [#allocation9], %s259_s26  ;;  %p11695_p4 = scmp.ne.s32.totalorder %s11999_s14, %s11694_s10 }
  0x72   : > { %s11699_s4 = scalar_lea.hbm %s14621_s1, 8192  ;;  %p11700_p3 = scmp.lt.u32.totalorder %s11999_s14, %s14621_s1 }
  0x73   : > { %p11697_p5 = pnand %p11695_p4, %p11666_p0  ;;  %p11701_p7 = scmp.lt.u32.totalorder %s11699_s4, %s11694_s10 }
  0x74   : > { %p11703_p12 = scmp.lt.u32.totalorder %s11694_s10, %s11999_s14 }
  0x75   : > { %p11698_p2 = pneg %p11697_p5  ;;  %p11702_p9 = por %p11701_p7, %p11700_p3 }
  0x77   : > { %p11704_p1 = por %p11703_p12, %p11702_p9 }
  0x79   : > { %p11705_p13 = pnand %p11704_p1, %p11698_p2 }
  0x7b   : > { %11708 = shalt.err (!%p11705_p13)
}
  0x7c   : > { %s11709_s20 = scalar_lea.vmem %s12035_s19, 4096  ;;  %s11809_s16 = smov [#allocation8]  }
  0x7d   : > { %p11710_p6 = scmp.ne.s32.totalorder %s12035_s19, %s11709_s20  ;;  %s11714_s17 = sshll.u32 %s11809_s16, 4  ;;  %s11715_s17 = int_to_ptr.vmem [resolvable:$false] %s11714_s17 }
  0x7e   : > { %s11716_s0 = scalar_lea.vmem %s11715_s17, 8192  ;;  %p11717_p5 = scmp.lt.s32.totalorder %s12035_s19, %s11715_s17 }
  0x7f   : > { %p11712_p10 = pnand %p11710_p6, %p11666_p0  ;;  %p11718_p3 = scmp.lt.s32.totalorder %s11716_s0, %s11709_s20 }
  0x81   : > { %p11713_p4 = pneg %p11712_p10  ;;  %p11719_p7 = por %p11718_p3, %p11717_p5 }
  0x83   : > { %p11720_p9 = pnand %p11719_p7, %p11713_p4 }
  0x85   : > { %11723 = shalt.err (!%p11720_p9)
}
  0x86   : > { %11558 = dma.hbm_to_vmem [thread:$0]  (!%p11992_p11), %s11999_s14, 4096, %s12035_s19, %s12038_s30, %s14690_s7, %s14690_s7, %s14689_s15  }
  0x87   : > { %282 = sbr.rel (%p11889_p8) target bundleno = 1226 (0x4ca), region = 44 }
  0x8e   : > { %s12070_s26 = sand.u32 1, %s11794_s22   ;;  %p14691_p0 = scmp.ne.s32.totalorder %s14679_s27, 0 }
  0x8f   : > { %s12073_s10 = sshll.u32 %s12070_s26, 8  ;;  %s285_s18 = scalar_lea.sflag [#allocation6], %s12070_s26 }
  0x90   : > { %s12077_s12 = scalar_lea.vmem [#allocation5], %s12073_s10 }
  0x91   : > { %11769 = dma.done.wait (%p14691_p0), %s285_s18, 4096  }
  0x92   : > { %11771 = vsyncadd (%p14691_p0), %s285_s18, 4294963200  ;;  %s293_s29 = sand.u32 1, %s11870_s25   ;;  %s12085_s14 = scalar_lea.vmem [#allocation8], %s12073_s10 }
  0x93   : > { %s294_s19 = scalar_lea.sflag [#allocation9], %s293_s29 }
  0x94   : > { %11773 = dma.done.wait (%p14691_p0), %s294_s19, 4096  }
  0x95   : > { %11775 = vsyncadd (%p14691_p0), %s294_s19, 4294963200  ;;  %p14692_p8 = scmp.eq.s32.totalorder %s11870_s25, 0 }
  0x97   : > { %11777 = dma.done.wait (%p14692_p8), [#allocation9], 4608   ;;  %p14693_p11 = pmov %p14692_p8 }
  0x98   : > { %p14694_p2 = pmov %p14692_p8 }
  0x99   : > { %11779 = vsyncadd (%p14693_p11), [#allocation9], 4294962688 }
  0x9a   : > { %11781 = dma.done.wait (%p14694_p2), [#allocation12], 4608   ;;  %p14695_p12 = pmov %p14694_p2 }
  0x9b   : > { %vm339_vm0 = vcmask 261120   ;;  %vm355_vm1 = vcmask 254976   ;;  %vm342_vm2 = vcmask 257024   ;;  %v14634_v0 = vmov 0.0   ;;  %v619_v1 = vld [vmem:[#allocation10] sm:$0xff]  ;;  %v620_v2 = vld [vmem:[#allocation10 + $0x8] sm:$0xff] }
  0x9c   : > { %11783 = vsyncadd (%p14695_p12), [#allocation12], 4294962688  ;;  %340 = vst.msk [vmem:[#allocation2] sm:$0xff] %vm339_vm0, %v14634_v0  ;;  %v621_v3 = vld [vmem:[#allocation10 + $0x10] sm:$0xff]  ;;  %v11387_v4 = vpack.c.bf16 %v620_v2, %v619_v1  ;;  %v622_v5 = vld [vmem:[#allocation10 + $0x18] sm:$0xff]  ;;  %vm4713_vm3 = vcmask 253952  }
  0x9d   : > { %341 = vst.msk [vmem:[#allocation2 + $0x8] sm:$0xff] %vm339_vm0, %v14634_v0  ;;  %344 = vst.msk [vmem:[#allocation2 + $0x18] sm:$0xff] %vm339_vm0, %v14634_v0  ;;  %v11391_v7 = vpack.c.bf16 %v622_v5, %v621_v3  ;;  %v1527_v8 = vld [vmem:[#allocation10 + $0x40] sm:$0xff]  ;;  %v1528_v9 = vld [vmem:[#allocation10 + $0x48] sm:$0xff]  ;;  %s14477_s2 = scalar_lea.vmem [#allocation13], %s12073_s10  ;;  %s9730_s4 = sshll.u32 %s11870_s25, 12 }
  0x9e   : > { %345 = vst.msk [vmem:[#allocation2 + $0x20] sm:$0xff] %vm339_vm0, %v14634_v0  ;;  %348 = vst.msk [vmem:[#allocation2 + $0x1b0] sm:$0xff] %vm339_vm0, %v14634_v0  ;;  %v1073_v10 = vld [vmem:[#allocation10 + $0x20] sm:$0xff]  ;;  %11388 = vmatprep.subr.bf16.mxu0 %v11387_v4  ;;  %v1074_v11 = vld [vmem:[#allocation10 + $0x28] sm:$0xff]  ;;  %v11403_v16 = vpack.c.bf16 %v1528_v9, %v1527_v8  ;;  %s9013_s13 = sshll.u32 %s14477_s2, 4  ;;  %s14570_s17 = scalar_lea.hbm %s14626_s6, %s9730_s4  ;;  %s14572_s13 = int_to_ptr.vmem [resolvable:$true] %s9013_s13 }
  0x9f   : > { %349 = vst.msk [vmem:[#allocation2 + $0x1b8] sm:$0xff] %vm339_vm0, %v14634_v0  ;;  %351 = vst.msk [vmem:[#allocation2 + $0x1c8] sm:$0xff] %vm339_vm0, %v14634_v0  ;;  %11390 = vmatpush3.bf16.msra.mxu0 %v11387_v4  ;;  %v11395_v12 = vpack.c.bf16 %v1074_v11, %v1073_v10  ;;  %v1075_v13 = vld [vmem:[#allocation10 + $0x30] sm:$0xff]  ;;  %v1076_v14 = vld [vmem:[#allocation10 + $0x38] sm:$0xff]  ;;  %s9000_s25 = scalar_lea.sflag [#allocation7], %s12070_s26  ;;  %s11724_s0 = scalar_lea.vmem %s14572_s13, 4096 }
  0xa0   : > { %352 = vst.msk [vmem:[#allocation2 + $0x1d0] sm:$0xff] %vm339_vm0, %v14634_v0  ;;  %4705 = vst.msk [vmem:[#allocation3] sm:$0xff] %vm339_vm0, %v14634_v0  ;;  %v388_v15 = vld [vmem:[%s12085_s14] sm:$0xff]  ;;  %11392 = vmatprep.subr.bf16.mxu0 %v11391_v7  ;;  %v11399_v17 = vpack.c.bf16 %v1076_v14, %v1075_v13  ;;  %v389_v18 = vld [vmem:[%s12085_s14 + $0x8] sm:$0xff]  ;;  %p11725_p1 = scmp.ne.s32.totalorder %s14572_s13, %s11724_s0  ;;  %p14777_p13 = scmp.ne.s32.totalorder %s14686_s9, 0 }
  0xa1   : > { %4706 = vst.msk [vmem:[#allocation3 + $0x8] sm:$0xff] %vm339_vm0, %v14634_v0  ;;  %4709 = vst.msk [vmem:[#allocation3 + $0x198] sm:$0xff] %vm339_vm0, %v14634_v0  ;;  %11396 = vmatprep.subr.bf16.mxu1 %v11395_v12  ;;  %v390_v21 = vld [vmem:[%s12085_s14 + $0x10] sm:$0xff]  ;;  %v391_v22 = vld [vmem:[%s12085_s14 + $0x18] sm:$0xff]  ;;  %s11811_s10 = smov [#allocation13]  }
  0xa2   : > { %4710 = vst.msk [vmem:[#allocation3 + $0x1a0] sm:$0xff] %vm339_vm0, %v14634_v0  ;;  %420 = vst.msk [vmem:[#allocation2 + $0x32] sm:$0xff] %vm339_vm0, %v388_v15  ;;  %11398 = vmatpush3.bf16.msra.mxu1 %v11395_v12  ;;  %v392_v24 = vld [vmem:[%s12085_s14 + $0x20] sm:$0xff]  ;;  %v393_v25 = vld [vmem:[%s12085_s14 + $0x28] sm:$0xff]  ;;  %p11726_p6 = pnand %p11725_p1, %p14777_p13  ;;  %s11728_s18 = sshll.u32 %s11811_s10, 4  ;;  %s11729_s18 = int_to_ptr.vmem [resolvable:$false] %s11728_s18 }
  0xa3   : > { %356 = vst.msk [vmem:[#allocation2 + $0x30] sm:$0x3] %vm355_vm1, %v14634_v0  ;;  %357 = vst.msk [vmem:[#allocation2 + $0x48] sm:$0x3] %vm355_vm1, %v14634_v0  ;;  %v555_v6 = vld [vmem:[#allocation2] sm:$0xff]  ;;  %11394 = vmatpush3.bf16.msra.mxu0 %v11391_v7  ;;  %11400 = vmatprep.subr.bf16.mxu1 %v11399_v17  ;;  %v395_v27 = vld [vmem:[%s12085_s14 + $0x38] sm:$0xff]  ;;  %p11731_p4 = scmp.lt.s32.totalorder %s14572_s13, %s11729_s18 }
  0xa4   : > { %358 = vst.msk [vmem:[#allocation2 + $0x60] sm:$0x3] %vm355_vm1, %v14634_v0  ;;  %359 = vst.msk [vmem:[#allocation2 + $0x78] sm:$0x3] %vm355_vm1, %v14634_v0  ;;  %10387 = vmatprep.mubr.msk.f32.mxu0 %vm339_vm0, %v555_v6  ;;  %v1008_v19 = vld [vmem:[#allocation2 + $0x2] sm:$0xff]  ;;  %v557_v23 = vld [vmem:[#allocation2 + $0x18] sm:$0xff]  ;;  %11404 = vmatprep.subr.bf16.mxu0 %v11403_v16  ;;  %p11727_p10 = pneg %p11726_p6 }
  0xa5   : > { %360 = vst.msk [vmem:[#allocation2 + $0x90] sm:$0x3] %vm355_vm1, %v14634_v0  ;;  %361 = vst.msk [vmem:[#allocation2 + $0xa8] sm:$0x3] %vm355_vm1, %v14634_v0  ;;  %v556_v20 = vld [vmem:[#allocation2 + $0x8] sm:$0xff]  ;;  %10443 = vmatprep.mubr.msk.f32.mxu1 %vm339_vm0, %v1008_v19  ;;  %v394_v26 = vld [vmem:[%s12085_s14 + $0x30] sm:$0xff] }
  0xa6   : > { %362 = vst.msk [vmem:[#allocation2 + $0xc0] sm:$0x3] %vm355_vm1, %v14634_v0  ;;  %363 = vst.msk [vmem:[#allocation2 + $0xd8] sm:$0x3] %vm355_vm1, %v14634_v0  ;;  %v396_v28 = vld [vmem:[%s12085_s14 + $0x40] sm:$0xff]  ;;  %v397_v30 = vld [vmem:[%s12085_s14 + $0x48] sm:$0xff]  ;;  %10388 = vmatmul.mubr.msk.f32.vlgmr.msra.gmra.mrb[0].mxu0 %vm339_vm0, %v556_v20  ;;  %11402 = vmatpush3.bf16.msra.mxu1 %v11399_v17 }
  0xa7   : > { %364 = vst.msk [vmem:[#allocation2 + $0xf0] sm:$0x3] %vm355_vm1, %v14634_v0  ;;  %365 = vst.msk [vmem:[#allocation2 + $0x108] sm:$0x3] %vm355_vm1, %v14634_v0  ;;  %v398_v31 = vld [vmem:[%s12085_s14 + $0x50] sm:$0xff]  ;;  %v399_v32 = vld [vmem:[%s12085_s14 + $0x58] sm:$0xff]  ;;  %11406 = vmatpush3.bf16.msra.mxu0 %v11403_v16  ;;  %10390 = vmatprep.mubr.msk.f32.mxu0 %vm339_vm0, %v557_v23 }
  0xa8   : > { %366 = vst.msk [vmem:[#allocation2 + $0x120] sm:$0x3] %vm355_vm1, %v14634_v0  ;;  %367 = vst.msk [vmem:[#allocation2 + $0x138] sm:$0x3] %vm355_vm1, %v14634_v0  ;;  %v400_v33 = vld [vmem:[%s12085_s14 + $0x60] sm:$0xff]  ;;  %v401_v34 = vld [vmem:[%s12085_s14 + $0x68] sm:$0xff] }
  0xa9   : > { %368 = vst.msk [vmem:[#allocation2 + $0x150] sm:$0x3] %vm355_vm1, %v14634_v0  ;;  %369 = vst.msk [vmem:[#allocation2 + $0x168] sm:$0x3] %vm355_vm1, %v14634_v0  ;;  %v1529_v35 = vld [vmem:[#allocation10 + $0x50] sm:$0xff]  ;;  %v1530_v36 = vld [vmem:[#allocation10 + $0x58] sm:$0xff] }
  0xaa   : > { %370 = vst.msk [vmem:[#allocation2 + $0x180] sm:$0x3] %vm355_vm1, %v14634_v0  ;;  %371 = vst.msk [vmem:[#allocation2 + $0x198] sm:$0x3] %vm355_vm1, %v14634_v0  ;;  %v402_v37 = vld [vmem:[%s12085_s14 + $0x70] sm:$0xff]  ;;  %v403_v38 = vld [vmem:[%s12085_s14 + $0x78] sm:$0xff]  ;;  %v11407_v41 = vpack.c.bf16 %v1530_v36, %v1529_v35 }
  0xab   : > { %372 = vst.msk [vmem:[#allocation2 + $0x42] sm:$0x3] %vm355_vm1, %v14634_v0  ;;  %373 = vst.msk [vmem:[#allocation2 + $0x5a] sm:$0x3] %vm355_vm1, %v14634_v0  ;;  %v558_v39 = vld [vmem:[#allocation2 + $0x20] sm:$0xff]  ;;  %v404_v42 = vld [vmem:[%s12085_s14 + $0x80] sm:$0xff] }
  0xac   : > { %374 = vst.msk [vmem:[#allocation2 + $0x72] sm:$0x3] %vm355_vm1, %v14634_v0  ;;  %375 = vst.msk [vmem:[#allocation2 + $0x8a] sm:$0x3] %vm355_vm1, %v14634_v0  ;;  %v1010_v40 = vld [vmem:[#allocation2 + $0x1a] sm:$0xff]  ;;  %v12236_v43 = vld [vmem:[#allocation2 + $0x30] sm:$0xff]  ;;  %11408 = vmatprep.subr.bf16.mxu0 %v11407_v41  ;;  %10391 = vmatmul.mubr.msk.f32.gmra.mrb[2].mxu0 %vm339_vm0, %v558_v39 }
  0xad   : > { %376 = vst.msk [vmem:[#allocation2 + $0xa2] sm:$0x3] %vm355_vm1, %v14634_v0  ;;  %377 = vst.msk [vmem:[#allocation2 + $0xba] sm:$0x3] %vm355_vm1, %v14634_v0  ;;  %v405_v44 = vld [vmem:[%s12085_s14 + $0x88] sm:$0xff]  ;;  %10393 = vmatprep.mubr.msk.f32.mxu0 %vm339_vm0, %v12236_v43  ;;  %11410 = vmatpush3.bf16.msra.mxu0 %v11407_v41  ;;  %v406_v54 = vld [vmem:[%s12085_s14 + $0x90] sm:$0xff] }
  0xae   : > { %378 = vst.msk [vmem:[#allocation2 + $0xd2] sm:$0x3] %vm355_vm1, %v14634_v0  ;;  %379 = vst.msk [vmem:[#allocation2 + $0xea] sm:$0x3] %vm355_vm1, %v14634_v0  ;;  %v12248_v47 = vld [vmem:[#allocation2 + $0x32] sm:$0xff]  ;;  %v407_v55 = vld [vmem:[%s12085_s14 + $0x98] sm:$0xff] }
  0xaf   : > { %380 = vst.msk [vmem:[#allocation2 + $0x102] sm:$0x3] %vm355_vm1, %v14634_v0  ;;  %381 = vst.msk [vmem:[#allocation2 + $0x11a] sm:$0x3] %vm355_vm1, %v14634_v0  ;;  %v408_v58 = vld [vmem:[%s12085_s14 + $0xa0] sm:$0xff]  ;;  %v409_v61 = vld [vmem:[%s12085_s14 + $0xa8] sm:$0xff] }
  0xb0   : > { %382 = vst.msk [vmem:[#allocation2 + $0x132] sm:$0x3] %vm355_vm1, %v14634_v0  ;;  %383 = vst.msk [vmem:[#allocation2 + $0x14a] sm:$0x3] %vm355_vm1, %v14634_v0  ;;  %v410_v63 = vld [vmem:[%s12085_s14 + $0xb0] sm:$0xff]  ;;  %v411_v1 = vld [vmem:[%s12085_s14 + $0xb8] sm:$0xff] }
  0xb1   : > { %384 = vst.msk [vmem:[#allocation2 + $0x162] sm:$0x3] %vm355_vm1, %v14634_v0  ;;  %385 = vst.msk [vmem:[#allocation2 + $0x17a] sm:$0x3] %vm355_vm1, %v14634_v0  ;;  %v1981_v2 = vld [vmem:[#allocation10 + $0x60] sm:$0xff]  ;;  %v1982_v3 = vld [vmem:[#allocation10 + $0x68] sm:$0xff] }
  0xb2   : > { %386 = vst.msk [vmem:[#allocation2 + $0x192] sm:$0x3] %vm355_vm1, %v14634_v0  ;;  %387 = vst.msk [vmem:[#allocation2 + $0x1aa] sm:$0x3] %vm355_vm1, %v14634_v0  ;;  %v412_v4 = vld [vmem:[%s12085_s14 + $0xc0] sm:$0xff]  ;;  %v413_v5 = vld [vmem:[%s12085_s14 + $0xc8] sm:$0xff]  ;;  %v11411_v7 = vpack.c.bf16 %v1982_v3, %v1981_v2 }
  0xb3   : > { %4707 = vst.msk [vmem:[#allocation3 + $0x10] sm:$0x3] %vm355_vm1, %v14634_v0  ;;  %4711 = vst.msk [vmem:[#allocation3 + $0x1a8] sm:$0x3] %vm355_vm1, %v14634_v0  ;;  %v414_v8 = vld [vmem:[%s12085_s14 + $0xd0] sm:$0xff]  ;;  %v415_v9 = vld [vmem:[%s12085_s14 + $0xd8] sm:$0xff] }
  0xb4   : > { %343 = vst.msk [vmem:[#allocation2 + $0x10] sm:$0xf] %vm342_vm2, %v14634_v0  ;;  %346 = vst.msk [vmem:[#allocation2 + $0x28] sm:$0xf] %vm342_vm2, %v14634_v0  ;;  %v2435_v11 = vld [vmem:[#allocation10 + $0x80] sm:$0xff]  ;;  %v2436_v12 = vld [vmem:[#allocation10 + $0x88] sm:$0xff]  ;;  %11412 = vmatprep.subr.bf16.mxu1 %v11411_v7 }
  0xb5   : > { %350 = vst.msk [vmem:[#allocation2 + $0x1c0] sm:$0xf] %vm342_vm2, %v14634_v0  ;;  %353 = vst.msk [vmem:[#allocation2 + $0x1d8] sm:$0xf] %vm342_vm2, %v14634_v0  ;;  %v12321_v13 = vpack.c.bf16 %v2436_v12, %v2435_v11  ;;  %v1983_v15 = vld [vmem:[#allocation10 + $0x70] sm:$0xff]  ;;  %v1984_v19 = vld [vmem:[#allocation10 + $0x78] sm:$0xff] }
  0xb6   : > { %421 = vst.msk [vmem:[#allocation2 + $0x3a] sm:$0xff] %vm339_vm0, %v389_v18  ;;  %422 = vst.msk [vmem:[#allocation2 + $0x4a] sm:$0xff] %vm339_vm0, %v390_v21  ;;  %v11415_v20 = vpack.c.bf16 %v1984_v19, %v1983_v15  ;;  %v2890_v35 = vld [vmem:[#allocation10 + $0xa8] sm:$0xff] }
  0xb7   : > { %423 = vst.msk [vmem:[#allocation2 + $0x52] sm:$0xff] %vm339_vm0, %v391_v22  ;;  %424 = vst.msk [vmem:[#allocation2 + $0x62] sm:$0xff] %vm339_vm0, %v392_v24  ;;  %11420 = vmatprep.subr.bf16.mxu0 %v12321_v13  ;;  %v417_v41 = vld [vmem:[%s12085_s14 + $0xe8] sm:$0xff] }
  0xb8   : > { %425 = vst.msk [vmem:[#allocation2 + $0x6a] sm:$0xff] %vm339_vm0, %v393_v25  ;;  %426 = vst.msk [vmem:[#allocation2 + $0x7a] sm:$0xff] %vm339_vm0, %v394_v26 }
  0xb9   : > { %427 = vst.msk [vmem:[#allocation2 + $0x82] sm:$0xff] %vm339_vm0, %v395_v27  ;;  %428 = vst.msk [vmem:[#allocation2 + $0x92] sm:$0xff] %vm339_vm0, %v396_v28 }
  0xba   : > { %429 = vst.msk [vmem:[#allocation2 + $0x9a] sm:$0xff] %vm339_vm0, %v397_v30  ;;  %430 = vst.msk [vmem:[#allocation2 + $0xaa] sm:$0xff] %vm339_vm0, %v398_v31 }
  0xbb   : > { %v1009_v29 = vld [vmem:[#allocation2 + $0xa] sm:$0xff]  ;;  %431 = vst.msk [vmem:[#allocation2 + $0xb2] sm:$0xff] %vm339_vm0, %v399_v32  ;;  %432 = vst.msk [vmem:[#allocation2 + $0xc2] sm:$0xff] %vm339_vm0, %v400_v33  ;;  %v1011_v45 = vld [vmem:[#allocation2 + $0x22] sm:$0xff] }
  0xbc   : > { %433 = vst.msk [vmem:[#allocation2 + $0xca] sm:$0xff] %vm339_vm0, %v401_v34  ;;  %434 = vst.msk [vmem:[#allocation2 + $0xda] sm:$0xff] %vm339_vm0, %v402_v37  ;;  %10444 = vmatmul.mubr.msk.f32.vlgmr.msra.gmra.mrb[0].mxu1 %vm339_vm0, %v1009_v29  ;;  %v2889_v33 = vld [vmem:[#allocation10 + $0xa0] sm:$0xff] }
  0xbd   : > { %435 = vst.msk [vmem:[#allocation2 + $0xe2] sm:$0xff] %vm339_vm0, %v403_v38  ;;  %436 = vst.msk [vmem:[#allocation2 + $0xf2] sm:$0xff] %vm339_vm0, %v404_v42  ;;  %10446 = vmatprep.mubr.msk.f32.mxu1 %vm339_vm0, %v1010_v40  ;;  %v12246_v46 = vld [vmem:[#allocation2 + $0x38] sm:$0xff]  ;;  %v12250_v48 = vld [vmem:[#allocation2 + $0x48] sm:$0xff]  ;;  %11414 = vmatpush3.bf16.msra.mxu1 %v11411_v7  ;;  %v12400_v38 = vpack.c.bf16 %v2890_v35, %v2889_v33 }
  0xbe   : > { %437 = vst.msk [vmem:[#allocation2 + $0xfa] sm:$0xff] %vm339_vm0, %v405_v44  ;;  %10394 = vmatmul.mubr.msk.f32.gmra.mrb[4].mxu0 %vm339_vm0, %v12246_v46  ;;  %v12257_v49 = vld [vmem:[#allocation2 + $0x3a] sm:$0xff]  ;;  %v12261_v50 = vld [vmem:[#allocation2 + $0x50] sm:$0xff]  ;;  %v12281_v57 = vld [vmem:[#allocation2 + $0x62] sm:$0xff]  ;;  %11416 = vmatprep.subr.bf16.mxu1 %v11415_v20 }
  0xbf   : > { %10396 = vmatprep.mubr.msk.f32.mxu0 %vm339_vm0, %v12250_v48  ;;  %v12263_v51 = vld [vmem:[#allocation2 + $0x4a] sm:$0xff]  ;;  %v12265_v52 = vld [vmem:[#allocation2 + $0x60] sm:$0xff]  ;;  %v12273_v53 = vld [vmem:[#allocation2 + $0x52] sm:$0xff]  ;;  %438 = vst.msk [vmem:[#allocation2 + $0x10a] sm:$0xff] %vm339_vm0, %v406_v54 }
  0xc0   : > { %10447 = vmatmul.mubr.msk.f32.gmra.mrb[2].mxu1 %vm339_vm0, %v1011_v45  ;;  %14696 = vst [vmem:[#allocation19_spill] sm:$0xff] %v12265_v52  ;;  %v12279_v56 = vld [vmem:[#allocation2 + $0x68] sm:$0xff]  ;;  %439 = vst.msk [vmem:[#allocation2 + $0x112] sm:$0xff] %vm339_vm0, %v407_v55  ;;  %v12286_v59 = vld [vmem:[#allocation2 + $0x78] sm:$0xff] }
  0xc1   : > { %10449 = vmatprep.mubr.msk.f32.mxu1 %vm339_vm0, %v12248_v47  ;;  %14697 = vst [vmem:[#allocation20_spill] sm:$0xff] %v12279_v56  ;;  %14698 = vst [vmem:[#allocation21_spill] sm:$0xff] %v12286_v59  ;;  %v12288_v60 = vld [vmem:[#allocation2 + $0x6a] sm:$0xff]  ;;  %v12292_v62 = vld [vmem:[#allocation2 + $0x80] sm:$0xff]  ;;  %11418 = vmatpush3.bf16.msra.mxu1 %v11415_v20 }
  0xc2   : > { %10397 = vmatmul.mubr.msk.f32.gmra.mrb[6].mxu0 %vm339_vm0, %v12261_v50  ;;  %440 = vst.msk [vmem:[#allocation2 + $0x122] sm:$0xff] %vm339_vm0, %v408_v58  ;;  %14699 = vst [vmem:[#allocation22_spill] sm:$0xff] %v12292_v62  ;;  %v12309_v6 = vld [vmem:[#allocation2 + $0x7a] sm:$0xff]  ;;  %v12315_v10 = vld [vmem:[#allocation2 + $0x90] sm:$0xff]  ;;  %11428 = vmatprep.subr.bf16.mxu1 %v12400_v38 }
  0xc3   : > { %10399 = vmatprep.mubr.msk.f32.mxu0 %vm339_vm0, %v12265_v52  ;;  %441 = vst.msk [vmem:[#allocation2 + $0x12a] sm:$0xff] %vm339_vm0, %v409_v61  ;;  %442 = vst.msk [vmem:[#allocation2 + $0x13a] sm:$0xff] %vm339_vm0, %v410_v63  ;;  %v12327_v14 = vld [vmem:[#allocation2 + $0x82] sm:$0xff]  ;;  %v12331_v16 = vld [vmem:[#allocation2 + $0x98] sm:$0xff] }
  0xc4   : > { %10450 = vmatmul.mubr.msk.f32.gmra.mrb[4].mxu1 %vm339_vm0, %v12257_v49  ;;  %443 = vst.msk [vmem:[#allocation2 + $0x142] sm:$0xff] %vm339_vm0, %v411_v1  ;;  %444 = vst.msk [vmem:[#allocation2 + $0x152] sm:$0xff] %vm339_vm0, %v412_v4  ;;  %v12333_v17 = vld [vmem:[#allocation2 + $0x92] sm:$0xff]  ;;  %v12335_v18 = vld [vmem:[#allocation2 + $0xa8] sm:$0xff] }
  0xc5   : > { %10452 = vmatprep.mubr.msk.f32.mxu1 %vm339_vm0, %v12263_v51  ;;  %445 = vst.msk [vmem:[#allocation2 + $0x15a] sm:$0xff] %vm339_vm0, %v413_v5  ;;  %14700 = vst [vmem:[#allocation23_spill] sm:$0xff] %v12315_v10  ;;  %v12344_v21 = vld [vmem:[#allocation2 + $0x9a] sm:$0xff]  ;;  %v12348_v22 = vld [vmem:[#allocation2 + $0xb0] sm:$0xff] }
  0xc6   : > { %10400 = vmatmul.mubr.msk.f32.gmra.mrb[8].mxu0 %vm339_vm0, %v12279_v56  ;;  %446 = vst.msk [vmem:[#allocation2 + $0x16a] sm:$0xff] %vm339_vm0, %v414_v8  ;;  %447 = vst.msk [vmem:[#allocation2 + $0x172] sm:$0xff] %vm339_vm0, %v415_v9  ;;  %v12350_v23 = vld [vmem:[#allocation2 + $0xaa] sm:$0xff]  ;;  %v12352_v24 = vld [vmem:[#allocation2 + $0xc0] sm:$0xff] }
  0xc7   : > { %10402 = vmatprep.mubr.msk.f32.mxu0 %vm339_vm0, %v12286_v59  ;;  %14701 = vst [vmem:[#allocation24_spill] sm:$0xff] %v12331_v16  ;;  %14702 = vst [vmem:[#allocation25_spill] sm:$0xff] %v12335_v18  ;;  %v12360_v25 = vld [vmem:[#allocation2 + $0xb2] sm:$0xff]  ;;  %v12364_v26 = vld [vmem:[#allocation2 + $0xc8] sm:$0xff] }
  0xc8   : > { %10453 = vmatmul.mubr.msk.f32.gmra.mrb[6].mxu1 %vm339_vm0, %v12273_v53  ;;  %14703 = vst [vmem:[#allocation26_spill] sm:$0xff] %v12348_v22  ;;  %14704 = vst [vmem:[#allocation27_spill] sm:$0xff] %v12352_v24  ;;  %v12366_v27 = vld [vmem:[#allocation2 + $0xc2] sm:$0xff]  ;;  %v12368_v28 = vld [vmem:[#allocation2 + $0xd8] sm:$0xff] }
  0xc9   : > { %10455 = vmatprep.mubr.msk.f32.mxu1 %vm339_vm0, %v12281_v57  ;;  %14705 = vst [vmem:[#allocation28_spill] sm:$0xff] %v12364_v26  ;;  %14706 = vst [vmem:[#allocation29_spill] sm:$0xff] %v12368_v28  ;;  %v12376_v29 = vld [vmem:[#allocation2 + $0xca] sm:$0xff]  ;;  %v12380_v30 = vld [vmem:[#allocation2 + $0xe0] sm:$0xff] }
  0xca   : > { %10403 = vmatmul.mubr.msk.f32.gmra.mrb[10].mxu0 %vm339_vm0, %v12292_v62  ;;  %14707 = vst [vmem:[#allocation30_spill] sm:$0xff] %v12380_v30  ;;  %v12382_v31 = vld [vmem:[#allocation2 + $0xda] sm:$0xff]  ;;  %v12384_v32 = vld [vmem:[#allocation2 + $0xf0] sm:$0xff]  ;;  %v12392_v34 = vld [vmem:[#allocation2 + $0xe2] sm:$0xff] }
  0xcb   : > { %10405 = vmatprep.mubr.msk.f32.mxu0 %vm339_vm0, %v12315_v10  ;;  %14708 = vst [vmem:[#allocation31_spill] sm:$0xff] %v12384_v32  ;;  %v12396_v36 = vld [vmem:[#allocation2 + $0xf8] sm:$0xff]  ;;  %v12402_v39 = vld [vmem:[#allocation2 + $0x108] sm:$0xff]  ;;  %v416_v40 = vld [vmem:[%s12085_s14 + $0xe0] sm:$0xff] }
  0xcc   : > { %10456 = vmatmul.mubr.msk.f32.gmra.mrb[8].mxu1 %vm339_vm0, %v12288_v60  ;;  %14709 = vst [vmem:[#allocation32_spill] sm:$0xff] %v12396_v36  ;;  %v12398_v37 = vld [vmem:[#allocation2 + $0xf2] sm:$0xff]  ;;  %14710 = vst [vmem:[#allocation33_spill] sm:$0xff] %v12402_v39  ;;  %v418_v42 = vld [vmem:[%s12085_s14 + $0xf0] sm:$0xff] }
  0xcd   : > { %10458 = vmatprep.mubr.msk.f32.mxu1 %vm339_vm0, %v12309_v6  ;;  %448 = vst.msk [vmem:[#allocation2 + $0x182] sm:$0xff] %vm339_vm0, %v416_v40  ;;  %449 = vst.msk [vmem:[#allocation2 + $0x18a] sm:$0xff] %vm339_vm0, %v417_v41  ;;  %v419_v44 = vld [vmem:[%s12085_s14 + $0xf8] sm:$0xff]  ;;  %v12417_v45 = vld [vmem:[#allocation2 + $0xfa] sm:$0xff] }
  0xce   : > { %10406 = vmatmul.mubr.msk.f32.gmra.mrb[12].mxu0 %vm339_vm0, %v12331_v16  ;;  %450 = vst.msk [vmem:[#allocation2 + $0x19a] sm:$0xff] %vm339_vm0, %v418_v42  ;;  %451 = vst.msk [vmem:[#allocation2 + $0x1a2] sm:$0xff] %vm339_vm0, %v419_v44  ;;  %v12423_v54 = vld [vmem:[#allocation2 + $0x110] sm:$0xff]  ;;  %v12427_v58 = vld [vmem:[#allocation2 + $0x120] sm:$0xff] }
  0xcf   : > { %10408 = vmatprep.mubr.msk.f32.mxu0 %vm339_vm0, %v12335_v18  ;;  %14711 = vst [vmem:[#allocation34_spill] sm:$0xff] %v12423_v54  ;;  %v12425_v55 = vld [vmem:[#allocation2 + $0x10a] sm:$0xff]  ;;  %14712 = vst [vmem:[#allocation35_spill] sm:$0xff] %v12427_v58  ;;  %v12435_v61 = vld [vmem:[#allocation2 + $0x112] sm:$0xff] }
  0xd0   : > { %10459 = vmatmul.mubr.msk.f32.gmra.mrb[10].mxu1 %vm339_vm0, %v12327_v14  ;;  %v12439_v63 = vld [vmem:[#allocation2 + $0x128] sm:$0xff]  ;;  %v12443_v2 = vld [vmem:[#allocation2 + $0x138] sm:$0xff]  ;;  %v12455_v4 = vld [vmem:[#allocation2 + $0x140] sm:$0xff] }
  0xd1   : > { %10461 = vmatprep.mubr.msk.f32.mxu1 %vm339_vm0, %v12333_v17  ;;  %14713 = vst [vmem:[#allocation36_spill] sm:$0xff] %v12439_v63  ;;  %v12441_v1 = vld [vmem:[#allocation2 + $0x122] sm:$0xff]  ;;  %14714 = vst [vmem:[#allocation37_spill] sm:$0xff] %v12443_v2  ;;  %v12451_v3 = vld [vmem:[#allocation2 + $0x12a] sm:$0xff] }
  0xd2   : > { %10409 = vmatmul.mubr.msk.f32.gmra.mrb[14].mxu0 %vm339_vm0, %v12348_v22  ;;  %v12457_v5 = vld [vmem:[#allocation2 + $0x13a] sm:$0xff]  ;;  %v12459_v7 = vld [vmem:[#allocation2 + $0x150] sm:$0xff]  ;;  %v12467_v8 = vld [vmem:[#allocation2 + $0x142] sm:$0xff] }
  0xd3   : > { %10411 = vmatprep.mubr.msk.f32.mxu0 %vm339_vm0, %v12352_v24  ;;  %14715 = vst [vmem:[#allocation38_spill] sm:$0xff] %v12457_v5  ;;  %14716 = vst [vmem:[#allocation39_spill] sm:$0xff] %v12467_v8  ;;  %v12471_v9 = vld [vmem:[#allocation2 + $0x158] sm:$0xff]  ;;  %v12475_v12 = vld [vmem:[#allocation2 + $0x168] sm:$0xff] }
  0xd4   : > { %10462 = vmatmul.mubr.msk.f32.gmra.mrb[12].mxu1 %vm339_vm0, %v12344_v21  ;;  %v12473_v11 = vld [vmem:[#allocation2 + $0x152] sm:$0xff]  ;;  %v12483_v15 = vld [vmem:[#allocation2 + $0x15a] sm:$0xff]  ;;  %v12489_v20 = vld [vmem:[#allocation2 + $0x16a] sm:$0xff] }
  0xd5   : > { %10464 = vmatprep.mubr.msk.f32.mxu1 %vm339_vm0, %v12350_v23  ;;  %14717 = vst [vmem:[#allocation40_spill] sm:$0xff] %v12473_v11  ;;  %14718 = vst [vmem:[#allocation41_spill] sm:$0xff] %v12483_v15  ;;  %v12487_v19 = vld [vmem:[#allocation2 + $0x170] sm:$0xff]  ;;  %v1462_v33 = vld [vmem:[#allocation2 + $0x4] sm:$0xff] }
  0xd6   : > { %10412 = vmatmul.mubr.msk.f32.gmra.mrb[16].mxu0 %vm339_vm0, %v12364_v26  ;;  %14719 = vst [vmem:[#allocation42_spill] sm:$0xff] %v12489_v20  ;;  %v2437_v35 = vld [vmem:[#allocation10 + $0x90] sm:$0xff]  ;;  %v2438_v40 = vld [vmem:[#allocation10 + $0x98] sm:$0xff]  ;;  %v12497_v41 = vld [vmem:[#allocation2 + $0x172] sm:$0xff] }
  0xd7   : > { %10414 = vmatprep.mubr.msk.f32.mxu0 %vm339_vm0, %v12368_v28  ;;  %v1463_v42 = vld [vmem:[#allocation2 + $0xc] sm:$0xff]  ;;  %v1464_v44 = vld [vmem:[#allocation2 + $0x1c] sm:$0xff]  ;;  %v11423_v0 = vpack.c.bf16 %v2438_v40, %v2437_v35 }
  0xd8   : > { %10465 = vmatmul.mubr.msk.f32.gmra.mrb[14].mxu1 %vm339_vm0, %v12360_v25 }
  0xd9   : > { %10467 = vmatprep.mubr.msk.f32.mxu1 %vm339_vm0, %v12366_v27 }
  0xda   : > { %10415 = vmatmul.mubr.msk.f32.gmra.mrb[18].mxu0 %vm339_vm0, %v12380_v30 }
  0xdb   : > { %10417 = vmatprep.mubr.msk.f32.mxu0 %vm339_vm0, %v12384_v32 }
  0xdc   : > { %10468 = vmatmul.mubr.msk.f32.gmra.mrb[16].mxu1 %vm339_vm0, %v12376_v29 }
  0xdd   : > { %10470 = vmatprep.mubr.msk.f32.mxu1 %vm339_vm0, %v12382_v31 }
  0xde   : > { %10418 = vmatmul.mubr.msk.f32.gmra.mrb[20].mxu0 %vm339_vm0, %v12396_v36 }
  0xdf   : > { %10420 = vmatprep.mubr.msk.f32.mxu0 %vm339_vm0, %v12402_v39 }
  0xe0   : > { %10471 = vmatmul.mubr.msk.f32.gmra.mrb[18].mxu1 %vm339_vm0, %v12392_v34 }
  0xe1   : > { %10473 = vmatprep.mubr.msk.f32.mxu1 %vm339_vm0, %v12398_v37 }
  0xe2   : > { %10421 = vmatmul.mubr.msk.f32.gmra.mrb[22].mxu0 %vm339_vm0, %v12423_v54 }
  0xe3   : > { %10423 = vmatprep.mubr.msk.f32.mxu0 %vm339_vm0, %v12427_v58 }
  0xe4   : > { %10474 = vmatmul.mubr.msk.f32.gmra.mrb[20].mxu1 %vm339_vm0, %v12417_v45 }
  0xe5   : > { %10476 = vmatprep.mubr.msk.f32.mxu1 %vm339_vm0, %v12425_v55 }
  0xe6   : > { %10424 = vmatmul.mubr.msk.f32.gmra.mrb[24].mxu0 %vm339_vm0, %v12439_v63 }
  0xe7   : > { %10426 = vmatprep.mubr.msk.f32.mxu0 %vm339_vm0, %v12443_v2 }
  0xe8   : > { %10477 = vmatmul.mubr.msk.f32.gmra.mrb[22].mxu1 %vm339_vm0, %v12435_v61 }
  0xe9   : > { %10479 = vmatprep.mubr.msk.f32.mxu1 %vm339_vm0, %v12441_v1 }
  0xea   : > { %10427 = vmatmul.mubr.msk.f32.gmra.mrb[26].mxu0 %vm339_vm0, %v12455_v4 }
  0xeb   : > { %10429 = vmatprep.mubr.msk.f32.mxu0 %vm339_vm0, %v12459_v7 }
  0xec   : > { %10480 = vmatmul.mubr.msk.f32.gmra.mrb[24].mxu1 %vm339_vm0, %v12451_v3 }
  0xed   : > { %10482 = vmatprep.mubr.msk.f32.mxu1 %vm339_vm0, %v12457_v5  ;;  %v2892_v5 = vld [vmem:[#allocation10 + $0xb8] sm:$0xff] }
  0xee   : > { %10430 = vmatmul.mubr.msk.f32.gmra.mrb[28].mxu0 %vm339_vm0, %v12471_v9 }
  0xef   : > { %10432 = vmatprep.mubr.msk.f32.mxu0 %vm339_vm0, %v12475_v12 }
  0xf0   : > { %10483 = vmatmul.mubr.msk.f32.gmra.mrb[26].mxu1 %vm339_vm0, %v12467_v8  ;;  %v2891_v8 = vld [vmem:[#allocation10 + $0xb0] sm:$0xff] }
  0xf1   : > { %10485 = vmatprep.mubr.msk.f32.mxu1 %vm339_vm0, %v12473_v11  ;;  %v3344_v11 = vld [vmem:[#allocation10 + $0xc0] sm:$0xff]  ;;  %v11431_v40 = vpack.c.bf16 %v2892_v5, %v2891_v8 }
  0xf2   : > { %10433 = vmatmul.mubr.msk.f32.gmra.mrb[30].mxu0 %vm339_vm0, %v12487_v19  ;;  %v452_v8 = vld [vmem:[%s12077_s12] sm:$0xff] }
  0xf3   : > { %10499 = vmatprep.mubr.msk.f32.mxu0 %vm339_vm0, %v1462_v33  ;;  %v1465_v33 = vld [vmem:[#allocation2 + $0x24] sm:$0xff] }
  0xf4   : > { %10486 = vmatmul.mubr.msk.f32.gmra.mrb[28].mxu1 %vm339_vm0, %v12483_v15  ;;  %v3345_v15 = vld [vmem:[#allocation10 + $0xc8] sm:$0xff] }
  0xf5   : > { %10488 = vmatprep.mubr.msk.f32.mxu1 %vm339_vm0, %v12489_v20  ;;  %v12507_v20 = vld [vmem:[#allocation2 + $0x34] sm:$0xff]  ;;  %v12509_v35 = vpack.c.bf16 %v3345_v15, %v3344_v11  ;;  %v12520_v11 = vld [vmem:[#allocation2 + $0x4c] sm:$0xff] }
  0xf6   : > { %10500 = vmatmul.mubr.msk.f32.vlgmr.msra.gmra.mrb[32].mxu0 %vm339_vm0, %v1463_v42  ;;  %v12518_v42 = vld [vmem:[#allocation2 + $0x3c] sm:$0xff] }
  0xf7   : > { %11422 = vmatpush3.bf16.msra.mxu0 %v12321_v13  ;;  %10502 = vmatprep.mubr.msk.f32.mxu0 %vm339_vm0, %v1464_v44  ;;  %v3799_v13 = vld [vmem:[#allocation10 + $0xe8] sm:$0xff]  ;;  %v12557_v44 = vld [vmem:[#allocation2 + $0x6c] sm:$0xff] }
  0xf8   : > { %10489 = vmatmul.mubr.msk.f32.gmra.mrb[30].mxu1 %vm339_vm0, %v12497_v41  ;;  %11424 = vmatprep.subr.bf16.mxu0 %v11423_v0 }
  0xf9   : > { %10555 = vmatprep.mubr.msk.f32.mxu1 %vm339_vm0, %v12236_v43  ;;  %v3798_v43 = vld [vmem:[#allocation10 + $0xe0] sm:$0xff] }
  0xfa   : > { %10503 = vmatmul.mubr.msk.f32.gmra.mrb[34].mxu0 %vm339_vm0, %v1465_v33  ;;  %v455_v33 = vld [vmem:[%s12077_s12 + $0x18] sm:$0xff] }
  0xfb   : > { %10505 = vmatprep.mubr.msk.f32.mxu0 %vm339_vm0, %v12507_v20  ;;  %11426 = vmatpush3.bf16.msra.mxu0 %v11423_v0  ;;  %v12534_v0 = vld [vmem:[#allocation2 + $0x54] sm:$0xff] }
  0xfc   : > { %10556 = vmatmul.mubr.msk.f32.vlgmr.msra.gmra.mrb[32].mxu1 %vm339_vm0, %v12246_v46  ;;  %11436 = vmatprep.subr.bf16.mxu0 %v12509_v35  ;;  %v12526_v46 = vpack.c.bf16 %v3799_v13, %v3798_v43  ;;  %v454_v13 = vld [vmem:[%s12077_s12 + $0x10] sm:$0xff] }
  0xfd   : > { %10558 = vmatprep.mubr.msk.f32.mxu1 %vm339_vm0, %v12250_v48  ;;  %11430 = vmatpush3.bf16.msra.mxu1 %v12400_v38  ;;  %v453_v48 = vld [vmem:[%s12077_s12 + $0x8] sm:$0xff]  ;;  %v12542_v38 = vld [vmem:[#allocation2 + $0x64] sm:$0xff] }
  0xfe   : > { %11432 = vmatprep.subr.bf16.mxu1 %v11431_v40  ;;  %10506 = vmatmul.mubr.msk.f32.gmra.mrb[36].mxu0 %vm339_vm0, %v12518_v42 }
  0xff   : > { %10508 = vmatprep.mubr.msk.f32.mxu0 %vm339_vm0, %v12520_v11 }
 0x100   : > { %10559 = vmatmul.mubr.msk.f32.gmra.mrb[34].mxu1 %vm339_vm0, %v12261_v50  ;;  %v12540_v50 = vld [vmem:[%s14623_s3] ss:$0 sm:$0xff] }
 0x101   : > { %10561 = vmatprep.mubr.msk.f32.mxu1 %vm339_vm0, %v12265_v52  ;;  %11434 = vmatpush3.bf16.msra.mxu1 %v11431_v40  ;;  %v492_v5 = vadd.f32 %v12540_v50, %v453_v48  ;;  %v491_v15 = vadd.f32 %v12540_v50, %v452_v8  ;;  %v12561_v40 = vld [vmem:[#allocation2 + $0x7c] sm:$0xff]  ;;  %v494_v43 = vadd.f32 %v12540_v50, %v455_v33 }
 0x102   : > { %11444 = vmatprep.subr.bf16.mxu1 %v12526_v46  ;;  %10509 = vmatmul.mubr.msk.f32.gmra.mrb[38].mxu0 %vm339_vm0, %v12534_v0  ;;  %v493_v48 = vadd.f32 %v12540_v50, %v454_v13  ;;  %v457_v8 = vld [vmem:[%s12077_s12 + $0x28] sm:$0xff]  ;;  %v456_v13 = vld [vmem:[%s12077_s12 + $0x20] sm:$0xff]  ;;  %v12774_v52 = vld [vmem:[#allocation2 + $0x1a0] sm:$0xff] }
 0x103   : > { %524 = vst.msk [vmem:[#allocation4 + $0x8] sm:$0xff] %vm339_vm0, %v492_v5  ;;  %10511 = vmatprep.mubr.msk.f32.mxu0 %vm339_vm0, %v12542_v38  ;;  %523 = vst.msk [vmem:[#allocation4] sm:$0xff] %vm339_vm0, %v491_v15  ;;  %v12575_v5 = vld [vmem:[#allocation2 + $0x84] sm:$0xff]  ;;  %v12579_v15 = vld [vmem:[#allocation2 + $0x94] sm:$0xff]  ;;  %v496_v33 = vadd.f32 %v12540_v50, %v457_v8 }
 0x104   : > { %10562 = vmatmul.mubr.msk.f32.gmra.mrb[36].mxu1 %vm339_vm0, %v12279_v56  ;;  %526 = vst.msk [vmem:[#allocation4 + $0x18] sm:$0xff] %vm339_vm0, %v494_v43  ;;  %525 = vst.msk [vmem:[#allocation4 + $0x10] sm:$0xff] %vm339_vm0, %v493_v48  ;;  %v495_v43 = vadd.f32 %v12540_v50, %v456_v13  ;;  %v12593_v48 = vld [vmem:[#allocation2 + $0x9c] sm:$0xff]  ;;  %v459_v8 = vld [vmem:[%s12077_s12 + $0x38] sm:$0xff] }
 0x105   : > { %10564 = vmatprep.mubr.msk.f32.mxu1 %vm339_vm0, %v12286_v59  ;;  %528 = vst.msk [vmem:[#allocation4 + $0x28] sm:$0xff] %vm339_vm0, %v496_v33  ;;  %v498_v13 = vadd.f32 %v12540_v50, %v459_v8  ;;  %v461_v8 = vld [vmem:[%s12077_s12 + $0x48] sm:$0xff]  ;;  %v476_v59 = vld [vmem:[%s12077_s12 + $0xc0] sm:$0xff] }
 0x106   : > { %10512 = vmatmul.mubr.msk.f32.gmra.mrb[40].mxu0 %vm339_vm0, %v12557_v44  ;;  %527 = vst.msk [vmem:[#allocation4 + $0x20] sm:$0xff] %vm339_vm0, %v495_v43  ;;  %v12611_v43 = vld [vmem:[#allocation2 + $0xb4] sm:$0xff]  ;;  %v515_v56 = vadd.f32 %v12540_v50, %v476_v59 }
 0x107   : > { %10514 = vmatprep.mubr.msk.f32.mxu0 %vm339_vm0, %v12561_v40  ;;  %530 = vst.msk [vmem:[#allocation4 + $0x38] sm:$0xff] %vm339_vm0, %v498_v13 }
 0x108   : > { %10565 = vmatmul.mubr.msk.f32.gmra.mrb[38].mxu1 %vm339_vm0, %v12292_v62  ;;  %v474_v62 = vld [vmem:[%s12077_s12 + $0xb0] sm:$0xff]  ;;  %547 = vst.msk [vmem:[#allocation4 + $0xc0] sm:$0xff] %vm339_vm0, %v515_v56  ;;  %v3801_v56 = vld [vmem:[#allocation10 + $0xf8] sm:$0xff] }
 0x109   : > { %10567 = vmatprep.mubr.msk.f32.mxu1 %vm339_vm0, %v12315_v10  ;;  %v458_v10 = vld [vmem:[%s12077_s12 + $0x30] sm:$0xff] }
 0x10a   : > { %10515 = vmatmul.mubr.msk.f32.gmra.mrb[42].mxu0 %vm339_vm0, %v12575_v5  ;;  %v497_v33 = vadd.f32 %v12540_v50, %v458_v10  ;;  %v500_v10 = vadd.f32 %v12540_v50, %v461_v8  ;;  %v463_v8 = vld [vmem:[%s12077_s12 + $0x58] sm:$0xff] }
 0x10b   : > { %10517 = vmatprep.mubr.msk.f32.mxu0 %vm339_vm0, %v12579_v15 }
 0x10c   : > { %10568 = vmatmul.mubr.msk.f32.gmra.mrb[40].mxu1 %vm339_vm0, %v12331_v16  ;;  %v12597_v16 = vld [vmem:[#allocation2 + $0xac] sm:$0xff]  ;;  %529 = vst.msk [vmem:[#allocation4 + $0x30] sm:$0xff] %vm339_vm0, %v497_v33  ;;  %532 = vst.msk [vmem:[#allocation4 + $0x48] sm:$0xff] %vm339_vm0, %v500_v10 }
 0x10d   : > { %10570 = vmatprep.mubr.msk.f32.mxu1 %vm339_vm0, %v12335_v18  ;;  %v460_v18 = vld [vmem:[%s12077_s12 + $0x40] sm:$0xff] }
 0x10e   : > { %10518 = vmatmul.mubr.msk.f32.gmra.mrb[44].mxu0 %vm339_vm0, %v12593_v48  ;;  %v499_v13 = vadd.f32 %v12540_v50, %v460_v18  ;;  %v12629_v33 = vld [vmem:[#allocation2 + $0xcc] sm:$0xff]  ;;  %v502_v18 = vadd.f32 %v12540_v50, %v463_v8  ;;  %v465_v8 = vld [vmem:[%s12077_s12 + $0x68] sm:$0xff] }
 0x10f   : > { %10520 = vmatprep.mubr.msk.f32.mxu0 %vm339_vm0, %v12597_v16 }
 0x110   : > { %10571 = vmatmul.mubr.msk.f32.gmra.mrb[42].mxu1 %vm339_vm0, %v12348_v22  ;;  %v12615_v22 = vld [vmem:[#allocation2 + $0xc4] sm:$0xff]  ;;  %531 = vst.msk [vmem:[#allocation4 + $0x40] sm:$0xff] %vm339_vm0, %v499_v13  ;;  %534 = vst.msk [vmem:[#allocation4 + $0x58] sm:$0xff] %vm339_vm0, %v502_v18 }
 0x111   : > { %10573 = vmatprep.mubr.msk.f32.mxu1 %vm339_vm0, %v12352_v24  ;;  %v462_v24 = vld [vmem:[%s12077_s12 + $0x50] sm:$0xff] }
 0x112   : > { %10521 = vmatmul.mubr.msk.f32.gmra.mrb[46].mxu0 %vm339_vm0, %v12611_v43  ;;  %v501_v10 = vadd.f32 %v12540_v50, %v462_v24  ;;  %v12647_v13 = vld [vmem:[#allocation2 + $0xe4] sm:$0xff]  ;;  %v504_v24 = vadd.f32 %v12540_v50, %v465_v8 }
 0x113   : > { %10523 = vmatprep.mubr.msk.f32.mxu0 %vm339_vm0, %v12615_v22  ;;  %v467_v8 = vld [vmem:[%s12077_s12 + $0x78] sm:$0xff] }
 0x114   : > { %10574 = vmatmul.mubr.msk.f32.gmra.mrb[44].mxu1 %vm339_vm0, %v12364_v26  ;;  %v12633_v26 = vld [vmem:[#allocation2 + $0xdc] sm:$0xff]  ;;  %533 = vst.msk [vmem:[#allocation4 + $0x50] sm:$0xff] %vm339_vm0, %v501_v10  ;;  %536 = vst.msk [vmem:[#allocation4 + $0x68] sm:$0xff] %vm339_vm0, %v504_v24 }
 0x115   : > { %10576 = vmatprep.mubr.msk.f32.mxu1 %vm339_vm0, %v12368_v28  ;;  %v464_v28 = vld [vmem:[%s12077_s12 + $0x60] sm:$0xff]  ;;  %v12665_v10 = vld [vmem:[#allocation2 + $0xfc] sm:$0xff] }
 0x116   : > { %10524 = vmatmul.mubr.msk.f32.gmra.mrb[48].mxu0 %vm339_vm0, %v12629_v33  ;;  %v503_v18 = vadd.f32 %v12540_v50, %v464_v28  ;;  %v506_v28 = vadd.f32 %v12540_v50, %v467_v8  ;;  %v469_v8 = vld [vmem:[%s12077_s12 + $0x88] sm:$0xff] }
 0x117   : > { %10526 = vmatprep.mubr.msk.f32.mxu0 %vm339_vm0, %v12633_v26 }
 0x118   : > { %10577 = vmatmul.mubr.msk.f32.gmra.mrb[46].mxu1 %vm339_vm0, %v12380_v30  ;;  %v12651_v30 = vld [vmem:[#allocation2 + $0xf4] sm:$0xff]  ;;  %535 = vst.msk [vmem:[#allocation4 + $0x60] sm:$0xff] %vm339_vm0, %v503_v18  ;;  %538 = vst.msk [vmem:[#allocation4 + $0x78] sm:$0xff] %vm339_vm0, %v506_v28 }
 0x119   : > { %10579 = vmatprep.mubr.msk.f32.mxu1 %vm339_vm0, %v12384_v32  ;;  %v466_v32 = vld [vmem:[%s12077_s12 + $0x70] sm:$0xff]  ;;  %v12683_v18 = vld [vmem:[#allocation2 + $0x114] sm:$0xff] }
 0x11a   : > { %10527 = vmatmul.mubr.msk.f32.gmra.mrb[50].mxu0 %vm339_vm0, %v12647_v13  ;;  %v505_v24 = vadd.f32 %v12540_v50, %v466_v32  ;;  %v508_v32 = vadd.f32 %v12540_v50, %v469_v8  ;;  %v471_v8 = vld [vmem:[%s12077_s12 + $0x98] sm:$0xff] }
 0x11b   : > { %10529 = vmatprep.mubr.msk.f32.mxu0 %vm339_vm0, %v12651_v30 }
 0x11c   : > { %10580 = vmatmul.mubr.msk.f32.gmra.mrb[48].mxu1 %vm339_vm0, %v12396_v36  ;;  %v12669_v36 = vld [vmem:[#allocation2 + $0x10c] sm:$0xff]  ;;  %537 = vst.msk [vmem:[#allocation4 + $0x70] sm:$0xff] %vm339_vm0, %v505_v24  ;;  %540 = vst.msk [vmem:[#allocation4 + $0x88] sm:$0xff] %vm339_vm0, %v508_v32 }
 0x11d   : > { %10582 = vmatprep.mubr.msk.f32.mxu1 %vm339_vm0, %v12402_v39  ;;  %v468_v39 = vld [vmem:[%s12077_s12 + $0x80] sm:$0xff] }
 0x11e   : > { %10530 = vmatmul.mubr.msk.f32.gmra.mrb[52].mxu0 %vm339_vm0, %v12665_v10  ;;  %v507_v28 = vadd.f32 %v12540_v50, %v468_v39  ;;  %v12701_v24 = vld [vmem:[#allocation2 + $0x12c] sm:$0xff]  ;;  %v510_v39 = vadd.f32 %v12540_v50, %v471_v8  ;;  %v473_v8 = vld [vmem:[%s12077_s12 + $0xa8] sm:$0xff] }
 0x11f   : > { %10532 = vmatprep.mubr.msk.f32.mxu0 %vm339_vm0, %v12669_v36 }
 0x120   : > { %10583 = vmatmul.mubr.msk.f32.gmra.mrb[50].mxu1 %vm339_vm0, %v12423_v54  ;;  %v12687_v54 = vld [vmem:[#allocation2 + $0x124] sm:$0xff]  ;;  %539 = vst.msk [vmem:[#allocation4 + $0x80] sm:$0xff] %vm339_vm0, %v507_v28  ;;  %542 = vst.msk [vmem:[#allocation4 + $0x98] sm:$0xff] %vm339_vm0, %v510_v39  ;;  %v12737_v39 = vld [vmem:[#allocation2 + $0x15c] sm:$0xff] }
 0x121   : > { %10585 = vmatprep.mubr.msk.f32.mxu1 %vm339_vm0, %v12427_v58  ;;  %v470_v58 = vld [vmem:[%s12077_s12 + $0x90] sm:$0xff] }
 0x122   : > { %10533 = vmatmul.mubr.msk.f32.gmra.mrb[54].mxu0 %vm339_vm0, %v12683_v18  ;;  %v509_v32 = vadd.f32 %v12540_v50, %v470_v58  ;;  %v12719_v28 = vld [vmem:[#allocation2 + $0x144] sm:$0xff]  ;;  %v512_v58 = vadd.f32 %v12540_v50, %v473_v8 }
 0x123   : > { %10535 = vmatprep.mubr.msk.f32.mxu0 %vm339_vm0, %v12687_v54 }
 0x124   : > { %10586 = vmatmul.mubr.msk.f32.gmra.mrb[52].mxu1 %vm339_vm0, %v12439_v63  ;;  %v12705_v63 = vld [vmem:[#allocation2 + $0x13c] sm:$0xff]  ;;  %541 = vst.msk [vmem:[#allocation4 + $0x90] sm:$0xff] %vm339_vm0, %v509_v32  ;;  %544 = vst.msk [vmem:[#allocation4 + $0xa8] sm:$0xff] %vm339_vm0, %v512_v58  ;;  %v12754_v58 = vld [vmem:[#allocation2 + $0x188] sm:$0xff] }
 0x125   : > { %10588 = vmatprep.mubr.msk.f32.mxu1 %vm339_vm0, %v12443_v2  ;;  %v472_v2 = vld [vmem:[%s12077_s12 + $0xa0] sm:$0xff]  ;;  %v12739_v32 = vld [vmem:[#allocation2 + $0x180] sm:$0xff]  ;;  %14722 = vst [vmem:[#allocation45_spill] sm:$0xff] %v12754_v58 }
 0x126   : > { %10536 = vmatmul.mubr.msk.f32.gmra.mrb[56].mxu0 %vm339_vm0, %v12701_v24  ;;  %14720 = vst [vmem:[#allocation43_spill] sm:$0xff] %v12739_v32 }
 0x127   : > { %10538 = vmatprep.mubr.msk.f32.mxu0 %vm339_vm0, %v12705_v63 }
 0x128   : > { %10589 = vmatmul.mubr.msk.f32.gmra.mrb[54].mxu1 %vm339_vm0, %v12455_v4  ;;  %v12723_v4 = vld [vmem:[#allocation2 + $0x154] sm:$0xff] }
 0x129   : > { %10591 = vmatprep.mubr.msk.f32.mxu1 %vm339_vm0, %v12459_v7  ;;  %v511_v7 = vadd.f32 %v12540_v50, %v472_v2  ;;  %v12743_v2 = vld [vmem:[#allocation2 + $0x16c] sm:$0xff] }
 0x12a   : > { %10539 = vmatmul.mubr.msk.f32.gmra.mrb[58].mxu0 %vm339_vm0, %v12719_v28  ;;  %14721 = vst [vmem:[#allocation44_spill] sm:$0xff] %v12743_v2 }
 0x12b   : > { %10541 = vmatprep.mubr.msk.f32.mxu0 %vm339_vm0, %v12723_v4  ;;  %543 = vst.msk [vmem:[#allocation4 + $0xa0] sm:$0xff] %vm339_vm0, %v511_v7  ;;  %v12759_v7 = vld [vmem:[#allocation2 + $0x174] sm:$0xff] }
 0x12c   : > { %10592 = vmatmul.mubr.msk.f32.gmra.mrb[56].mxu1 %vm339_vm0, %v12471_v9  ;;  %v475_v9 = vld [vmem:[%s12077_s12 + $0xb8] sm:$0xff]  ;;  %14723 = vst [vmem:[#allocation46_spill] sm:$0xff] %v12759_v7 }
 0x12d   : > { %10594 = vmatprep.mubr.msk.f32.mxu1 %vm339_vm0, %v12475_v12  ;;  %v514_v8 = vadd.f32 %v12540_v50, %v475_v9  ;;  %v513_v12 = vadd.f32 %v12540_v50, %v474_v62  ;;  %v12761_v9 = vld [vmem:[#allocation2 + $0x198] sm:$0xff] }
 0x12e   : > { %10542 = vmatmul.mubr.msk.f32.gmra.mrb[60].mxu0 %vm339_vm0, %v12737_v39  ;;  %14724 = vst [vmem:[#allocation47_spill] sm:$0xff] %v12761_v9  ;;  %v477_v62 = vld [vmem:[%s12077_s12 + $0xc8] sm:$0xff] }
 0x12f   : > { %546 = vst.msk [vmem:[#allocation4 + $0xb8] sm:$0xff] %vm339_vm0, %v514_v8  ;;  %10544 = vmatprep.mubr.msk.f32.mxu0 %vm339_vm0, %v12743_v2  ;;  %545 = vst.msk [vmem:[#allocation4 + $0xb0] sm:$0xff] %vm339_vm0, %v513_v12  ;;  %v3347_v8 = vld [vmem:[#allocation10 + $0xd8] sm:$0xff] }
 0x130   : > { %10595 = vmatmul.mubr.msk.f32.gmra.mrb[58].mxu1 %vm339_vm0, %v12487_v19  ;;  %v516_v19 = vadd.f32 %v12540_v50, %v477_v62  ;;  %v479_v12 = vld [vmem:[%s12077_s12 + $0xd8] sm:$0xff] }
 0x131   : > { %10597 = vmatprep.mubr.msk.f32.mxu1 %vm339_vm0, %v12739_v32  ;;  %v3346_v32 = vld [vmem:[#allocation10 + $0xd0] sm:$0xff]  ;;  %v518_v59 = vadd.f32 %v12540_v50, %v479_v12  ;;  %v14745_v12 = vld [vmem:[#allocation32_spill] sm:$0xff] }
 0x132   : > { %10545 = vmatmul.mubr.msk.f32.gmra.mrb[62].mxu0 %vm339_vm0, %v12759_v7  ;;  %548 = vst.msk [vmem:[#allocation4 + $0xc8] sm:$0xff] %vm339_vm0, %v516_v19  ;;  %v11439_v62 = vpack.c.bf16 %v3347_v8, %v3346_v32  ;;  %v4253_v7 = vld [vmem:[#allocation10 + $0x108] sm:$0xff] }
 0x133   : > { %10611 = vmatprep.mubr.msk.f32.mxu0 %vm339_vm0, %v12248_v47  ;;  %v3800_v47 = vld [vmem:[#allocation10 + $0xf0] sm:$0xff]  ;;  %550 = vst.msk [vmem:[#allocation4 + $0xd8] sm:$0xff] %vm339_vm0, %v518_v59  ;;  %v481_v32 = vld [vmem:[%s12077_s12 + $0xe8] sm:$0xff] }
 0x134   : > { %10598 = vmatmul.mubr.msk.f32.gmra.mrb[60].mxu1 %vm339_vm0, %v12754_v58  ;;  %v478_v58 = vld [vmem:[%s12077_s12 + $0xd0] sm:$0xff]  ;;  %v11447_v19 = vpack.c.bf16 %v3801_v56, %v3800_v47  ;;  %v3747_v47 = vld [vmem:[#allocation2 + $0x10a] sm:$0xff] }
 0x135   : > { %10600 = vmatprep.mubr.msk.f32.mxu1 %vm339_vm0, %v12761_v9  ;;  %v4252_v9 = vld [vmem:[#allocation10 + $0x100] sm:$0xff]  ;;  %v517_v2 = vadd.f32 %v12540_v50, %v478_v58  ;;  %v14746_v59 = vld [vmem:[#allocation33_spill] sm:$0xff] }
 0x136   : > { %10612 = vmatmul.mubr.msk.f32.vlgmr.msra.gmra.mrb[64].mxu0 %vm339_vm0, %v12257_v49  ;;  %v12796_v58 = vpack.c.bf16 %v4253_v7, %v4252_v9  ;;  %v520_v49 = vadd.f32 %v12540_v50, %v481_v32  ;;  %v591_v56 = vld [vmem:[#allocation4 + $0x20] sm:$0xff] }
 0x137   : > { %11438 = vmatpush3.bf16.msra.mxu0 %v12509_v35  ;;  %10614 = vmatprep.mubr.msk.f32.mxu0 %vm339_vm0, %v12263_v51  ;;  %549 = vst.msk [vmem:[#allocation4 + $0xd0] sm:$0xff] %vm339_vm0, %v517_v2  ;;  %v483_v51 = vld [vmem:[%s12077_s12 + $0xf8] sm:$0xff]  ;;  %v482_v2 = vld [vmem:[%s12077_s12 + $0xf0] sm:$0xff] }
 0x138   : > { %10601 = vmatmul.mubr.msk.f32.gmra.mrb[62].mxu1 %vm339_vm0, %v12774_v52  ;;  %11440 = vmatprep.subr.bf16.mxu0 %v11439_v62  ;;  %552 = vst.msk [vmem:[#allocation4 + $0xe8] sm:$0xff] %vm339_vm0, %v520_v49 }
 0x139   : > { %10667 = vmatprep.mubr.msk.f32.mxu1 %vm339_vm0, %v12507_v20  ;;  %v480_v20 = vld [vmem:[%s12077_s12 + $0xe0] sm:$0xff]  ;;  %s11730_s12 = scalar_lea.vmem %s11729_s18, 8192 }
 0x13a   : > { %v519_v35 = vadd.f32 %v12540_v50, %v480_v20  ;;  %10615 = vmatmul.mubr.msk.f32.gmra.mrb[66].mxu0 %vm339_vm0, %v12273_v53  ;;  %v521_v53 = vadd.f32 %v12540_v50, %v482_v2  ;;  %v14748_v2 = vld [vmem:[#allocation35_spill] sm:$0xff]  ;;  %p11732_p5 = scmp.lt.s32.totalorder %s11730_s12, %s11724_s0 }
 0x13b   : > { %10617 = vmatprep.mubr.msk.f32.mxu0 %vm339_vm0, %v12281_v57  ;;  %11442 = vmatpush3.bf16.msra.mxu0 %v11439_v62  ;;  %v592_v62 = vld [vmem:[#allocation4 + $0x28] sm:$0xff] }
 0x13c   : > { %10668 = vmatmul.mubr.msk.f32.vlgmr.msra.gmra.mrb[64].mxu1 %vm339_vm0, %v12518_v42  ;;  %551 = vst.msk [vmem:[#allocation4 + $0xe0] sm:$0xff] %vm339_vm0, %v519_v35  ;;  %11452 = vmatprep.subr.bf16.mxu0 %v12796_v58  ;;  %v522_v42 = vadd.f32 %v12540_v50, %v483_v51  ;;  %553 = vst.msk [vmem:[#allocation4 + $0xf0] sm:$0xff] %vm339_vm0, %v521_v53  ;;  %v4255_v50 = vld [vmem:[#allocation10 + $0x118] sm:$0xff]  ;;  %p11733_p3 = por %p11732_p5, %p11731_p4 }
 0x13d   : > { %10670 = vmatprep.mubr.msk.f32.mxu1 %vm339_vm0, %v12520_v11  ;;  %11446 = vmatpush3.bf16.msra.mxu1 %v12526_v46  ;;  %v12928_v11 = vld [vmem:[#allocation2 + $0x1a2] sm:$0xff] }
 0x13e   : > { %11448 = vmatprep.subr.bf16.mxu1 %v11447_v19  ;;  %10618 = vmatmul.mubr.msk.f32.gmra.mrb[68].mxu0 %vm339_vm0, %v12288_v60  ;;  %554 = vst.msk [vmem:[#allocation4 + $0xf8] sm:$0xff] %vm339_vm0, %v522_v42  ;;  %v2854_v46 = vld [vmem:[#allocation2 + $0x19c] sm:$0xff]  ;;  %v594_v42 = vld [vmem:[#allocation4 + $0x38] sm:$0xff]  ;;  %p11734_p7 = pnand %p11733_p3, %p11727_p10 }
 0x13f   : > { %10620 = vmatprep.mubr.msk.f32.mxu0 %vm339_vm0, %v12309_v6  ;;  %v3749_v53 = vld [vmem:[#allocation2 + $0x122] sm:$0xff] }
 0x140   : > { %10671 = vmatmul.mubr.msk.f32.gmra.mrb[66].mxu1 %vm339_vm0, %v12534_v0  ;;  %v4254_v0 = vld [vmem:[#allocation10 + $0x110] sm:$0xff] }
 0x141   : > { %10673 = vmatprep.mubr.msk.f32.mxu1 %vm339_vm0, %v12542_v38  ;;  %11450 = vmatpush3.bf16.msra.mxu1 %v11447_v19  ;;  %v2855_v38 = vld [vmem:[#allocation2 + $0x1a4] sm:$0xff]  ;;  %v3748_v19 = vld [vmem:[#allocation2 + $0x112] sm:$0xff] }
 0x142   : > { %10621 = vmatmul.mubr.msk.f32.gmra.mrb[70].mxu0 %vm339_vm0, %v12327_v14 }
 0x143   : > { %10623 = vmatprep.mubr.msk.f32.mxu0 %vm339_vm0, %v12333_v17 }
 0x144   : > { %10674 = vmatmul.mubr.msk.f32.gmra.mrb[68].mxu1 %vm339_vm0, %v12557_v44  ;;  %v14732_v44 = vld [vmem:[#allocation19_spill] sm:$0xff] }
 0x145   : > { %10676 = vmatprep.mubr.msk.f32.mxu1 %vm339_vm0, %v12561_v40  ;;  %v11455_v40 = vpack.c.bf16 %v4255_v50, %v4254_v0  ;;  %v3750_v0 = vld [vmem:[#allocation2 + $0x12a] sm:$0xff] }
 0x146   : > { %10624 = vmatmul.mubr.msk.f32.gmra.mrb[72].mxu0 %vm339_vm0, %v12344_v21 }
 0x147   : > { %10626 = vmatprep.mubr.msk.f32.mxu0 %vm339_vm0, %v12350_v23 }
 0x148   : > { %10677 = vmatmul.mubr.msk.f32.gmra.mrb[70].mxu1 %vm339_vm0, %v12575_v5  ;;  %v14733_v5 = vld [vmem:[#allocation20_spill] sm:$0xff] }
 0x149   : > { %10679 = vmatprep.mubr.msk.f32.mxu1 %vm339_vm0, %v12579_v15  ;;  %v14734_v15 = vld [vmem:[#allocation21_spill] sm:$0xff] }
 0x14a   : > { %10627 = vmatmul.mubr.msk.f32.gmra.mrb[74].mxu0 %vm339_vm0, %v12360_v25 }
 0x14b   : > { %10629 = vmatprep.mubr.msk.f32.mxu0 %vm339_vm0, %v12366_v27 }
 0x14c   : > { %10680 = vmatmul.mubr.msk.f32.gmra.mrb[72].mxu1 %vm339_vm0, %v12593_v48  ;;  %v14735_v48 = vld [vmem:[#allocation22_spill] sm:$0xff] }
 0x14d   : > { %10682 = vmatprep.mubr.msk.f32.mxu1 %vm339_vm0, %v12597_v16  ;;  %v14725_v16 = vld [vmem:[#allocation38_spill] sm:$0xff] }
 0x14e   : > { %10630 = vmatmul.mubr.msk.f32.gmra.mrb[76].mxu0 %vm339_vm0, %v12376_v29 }
 0x14f   : > { %10632 = vmatprep.mubr.msk.f32.mxu0 %vm339_vm0, %v12382_v31 }
 0x150   : > { %10683 = vmatmul.mubr.msk.f32.gmra.mrb[74].mxu1 %vm339_vm0, %v12611_v43  ;;  %v14736_v43 = vld [vmem:[#allocation23_spill] sm:$0xff] }
 0x151   : > { %10685 = vmatprep.mubr.msk.f32.mxu1 %vm339_vm0, %v12615_v22  ;;  %v14726_v22 = vld [vmem:[#allocation39_spill] sm:$0xff] }
 0x152   : > { %10633 = vmatmul.mubr.msk.f32.gmra.mrb[78].mxu0 %vm339_vm0, %v12392_v34 }
 0x153   : > { %10635 = vmatprep.mubr.msk.f32.mxu0 %vm339_vm0, %v12398_v37 }
 0x154   : > { %10686 = vmatmul.mubr.msk.f32.gmra.mrb[76].mxu1 %vm339_vm0, %v12629_v33  ;;  %v14740_v33 = vld [vmem:[#allocation27_spill] sm:$0xff] }
 0x155   : > { %10688 = vmatprep.mubr.msk.f32.mxu1 %vm339_vm0, %v12633_v26  ;;  %v14727_v26 = vld [vmem:[#allocation40_spill] sm:$0xff] }
 0x156   : > { %10636 = vmatmul.mubr.msk.f32.gmra.mrb[80].mxu0 %vm339_vm0, %v12417_v45 }
 0x157   : > { %10638 = vmatprep.mubr.msk.f32.mxu0 %vm339_vm0, %v12425_v55  ;;  %v14730_v55 = vld [vmem:[#allocation44_spill] sm:$0xff] }
 0x158   : > { %10689 = vmatmul.mubr.msk.f32.gmra.mrb[78].mxu1 %vm339_vm0, %v12647_v13  ;;  %v587_v13 = vld [vmem:[#allocation4] sm:$0xff] }
 0x159   : > { %10691 = vmatprep.mubr.msk.f32.mxu1 %vm339_vm0, %v12651_v30  ;;  %v14728_v30 = vld [vmem:[#allocation41_spill] sm:$0xff] }
 0x15a   : > { %10639 = vmatmul.mubr.msk.f32.gmra.mrb[82].mxu0 %vm339_vm0, %v12435_v61  ;;  %v12917_v61 = vld [vmem:[#allocation2 + $0x18a] sm:$0xff] }
 0x15b   : > { %10641 = vmatprep.mubr.msk.f32.mxu0 %vm339_vm0, %v12441_v1  ;;  %v12919_v1 = vld [vmem:[#allocation2 + $0x19a] sm:$0xff] }
 0x15c   : > { %10692 = vmatmul.mubr.msk.f32.gmra.mrb[80].mxu1 %vm339_vm0, %v12665_v10 }
 0x15d   : > { %10694 = vmatprep.mubr.msk.f32.mxu1 %vm339_vm0, %v12669_v36  ;;  %v14729_v36 = vld [vmem:[#allocation42_spill] sm:$0xff] }
 0x15e   : > { %10642 = vmatmul.mubr.msk.f32.gmra.mrb[84].mxu0 %vm339_vm0, %v12451_v3  ;;  %v14731_v3 = vld [vmem:[#allocation46_spill] sm:$0xff] }
 0x15f   : > { %10644 = vmatprep.mubr.msk.f32.mxu0 %vm339_vm0, %v14725_v16 }
 0x160   : > { %10695 = vmatmul.mubr.msk.f32.gmra.mrb[82].mxu1 %vm339_vm0, %v12683_v18 }
 0x161   : > { %10697 = vmatprep.mubr.msk.f32.mxu1 %vm339_vm0, %v12687_v54  ;;  %v12907_v54 = vld [vmem:[#allocation2 + $0x182] sm:$0xff] }
 0x162   : > { %10645 = vmatmul.mubr.msk.f32.gmra.mrb[86].mxu0 %vm339_vm0, %v14726_v22 }
 0x163   : > { %10647 = vmatprep.mubr.msk.f32.mxu0 %vm339_vm0, %v14727_v26 }
 0x164   : > { %10698 = vmatmul.mubr.msk.f32.gmra.mrb[84].mxu1 %vm339_vm0, %v12701_v24  ;;  %v14743_v24 = vld [vmem:[#allocation30_spill] sm:$0xff] }
 0x165   : > { %10700 = vmatprep.mubr.msk.f32.mxu1 %vm339_vm0, %v12705_v63  ;;  %v2852_v63 = vld [vmem:[#allocation2 + $0x184] sm:$0xff] }
 0x166   : > { %10648 = vmatmul.mubr.msk.f32.gmra.mrb[88].mxu0 %vm339_vm0, %v14728_v30 }
 0x167   : > { %10650 = vmatprep.mubr.msk.f32.mxu0 %vm339_vm0, %v14729_v36 }
 0x168   : > { %10701 = vmatmul.mubr.msk.f32.gmra.mrb[86].mxu1 %vm339_vm0, %v12719_v28  ;;  %v590_v28 = vld [vmem:[#allocation4 + $0x18] sm:$0xff] }
 0x169   : > { %10703 = vmatprep.mubr.msk.f32.mxu1 %vm339_vm0, %v12723_v4  ;;  %v589_v4 = vld [vmem:[#allocation4 + $0x10] sm:$0xff] }
 0x16a   : > { %10651 = vmatmul.mubr.msk.f32.gmra.mrb[90].mxu0 %vm339_vm0, %v12497_v41  ;;  %v2853_v41 = vld [vmem:[#allocation2 + $0x18c] sm:$0xff] }
 0x16b   : > { %10653 = vmatprep.mubr.msk.f32.mxu0 %vm339_vm0, %v12907_v54 }
 0x16c   : > { %10704 = vmatmul.mubr.msk.f32.gmra.mrb[88].mxu1 %vm339_vm0, %v12737_v39 }
 0x16d   : > { %10706 = vmatprep.mubr.msk.f32.mxu1 %vm339_vm0, %v14730_v55 }
 0x16e   : > { %10654 = vmatmul.mubr.msk.f32.gmra.mrb[92].mxu0 %vm339_vm0, %v12917_v61 }
 0x16f   : > { %10656 = vmatprep.mubr.msk.f32.mxu0 %vm339_vm0, %v12919_v1 }
 0x170   : > { %10707 = vmatmul.mubr.msk.f32.gmra.mrb[90].mxu1 %vm339_vm0, %v14731_v3 }
 0x171   : > { %10709 = vmatprep.mubr.msk.f32.mxu1 %vm339_vm0, %v2852_v63 }
 0x172   : > { %10657 = vmatmul.mubr.msk.f32.gmra.mrb[94].mxu0 %vm339_vm0, %v12928_v11 }
 0x173   : > { %10723 = vmatprep.mubr.msk.f32.mxu0 %vm339_vm0, %v14732_v44  ;;  %v14750_v44 = vld [vmem:[#allocation37_spill] sm:$0xff] }
 0x174   : > { %10710 = vmatmul.mubr.msk.f32.gmra.mrb[92].mxu1 %vm339_vm0, %v2853_v41  ;;  %v14749_v41 = vld [vmem:[#allocation36_spill] sm:$0xff] }
 0x175   : > { %10712 = vmatprep.mubr.msk.f32.mxu1 %vm339_vm0, %v2854_v46  ;;  %v596_v46 = vld [vmem:[#allocation4 + $0x48] sm:$0xff] }
 0x176   : > { %10724 = vmatmul.mubr.msk.f32.vlgmr.msra.gmra.mrb[96].mxu0 %vm339_vm0, %v14733_v5  ;;  %v3751_v5 = vld [vmem:[#allocation2 + $0x13a] sm:$0xff] }
 0x177   : > { %11454 = vmatpush3.bf16.msra.mxu0 %v12796_v58  ;;  %10726 = vmatprep.mubr.msk.f32.mxu0 %vm339_vm0, %v14734_v15 }
 0x178   : > { %10713 = vmatmul.mubr.msk.f32.gmra.mrb[94].mxu1 %vm339_vm0, %v2855_v38  ;;  %11456 = vmatprep.subr.bf16.mxu0 %v11455_v40 }
 0x179   : > { %10779 = vmatprep.mubr.msk.f32.mxu1 %vm339_vm0, %v12281_v57  ;;  %v14737_v57 = vld [vmem:[#allocation24_spill] sm:$0xff]  ;;  %v10389_v10 = vpop.f32.mrb[0].mxu0 }
 0x17a   : > { %10727 = vmatmul.mubr.msk.f32.gmra.mrb[98].mxu0 %vm339_vm0, %v14735_v48  ;;  %v785_v18 = vpop.f32.mrb[1].mxu0 }
 0x17b   : > { %10729 = vmatprep.mubr.msk.f32.mxu0 %vm339_vm0, %v14736_v43  ;;  %11458 = vmatpush3.bf16.msra.mxu0 %v11455_v40  ;;  %v3298_v40 = vld [vmem:[#allocation2 + $0x140] sm:$0xff]  ;;  %v595_v43 = vld [vmem:[#allocation4 + $0x40] sm:$0xff] }
 0x17c   : > { %10780 = vmatmul.mubr.msk.f32.vlgmr.msra.gmra.mrb[96].mxu1 %vm339_vm0, %v12288_v60  ;;  %v14738_v60 = vld [vmem:[#allocation25_spill] sm:$0xff] }
 0x17d   : > { %10782 = vmatprep.mubr.msk.f32.mxu1 %vm339_vm0, %v12309_v6  ;;  %v14739_v6 = vld [vmem:[#allocation26_spill] sm:$0xff] }
 0x17e   : > { %10730 = vmatmul.mubr.msk.f32.gmra.mrb[100].mxu0 %vm339_vm0, %v14737_v57  ;;  %v3299_v57 = vld [vmem:[#allocation2 + $0x150] sm:$0xff] }
 0x17f   : > { %10732 = vmatprep.mubr.msk.f32.mxu0 %vm339_vm0, %v14738_v60 }
 0x180   : > { %10783 = vmatmul.mubr.msk.f32.gmra.mrb[98].mxu1 %vm339_vm0, %v12327_v14  ;;  %v14741_v14 = vld [vmem:[#allocation28_spill] sm:$0xff] }
 0x181   : > { %10785 = vmatprep.mubr.msk.f32.mxu1 %vm339_vm0, %v12333_v17  ;;  %v588_v17 = vld [vmem:[#allocation4 + $0x8] sm:$0xff] }
 0x182   : > { %10733 = vmatmul.mubr.msk.f32.gmra.mrb[102].mxu0 %vm339_vm0, %v14739_v6 }
 0x183   : > { %10735 = vmatprep.mubr.msk.f32.mxu0 %vm339_vm0, %v14740_v33 }
 0x184   : > { %10786 = vmatmul.mubr.msk.f32.gmra.mrb[100].mxu1 %vm339_vm0, %v12344_v21  ;;  %v14742_v21 = vld [vmem:[#allocation29_spill] sm:$0xff] }
 0x185   : > { %10788 = vmatprep.mubr.msk.f32.mxu1 %vm339_vm0, %v12350_v23  ;;  %v945_v23 = vadd.f32 %v10389_v10, %v588_v17  ;;  %v3752_v10 = vld [vmem:[#allocation2 + $0x142] sm:$0xff] }
 0x186   : > { %10736 = vmatmul.mubr.msk.f32.gmra.mrb[104].mxu0 %vm339_vm0, %v14741_v14 }
 0x187   : > { %10738 = vmatprep.mubr.msk.f32.mxu0 %vm339_vm0, %v14742_v21  ;;  %977 = vst.msk [vmem:[#allocation4 + $0x8] sm:$0xff] %vm339_vm0, %v945_v23 }
 0x188   : > { %10789 = vmatmul.mubr.msk.f32.gmra.mrb[102].mxu1 %vm339_vm0, %v12360_v25  ;;  %v944_v25 = vadd.f32 %v785_v18, %v587_v13  ;;  %v598_v13 = vld [vmem:[#allocation4 + $0x58] sm:$0xff] }
 0x189   : > { %10791 = vmatprep.mubr.msk.f32.mxu1 %vm339_vm0, %v12366_v27  ;;  %v14744_v27 = vld [vmem:[#allocation31_spill] sm:$0xff] }
 0x18a   : > { %10739 = vmatmul.mubr.msk.f32.gmra.mrb[106].mxu0 %vm339_vm0, %v14743_v24  ;;  %976 = vst.msk [vmem:[#allocation4] sm:$0xff] %vm339_vm0, %v944_v25  ;;  %v3300_v24 = vld [vmem:[#allocation2 + $0x158] sm:$0xff] }
 0x18b   : > { %10741 = vmatprep.mubr.msk.f32.mxu0 %vm339_vm0, %v14744_v27  ;;  %v3753_v25 = vld [vmem:[#allocation2 + $0x152] sm:$0xff] }
 0x18c   : > { %10792 = vmatmul.mubr.msk.f32.gmra.mrb[104].mxu1 %vm339_vm0, %v12376_v29  ;;  %v10392_v29 = vpop.f32.mrb[2].mxu0 }
 0x18d   : > { %10794 = vmatprep.mubr.msk.f32.mxu1 %vm339_vm0, %v12382_v31  ;;  %v947_v9 = vadd.f32 %v10392_v29, %v590_v28  ;;  %v795_v8 = vpop.f32.mrb[3].mxu0 }
 0x18e   : > { %10742 = vmatmul.mubr.msk.f32.gmra.mrb[108].mxu0 %vm339_vm0, %v14745_v12  ;;  %v946_v31 = vadd.f32 %v795_v8, %v589_v4  ;;  %v1041_v51 = vld [vmem:[#allocation4 + $0x8] sm:$0xff]  ;;  %v597_v4 = vld [vmem:[#allocation4 + $0x50] sm:$0xff] }
 0x18f   : > { %v10445_v39 = vpop.f32.mrb[0].mxu1  ;;  %10744 = vmatprep.mubr.msk.f32.mxu0 %vm339_vm0, %v14746_v59  ;;  %979 = vst.msk [vmem:[#allocation4 + $0x18] sm:$0xff] %vm339_vm0, %v947_v9  ;;  %v3754_v59 = vld [vmem:[#allocation2 + $0x15a] sm:$0xff] }
 0x190   : > { %v1239_v7 = vpop.f32.mrb[1].mxu1  ;;  %10795 = vmatmul.mubr.msk.f32.gmra.mrb[106].mxu1 %vm339_vm0, %v12392_v34  ;;  %978 = vst.msk [vmem:[#allocation4 + $0x10] sm:$0xff] %vm339_vm0, %v946_v31  ;;  %v1399_v16 = vadd.f32 %v10445_v39, %v1041_v51  ;;  %v3301_v39 = vld [vmem:[#allocation2 + $0x168] sm:$0xff] }
 0x191   : > { %10797 = vmatprep.mubr.msk.f32.mxu1 %vm339_vm0, %v12398_v37  ;;  %v10395_v34 = vpop.f32.mrb[4].mxu0  ;;  %v14747_v37 = vld [vmem:[#allocation34_spill] sm:$0xff]  ;;  %v1040_v22 = vld [vmem:[#allocation4] sm:$0xff] }
 0x192   : > { %v949_v49 = vadd.f32 %v10395_v34, %v592_v62  ;;  %v805_v20 = vpop.f32.mrb[5].mxu0  ;;  %10745 = vmatmul.mubr.msk.f32.gmra.mrb[110].mxu0 %vm339_vm0, %v14747_v37  ;;  %v1398_v30 = vadd.f32 %v1239_v7, %v1040_v22  ;;  %1431 = vst.msk [vmem:[#allocation4 + $0x8] sm:$0xff] %vm339_vm0, %v1399_v16  ;;  %v600_v62 = vld [vmem:[#allocation4 + $0x68] sm:$0xff]  ;;  %v3755_v34 = vld [vmem:[#allocation2 + $0x16a] sm:$0xff] }
 0x193   : > { %v10448_v32 = vpop.f32.mrb[2].mxu1  ;;  %v948_v35 = vadd.f32 %v805_v20, %v591_v56  ;;  %10747 = vmatprep.mubr.msk.f32.mxu0 %vm339_vm0, %v14748_v2  ;;  %v599_v20 = vld [vmem:[#allocation4 + $0x60] sm:$0xff] }
 0x194   : > { %v1249_v58 = vpop.f32.mrb[3].mxu1  ;;  %10798 = vmatmul.mubr.msk.f32.gmra.mrb[108].mxu1 %vm339_vm0, %v12417_v45  ;;  %981 = vst.msk [vmem:[#allocation4 + $0x28] sm:$0xff] %vm339_vm0, %v949_v49  ;;  %v593_v45 = vld [vmem:[#allocation4 + $0x30] sm:$0xff]  ;;  %1430 = vst.msk [vmem:[#allocation4] sm:$0xff] %vm339_vm0, %v1398_v30 }
 0x195   : > { %10800 = vmatprep.mubr.msk.f32.mxu1 %vm339_vm0, %v3747_v47  ;;  %980 = vst.msk [vmem:[#allocation4 + $0x20] sm:$0xff] %vm339_vm0, %v948_v35  ;;  %v10398_v36 = vpop.f32.mrb[6].mxu0 }
 0x196   : > { %v951_v63 = vadd.f32 %v10398_v36, %v594_v42  ;;  %v815_v3 = vpop.f32.mrb[7].mxu0  ;;  %10748 = vmatmul.mubr.msk.f32.gmra.mrb[112].mxu0 %vm339_vm0, %v14749_v41  ;;  %v1043_v38 = vld [vmem:[#allocation4 + $0x18] sm:$0xff] }
 0x197   : > { %v10451_v26 = vpop.f32.mrb[4].mxu1  ;;  %v950_v50 = vadd.f32 %v815_v3, %v593_v45  ;;  %10750 = vmatprep.mubr.msk.f32.mxu0 %vm339_vm0, %v14750_v44  ;;  %v1401_v15 = vadd.f32 %v10448_v32, %v1043_v38  ;;  %v1042_v48 = vld [vmem:[#allocation4 + $0x10] sm:$0xff]  ;;  %v3302_v32 = vld [vmem:[#allocation2 + $0x170] sm:$0xff]  ;;  %v602_v45 = vld [vmem:[#allocation4 + $0x78] sm:$0xff] }
 0x198   : > { %v1259_v55 = vpop.f32.mrb[5].mxu1  ;;  %10801 = vmatmul.mubr.msk.f32.gmra.mrb[110].mxu1 %vm339_vm0, %v3748_v19  ;;  %983 = vst.msk [vmem:[#allocation4 + $0x38] sm:$0xff] %vm339_vm0, %v951_v63  ;;  %v1400_v6 = vadd.f32 %v1249_v58, %v1042_v48  ;;  %v14752_v38 = vld [vmem:[#allocation45_spill] sm:$0xff] }
 0x199   : > { %10803 = vmatprep.mubr.msk.f32.mxu1 %vm339_vm0, %v3749_v53  ;;  %982 = vst.msk [vmem:[#allocation4 + $0x30] sm:$0xff] %vm339_vm0, %v950_v50  ;;  %v10401_v33 = vpop.f32.mrb[8].mxu0  ;;  %1433 = vst.msk [vmem:[#allocation4 + $0x18] sm:$0xff] %vm339_vm0, %v1401_v15  ;;  %v3756_v53 = vld [vmem:[#allocation2 + $0x172] sm:$0xff] }
 0x19a   : > { %v953_v17 = vadd.f32 %v10401_v33, %v596_v46  ;;  %v825_v21 = vpop.f32.mrb[9].mxu0  ;;  %10751 = vmatmul.mubr.msk.f32.gmra.mrb[114].mxu0 %vm339_vm0, %v3298_v40  ;;  %1432 = vst.msk [vmem:[#allocation4 + $0x10] sm:$0xff] %vm339_vm0, %v1400_v6  ;;  %v14753_v15 = vld [vmem:[#allocation47_spill] sm:$0xff] }
 0x19b   : > { %v10454_v60 = vpop.f32.mrb[6].mxu1  ;;  %v952_v23 = vadd.f32 %v825_v21, %v595_v43  ;;  %v1045_v18 = vld [vmem:[#allocation4 + $0x28] sm:$0xff]  ;;  %10753 = vmatprep.mubr.msk.f32.mxu0 %vm339_vm0, %v3299_v57  ;;  %v603_v57 = vld [vmem:[#allocation4 + $0x80] sm:$0xff] }
 0x19c   : > { %v1269_v14 = vpop.f32.mrb[7].mxu1  ;;  %10804 = vmatmul.mubr.msk.f32.gmra.mrb[112].mxu1 %vm339_vm0, %v3750_v0  ;;  %985 = vst.msk [vmem:[#allocation4 + $0x48] sm:$0xff] %vm339_vm0, %v953_v17  ;;  %v1403_v28 = vadd.f32 %v10451_v26, %v1045_v18  ;;  %v1044_v27 = vld [vmem:[#allocation4 + $0x20] sm:$0xff]  ;;  %v3308_v18 = vld [vmem:[#allocation2 + $0x1b8] sm:$0xff] }
 0x19d   : > { %10806 = vmatprep.mubr.msk.f32.mxu1 %vm339_vm0, %v3751_v5  ;;  %984 = vst.msk [vmem:[#allocation4 + $0x40] sm:$0xff] %vm339_vm0, %v952_v23  ;;  %v1402_v7 = vadd.f32 %v1259_v55, %v1044_v27  ;;  %v10404_v9 = vpop.f32.mrb[10].mxu0  ;;  %v14751_v26 = vld [vmem:[#allocation43_spill] sm:$0xff]  ;;  %v601_v55 = vld [vmem:[#allocation4 + $0x70] sm:$0xff]  ;;  %v604_v5 = vld [vmem:[#allocation4 + $0x88] sm:$0xff] }
 0x19e   : > { %1435 = vst.msk [vmem:[#allocation4 + $0x28] sm:$0xff] %vm339_vm0, %v1403_v28  ;;  %v955_v12 = vadd.f32 %v10404_v9, %v598_v13  ;;  %v835_v31 = vpop.f32.mrb[11].mxu0  ;;  %10754 = vmatmul.mubr.msk.f32.gmra.mrb[116].mxu0 %vm339_vm0, %v3300_v24  ;;  %v606_v13 = vld [vmem:[#allocation4 + $0x98] sm:$0xff]  ;;  %v3761_v24 = vld [vmem:[#allocation2 + $0x1b2] sm:$0xff]  ;;  %v605_v28 = vld [vmem:[#allocation4 + $0x90] sm:$0xff] }
 0x19f   : > { %v10457_v29 = vpop.f32.mrb[8].mxu1  ;;  %1434 = vst.msk [vmem:[#allocation4 + $0x20] sm:$0xff] %vm339_vm0, %v1402_v7  ;;  %v954_v47 = vadd.f32 %v835_v31, %v597_v4  ;;  %v1047_v56 = vld [vmem:[#allocation4 + $0x38] sm:$0xff]  ;;  %10756 = vmatprep.mubr.msk.f32.mxu0 %vm339_vm0, %v3301_v39  ;;  %v608_v9 = vld [vmem:[#allocation4 + $0xa8] sm:$0xff] }
 0x1a0   : > { %v1279_v8 = vpop.f32.mrb[9].mxu1  ;;  %10807 = vmatmul.mubr.msk.f32.gmra.mrb[114].mxu1 %vm339_vm0, %v3752_v10  ;;  %987 = vst.msk [vmem:[#allocation4 + $0x58] sm:$0xff] %vm339_vm0, %v955_v12  ;;  %v1405_v58 = vadd.f32 %v10454_v60, %v1047_v56  ;;  %v1046_v49 = vld [vmem:[#allocation4 + $0x30] sm:$0xff]  ;;  %v3307_v60 = vld [vmem:[#allocation2 + $0x1b0] sm:$0xff]  ;;  %v3309_v27 = vld [vmem:[#allocation2 + $0x1c8] sm:$0xff] }
 0x1a1   : > { %10809 = vmatprep.mubr.msk.f32.mxu1 %vm339_vm0, %v3753_v25  ;;  %986 = vst.msk [vmem:[#allocation4 + $0x50] sm:$0xff] %vm339_vm0, %v954_v47  ;;  %v1404_v19 = vadd.f32 %v1269_v14, %v1046_v49  ;;  %v10407_v35 = vpop.f32.mrb[12].mxu0  ;;  %v607_v56 = vld [vmem:[#allocation4 + $0xa0] sm:$0xff] }
 0x1a2   : > { %1437 = vst.msk [vmem:[#allocation4 + $0x38] sm:$0xff] %vm339_vm0, %v1405_v58  ;;  %v957_v42 = vadd.f32 %v10407_v35, %v600_v62  ;;  %v845_v2 = vpop.f32.mrb[13].mxu0  ;;  %10757 = vmatmul.mubr.msk.f32.gmra.mrb[118].mxu0 %vm339_vm0, %v3302_v32  ;;  %v3310_v62 = vld [vmem:[#allocation2 + $0x1d0] sm:$0xff]  ;;  %v4187_v32 = vld [vmem:[#allocation2 + $0x64] sm:$0xff] }
 0x1a3   : > { %v10460_v37 = vpop.f32.mrb[10].mxu1  ;;  %1436 = vst.msk [vmem:[#allocation4 + $0x30] sm:$0xff] %vm339_vm0, %v1404_v19  ;;  %v956_v16 = vadd.f32 %v845_v2, %v599_v20  ;;  %v1049_v22 = vld [vmem:[#allocation4 + $0x48] sm:$0xff]  ;;  %10759 = vmatprep.mubr.msk.f32.mxu0 %vm339_vm0, %v14751_v26  ;;  %v610_v2 = vld [vmem:[#allocation4 + $0xb8] sm:$0xff] }
 0x1a4   : > { %v1289_v51 = vpop.f32.mrb[11].mxu1  ;;  %10810 = vmatmul.mubr.msk.f32.gmra.mrb[116].mxu1 %vm339_vm0, %v3754_v59  ;;  %989 = vst.msk [vmem:[#allocation4 + $0x68] sm:$0xff] %vm339_vm0, %v957_v42  ;;  %v1407_v30 = vadd.f32 %v10457_v29, %v1049_v22  ;;  %v1048_v36 = vld [vmem:[#allocation4 + $0x40] sm:$0xff]  ;;  %v4189_v26 = vld [vmem:[#allocation2 + $0x7c] sm:$0xff] }
 0x1a5   : > { %10812 = vmatprep.mubr.msk.f32.mxu1 %vm339_vm0, %v3755_v34  ;;  %988 = vst.msk [vmem:[#allocation4 + $0x60] sm:$0xff] %vm339_vm0, %v956_v16  ;;  %v1406_v3 = vadd.f32 %v1279_v8, %v1048_v36  ;;  %v10410_v41 = vpop.f32.mrb[14].mxu0  ;;  %v3762_v8 = vld [vmem:[#allocation2 + $0x1ba] sm:$0xff]  ;;  %v3763_v59 = vld [vmem:[#allocation2 + $0x1ca] sm:$0xff]  ;;  %v3764_v35 = vld [vmem:[#allocation2 + $0x1d2] sm:$0xff] }
 0x1a6   : > { %1439 = vst.msk [vmem:[#allocation4 + $0x48] sm:$0xff] %vm339_vm0, %v1407_v30  ;;  %v959_v0 = vadd.f32 %v10410_v41, %v602_v45  ;;  %v855_v50 = vpop.f32.mrb[15].mxu0  ;;  %10760 = vmatmul.mubr.msk.f32.gmra.mrb[120].mxu0 %vm339_vm0, %v14752_v38  ;;  %v609_v45 = vld [vmem:[#allocation4 + $0xb0] sm:$0xff] }
 0x1a7   : > { %v10463_v63 = vpop.f32.mrb[12].mxu1  ;;  %1438 = vst.msk [vmem:[#allocation4 + $0x40] sm:$0xff] %vm339_vm0, %v1406_v3  ;;  %v958_v44 = vadd.f32 %v855_v50, %v601_v55  ;;  %v1051_v40 = vld [vmem:[#allocation4 + $0x58] sm:$0xff]  ;;  %10762 = vmatprep.mubr.msk.f32.mxu0 %vm339_vm0, %v14753_v15  ;;  %v612_v50 = vld [vmem:[#allocation4 + $0xc8] sm:$0xff] }
 0x1a8   : > { %v1299_v46 = vpop.f32.mrb[13].mxu1  ;;  %10813 = vmatmul.mubr.msk.f32.gmra.mrb[118].mxu1 %vm339_vm0, %v3756_v53  ;;  %991 = vst.msk [vmem:[#allocation4 + $0x78] sm:$0xff] %vm339_vm0, %v959_v0  ;;  %v1409_v48 = vadd.f32 %v10460_v37, %v1051_v40  ;;  %v1050_v43 = vld [vmem:[#allocation4 + $0x50] sm:$0xff]  ;;  %v4188_v53 = vld [vmem:[#allocation2 + $0x6c] sm:$0xff]  ;;  %v4191_v15 = vld [vmem:[#allocation2 + $0x94] sm:$0xff] }
 0x1a9   : > { %10815 = vmatprep.mubr.msk.f32.mxu1 %vm339_vm0, %v12907_v54  ;;  %990 = vst.msk [vmem:[#allocation4 + $0x70] sm:$0xff] %vm339_vm0, %v958_v44  ;;  %v1408_v33 = vadd.f32 %v1289_v51, %v1050_v43  ;;  %v10413_v14 = vpop.f32.mrb[16].mxu0  ;;  %v4190_v38 = vld [vmem:[#allocation2 + $0x84] sm:$0xff] }
 0x1aa   : > { %1441 = vst.msk [vmem:[#allocation4 + $0x58] sm:$0xff] %vm339_vm0, %v1409_v48  ;;  %v961_v17 = vadd.f32 %v10413_v14, %v604_v5  ;;  %v865_v21 = vpop.f32.mrb[17].mxu0  ;;  %10763 = vmatmul.mubr.msk.f32.gmra.mrb[122].mxu0 %vm339_vm0, %v12774_v52  ;;  %v611_v5 = vld [vmem:[#allocation4 + $0xc0] sm:$0xff] }
 0x1ab   : > { %v10466_v6 = vpop.f32.mrb[14].mxu1  ;;  %1440 = vst.msk [vmem:[#allocation4 + $0x50] sm:$0xff] %vm339_vm0, %v1408_v33  ;;  %v960_v10 = vadd.f32 %v865_v21, %v603_v57  ;;  %v1053_v23 = vld [vmem:[#allocation4 + $0x68] sm:$0xff]  ;;  %10765 = vmatprep.mubr.msk.f32.mxu0 %vm339_vm0, %v3307_v60 }
 0x1ac   : > { %v1309_v54 = vpop.f32.mrb[15].mxu1  ;;  %10816 = vmatmul.mubr.msk.f32.gmra.mrb[120].mxu1 %vm339_vm0, %v12917_v61  ;;  %993 = vst.msk [vmem:[#allocation4 + $0x88] sm:$0xff] %vm339_vm0, %v961_v17  ;;  %v1411_v61 = vadd.f32 %v10463_v63, %v1053_v23  ;;  %v1052_v25 = vld [vmem:[#allocation4 + $0x60] sm:$0xff]  ;;  %v614_v17 = vld [vmem:[#allocation4 + $0xd8] sm:$0xff]  ;;  %v4192_v21 = vld [vmem:[#allocation2 + $0x9c] sm:$0xff] }
 0x1ad   : > { %10818 = vmatprep.mubr.msk.f32.mxu1 %vm339_vm0, %v12919_v1  ;;  %992 = vst.msk [vmem:[#allocation4 + $0x80] sm:$0xff] %vm339_vm0, %v960_v10  ;;  %v1410_v52 = vadd.f32 %v1299_v46, %v1052_v25  ;;  %v10416_v39 = vpop.f32.mrb[18].mxu0  ;;  %v613_v23 = vld [vmem:[#allocation4 + $0xd0] sm:$0xff] }
 0x1ae   : > { %1443 = vst.msk [vmem:[#allocation4 + $0x68] sm:$0xff] %vm339_vm0, %v1411_v61  ;;  %v963_v29 = vadd.f32 %v10416_v39, %v606_v13  ;;  %v875_v7 = vpop.f32.mrb[19].mxu0  ;;  %10766 = vmatmul.mubr.msk.f32.gmra.mrb[124].mxu0 %vm339_vm0, %v3308_v18  ;;  %v4193_v18 = vld [vmem:[#allocation2 + $0xac] sm:$0xff] }
 0x1af   : > { %v10469_v4 = vpop.f32.mrb[16].mxu1  ;;  %1442 = vst.msk [vmem:[#allocation4 + $0x60] sm:$0xff] %vm339_vm0, %v1410_v52  ;;  %v962_v12 = vadd.f32 %v875_v7, %v605_v28  ;;  %v1055_v31 = vld [vmem:[#allocation4 + $0x78] sm:$0xff]  ;;  %10768 = vmatprep.mubr.msk.f32.mxu0 %vm339_vm0, %v3309_v27 }
 0x1b0   : > { %v1319_v1 = vpop.f32.mrb[17].mxu1  ;;  %10819 = vmatmul.mubr.msk.f32.gmra.mrb[122].mxu1 %vm339_vm0, %v12928_v11  ;;  %995 = vst.msk [vmem:[#allocation4 + $0x98] sm:$0xff] %vm339_vm0, %v963_v29  ;;  %v1413_v11 = vadd.f32 %v10466_v6, %v1055_v31  ;;  %v1054_v47 = vld [vmem:[#allocation4 + $0x70] sm:$0xff]  ;;  %v4194_v29 = vld [vmem:[#allocation2 + $0xb4] sm:$0xff] }
 0x1b1   : > { %10821 = vmatprep.mubr.msk.f32.mxu1 %vm339_vm0, %v3761_v24  ;;  %994 = vst.msk [vmem:[#allocation4 + $0x90] sm:$0xff] %vm339_vm0, %v962_v12  ;;  %v1412_v58 = vadd.f32 %v1309_v54, %v1054_v47  ;;  %v10419_v49 = vpop.f32.mrb[20].mxu0  ;;  %v4195_v12 = vld [vmem:[#allocation2 + $0xc4] sm:$0xff] }
 0x1b2   : > { %1445 = vst.msk [vmem:[#allocation4 + $0x78] sm:$0xff] %vm339_vm0, %v1413_v11  ;;  %v965_v37 = vadd.f32 %v10419_v49, %v608_v9  ;;  %v885_v19 = vpop.f32.mrb[21].mxu0  ;;  %10769 = vmatmul.mubr.msk.f32.gmra.mrb[126].mxu0 %vm339_vm0, %v3310_v62  ;;  %v4196_v49 = vld [vmem:[#allocation2 + $0xcc] sm:$0xff] }
 0x1b3   : > { %v10472_v34 = vpop.f32.mrb[18].mxu1  ;;  %1444 = vst.msk [vmem:[#allocation4 + $0x70] sm:$0xff] %vm339_vm0, %v1412_v58  ;;  %v964_v51 = vadd.f32 %v885_v19, %v607_v56  ;;  %v1057_v42 = vld [vmem:[#allocation4 + $0x88] sm:$0xff]  ;;  %10835 = vmatprep.mubr.msk.f32.mxu0 %vm339_vm0, %v4187_v32  ;;  %v618_v58 = vld [vmem:[#allocation4 + $0xf8] sm:$0xff]  ;;  %v617_v19 = vld [vmem:[#allocation4 + $0xf0] sm:$0xff] }
 0x1b4   : > { %v1329_v20 = vpop.f32.mrb[19].mxu1  ;;  %10822 = vmatmul.mubr.msk.f32.gmra.mrb[124].mxu1 %vm339_vm0, %v3762_v8  ;;  %997 = vst.msk [vmem:[#allocation4 + $0xa8] sm:$0xff] %vm339_vm0, %v965_v37  ;;  %v1415_v16 = vadd.f32 %v10469_v4, %v1057_v42  ;;  %v1056_v22 = vld [vmem:[#allocation4 + $0x80] sm:$0xff] }
 0x1b5   : > { %10824 = vmatprep.mubr.msk.f32.mxu1 %vm339_vm0, %v3763_v59  ;;  %996 = vst.msk [vmem:[#allocation4 + $0xa0] sm:$0xff] %vm339_vm0, %v964_v51  ;;  %v1414_v36 = vadd.f32 %v1319_v1, %v1056_v22  ;;  %v10422_v55 = vpop.f32.mrb[22].mxu0  ;;  %v616_v1 = vld [vmem:[#allocation4 + $0xe8] sm:$0xff]  ;;  %v615_v8 = vld [vmem:[#allocation4 + $0xe0] sm:$0xff] }
 0x1b6   : > { %1447 = vst.msk [vmem:[#allocation4 + $0x88] sm:$0xff] %vm339_vm0, %v1415_v16  ;;  %v967_v3 = vadd.f32 %v10422_v55, %v610_v2  ;;  %v895_v41 = vpop.f32.mrb[23].mxu0  ;;  %10836 = vmatmul.mubr.msk.f32.vlgmr.msra.gmra.mrb[128].mxu0 %vm339_vm0, %v4188_v53 }
 0x1b7   : > { %v10475_v30 = vpop.f32.mrb[20].mxu1  ;;  %1446 = vst.msk [vmem:[#allocation4 + $0x80] sm:$0xff] %vm339_vm0, %v1414_v36  ;;  %v966_v46 = vadd.f32 %v895_v41, %v609_v45  ;;  %v1059_v0 = vld [vmem:[#allocation4 + $0x98] sm:$0xff]  ;;  %10838 = vmatprep.mubr.msk.f32.mxu0 %vm339_vm0, %v4189_v26 }
 0x1b8   : > { %v1339_v63 = vpop.f32.mrb[21].mxu1  ;;  %10825 = vmatmul.mubr.msk.f32.gmra.mrb[126].mxu1 %vm339_vm0, %v3764_v35  ;;  %999 = vst.msk [vmem:[#allocation4 + $0xb8] sm:$0xff] %vm339_vm0, %v967_v3  ;;  %v1417_v44 = vadd.f32 %v10472_v34, %v1059_v0  ;;  %v1058_v40 = vld [vmem:[#allocation4 + $0x90] sm:$0xff] }
 0x1b9   : > { %998 = vst.msk [vmem:[#allocation4 + $0xb0] sm:$0xff] %vm339_vm0, %v966_v46  ;;  %v1416_v43 = vadd.f32 %v1329_v20, %v1058_v40  ;;  %v10425_v57 = vpop.f32.mrb[24].mxu0  ;;  %v4197_v35 = vld [vmem:[#allocation2 + $0xdc] sm:$0xff] }
 0x1ba   : > { %1449 = vst.msk [vmem:[#allocation4 + $0x98] sm:$0xff] %vm339_vm0, %v1417_v44  ;;  %v969_v6 = vadd.f32 %v10425_v57, %v612_v50  ;;  %v905_v33 = vpop.f32.mrb[25].mxu0  ;;  %10839 = vmatmul.mubr.msk.f32.gmra.mrb[130].mxu0 %vm339_vm0, %v4190_v38  ;;  %v1495_v46 = vld [vmem:[#allocation4 + $0x8] sm:$0xff]  ;;  %v1494_v44 = vld [vmem:[#allocation4] sm:$0xff] }
 0x1bb   : > { %v10478_v48 = vpop.f32.mrb[22].mxu1  ;;  %1448 = vst.msk [vmem:[#allocation4 + $0x90] sm:$0xff] %vm339_vm0, %v1416_v43  ;;  %v968_v14 = vadd.f32 %v905_v33, %v611_v5  ;;  %v1061_v54 = vld [vmem:[#allocation4 + $0xa8] sm:$0xff]  ;;  %10841 = vmatprep.mubr.msk.f32.mxu0 %vm339_vm0, %v4191_v15 }
 0x1bc   : > { %v1349_v60 = vpop.f32.mrb[23].mxu1  ;;  %1001 = vst.msk [vmem:[#allocation4 + $0xc8] sm:$0xff] %vm339_vm0, %v969_v6  ;;  %v1419_v13 = vadd.f32 %v10475_v30, %v1061_v54  ;;  %v1060_v10 = vld [vmem:[#allocation4 + $0xa0] sm:$0xff]  ;;  %v4198_v30 = vld [vmem:[#allocation2 + $0xe4] sm:$0xff] }
 0x1bd   : > { %1000 = vst.msk [vmem:[#allocation4 + $0xc0] sm:$0xff] %vm339_vm0, %v968_v14  ;;  %v1418_v61 = vadd.f32 %v1339_v63, %v1060_v10  ;;  %v10428_v25 = vpop.f32.mrb[26].mxu0  ;;  %v4199_v63 = vld [vmem:[#allocation2 + $0xf4] sm:$0xff]  ;;  %v1497_v14 = vld [vmem:[#allocation4 + $0x18] sm:$0xff] }
 0x1be   : > { %1451 = vst.msk [vmem:[#allocation4 + $0xa8] sm:$0xff] %vm339_vm0, %v1419_v13  ;;  %v971_v27 = vadd.f32 %v10428_v25, %v614_v17  ;;  %v915_v4 = vpop.f32.mrb[27].mxu0  ;;  %10842 = vmatmul.mubr.msk.f32.gmra.mrb[132].mxu0 %vm339_vm0, %v4192_v21  ;;  %v1496_v13 = vld [vmem:[#allocation4 + $0x10] sm:$0xff] }
 0x1bf   : > { %v10481_v24 = vpop.f32.mrb[24].mxu1  ;;  %1450 = vst.msk [vmem:[#allocation4 + $0xa0] sm:$0xff] %vm339_vm0, %v1418_v61  ;;  %v970_v52 = vadd.f32 %v915_v4, %v613_v23  ;;  %v1063_v39 = vld [vmem:[#allocation4 + $0xb8] sm:$0xff]  ;;  %10844 = vmatprep.mubr.msk.f32.mxu0 %vm339_vm0, %v4193_v18 }
 0x1c0   : > { %v1359_v28 = vpop.f32.mrb[25].mxu1  ;;  %1003 = vst.msk [vmem:[#allocation4 + $0xd8] sm:$0xff] %vm339_vm0, %v971_v27  ;;  %v1421_v7 = vadd.f32 %v10478_v48, %v1063_v39  ;;  %v1062_v9 = vld [vmem:[#allocation4 + $0xb0] sm:$0xff] }
 0x1c1   : > { %1002 = vst.msk [vmem:[#allocation4 + $0xd0] sm:$0xff] %vm339_vm0, %v970_v52  ;;  %v1420_v62 = vadd.f32 %v1349_v60, %v1062_v9  ;;  %v10431_v59 = vpop.f32.mrb[28].mxu0  ;;  %v4200_v48 = vld [vmem:[#allocation2 + $0xfc] sm:$0xff]  ;;  %v4201_v60 = vld [vmem:[#allocation2 + $0x10c] sm:$0xff] }
 0x1c2   : > { %1453 = vst.msk [vmem:[#allocation4 + $0xb8] sm:$0xff] %vm339_vm0, %v1421_v7  ;;  %v973_v47 = vadd.f32 %v10431_v59, %v616_v1  ;;  %v925_v56 = vpop.f32.mrb[29].mxu0  ;;  %10845 = vmatmul.mubr.msk.f32.gmra.mrb[134].mxu0 %vm339_vm0, %v4194_v29  ;;  %v1499_v52 = vld [vmem:[#allocation4 + $0x28] sm:$0xff]  ;;  %v1498_v7 = vld [vmem:[#allocation4 + $0x20] sm:$0xff] }
 0x1c3   : > { %v10484_v31 = vpop.f32.mrb[26].mxu1  ;;  %1452 = vst.msk [vmem:[#allocation4 + $0xb0] sm:$0xff] %vm339_vm0, %v1420_v62  ;;  %v972_v32 = vadd.f32 %v925_v56, %v615_v8  ;;  %v1065_v34 = vld [vmem:[#allocation4 + $0xc8] sm:$0xff]  ;;  %10847 = vmatprep.mubr.msk.f32.mxu0 %vm339_vm0, %v4195_v12 }
 0x1c4   : > { %v1369_v11 = vpop.f32.mrb[27].mxu1  ;;  %1005 = vst.msk [vmem:[#allocation4 + $0xe8] sm:$0xff] %vm339_vm0, %v973_v47  ;;  %v1423_v20 = vadd.f32 %v10481_v24, %v1065_v34  ;;  %v1064_v37 = vld [vmem:[#allocation4 + $0xc0] sm:$0xff] }
 0x1c5   : > { %1004 = vst.msk [vmem:[#allocation4 + $0xe0] sm:$0xff] %vm339_vm0, %v972_v32  ;;  %v1422_v42 = vadd.f32 %v1359_v28, %v1064_v37  ;;  %v10434_v2 = vpop.f32.mrb[30].mxu0  ;;  %v4202_v24 = vld [vmem:[#allocation2 + $0x114] sm:$0xff]  ;;  %v4203_v28 = vld [vmem:[#allocation2 + $0x124] sm:$0xff] }
 0x1c6   : > { %1455 = vst.msk [vmem:[#allocation4 + $0xc8] sm:$0xff] %vm339_vm0, %v1423_v20  ;;  %v975_v16 = vadd.f32 %v10434_v2, %v618_v58  ;;  %v935_v22 = vpop.f32.mrb[31].mxu0  ;;  %10848 = vmatmul.mubr.msk.f32.gmra.mrb[136].mxu0 %vm339_vm0, %v4196_v49  ;;  %v1501_v32 = vld [vmem:[#allocation4 + $0x38] sm:$0xff]  ;;  %v1500_v20 = vld [vmem:[#allocation4 + $0x30] sm:$0xff] }
 0x1c7   : > { %v10487_v51 = vpop.f32.mrb[28].mxu1  ;;  %1454 = vst.msk [vmem:[#allocation4 + $0xc0] sm:$0xff] %vm339_vm0, %v1422_v42  ;;  %v974_v45 = vadd.f32 %v935_v22, %v617_v19  ;;  %v1067_v26 = vld [vmem:[#allocation4 + $0xd8] sm:$0xff]  ;;  %10850 = vmatprep.mubr.msk.f32.mxu0 %vm339_vm0, %v4197_v35 }
 0x1c8   : > { %v1379_v53 = vpop.f32.mrb[29].mxu1  ;;  %1007 = vst.msk [vmem:[#allocation4 + $0xf8] sm:$0xff] %vm339_vm0, %v975_v16  ;;  %v1425_v36 = vadd.f32 %v10484_v31, %v1067_v26  ;;  %v1066_v55 = vld [vmem:[#allocation4 + $0xd0] sm:$0xff]  ;;  %v4204_v31 = vld [vmem:[#allocation2 + $0x12c] sm:$0xff] }
 0x1c9   : > { %1006 = vst.msk [vmem:[#allocation4 + $0xf0] sm:$0xff] %vm339_vm0, %v974_v45  ;;  %v1424_v41 = vadd.f32 %v1369_v11, %v1066_v55  ;;  %v10501_v0 = vpop.f32.mrb[32].mxu0  ;;  %v4205_v11 = vld [vmem:[#allocation2 + $0x13c] sm:$0xff]  ;;  %v1502_v55 = vld [vmem:[#allocation4 + $0x40] sm:$0xff] }
 0x1ca   : > { %1457 = vst.msk [vmem:[#allocation4 + $0xd8] sm:$0xff] %vm339_vm0, %v1425_v36  ;;  %v1853_v38 = vadd.f32 %v10501_v0, %v1495_v46  ;;  %v1693_v40 = vpop.f32.mrb[33].mxu0  ;;  %10851 = vmatmul.mubr.msk.f32.gmra.mrb[138].mxu0 %vm339_vm0, %v4198_v30  ;;  %v1503_v45 = vld [vmem:[#allocation4 + $0x48] sm:$0xff] }
 0x1cb   : > { %v10490_v3 = vpop.f32.mrb[30].mxu1  ;;  %1456 = vst.msk [vmem:[#allocation4 + $0xd0] sm:$0xff] %vm339_vm0, %v1424_v41  ;;  %v1852_v5 = vadd.f32 %v1693_v40, %v1494_v44  ;;  %v1069_v15 = vld [vmem:[#allocation4 + $0xe8] sm:$0xff]  ;;  %10853 = vmatprep.mubr.msk.f32.mxu0 %vm339_vm0, %v4199_v63 }
 0x1cc   : > { %v1389_v50 = vpop.f32.mrb[31].mxu1  ;;  %1885 = vst.msk [vmem:[#allocation4 + $0x8] sm:$0xff] %vm339_vm0, %v1853_v38  ;;  %v1427_v43 = vadd.f32 %v10487_v51, %v1069_v15  ;;  %v1068_v57 = vld [vmem:[#allocation4 + $0xe0] sm:$0xff]  ;;  %v4206_v51 = vld [vmem:[#allocation2 + $0x144] sm:$0xff]  ;;  %v4208_v46 = vld [vmem:[#allocation2 + $0x15c] sm:$0xff] }
 0x1cd   : > { %1884 = vst.msk [vmem:[#allocation4] sm:$0xff] %vm339_vm0, %v1852_v5  ;;  %v1426_v33 = vadd.f32 %v1379_v53, %v1068_v57  ;;  %v10504_v54 = vpop.f32.mrb[34].mxu0  ;;  %v4207_v53 = vld [vmem:[#allocation2 + $0x154] sm:$0xff]  ;;  %v4209_v38 = vld [vmem:[#allocation2 + $0x16c] sm:$0xff]  ;;  %v1504_v57 = vld [vmem:[#allocation4 + $0x50] sm:$0xff] }
 0x1ce   : > { %1459 = vst.msk [vmem:[#allocation4 + $0xe8] sm:$0xff] %vm339_vm0, %v1427_v43  ;;  %v1855_v21 = vadd.f32 %v10504_v54, %v1497_v14  ;;  %v1703_v10 = vpop.f32.mrb[35].mxu0  ;;  %10854 = vmatmul.mubr.msk.f32.gmra.mrb[140].mxu0 %vm339_vm0, %v4200_v48  ;;  %v1505_v5 = vld [vmem:[#allocation4 + $0x58] sm:$0xff]  ;;  %v4881_v54 = vld [vmem:[#allocation11] sm:$0xff] }
 0x1cf   : > { %v10557_v6 = vpop.f32.mrb[32].mxu1  ;;  %1458 = vst.msk [vmem:[#allocation4 + $0xe0] sm:$0xff] %vm339_vm0, %v1426_v33  ;;  %v1854_v23 = vadd.f32 %v1703_v10, %v1496_v13  ;;  %v1071_v18 = vld [vmem:[#allocation4 + $0xf8] sm:$0xff]  ;;  %10856 = vmatprep.mubr.msk.f32.mxu0 %vm339_vm0, %v4201_v60 }
 0x1d0   : > { %v2147_v17 = vpop.f32.mrb[33].mxu1  ;;  %1887 = vst.msk [vmem:[#allocation4 + $0x18] sm:$0xff] %vm339_vm0, %v1855_v21  ;;  %v1429_v61 = vadd.f32 %v10490_v3, %v1071_v18  ;;  %v1070_v25 = vld [vmem:[#allocation4 + $0xf0] sm:$0xff] }
 0x1d1   : > { %1886 = vst.msk [vmem:[#allocation4 + $0x10] sm:$0xff] %vm339_vm0, %v1854_v23  ;;  %v1428_v4 = vadd.f32 %v1389_v50, %v1070_v25  ;;  %v10507_v39 = vpop.f32.mrb[36].mxu0  ;;  %v4211_v10 = vld [vmem:[#allocation2 + $0x184] sm:$0xff] }
 0x1d2   : > { %1461 = vst.msk [vmem:[#allocation4 + $0xf8] sm:$0xff] %vm339_vm0, %v1429_v61  ;;  %v1857_v29 = vadd.f32 %v10507_v39, %v1499_v52  ;;  %v1713_v9 = vpop.f32.mrb[37].mxu0  ;;  %10857 = vmatmul.mubr.msk.f32.gmra.mrb[142].mxu0 %vm339_vm0, %v4202_v24  ;;  %v1507_v61 = vld [vmem:[#allocation4 + $0x68] sm:$0xff] }
 0x1d3   : > { %v10560_v27 = vpop.f32.mrb[34].mxu1  ;;  %1460 = vst.msk [vmem:[#allocation4 + $0xf0] sm:$0xff] %vm339_vm0, %v1428_v4  ;;  %v1856_v8 = vadd.f32 %v1713_v9, %v1498_v7  ;;  %v1949_v12 = vld [vmem:[#allocation4 + $0x8] sm:$0xff]  ;;  %10859 = vmatprep.mubr.msk.f32.mxu0 %vm339_vm0, %v4203_v28  ;;  %v1506_v4 = vld [vmem:[#allocation4 + $0x60] sm:$0xff] }
 0x1d4   : > { %v2157_v1 = vpop.f32.mrb[35].mxu1  ;;  %1889 = vst.msk [vmem:[#allocation4 + $0x28] sm:$0xff] %vm339_vm0, %v1857_v29  ;;  %v2307_v62 = vadd.f32 %v10557_v6, %v1949_v12  ;;  %v1948_v59 = vld [vmem:[#allocation4] sm:$0xff] }
 0x1d5   : > { %1888 = vst.msk [vmem:[#allocation4 + $0x20] sm:$0xff] %vm339_vm0, %v1856_v8  ;;  %v2306_v56 = vadd.f32 %v2147_v17, %v1948_v59  ;;  %v10510_v34 = vpop.f32.mrb[38].mxu0  ;;  %v4210_v6 = vld [vmem:[#allocation2 + $0x174] sm:$0xff]  ;;  %v4212_v29 = vld [vmem:[#allocation2 + $0x18c] sm:$0xff]  ;;  %v4213_v8 = vld [vmem:[#allocation2 + $0x19c] sm:$0xff] }
 0x1d6   : > { %2339 = vst.msk [vmem:[#allocation4 + $0x8] sm:$0xff] %vm339_vm0, %v2307_v62  ;;  %v1859_v49 = vadd.f32 %v10510_v34, %v1501_v32  ;;  %v1723_v37 = vpop.f32.mrb[39].mxu0  ;;  %10860 = vmatmul.mubr.msk.f32.gmra.mrb[144].mxu0 %vm339_vm0, %v4204_v31  ;;  %v4882_v17 = vld [vmem:[#allocation11 + $0x8] sm:$0xff]  ;;  %v1509_v62 = vld [vmem:[#allocation4 + $0x78] sm:$0xff] }
 0x1d7   : > { %v10563_v47 = vpop.f32.mrb[36].mxu1  ;;  %2338 = vst.msk [vmem:[#allocation4] sm:$0xff] %vm339_vm0, %v2306_v56  ;;  %v1858_v19 = vadd.f32 %v1723_v37, %v1500_v20  ;;  %v1951_v35 = vld [vmem:[#allocation4 + $0x18] sm:$0xff]  ;;  %10862 = vmatprep.mubr.msk.f32.mxu0 %vm339_vm0, %v4205_v11  ;;  %v11459_v18 = vpack.c.bf16 %v4882_v17, %v4881_v54  ;;  %v1508_v56 = vld [vmem:[#allocation4 + $0x70] sm:$0xff] }
 0x1d8   : > { %v2167_v58 = vpop.f32.mrb[37].mxu1  ;;  %1891 = vst.msk [vmem:[#allocation4 + $0x38] sm:$0xff] %vm339_vm0, %v1859_v49  ;;  %v2309_v42 = vadd.f32 %v10560_v27, %v1951_v35  ;;  %v1950_v2 = vld [vmem:[#allocation4 + $0x10] sm:$0xff] }
 0x1d9   : > { %1890 = vst.msk [vmem:[#allocation4 + $0x30] sm:$0xff] %vm339_vm0, %v1858_v19  ;;  %v2308_v22 = vadd.f32 %v2157_v1, %v1950_v2  ;;  %v10513_v26 = vpop.f32.mrb[40].mxu0  ;;  %11460 = vmatprep.subr.bf16.mxu1 %v11459_v18  ;;  %v4214_v49 = vld [vmem:[#allocation2 + $0x1a4] sm:$0xff]  ;;  %v4215_v19 = vld [vmem:[#allocation2 + $0x1b4] sm:$0xff] }
 0x1da   : > { %2341 = vst.msk [vmem:[#allocation4 + $0x18] sm:$0xff] %vm339_vm0, %v2309_v42  ;;  %v1861_v36 = vadd.f32 %v10513_v26, %v1503_v45  ;;  %v1733_v63 = vpop.f32.mrb[41].mxu0  ;;  %10863 = vmatmul.mubr.msk.f32.gmra.mrb[146].mxu0 %vm339_vm0, %v4206_v51  ;;  %11462 = vmatpush3.bf16.msra.mxu1 %v11459_v18  ;;  %v1511_v42 = vld [vmem:[#allocation4 + $0x88] sm:$0xff] }
 0x1db   : > { %v10566_v16 = vpop.f32.mrb[38].mxu1  ;;  %2340 = vst.msk [vmem:[#allocation4 + $0x10] sm:$0xff] %vm339_vm0, %v2308_v22  ;;  %v1860_v3 = vadd.f32 %v1733_v63, %v1502_v55  ;;  %v1953_v41 = vld [vmem:[#allocation4 + $0x28] sm:$0xff]  ;;  %10865 = vmatprep.mubr.msk.f32.mxu0 %vm339_vm0, %v4207_v53  ;;  %v1510_v22 = vld [vmem:[#allocation4 + $0x80] sm:$0xff] }
 0x1dc   : > { %v2177_v30 = vpop.f32.mrb[39].mxu1  ;;  %1893 = vst.msk [vmem:[#allocation4 + $0x48] sm:$0xff] %vm339_vm0, %v1861_v36  ;;  %v2311_v0 = vadd.f32 %v10563_v47, %v1953_v41  ;;  %v1952_v50 = vld [vmem:[#allocation4 + $0x20] sm:$0xff]  ;;  %v4216_v36 = vld [vmem:[#allocation2 + $0x1bc] sm:$0xff] }
 0x1dd   : > { %1892 = vst.msk [vmem:[#allocation4 + $0x40] sm:$0xff] %vm339_vm0, %v1860_v3  ;;  %v2310_v40 = vadd.f32 %v2167_v58, %v1952_v50  ;;  %v10516_v15 = vpop.f32.mrb[42].mxu0  ;;  %v4217_v3 = vld [vmem:[#allocation2 + $0x1cc] sm:$0xff] }
 0x1de   : > { %2343 = vst.msk [vmem:[#allocation4 + $0x28] sm:$0xff] %vm339_vm0, %v2311_v0  ;;  %v1863_v43 = vadd.f32 %v10516_v15, %v1505_v5  ;;  %v1743_v60 = vpop.f32.mrb[43].mxu0  ;;  %10866 = vmatmul.mubr.msk.f32.gmra.mrb[148].mxu0 %vm339_vm0, %v4208_v46  ;;  %v1513_v0 = vld [vmem:[#allocation4 + $0x98] sm:$0xff] }
 0x1df   : > { %v10569_v44 = vpop.f32.mrb[40].mxu1  ;;  %2342 = vst.msk [vmem:[#allocation4 + $0x20] sm:$0xff] %vm339_vm0, %v2310_v40  ;;  %v1862_v33 = vadd.f32 %v1743_v60, %v1504_v57  ;;  %v1955_v14 = vld [vmem:[#allocation4 + $0x38] sm:$0xff]  ;;  %10868 = vmatprep.mubr.msk.f32.mxu0 %vm339_vm0, %v4209_v38  ;;  %v1512_v40 = vld [vmem:[#allocation4 + $0x90] sm:$0xff] }
 0x1e0   : > { %v2187_v48 = vpop.f32.mrb[41].mxu1  ;;  %1895 = vst.msk [vmem:[#allocation4 + $0x58] sm:$0xff] %vm339_vm0, %v1863_v43  ;;  %v2313_v21 = vadd.f32 %v10566_v16, %v1955_v14  ;;  %v1954_v13 = vld [vmem:[#allocation4 + $0x30] sm:$0xff]  ;;  %v4218_v43 = vld [vmem:[#allocation2 + $0x1d4] sm:$0xff] }
 0x1e1   : > { %1894 = vst.msk [vmem:[#allocation4 + $0x50] sm:$0xff] %vm339_vm0, %v1862_v33  ;;  %v2312_v24 = vadd.f32 %v2177_v30, %v1954_v13  ;;  %v10519_v25 = vpop.f32.mrb[44].mxu0  ;;  %v1515_v14 = vld [vmem:[#allocation4 + $0xa8] sm:$0xff]  ;;  %v1514_v13 = vld [vmem:[#allocation4 + $0xa0] sm:$0xff] }
 0x1e2   : > { %2345 = vst.msk [vmem:[#allocation4 + $0x38] sm:$0xff] %vm339_vm0, %v2313_v21  ;;  %v1865_v27 = vadd.f32 %v10519_v25, %v1507_v61  ;;  %v1753_v52 = vpop.f32.mrb[45].mxu0  ;;  %10869 = vmatmul.mubr.msk.f32.gmra.mrb[150].mxu0 %vm339_vm0, %v4210_v6 }
 0x1e3   : > { %v10572_v23 = vpop.f32.mrb[42].mxu1  ;;  %2344 = vst.msk [vmem:[#allocation4 + $0x30] sm:$0xff] %vm339_vm0, %v2312_v24  ;;  %v1864_v39 = vadd.f32 %v1753_v52, %v1506_v4  ;;  %v1957_v1 = vld [vmem:[#allocation4 + $0x48] sm:$0xff]  ;;  %10871 = vmatprep.mubr.msk.f32.mxu0 %vm339_vm0, %v4211_v10 }
 0x1e4   : > { %v2197_v28 = vpop.f32.mrb[43].mxu1  ;;  %1897 = vst.msk [vmem:[#allocation4 + $0x68] sm:$0xff] %vm339_vm0, %v1865_v27  ;;  %v2315_v7 = vadd.f32 %v10569_v44, %v1957_v1  ;;  %v1956_v9 = vld [vmem:[#allocation4 + $0x40] sm:$0xff]  ;;  %v1517_v27 = vld [vmem:[#allocation4 + $0xb8] sm:$0xff]  ;;  %v1516_v1 = vld [vmem:[#allocation4 + $0xb0] sm:$0xff] }
 0x1e5   : > { %1896 = vst.msk [vmem:[#allocation4 + $0x60] sm:$0xff] %vm339_vm0, %v1864_v39  ;;  %v2314_v31 = vadd.f32 %v2187_v48, %v1956_v9  ;;  %v10522_v59 = vpop.f32.mrb[46].mxu0 }
 0x1e6   : > { %2347 = vst.msk [vmem:[#allocation4 + $0x48] sm:$0xff] %vm339_vm0, %v2315_v7  ;;  %v1867_v47 = vadd.f32 %v10522_v59, %v1509_v62  ;;  %v1763_v32 = vpop.f32.mrb[47].mxu0  ;;  %10872 = vmatmul.mubr.msk.f32.gmra.mrb[152].mxu0 %vm339_vm0, %v4212_v29  ;;  %v1519_v59 = vld [vmem:[#allocation4 + $0xc8] sm:$0xff] }
 0x1e7   : > { %v10575_v12 = vpop.f32.mrb[44].mxu1  ;;  %2346 = vst.msk [vmem:[#allocation4 + $0x40] sm:$0xff] %vm339_vm0, %v2314_v31  ;;  %v1866_v34 = vadd.f32 %v1763_v32, %v1508_v56  ;;  %v1959_v58 = vld [vmem:[#allocation4 + $0x58] sm:$0xff]  ;;  %10874 = vmatprep.mubr.msk.f32.mxu0 %vm339_vm0, %v4213_v8  ;;  %v1518_v32 = vld [vmem:[#allocation4 + $0xc0] sm:$0xff] }
 0x1e8   : > { %v2207_v11 = vpop.f32.mrb[45].mxu1  ;;  %1899 = vst.msk [vmem:[#allocation4 + $0x78] sm:$0xff] %vm339_vm0, %v1867_v47  ;;  %v2317_v20 = vadd.f32 %v10572_v23, %v1959_v58  ;;  %v1958_v37 = vld [vmem:[#allocation4 + $0x50] sm:$0xff] }
 0x1e9   : > { %1898 = vst.msk [vmem:[#allocation4 + $0x70] sm:$0xff] %vm339_vm0, %v1866_v34  ;;  %v2316_v51 = vadd.f32 %v2197_v28, %v1958_v37  ;;  %v10525_v2 = vpop.f32.mrb[48].mxu0 }
 0x1ea   : > { %2349 = vst.msk [vmem:[#allocation4 + $0x58] sm:$0xff] %vm339_vm0, %v2317_v20  ;;  %v1869_v16 = vadd.f32 %v10525_v2, %v1511_v42  ;;  %v1773_v45 = vpop.f32.mrb[49].mxu0  ;;  %10875 = vmatmul.mubr.msk.f32.gmra.mrb[154].mxu0 %vm339_vm0, %v4214_v49 }
 0x1eb   : > { %v10578_v35 = vpop.f32.mrb[46].mxu1  ;;  %2348 = vst.msk [vmem:[#allocation4 + $0x50] sm:$0xff] %vm339_vm0, %v2316_v51  ;;  %v1868_v26 = vadd.f32 %v1773_v45, %v1510_v22  ;;  %v1961_v30 = vld [vmem:[#allocation4 + $0x68] sm:$0xff]  ;;  %10877 = vmatprep.mubr.msk.f32.mxu0 %vm339_vm0, %v4215_v19  ;;  %v1521_v51 = vld [vmem:[#allocation4 + $0xd8] sm:$0xff] }
 0x1ec   : > { %v2217_v53 = vpop.f32.mrb[47].mxu1  ;;  %1901 = vst.msk [vmem:[#allocation4 + $0x88] sm:$0xff] %vm339_vm0, %v1869_v16  ;;  %v2319_v55 = vadd.f32 %v10575_v12, %v1961_v30  ;;  %v1960_v63 = vld [vmem:[#allocation4 + $0x60] sm:$0xff]  ;;  %v1520_v16 = vld [vmem:[#allocation4 + $0xd0] sm:$0xff] }
 0x1ed   : > { %1900 = vst.msk [vmem:[#allocation4 + $0x80] sm:$0xff] %vm339_vm0, %v1868_v26  ;;  %v2318_v46 = vadd.f32 %v2207_v11, %v1960_v63  ;;  %v10528_v50 = vpop.f32.mrb[50].mxu0  ;;  %v4883_v30 = vld [vmem:[#allocation11 + $0x10] sm:$0xff] }
 0x1ee   : > { %2351 = vst.msk [vmem:[#allocation4 + $0x68] sm:$0xff] %vm339_vm0, %v2319_v55  ;;  %v1871_v44 = vadd.f32 %v10528_v50, %v1513_v0  ;;  %v1783_v5 = vpop.f32.mrb[51].mxu0  ;;  %10878 = vmatmul.mubr.msk.f32.gmra.mrb[156].mxu0 %vm339_vm0, %v4216_v36  ;;  %v4884_v36 = vld [vmem:[#allocation11 + $0x18] sm:$0xff]  ;;  %v1523_v0 = vld [vmem:[#allocation4 + $0xe8] sm:$0xff] }
 0x1ef   : > { %v10581_v41 = vpop.f32.mrb[48].mxu1  ;;  %2350 = vst.msk [vmem:[#allocation4 + $0x60] sm:$0xff] %vm339_vm0, %v2318_v46  ;;  %v1870_v15 = vadd.f32 %v1783_v5, %v1512_v40  ;;  %v1963_v48 = vld [vmem:[#allocation4 + $0x78] sm:$0xff]  ;;  %10880 = vmatprep.mubr.msk.f32.mxu0 %vm339_vm0, %v4217_v3  ;;  %v1522_v40 = vld [vmem:[#allocation4 + $0xe0] sm:$0xff] }
 0x1f0   : > { %v2227_v38 = vpop.f32.mrb[49].mxu1  ;;  %1903 = vst.msk [vmem:[#allocation4 + $0x98] sm:$0xff] %vm339_vm0, %v1871_v44  ;;  %v2321_v57 = vadd.f32 %v10578_v35, %v1963_v48  ;;  %v1962_v60 = vld [vmem:[#allocation4 + $0x70] sm:$0xff] }
 0x1f1   : > { %1902 = vst.msk [vmem:[#allocation4 + $0x90] sm:$0xff] %vm339_vm0, %v1870_v15  ;;  %v2320_v33 = vadd.f32 %v2217_v53, %v1962_v60  ;;  %v10531_v54 = vpop.f32.mrb[52].mxu0 }
 0x1f2   : > { %2353 = vst.msk [vmem:[#allocation4 + $0x78] sm:$0xff] %vm339_vm0, %v2321_v57  ;;  %v1873_v21 = vadd.f32 %v10531_v54, %v1515_v14  ;;  %v1793_v10 = vpop.f32.mrb[53].mxu0  ;;  %10881 = vmatmul.mubr.msk.f32.gmra.mrb[158].mxu0 %vm339_vm0, %v4218_v43 }
 0x1f3   : > { %v10584_v6 = vpop.f32.mrb[50].mxu1  ;;  %2352 = vst.msk [vmem:[#allocation4 + $0x70] sm:$0xff] %vm339_vm0, %v2320_v33  ;;  %v1872_v23 = vadd.f32 %v1793_v10, %v1514_v13  ;;  %v1965_v18 = vld [vmem:[#allocation4 + $0x88] sm:$0xff]  ;;  %v1525_v33 = vld [vmem:[#allocation4 + $0xf8] sm:$0xff] }
 0x1f4   : > { %v2237_v17 = vpop.f32.mrb[51].mxu1  ;;  %1905 = vst.msk [vmem:[#allocation4 + $0xa8] sm:$0xff] %vm339_vm0, %v1873_v21  ;;  %v2323_v24 = vadd.f32 %v10581_v41, %v1965_v18  ;;  %v1964_v61 = vld [vmem:[#allocation4 + $0x80] sm:$0xff]  ;;  %v11463_v41 = vpack.c.bf16 %v4884_v36, %v4883_v30  ;;  %v1524_v21 = vld [vmem:[#allocation4 + $0xf0] sm:$0xff] }
 0x1f5   : > { %1904 = vst.msk [vmem:[#allocation4 + $0xa0] sm:$0xff] %vm339_vm0, %v1872_v23  ;;  %v2322_v28 = vadd.f32 %v2227_v38, %v1964_v61  ;;  %v10534_v4 = vpop.f32.mrb[54].mxu0 }
 0x1f6   : > { %2355 = vst.msk [vmem:[#allocation4 + $0x88] sm:$0xff] %vm339_vm0, %v2323_v24  ;;  %v1875_v39 = vadd.f32 %v10534_v4, %v1517_v27  ;;  %v1803_v29 = vpop.f32.mrb[55].mxu0  ;;  %11464 = vmatprep.subr.bf16.mxu1 %v11463_v41 }
 0x1f7   : > { %v10587_v25 = vpop.f32.mrb[52].mxu1  ;;  %2354 = vst.msk [vmem:[#allocation4 + $0x80] sm:$0xff] %vm339_vm0, %v2322_v28  ;;  %v1874_v7 = vadd.f32 %v1803_v29, %v1516_v1  ;;  %v1967_v9 = vld [vmem:[#allocation4 + $0x98] sm:$0xff]  ;;  %11466 = vmatpush3.bf16.msra.mxu1 %v11463_v41  ;;  %v2403_v28 = vld [vmem:[#allocation4 + $0x8] sm:$0xff] }
 0x1f8   : > { %v2247_v52 = vpop.f32.mrb[53].mxu1  ;;  %1907 = vst.msk [vmem:[#allocation4 + $0xb8] sm:$0xff] %vm339_vm0, %v1875_v39  ;;  %v2325_v8 = vadd.f32 %v10584_v6, %v1967_v9  ;;  %v1966_v12 = vld [vmem:[#allocation4 + $0x90] sm:$0xff]  ;;  %v2402_v39 = vld [vmem:[#allocation4] sm:$0xff] }
 0x1f9   : > { %1906 = vst.msk [vmem:[#allocation4 + $0xb0] sm:$0xff] %vm339_vm0, %v1874_v7  ;;  %v2324_v62 = vadd.f32 %v2237_v17, %v1966_v12  ;;  %v10537_v11 = vpop.f32.mrb[56].mxu0 }
 0x1fa   : > { %2357 = vst.msk [vmem:[#allocation4 + $0x98] sm:$0xff] %vm339_vm0, %v2325_v8  ;;  %v1877_v56 = vadd.f32 %v10537_v11, %v1519_v59  ;;  %v1813_v34 = vpop.f32.mrb[57].mxu0 }
 0x1fb   : > { %v10590_v31 = vpop.f32.mrb[54].mxu1  ;;  %2356 = vst.msk [vmem:[#allocation4 + $0x90] sm:$0xff] %vm339_vm0, %v2324_v62  ;;  %v1876_v58 = vadd.f32 %v1813_v34, %v1518_v32  ;;  %v1969_v49 = vld [vmem:[#allocation4 + $0xa8] sm:$0xff]  ;;  %v2405_v62 = vld [vmem:[#allocation4 + $0x18] sm:$0xff] }
 0x1fc   : > { %v2257_v47 = vpop.f32.mrb[55].mxu1  ;;  %1909 = vst.msk [vmem:[#allocation4 + $0xc8] sm:$0xff] %vm339_vm0, %v1877_v56  ;;  %v2327_v20 = vadd.f32 %v10587_v25, %v1969_v49  ;;  %v1968_v37 = vld [vmem:[#allocation4 + $0xa0] sm:$0xff]  ;;  %v2404_v56 = vld [vmem:[#allocation4 + $0x10] sm:$0xff] }
 0x1fd   : > { %1908 = vst.msk [vmem:[#allocation4 + $0xc0] sm:$0xff] %vm339_vm0, %v1876_v58  ;;  %v2326_v35 = vadd.f32 %v2247_v52, %v1968_v37  ;;  %v10540_v42 = vpop.f32.mrb[58].mxu0 }
 0x1fe   : > { %2359 = vst.msk [vmem:[#allocation4 + $0xa8] sm:$0xff] %vm339_vm0, %v2327_v20  ;;  %v1879_v53 = vadd.f32 %v10540_v42, %v1521_v51  ;;  %v1823_v22 = vpop.f32.mrb[59].mxu0 }
 0x1ff   : > { %v10593_v19 = vpop.f32.mrb[56].mxu1  ;;  %2358 = vst.msk [vmem:[#allocation4 + $0xa0] sm:$0xff] %vm339_vm0, %v2326_v35  ;;  %v1878_v45 = vadd.f32 %v1823_v22, %v1520_v16  ;;  %v1971_v26 = vld [vmem:[#allocation4 + $0xb8] sm:$0xff]  ;;  %v2407_v35 = vld [vmem:[#allocation4 + $0x28] sm:$0xff]  ;;  %v2406_v22 = vld [vmem:[#allocation4 + $0x20] sm:$0xff] }
 0x200   : > { %v2267_v2 = vpop.f32.mrb[57].mxu1  ;;  %1911 = vst.msk [vmem:[#allocation4 + $0xd8] sm:$0xff] %vm339_vm0, %v1879_v53  ;;  %v2329_v55 = vadd.f32 %v10590_v31, %v1971_v26  ;;  %v1970_v63 = vld [vmem:[#allocation4 + $0xb0] sm:$0xff]  ;;  %v5336_v53 = vld [vmem:[#allocation11 + $0x28] sm:$0xff] }
 0x201   : > { %1910 = vst.msk [vmem:[#allocation4 + $0xd0] sm:$0xff] %vm339_vm0, %v1878_v45  ;;  %v2328_v46 = vadd.f32 %v2257_v47, %v1970_v63  ;;  %v10543_v50 = vpop.f32.mrb[60].mxu0 }
 0x202   : > { %2361 = vst.msk [vmem:[#allocation4 + $0xb8] sm:$0xff] %vm339_vm0, %v2329_v55  ;;  %v1881_v44 = vadd.f32 %v10543_v50, %v1523_v0  ;;  %v1833_v5 = vpop.f32.mrb[61].mxu0 }
 0x203   : > { %v10596_v3 = vpop.f32.mrb[58].mxu1  ;;  %2360 = vst.msk [vmem:[#allocation4 + $0xb0] sm:$0xff] %vm339_vm0, %v2328_v46  ;;  %v1880_v15 = vadd.f32 %v1833_v5, %v1522_v40  ;;  %v1973_v48 = vld [vmem:[#allocation4 + $0xc8] sm:$0xff]  ;;  %v2409_v46 = vld [vmem:[#allocation4 + $0x38] sm:$0xff]  ;;  %v2408_v5 = vld [vmem:[#allocation4 + $0x30] sm:$0xff] }
 0x204   : > { %v2277_v38 = vpop.f32.mrb[59].mxu1  ;;  %1913 = vst.msk [vmem:[#allocation4 + $0xe8] sm:$0xff] %vm339_vm0, %v1881_v44  ;;  %v2331_v43 = vadd.f32 %v10593_v19, %v1973_v48  ;;  %v1972_v57 = vld [vmem:[#allocation4 + $0xc0] sm:$0xff]  ;;  %v5338_v44 = vld [vmem:[#allocation11 + $0x38] sm:$0xff] }
 0x205   : > { %1912 = vst.msk [vmem:[#allocation4 + $0xe0] sm:$0xff] %vm339_vm0, %v1880_v15  ;;  %v2330_v6 = vadd.f32 %v2267_v2, %v1972_v57  ;;  %v10546_v14 = vpop.f32.mrb[62].mxu0  ;;  %v5335_v2 = vld [vmem:[#allocation11 + $0x20] sm:$0xff] }
 0x206   : > { %2363 = vst.msk [vmem:[#allocation4 + $0xc8] sm:$0xff] %vm339_vm0, %v2331_v43  ;;  %v1883_v17 = vadd.f32 %v10546_v14, %v1525_v33  ;;  %v1843_v13 = vpop.f32.mrb[63].mxu0  ;;  %v11467_v26 = vpack.c.bf16 %v5336_v53, %v5335_v2  ;;  %v14754_v43 = vmov 0.0  }
 0x207   : > { %v10599_v60 = vpop.f32.mrb[60].mxu1  ;;  %2362 = vst.msk [vmem:[#allocation4 + $0xc0] sm:$0xff] %vm339_vm0, %v2330_v6  ;;  %v1882_v10 = vadd.f32 %v1843_v13, %v1524_v21  ;;  %v1975_v23 = vld [vmem:[#allocation4 + $0xd8] sm:$0xff] }
 0x208   : > { %v2287_v54 = vpop.f32.mrb[61].mxu1  ;;  %1915 = vst.msk [vmem:[#allocation4 + $0xf8] sm:$0xff] %vm339_vm0, %v1883_v17  ;;  %v2333_v18 = vadd.f32 %v10596_v3, %v1975_v23  ;;  %v1974_v24 = vld [vmem:[#allocation4 + $0xd0] sm:$0xff]  ;;  %11468 = vmatprep.subr.bf16.mxu0 %v11467_v26  ;;  %v2411_v17 = vld [vmem:[#allocation4 + $0x48] sm:$0xff] }
 0x209   : > { %1914 = vst.msk [vmem:[#allocation4 + $0xf0] sm:$0xff] %vm339_vm0, %v1882_v10  ;;  %v2332_v25 = vadd.f32 %v2277_v38, %v1974_v24  ;;  %v10613_v27 = vpop.f32.mrb[64].mxu0  ;;  %11470 = vmatpush3.bf16.msra.mxu0 %v11467_v26  ;;  %v5337_v38 = vld [vmem:[#allocation11 + $0x30] sm:$0xff] }
 0x20a   : > { %2365 = vst.msk [vmem:[#allocation4 + $0xd8] sm:$0xff] %vm339_vm0, %v2333_v18  ;;  %v2761_v52 = vadd.f32 %v10613_v27, %v2403_v28  ;;  %v2601_v1 = vpop.f32.mrb[65].mxu0  ;;  %v11471_v48 = vpack.c.bf16 %v5338_v44, %v5337_v38  ;;  %v4817_v10 = vld [vmem:[#allocation3] sm:$0xff]  ;;  %v2410_v18 = vld [vmem:[#allocation4 + $0x40] sm:$0xff] }
 0x20b   : > { %v10602_v61 = vpop.f32.mrb[62].mxu1  ;;  %2364 = vst.msk [vmem:[#allocation4 + $0xd0] sm:$0xff] %vm339_vm0, %v2332_v25  ;;  %v2760_v29 = vadd.f32 %v2601_v1, %v2402_v39  ;;  %v1977_v7 = vld [vmem:[#allocation4 + $0xe8] sm:$0xff]  ;;  %10891 = vmatprep.mubr.msk.f32.mxu1 %vm339_vm0, %v4817_v10  ;;  %v4818_v25 = vld [vmem:[#allocation3 + $0x8] sm:$0xff] }
 0x20c   : > { %v2297_v4 = vpop.f32.mrb[63].mxu1  ;;  %2793 = vst.msk [vmem:[#allocation4 + $0x8] sm:$0xff] %vm339_vm0, %v2761_v52  ;;  %v2335_v9 = vadd.f32 %v10599_v60, %v1977_v7  ;;  %v1976_v8 = vld [vmem:[#allocation4 + $0xe0] sm:$0xff]  ;;  %11472 = vmatprep.subr.bf16.mxu0 %v11471_v48  ;;  %10892 = vmatmul.mubr.msk.f32.vlgmr.msra.gmra.mrb[128].mxu1 %vm339_vm0, %v4818_v25  ;;  %v2413_v7 = vld [vmem:[#allocation4 + $0x58] sm:$0xff] }
 0x20d   : > { %2792 = vst.msk [vmem:[#allocation4] sm:$0xff] %vm339_vm0, %v2760_v29  ;;  %v2334_v31 = vadd.f32 %v2287_v54, %v1976_v8  ;;  %v10616_v59 = vpop.f32.mrb[66].mxu0  ;;  %11474 = vmatpush3.bf16.msra.mxu0 %v11471_v48  ;;  %v2421_v10 = vld [vmem:[#allocation4 + $0x98] sm:$0xff] }
 0x20e   : > { %2367 = vst.msk [vmem:[#allocation4 + $0xe8] sm:$0xff] %vm339_vm0, %v2335_v9  ;;  %v2763_v47 = vadd.f32 %v10616_v59, %v2405_v62  ;;  %v2611_v32 = vpop.f32.mrb[67].mxu0 }
 0x20f   : > { %v10669_v12 = vpop.f32.mrb[64].mxu1  ;;  %2366 = vst.msk [vmem:[#allocation4 + $0xe0] sm:$0xff] %vm339_vm0, %v2334_v31  ;;  %v2762_v34 = vadd.f32 %v2611_v32, %v2404_v56  ;;  %v1979_v58 = vld [vmem:[#allocation4 + $0xf8] sm:$0xff]  ;;  %v2412_v31 = vld [vmem:[#allocation4 + $0x50] sm:$0xff] }
 0x210   : > { %v3055_v11 = vpop.f32.mrb[65].mxu1  ;;  %2795 = vst.msk [vmem:[#allocation4 + $0x18] sm:$0xff] %vm339_vm0, %v2763_v47  ;;  %v2337_v49 = vadd.f32 %v10602_v61, %v1979_v58  ;;  %v1978_v20 = vld [vmem:[#allocation4 + $0xf0] sm:$0xff]  ;;  %v2415_v58 = vld [vmem:[#allocation4 + $0x68] sm:$0xff] }
 0x211   : > { %2794 = vst.msk [vmem:[#allocation4 + $0x10] sm:$0xff] %vm339_vm0, %v2762_v34  ;;  %v2336_v19 = vadd.f32 %v2297_v4, %v1978_v20  ;;  %v10619_v51 = vpop.f32.mrb[68].mxu0  ;;  %v5270_v61 = vld [vmem:[#allocation3 + $0x1] sm:$0xff]  ;;  %v5271_v4 = vld [vmem:[#allocation3 + $0x9] sm:$0xff] }
 0x212   : > { %2369 = vst.msk [vmem:[#allocation4 + $0xf8] sm:$0xff] %vm339_vm0, %v2337_v49  ;;  %v2765_v16 = vadd.f32 %v10619_v51, %v2407_v35  ;;  %v2621_v45 = vpop.f32.mrb[69].mxu0  ;;  %10947 = vmatprep.mubr.msk.f32.mxu0 %vm339_vm0, %v5270_v61  ;;  %v2420_v61 = vld [vmem:[#allocation4 + $0x90] sm:$0xff] }
 0x213   : > { %v13202_v37 = vpop.f32.mrb[66].mxu1  ;;  %2368 = vst.msk [vmem:[#allocation4 + $0xf0] sm:$0xff] %vm339_vm0, %v2336_v19  ;;  %v2764_v30 = vadd.f32 %v2621_v45, %v2406_v22  ;;  %v2857_v36 = vld [vmem:[#allocation4 + $0x8] sm:$0xff]  ;;  %10948 = vmatmul.mubr.msk.f32.vlgmr.msra.gmra.mrb[160].mxu0 %vm339_vm0, %v5271_v4  ;;  %v2414_v19 = vld [vmem:[#allocation4 + $0x60] sm:$0xff] }
 0x214   : > { %v13205_v42 = vpop.f32.mrb[67].mxu1  ;;  %2797 = vst.msk [vmem:[#allocation4 + $0x28] sm:$0xff] %vm339_vm0, %v2765_v16  ;;  %v3215_v55 = vadd.f32 %v10669_v12, %v2857_v36  ;;  %v2856_v63 = vld [vmem:[#allocation4] sm:$0xff]  ;;  %v5790_v45 = vld [vmem:[#allocation11 + $0x48] sm:$0xff] }
 0x215   : > { %2796 = vst.msk [vmem:[#allocation4 + $0x20] sm:$0xff] %vm339_vm0, %v2764_v30  ;;  %v3214_v41 = vadd.f32 %v3055_v11, %v2856_v63  ;;  %v10622_v0 = vpop.f32.mrb[70].mxu0  ;;  %v5789_v22 = vld [vmem:[#allocation11 + $0x40] sm:$0xff]  ;;  %v2417_v30 = vld [vmem:[#allocation4 + $0x78] sm:$0xff] }
 0x216   : > { %3247 = vst.msk [vmem:[#allocation4 + $0x8] sm:$0xff] %vm339_vm0, %v3215_v55  ;;  %v2767_v40 = vadd.f32 %v10622_v0, %v2409_v46  ;;  %v2631_v15 = vpop.f32.mrb[71].mxu0  ;;  %v11475_v63 = vpack.c.bf16 %v5790_v45, %v5789_v22  ;;  %v2427_v22 = vld [vmem:[#allocation4 + $0xc8] sm:$0xff] }
 0x217   : > { %v13210_v3 = vpop.f32.mrb[68].mxu1  ;;  %4714 = vst.msk [vmem:[#allocation3 + $0x18] sm:$0x1] %vm4713_vm3, %v14754_v43  ;;  %4715 = vst.msk [vmem:[#allocation3 + $0x30] sm:$0x1] %vm4713_vm3, %v14754_v43  ;;  %v2766_v57 = vadd.f32 %v2631_v15, %v2408_v5  ;;  %v2859_v60 = vld [vmem:[#allocation4 + $0x18] sm:$0xff] }
 0x218   : > { %v13213_v50 = vpop.f32.mrb[69].mxu1  ;;  %4716 = vst.msk [vmem:[#allocation3 + $0x48] sm:$0x1] %vm4713_vm3, %v14754_v43  ;;  %4717 = vst.msk [vmem:[#allocation3 + $0x60] sm:$0x1] %vm4713_vm3, %v14754_v43  ;;  %v3217_v6 = vadd.f32 %v13202_v37, %v2859_v60  ;;  %v2858_v33 = vld [vmem:[#allocation4 + $0x10] sm:$0xff]  ;;  %11476 = vmatprep.subr.bf16.mxu1 %v11475_v63 }
 0x219   : > { %4718 = vst.msk [vmem:[#allocation3 + $0x78] sm:$0x1] %vm4713_vm3, %v14754_v43  ;;  %4719 = vst.msk [vmem:[#allocation3 + $0x90] sm:$0x1] %vm4713_vm3, %v14754_v43  ;;  %v3216_v54 = vadd.f32 %v13205_v42, %v2858_v33  ;;  %v10625_v21 = vpop.f32.mrb[72].mxu0  ;;  %11478 = vmatpush3.bf16.msra.mxu1 %v11475_v63  ;;  %v2419_v15 = vld [vmem:[#allocation4 + $0x88] sm:$0xff] }
 0x21a   : > { %4720 = vst.msk [vmem:[#allocation3 + $0xa8] sm:$0x1] %vm4713_vm3, %v14754_v43  ;;  %4721 = vst.msk [vmem:[#allocation3 + $0xc0] sm:$0x1] %vm4713_vm3, %v14754_v43  ;;  %v2769_v23 = vadd.f32 %v10625_v21, %v2411_v17  ;;  %v2641_v24 = vpop.f32.mrb[73].mxu0  ;;  %v2418_v60 = vld [vmem:[#allocation4 + $0x80] sm:$0xff] }
 0x21b   : > { %4722 = vst.msk [vmem:[#allocation3 + $0xd8] sm:$0x1] %vm4713_vm3, %v14754_v43  ;;  %4723 = vst.msk [vmem:[#allocation3 + $0xf0] sm:$0x1] %vm4713_vm3, %v14754_v43  ;;  %v10678_v14 = vpop.f32.mrb[70].mxu1  ;;  %v2768_v28 = vadd.f32 %v2641_v24, %v2410_v18  ;;  %v2861_v27 = vld [vmem:[#allocation4 + $0x28] sm:$0xff] }
 0x21c   : > { %4724 = vst.msk [vmem:[#allocation3 + $0x108] sm:$0x1] %vm4713_vm3, %v14754_v43  ;;  %4725 = vst.msk [vmem:[#allocation3 + $0x120] sm:$0x1] %vm4713_vm3, %v14754_v43  ;;  %v3085_v13 = vpop.f32.mrb[71].mxu1  ;;  %v3219_v52 = vadd.f32 %v13210_v3, %v2861_v27  ;;  %v2860_v39 = vld [vmem:[#allocation4 + $0x20] sm:$0xff] }
 0x21d   : > { %4726 = vst.msk [vmem:[#allocation3 + $0x138] sm:$0x1] %vm4713_vm3, %v14754_v43  ;;  %4727 = vst.msk [vmem:[#allocation3 + $0x150] sm:$0x1] %vm4713_vm3, %v14754_v43  ;;  %v3218_v29 = vadd.f32 %v13213_v50, %v2860_v39  ;;  %v10628_v9 = vpop.f32.mrb[74].mxu0 }
 0x21e   : > { %4728 = vst.msk [vmem:[#allocation3 + $0x168] sm:$0x1] %vm4713_vm3, %v14754_v43  ;;  %4729 = vst.msk [vmem:[#allocation3 + $0x180] sm:$0x1] %vm4713_vm3, %v14754_v43  ;;  %v2771_v12 = vadd.f32 %v10628_v9, %v2413_v7  ;;  %v2651_v62 = vpop.f32.mrb[75].mxu0 }
 0x21f   : > { %4730 = vst.msk [vmem:[#allocation3 + $0x29] sm:$0x1] %vm4713_vm3, %v14754_v43  ;;  %4731 = vst.msk [vmem:[#allocation3 + $0x41] sm:$0x1] %vm4713_vm3, %v14754_v43  ;;  %v10681_v1 = vpop.f32.mrb[72].mxu1  ;;  %v2770_v59 = vadd.f32 %v2651_v62, %v2412_v31 }
 0x220   : > { %4732 = vst.msk [vmem:[#allocation3 + $0x59] sm:$0x1] %vm4713_vm3, %v14754_v43  ;;  %4733 = vst.msk [vmem:[#allocation3 + $0x71] sm:$0x1] %vm4713_vm3, %v14754_v43  ;;  %v3095_v8 = vpop.f32.mrb[73].mxu1 }
 0x221   : > { %4734 = vst.msk [vmem:[#allocation3 + $0x89] sm:$0x1] %vm4713_vm3, %v14754_v43  ;;  %4735 = vst.msk [vmem:[#allocation3 + $0xa1] sm:$0x1] %vm4713_vm3, %v14754_v43  ;;  %v10631_v49 = vpop.f32.mrb[76].mxu0 }
 0x222   : > { %4736 = vst.msk [vmem:[#allocation3 + $0xb9] sm:$0x1] %vm4713_vm3, %v14754_v43  ;;  %4737 = vst.msk [vmem:[#allocation3 + $0xd1] sm:$0x1] %vm4713_vm3, %v14754_v43  ;;  %v2773_v37 = vadd.f32 %v10631_v49, %v2415_v58  ;;  %v2661_v35 = vpop.f32.mrb[77].mxu0 }
 0x223   : > { %4738 = vst.msk [vmem:[#allocation3 + $0xe9] sm:$0x1] %vm4713_vm3, %v14754_v43  ;;  %4739 = vst.msk [vmem:[#allocation3 + $0x101] sm:$0x1] %vm4713_vm3, %v14754_v43  ;;  %v10684_v32 = vpop.f32.mrb[74].mxu1  ;;  %v2772_v51 = vadd.f32 %v2661_v35, %v2414_v19 }
 0x224   : > { %4740 = vst.msk [vmem:[#allocation3 + $0x119] sm:$0x1] %vm4713_vm3, %v14754_v43  ;;  %4741 = vst.msk [vmem:[#allocation3 + $0x131] sm:$0x1] %vm4713_vm3, %v14754_v43  ;;  %v3105_v20 = vpop.f32.mrb[75].mxu1 }
 0x225   : > { %4742 = vst.msk [vmem:[#allocation3 + $0x149] sm:$0x1] %vm4713_vm3, %v14754_v43  ;;  %4743 = vst.msk [vmem:[#allocation3 + $0x161] sm:$0x1] %vm4713_vm3, %v14754_v43  ;;  %v10634_v36 = vpop.f32.mrb[78].mxu0 }
 0x226   : > { %4744 = vst.msk [vmem:[#allocation3 + $0x179] sm:$0x1] %vm4713_vm3, %v14754_v43  ;;  %4745 = vst.msk [vmem:[#allocation3 + $0x191] sm:$0x1] %vm4713_vm3, %v14754_v43  ;;  %v2775_v3 = vadd.f32 %v10634_v36, %v2417_v30  ;;  %v2671_v46 = vpop.f32.mrb[79].mxu0  ;;  %v2426_v36 = vld [vmem:[#allocation4 + $0xc0] sm:$0xff] }
 0x227   : > { %3246 = vst.msk [vmem:[#allocation4] sm:$0xff] %vm339_vm0, %v3214_v41  ;;  %2799 = vst.msk [vmem:[#allocation4 + $0x38] sm:$0xff] %vm339_vm0, %v2767_v40  ;;  %v10687_v16 = vpop.f32.mrb[76].mxu1  ;;  %v2416_v41 = vld [vmem:[#allocation4 + $0x70] sm:$0xff] }
 0x228   : > { %2798 = vst.msk [vmem:[#allocation4 + $0x30] sm:$0xff] %vm339_vm0, %v2766_v57  ;;  %3249 = vst.msk [vmem:[#allocation4 + $0x18] sm:$0xff] %vm339_vm0, %v3217_v6  ;;  %v3115_v55 = vpop.f32.mrb[77].mxu1  ;;  %v2774_v0 = vadd.f32 %v2671_v46, %v2416_v41 }
 0x229   : > { %3248 = vst.msk [vmem:[#allocation4 + $0x10] sm:$0xff] %vm339_vm0, %v3216_v54  ;;  %2801 = vst.msk [vmem:[#allocation4 + $0x48] sm:$0xff] %vm339_vm0, %v2769_v23  ;;  %v10637_v48 = vpop.f32.mrb[80].mxu0 }
 0x22a   : > { %2800 = vst.msk [vmem:[#allocation4 + $0x40] sm:$0xff] %vm339_vm0, %v2768_v28  ;;  %3251 = vst.msk [vmem:[#allocation4 + $0x28] sm:$0xff] %vm339_vm0, %v3219_v52  ;;  %v2777_v57 = vadd.f32 %v10637_v48, %v2419_v15  ;;  %v2681_v6 = vpop.f32.mrb[81].mxu0  ;;  %v2428_v15 = vld [vmem:[#allocation4 + $0xd0] sm:$0xff] }
 0x22b   : > { %3250 = vst.msk [vmem:[#allocation4 + $0x20] sm:$0xff] %vm339_vm0, %v3218_v29  ;;  %2803 = vst.msk [vmem:[#allocation4 + $0x58] sm:$0xff] %vm339_vm0, %v2771_v12  ;;  %v10690_v40 = vpop.f32.mrb[78].mxu1  ;;  %v2776_v33 = vadd.f32 %v2681_v6, %v2418_v60  ;;  %v2423_v29 = vld [vmem:[#allocation4 + $0xa8] sm:$0xff]  ;;  %v2422_v12 = vld [vmem:[#allocation4 + $0xa0] sm:$0xff] }
 0x22c   : > { %2802 = vst.msk [vmem:[#allocation4 + $0x50] sm:$0xff] %vm339_vm0, %v2770_v59  ;;  %2805 = vst.msk [vmem:[#allocation4 + $0x68] sm:$0xff] %vm339_vm0, %v2773_v37  ;;  %v3125_v43 = vpop.f32.mrb[79].mxu1  ;;  %v2424_v37 = vld [vmem:[#allocation4 + $0xb0] sm:$0xff] }
 0x22d   : > { %2804 = vst.msk [vmem:[#allocation4 + $0x60] sm:$0xff] %vm339_vm0, %v2772_v51  ;;  %2807 = vst.msk [vmem:[#allocation4 + $0x78] sm:$0xff] %vm339_vm0, %v2775_v3  ;;  %v10640_v23 = vpop.f32.mrb[82].mxu0 }
 0x22e   : > { %v2863_v11 = vld [vmem:[#allocation4 + $0x38] sm:$0xff]  ;;  %2806 = vst.msk [vmem:[#allocation4 + $0x70] sm:$0xff] %vm339_vm0, %v2774_v0  ;;  %2809 = vst.msk [vmem:[#allocation4 + $0x88] sm:$0xff] %vm339_vm0, %v2777_v57  ;;  %v2779_v24 = vadd.f32 %v10640_v23, %v2421_v10  ;;  %v2691_v25 = vpop.f32.mrb[83].mxu0  ;;  %v2430_v10 = vld [vmem:[#allocation4 + $0xe0] sm:$0xff] }
 0x22f   : > { %v3221_v47 = vadd.f32 %v10678_v14, %v2863_v11  ;;  %v2862_v56 = vld [vmem:[#allocation4 + $0x30] sm:$0xff]  ;;  %v10693_v21 = vpop.f32.mrb[80].mxu1  ;;  %2808 = vst.msk [vmem:[#allocation4 + $0x80] sm:$0xff] %vm339_vm0, %v2776_v33  ;;  %v2778_v28 = vadd.f32 %v2691_v25, %v2420_v61 }
 0x230   : > { %v3220_v34 = vadd.f32 %v3085_v13, %v2862_v56  ;;  %v2865_v42 = vld [vmem:[#allocation4 + $0x48] sm:$0xff]  ;;  %v3135_v18 = vpop.f32.mrb[81].mxu1  ;;  %2811 = vst.msk [vmem:[#allocation4 + $0x98] sm:$0xff] %vm339_vm0, %v2779_v24 }
 0x231   : > { %3253 = vst.msk [vmem:[#allocation4 + $0x38] sm:$0xff] %vm339_vm0, %v3221_v47  ;;  %v3223_v2 = vadd.f32 %v10681_v1, %v2865_v42  ;;  %v2864_v53 = vld [vmem:[#allocation4 + $0x40] sm:$0xff]  ;;  %2810 = vst.msk [vmem:[#allocation4 + $0x90] sm:$0xff] %vm339_vm0, %v2778_v28  ;;  %v10643_v7 = vpop.f32.mrb[84].mxu0 }
 0x232   : > { %3252 = vst.msk [vmem:[#allocation4 + $0x30] sm:$0xff] %vm339_vm0, %v3220_v34  ;;  %v3222_v26 = vadd.f32 %v3095_v8, %v2864_v53  ;;  %v2867_v50 = vld [vmem:[#allocation4 + $0x58] sm:$0xff]  ;;  %v2781_v8 = vadd.f32 %v10643_v7, %v2423_v29  ;;  %v2701_v31 = vpop.f32.mrb[85].mxu0 }
 0x233   : > { %3255 = vst.msk [vmem:[#allocation4 + $0x48] sm:$0xff] %vm339_vm0, %v3223_v2  ;;  %v3225_v38 = vadd.f32 %v10684_v32, %v2867_v50  ;;  %v2866_v44 = vld [vmem:[#allocation4 + $0x50] sm:$0xff]  ;;  %v2869_v14 = vld [vmem:[#allocation4 + $0x68] sm:$0xff]  ;;  %v10696_v39 = vpop.f32.mrb[82].mxu1  ;;  %v2780_v62 = vadd.f32 %v2701_v31, %v2422_v12  ;;  %v2425_v34 = vld [vmem:[#allocation4 + $0xb8] sm:$0xff] }
 0x234   : > { %3254 = vst.msk [vmem:[#allocation4 + $0x40] sm:$0xff] %vm339_vm0, %v3222_v26  ;;  %v3224_v5 = vadd.f32 %v3105_v20, %v2866_v44  ;;  %v3227_v54 = vadd.f32 %v10687_v16, %v2869_v14  ;;  %v2868_v17 = vld [vmem:[#allocation4 + $0x60] sm:$0xff]  ;;  %v2871_v27 = vld [vmem:[#allocation4 + $0x78] sm:$0xff]  ;;  %v3145_v9 = vpop.f32.mrb[83].mxu1  ;;  %2813 = vst.msk [vmem:[#allocation4 + $0xa8] sm:$0xff] %vm339_vm0, %v2781_v8 }
 0x235   : > { %3257 = vst.msk [vmem:[#allocation4 + $0x58] sm:$0xff] %vm339_vm0, %v3225_v38  ;;  %v3226_v13 = vadd.f32 %v3115_v55, %v2868_v17  ;;  %v3229_v4 = vadd.f32 %v10690_v40, %v2871_v27  ;;  %v2870_v52 = vld [vmem:[#allocation4 + $0x70] sm:$0xff]  ;;  %v2873_v59 = vld [vmem:[#allocation4 + $0x88] sm:$0xff]  ;;  %2812 = vst.msk [vmem:[#allocation4 + $0xa0] sm:$0xff] %vm339_vm0, %v2780_v62  ;;  %v10646_v58 = vpop.f32.mrb[86].mxu0 }
 0x236   : > { %3256 = vst.msk [vmem:[#allocation4 + $0x50] sm:$0xff] %vm339_vm0, %v3224_v5  ;;  %3259 = vst.msk [vmem:[#allocation4 + $0x68] sm:$0xff] %vm339_vm0, %v3227_v54  ;;  %v3228_v1 = vadd.f32 %v3125_v43, %v2870_v52  ;;  %v3231_v11 = vadd.f32 %v10693_v21, %v2873_v59  ;;  %v2872_v47 = vld [vmem:[#allocation4 + $0x80] sm:$0xff]  ;;  %v2783_v20 = vadd.f32 %v10646_v58, %v2425_v34  ;;  %v2711_v19 = vpop.f32.mrb[87].mxu0  ;;  %v2429_v38 = vld [vmem:[#allocation4 + $0xd8] sm:$0xff] }
 0x237   : > { %3258 = vst.msk [vmem:[#allocation4 + $0x60] sm:$0xff] %vm339_vm0, %v3226_v13  ;;  %3261 = vst.msk [vmem:[#allocation4 + $0x78] sm:$0xff] %vm339_vm0, %v3229_v4  ;;  %v10699_v56 = vpop.f32.mrb[84].mxu1  ;;  %v3230_v32 = vadd.f32 %v3135_v18, %v2872_v47  ;;  %v2782_v35 = vadd.f32 %v2711_v19, %v2424_v37  ;;  %v2875_v51 = vld [vmem:[#allocation4 + $0x98] sm:$0xff]  ;;  %v2431_v54 = vld [vmem:[#allocation4 + $0xe8] sm:$0xff] }
 0x238   : > { %3260 = vst.msk [vmem:[#allocation4 + $0x70] sm:$0xff] %vm339_vm0, %v3228_v1  ;;  %v3155_v49 = vpop.f32.mrb[85].mxu1  ;;  %3263 = vst.msk [vmem:[#allocation4 + $0x88] sm:$0xff] %vm339_vm0, %v3231_v11  ;;  %v3233_v42 = vadd.f32 %v10696_v39, %v2875_v51  ;;  %v2874_v2 = vld [vmem:[#allocation4 + $0x90] sm:$0xff]  ;;  %v5792_v4 = vld [vmem:[#allocation11 + $0x58] sm:$0xff] }
 0x239   : > { %3262 = vst.msk [vmem:[#allocation4 + $0x80] sm:$0xff] %vm339_vm0, %v3230_v32  ;;  %2815 = vst.msk [vmem:[#allocation4 + $0xb8] sm:$0xff] %vm339_vm0, %v2783_v20  ;;  %v3232_v16 = vadd.f32 %v3145_v9, %v2874_v2  ;;  %v10649_v45 = vpop.f32.mrb[88].mxu0  ;;  %v5791_v27 = vld [vmem:[#allocation11 + $0x50] sm:$0xff]  ;;  %v2433_v39 = vld [vmem:[#allocation4 + $0xf8] sm:$0xff] }
 0x23a   : > { %2814 = vst.msk [vmem:[#allocation4 + $0xb0] sm:$0xff] %vm339_vm0, %v2782_v35  ;;  %3265 = vst.msk [vmem:[#allocation4 + $0x98] sm:$0xff] %vm339_vm0, %v3233_v42  ;;  %v2785_v30 = vadd.f32 %v10649_v45, %v2427_v22  ;;  %v2721_v55 = vpop.f32.mrb[89].mxu0  ;;  %v11479_v7 = vpack.c.bf16 %v5792_v4, %v5791_v27  ;;  %v2432_v8 = vld [vmem:[#allocation4 + $0xf0] sm:$0xff]  ;;  %v3312_v32 = vld [vmem:[#allocation4 + $0x8] sm:$0xff] }
 0x23b   : > { %v10702_v53 = vpop.f32.mrb[86].mxu1  ;;  %3264 = vst.msk [vmem:[#allocation4 + $0x90] sm:$0xff] %vm339_vm0, %v3232_v16  ;;  %v2784_v63 = vadd.f32 %v2721_v55, %v2426_v36  ;;  %v2877_v3 = vld [vmem:[#allocation4 + $0xa8] sm:$0xff]  ;;  %v3311_v20 = vld [vmem:[#allocation4] sm:$0xff]  ;;  %v3314_v16 = vld [vmem:[#allocation4 + $0x18] sm:$0xff] }
 0x23c   : > { %v3165_v26 = vpop.f32.mrb[87].mxu1  ;;  %2817 = vst.msk [vmem:[#allocation4 + $0xc8] sm:$0xff] %vm339_vm0, %v2785_v30  ;;  %v3235_v41 = vadd.f32 %v10699_v56, %v2877_v3  ;;  %v2876_v46 = vld [vmem:[#allocation4 + $0xa0] sm:$0xff]  ;;  %11480 = vmatprep.subr.bf16.mxu1 %v11479_v7  ;;  %v3313_v30 = vld [vmem:[#allocation4 + $0x10] sm:$0xff] }
 0x23d   : > { %2816 = vst.msk [vmem:[#allocation4 + $0xc0] sm:$0xff] %vm339_vm0, %v2784_v63  ;;  %v3234_v50 = vadd.f32 %v3155_v49, %v2876_v46  ;;  %v10652_v44 = vpop.f32.mrb[90].mxu0  ;;  %11482 = vmatpush3.bf16.msra.mxu1 %v11479_v7  ;;  %v3320_v7 = vld [vmem:[#allocation4 + $0x48] sm:$0xff] }
 0x23e   : > { %3267 = vst.msk [vmem:[#allocation4 + $0xa8] sm:$0xff] %vm339_vm0, %v3235_v41  ;;  %v2787_v5 = vadd.f32 %v10652_v44, %v2429_v38  ;;  %v2731_v48 = vpop.f32.mrb[91].mxu0  ;;  %v3316_v44 = vld [vmem:[#allocation4 + $0x28] sm:$0xff] }
 0x23f   : > { %v10705_v0 = vpop.f32.mrb[88].mxu1  ;;  %3266 = vst.msk [vmem:[#allocation4 + $0xa0] sm:$0xff] %vm339_vm0, %v3234_v50  ;;  %v2786_v43 = vadd.f32 %v2731_v48, %v2428_v15  ;;  %v6244_v50 = vld [vmem:[#allocation11 + $0x68] sm:$0xff] }
 0x240   : > { %v3175_v40 = vpop.f32.mrb[89].mxu1  ;;  %v2879_v57 = vld [vmem:[#allocation4 + $0xb8] sm:$0xff]  ;;  %2819 = vst.msk [vmem:[#allocation4 + $0xd8] sm:$0xff] %vm339_vm0, %v2787_v5 }
 0x241   : > { %v3237_v60 = vadd.f32 %v10702_v53, %v2879_v57  ;;  %v2878_v6 = vld [vmem:[#allocation4 + $0xb0] sm:$0xff]  ;;  %2818 = vst.msk [vmem:[#allocation4 + $0xd0] sm:$0xff] %vm339_vm0, %v2786_v43  ;;  %v10655_v17 = vpop.f32.mrb[92].mxu0  ;;  %v3315_v43 = vld [vmem:[#allocation4 + $0x20] sm:$0xff] }
 0x242   : > { %v3236_v14 = vadd.f32 %v3165_v26, %v2878_v6  ;;  %v2789_v13 = vadd.f32 %v10655_v17, %v2431_v54  ;;  %v2741_v23 = vpop.f32.mrb[93].mxu0 }
 0x243   : > { %v10708_v33 = vpop.f32.mrb[90].mxu1  ;;  %3269 = vst.msk [vmem:[#allocation4 + $0xb8] sm:$0xff] %vm339_vm0, %v3237_v60  ;;  %v2788_v18 = vadd.f32 %v2741_v23, %v2430_v10  ;;  %v2881_v24 = vld [vmem:[#allocation4 + $0xc8] sm:$0xff]  ;;  %v6245_v23 = vld [vmem:[#allocation11 + $0x70] sm:$0xff] }
 0x244   : > { %v3185_v21 = vpop.f32.mrb[91].mxu1  ;;  %3268 = vst.msk [vmem:[#allocation4 + $0xb0] sm:$0xff] %vm339_vm0, %v3236_v14  ;;  %2821 = vst.msk [vmem:[#allocation4 + $0xe8] sm:$0xff] %vm339_vm0, %v2789_v13  ;;  %v3239_v61 = vadd.f32 %v10705_v0, %v2881_v24  ;;  %v2880_v25 = vld [vmem:[#allocation4 + $0xc0] sm:$0xff] }
 0x245   : > { %2820 = vst.msk [vmem:[#allocation4 + $0xe0] sm:$0xff] %vm339_vm0, %v2788_v18  ;;  %v3238_v52 = vadd.f32 %v3175_v40, %v2880_v25  ;;  %v10658_v1 = vpop.f32.mrb[94].mxu0  ;;  %v6243_v0 = vld [vmem:[#allocation11 + $0x60] sm:$0xff]  ;;  %v6246_v18 = vld [vmem:[#allocation11 + $0x78] sm:$0xff] }
 0x246   : > { %3271 = vst.msk [vmem:[#allocation4 + $0xc8] sm:$0xff] %vm339_vm0, %v3239_v61  ;;  %v2791_v9 = vadd.f32 %v10658_v1, %v2433_v39  ;;  %v2751_v12 = vpop.f32.mrb[95].mxu0  ;;  %v11483_v15 = vpack.c.bf16 %v6244_v50, %v6243_v0  ;;  %v3317_v61 = vld [vmem:[#allocation4 + $0x30] sm:$0xff] }
 0x247   : > { %v10711_v28 = vpop.f32.mrb[92].mxu1  ;;  %3270 = vst.msk [vmem:[#allocation4 + $0xc0] sm:$0xff] %vm339_vm0, %v3238_v52  ;;  %v2790_v31 = vadd.f32 %v2751_v12, %v2432_v8  ;;  %v2883_v62 = vld [vmem:[#allocation4 + $0xd8] sm:$0xff] }
 0x248   : > { %v3195_v29 = vpop.f32.mrb[93].mxu1  ;;  %2823 = vst.msk [vmem:[#allocation4 + $0xf8] sm:$0xff] %vm339_vm0, %v2791_v9  ;;  %v3241_v59 = vadd.f32 %v10708_v33, %v2883_v62  ;;  %v2882_v11 = vld [vmem:[#allocation4 + $0xd0] sm:$0xff]  ;;  %11484 = vmatprep.subr.bf16.mxu0 %v11483_v15 }
 0x249   : > { %2822 = vst.msk [vmem:[#allocation4 + $0xf0] sm:$0xff] %vm339_vm0, %v2790_v31  ;;  %v3240_v56 = vadd.f32 %v3185_v21, %v2882_v11  ;;  %v10725_v34 = vpop.f32.mrb[96].mxu0  ;;  %11486 = vmatpush3.bf16.msra.mxu0 %v11483_v15  ;;  %v3318_v21 = vld [vmem:[#allocation4 + $0x38] sm:$0xff]  ;;  %v3319_v31 = vld [vmem:[#allocation4 + $0x40] sm:$0xff] }
 0x24a   : > { %3273 = vst.msk [vmem:[#allocation4 + $0xd8] sm:$0xff] %vm339_vm0, %v3241_v59  ;;  %v3670_v49 = vadd.f32 %v10725_v34, %v3312_v32  ;;  %v3510_v37 = vpop.f32.mrb[97].mxu0  ;;  %v6697_v34 = vld [vmem:[#allocation11 + $0x80] sm:$0xff]  ;;  %v3326_v15 = vld [vmem:[#allocation4 + $0x78] sm:$0xff] }
 0x24b   : > { %v10714_v47 = vpop.f32.mrb[94].mxu1  ;;  %3272 = vst.msk [vmem:[#allocation4 + $0xd0] sm:$0xff] %vm339_vm0, %v3240_v56  ;;  %v3669_v19 = vadd.f32 %v3510_v37, %v3311_v20  ;;  %v2885_v35 = vld [vmem:[#allocation4 + $0xe8] sm:$0xff]  ;;  %v3322_v20 = vld [vmem:[#allocation4 + $0x58] sm:$0xff] }
 0x24c   : > { %v3205_v58 = vpop.f32.mrb[95].mxu1  ;;  %3702 = vst.msk [vmem:[#allocation4 + $0x8] sm:$0xff] %vm339_vm0, %v3670_v49  ;;  %v3243_v51 = vadd.f32 %v10711_v28, %v2885_v35  ;;  %v2884_v42 = vld [vmem:[#allocation4 + $0xe0] sm:$0xff]  ;;  %v11487_v28 = vpack.c.bf16 %v6246_v18, %v6245_v23 }
 0x24d   : > { %3701 = vst.msk [vmem:[#allocation4] sm:$0xff] %vm339_vm0, %v3669_v19  ;;  %v3242_v53 = vadd.f32 %v3195_v29, %v2884_v42  ;;  %v10728_v22 = vpop.f32.mrb[98].mxu0  ;;  %v3321_v42 = vld [vmem:[#allocation4 + $0x50] sm:$0xff] }
 0x24e   : > { %3275 = vst.msk [vmem:[#allocation4 + $0xe8] sm:$0xff] %vm339_vm0, %v3243_v51  ;;  %v3672_v26 = vadd.f32 %v10728_v22, %v3314_v16  ;;  %v3520_v36 = vpop.f32.mrb[99].mxu0  ;;  %11488 = vmatprep.subr.bf16.mxu0 %v11487_v28 }
 0x24f   : > { %v10781_v2 = vpop.f32.mrb[96].mxu1  ;;  %3274 = vst.msk [vmem:[#allocation4 + $0xe0] sm:$0xff] %vm339_vm0, %v3242_v53  ;;  %v3671_v55 = vadd.f32 %v3520_v36, %v3313_v30  ;;  %v2887_v63 = vld [vmem:[#allocation4 + $0xf8] sm:$0xff]  ;;  %11490 = vmatpush3.bf16.msra.mxu0 %v11487_v28  ;;  %v3324_v36 = vld [vmem:[#allocation4 + $0x68] sm:$0xff] }
 0x250   : > { %v3964_v45 = vpop.f32.mrb[97].mxu1  ;;  %3704 = vst.msk [vmem:[#allocation4 + $0x18] sm:$0xff] %vm339_vm0, %v3672_v26  ;;  %v3245_v3 = vadd.f32 %v10714_v47, %v2887_v63  ;;  %v2886_v41 = vld [vmem:[#allocation4 + $0xf0] sm:$0xff] }
 0x251   : > { %3703 = vst.msk [vmem:[#allocation4 + $0x10] sm:$0xff] %vm339_vm0, %v3671_v55  ;;  %v3244_v38 = vadd.f32 %v3205_v58, %v2886_v41  ;;  %v10731_v40 = vpop.f32.mrb[100].mxu0  ;;  %v6698_v58 = vld [vmem:[#allocation11 + $0x88] sm:$0xff]  ;;  %v3323_v41 = vld [vmem:[#allocation4 + $0x60] sm:$0xff] }
 0x252   : > { %3277 = vst.msk [vmem:[#allocation4 + $0xf8] sm:$0xff] %vm339_vm0, %v3245_v3  ;;  %v3674_v48 = vadd.f32 %v10731_v40, %v3316_v44  ;;  %v3530_v57 = vpop.f32.mrb[101].mxu0  ;;  %v13359_v35 = vpack.c.bf16 %v6698_v58, %v6697_v34  ;;  %v3332_v34 = vld [vmem:[#allocation4 + $0xa8] sm:$0xff] }
 0x253   : > { %v10784_v46 = vpop.f32.mrb[98].mxu1  ;;  %3276 = vst.msk [vmem:[#allocation4 + $0xf0] sm:$0xff] %vm339_vm0, %v3244_v38  ;;  %v3673_v60 = vadd.f32 %v3530_v57, %v3315_v43  ;;  %v3766_v6 = vld [vmem:[#allocation4 + $0x8] sm:$0xff] }
 0x254   : > { %v3974_v5 = vpop.f32.mrb[99].mxu1  ;;  %3706 = vst.msk [vmem:[#allocation4 + $0x28] sm:$0xff] %vm339_vm0, %v3674_v48  ;;  %v4124_v33 = vadd.f32 %v10781_v2, %v3766_v6  ;;  %v3765_v14 = vld [vmem:[#allocation4] sm:$0xff]  ;;  %11492 = vmatprep.subr.bf16.mxu1 %v13359_v35 }
 0x255   : > { %3705 = vst.msk [vmem:[#allocation4 + $0x20] sm:$0xff] %vm339_vm0, %v3673_v60  ;;  %v4123_v17 = vadd.f32 %v3964_v45, %v3765_v14  ;;  %v10734_v13 = vpop.f32.mrb[102].mxu0  ;;  %v3325_v60 = vld [vmem:[#allocation4 + $0x70] sm:$0xff] }
 0x256   : > { %4156 = vst.msk [vmem:[#allocation4 + $0x8] sm:$0xff] %vm339_vm0, %v4124_v33  ;;  %v3676_v24 = vadd.f32 %v10734_v13, %v3318_v21  ;;  %v3540_v25 = vpop.f32.mrb[103].mxu0 }
 0x257   : > { %v10787_v54 = vpop.f32.mrb[100].mxu1  ;;  %4155 = vst.msk [vmem:[#allocation4] sm:$0xff] %vm339_vm0, %v4123_v17  ;;  %v3675_v27 = vadd.f32 %v3540_v25, %v3317_v61  ;;  %v3768_v4 = vld [vmem:[#allocation4 + $0x18] sm:$0xff]  ;;  %v3327_v61 = vld [vmem:[#allocation4 + $0x80] sm:$0xff] }
 0x258   : > { %v3984_v10 = vpop.f32.mrb[101].mxu1  ;;  %3708 = vst.msk [vmem:[#allocation4 + $0x38] sm:$0xff] %vm339_vm0, %v3676_v24  ;;  %v4126_v52 = vadd.f32 %v10784_v46, %v3768_v4  ;;  %v3767_v39 = vld [vmem:[#allocation4 + $0x10] sm:$0xff] }
 0x259   : > { %3707 = vst.msk [vmem:[#allocation4 + $0x30] sm:$0xff] %vm339_vm0, %v3675_v27  ;;  %v4125_v29 = vadd.f32 %v3974_v5, %v3767_v39  ;;  %v10737_v9 = vpop.f32.mrb[104].mxu0 }
 0x25a   : > { %4158 = vst.msk [vmem:[#allocation4 + $0x18] sm:$0xff] %vm339_vm0, %v4126_v52  ;;  %v3678_v12 = vadd.f32 %v10737_v9, %v3320_v7  ;;  %v3550_v62 = vpop.f32.mrb[105].mxu0 }
 0x25b   : > { %v10790_v1 = vpop.f32.mrb[102].mxu1  ;;  %4157 = vst.msk [vmem:[#allocation4 + $0x10] sm:$0xff] %vm339_vm0, %v4125_v29  ;;  %v3677_v59 = vadd.f32 %v3550_v62, %v3319_v31  ;;  %v3770_v11 = vld [vmem:[#allocation4 + $0x28] sm:$0xff]  ;;  %v3330_v29 = vld [vmem:[#allocation4 + $0x98] sm:$0xff] }
 0x25c   : > { %v3994_v8 = vpop.f32.mrb[103].mxu1  ;;  %3710 = vst.msk [vmem:[#allocation4 + $0x48] sm:$0xff] %vm339_vm0, %v3678_v12  ;;  %v4128_v47 = vadd.f32 %v10787_v54, %v3770_v11  ;;  %v3769_v56 = vld [vmem:[#allocation4 + $0x20] sm:$0xff]  ;;  %v3329_v12 = vld [vmem:[#allocation4 + $0x90] sm:$0xff] }
 0x25d   : > { %3709 = vst.msk [vmem:[#allocation4 + $0x40] sm:$0xff] %vm339_vm0, %v3677_v59  ;;  %v4127_v49 = vadd.f32 %v3984_v10, %v3769_v56  ;;  %v10740_v37 = vpop.f32.mrb[106].mxu0  ;;  %v3328_v10 = vld [vmem:[#allocation4 + $0x88] sm:$0xff] }
 0x25e   : > { %4160 = vst.msk [vmem:[#allocation4 + $0x28] sm:$0xff] %vm339_vm0, %v4128_v47  ;;  %v3680_v51 = vadd.f32 %v10740_v37, %v3322_v20  ;;  %v3560_v2 = vpop.f32.mrb[107].mxu0  ;;  %v3331_v37 = vld [vmem:[#allocation4 + $0xa0] sm:$0xff] }
 0x25f   : > { %v10793_v32 = vpop.f32.mrb[104].mxu1  ;;  %4159 = vst.msk [vmem:[#allocation4 + $0x20] sm:$0xff] %vm339_vm0, %v4127_v49  ;;  %v3679_v53 = vadd.f32 %v3560_v2, %v3321_v42  ;;  %v3772_v16 = vld [vmem:[#allocation4 + $0x38] sm:$0xff] }
 0x260   : > { %v4004_v19 = vpop.f32.mrb[105].mxu1  ;;  %3712 = vst.msk [vmem:[#allocation4 + $0x58] sm:$0xff] %vm339_vm0, %v3680_v51  ;;  %v4130_v22 = vadd.f32 %v10790_v1, %v3772_v16  ;;  %v3771_v45 = vld [vmem:[#allocation4 + $0x30] sm:$0xff] }
 0x261   : > { %3711 = vst.msk [vmem:[#allocation4 + $0x50] sm:$0xff] %vm339_vm0, %v3679_v53  ;;  %v4129_v30 = vadd.f32 %v3994_v8, %v3771_v45  ;;  %v10743_v55 = vpop.f32.mrb[108].mxu0  ;;  %v3334_v45 = vld [vmem:[#allocation4 + $0xb8] sm:$0xff] }
 0x262   : > { %4162 = vst.msk [vmem:[#allocation4 + $0x38] sm:$0xff] %vm339_vm0, %v4130_v22  ;;  %v3682_v3 = vadd.f32 %v10743_v55, %v3324_v36  ;;  %v3570_v46 = vpop.f32.mrb[109].mxu0  ;;  %v3333_v55 = vld [vmem:[#allocation4 + $0xb0] sm:$0xff] }
 0x263   : > { %v10796_v26 = vpop.f32.mrb[106].mxu1  ;;  %4161 = vst.msk [vmem:[#allocation4 + $0x30] sm:$0xff] %vm339_vm0, %v4129_v30  ;;  %v3681_v0 = vadd.f32 %v3570_v46, %v3323_v41  ;;  %v3774_v50 = vld [vmem:[#allocation4 + $0x48] sm:$0xff] }
 0x264   : > { %v4014_v63 = vpop.f32.mrb[107].mxu1  ;;  %3714 = vst.msk [vmem:[#allocation4 + $0x68] sm:$0xff] %vm339_vm0, %v3682_v3  ;;  %v4132_v38 = vadd.f32 %v10793_v32, %v3774_v50  ;;  %v3773_v44 = vld [vmem:[#allocation4 + $0x40] sm:$0xff] }
 0x265   : > { %3713 = vst.msk [vmem:[#allocation4 + $0x60] sm:$0xff] %vm339_vm0, %v3681_v0  ;;  %v4131_v5 = vadd.f32 %v4004_v19, %v3773_v44  ;;  %v10746_v48 = vpop.f32.mrb[110].mxu0  ;;  %v3336_v44 = vld [vmem:[#allocation4 + $0xc8] sm:$0xff] }
 0x266   : > { %4164 = vst.msk [vmem:[#allocation4 + $0x48] sm:$0xff] %vm339_vm0, %v4132_v38  ;;  %v3684_v57 = vadd.f32 %v10746_v48, %v3326_v15  ;;  %v3580_v6 = vpop.f32.mrb[111].mxu0  ;;  %v3335_v48 = vld [vmem:[#allocation4 + $0xc0] sm:$0xff] }
 0x267   : > { %v10799_v40 = vpop.f32.mrb[108].mxu1  ;;  %4163 = vst.msk [vmem:[#allocation4 + $0x40] sm:$0xff] %vm339_vm0, %v4131_v5  ;;  %v3683_v33 = vadd.f32 %v3580_v6, %v3325_v60  ;;  %v3776_v14 = vld [vmem:[#allocation4 + $0x58] sm:$0xff] }
 0x268   : > { %v4024_v43 = vpop.f32.mrb[109].mxu1  ;;  %3716 = vst.msk [vmem:[#allocation4 + $0x78] sm:$0xff] %vm339_vm0, %v3684_v57  ;;  %v4134_v54 = vadd.f32 %v10796_v26, %v3776_v14  ;;  %v3775_v17 = vld [vmem:[#allocation4 + $0x50] sm:$0xff] }
 0x269   : > { %3715 = vst.msk [vmem:[#allocation4 + $0x70] sm:$0xff] %vm339_vm0, %v3683_v33  ;;  %v4133_v13 = vadd.f32 %v4014_v63, %v3775_v17  ;;  %v10749_v23 = vpop.f32.mrb[112].mxu0  ;;  %v3338_v17 = vld [vmem:[#allocation4 + $0xd8] sm:$0xff] }
 0x26a   : > { %4166 = vst.msk [vmem:[#allocation4 + $0x58] sm:$0xff] %vm339_vm0, %v4134_v54  ;;  %v3686_v24 = vadd.f32 %v10749_v23, %v3328_v10  ;;  %v3590_v25 = vpop.f32.mrb[113].mxu0  ;;  %v3337_v23 = vld [vmem:[#allocation4 + $0xd0] sm:$0xff] }
 0x26b   : > { %v10802_v21 = vpop.f32.mrb[110].mxu1  ;;  %4165 = vst.msk [vmem:[#allocation4 + $0x50] sm:$0xff] %vm339_vm0, %v4133_v13  ;;  %v3685_v28 = vadd.f32 %v3590_v25, %v3327_v61  ;;  %v3778_v27 = vld [vmem:[#allocation4 + $0x68] sm:$0xff] }
 0x26c   : > { %v4034_v18 = vpop.f32.mrb[111].mxu1  ;;  %3718 = vst.msk [vmem:[#allocation4 + $0x88] sm:$0xff] %vm339_vm0, %v3686_v24  ;;  %v4136_v4 = vadd.f32 %v10799_v40, %v3778_v27  ;;  %v3777_v52 = vld [vmem:[#allocation4 + $0x60] sm:$0xff] }
 0x26d   : > { %3717 = vst.msk [vmem:[#allocation4 + $0x80] sm:$0xff] %vm339_vm0, %v3685_v28  ;;  %v4135_v1 = vadd.f32 %v4024_v43, %v3777_v52  ;;  %v10752_v7 = vpop.f32.mrb[114].mxu0  ;;  %v3340_v52 = vld [vmem:[#allocation4 + $0xe8] sm:$0xff] }
 0x26e   : > { %4168 = vst.msk [vmem:[#allocation4 + $0x68] sm:$0xff] %vm339_vm0, %v4136_v4  ;;  %v3688_v8 = vadd.f32 %v10752_v7, %v3330_v29  ;;  %v3600_v31 = vpop.f32.mrb[115].mxu0  ;;  %v3339_v7 = vld [vmem:[#allocation4 + $0xe0] sm:$0xff] }
 0x26f   : > { %v10805_v39 = vpop.f32.mrb[112].mxu1  ;;  %4167 = vst.msk [vmem:[#allocation4 + $0x60] sm:$0xff] %vm339_vm0, %v4135_v1  ;;  %v3687_v62 = vadd.f32 %v3600_v31, %v3329_v12  ;;  %v3780_v59 = vld [vmem:[#allocation4 + $0x78] sm:$0xff] }
 0x270   : > { %v4044_v9 = vpop.f32.mrb[113].mxu1  ;;  %3720 = vst.msk [vmem:[#allocation4 + $0x98] sm:$0xff] %vm339_vm0, %v3688_v8  ;;  %v4138_v11 = vadd.f32 %v10802_v21, %v3780_v59  ;;  %v3779_v47 = vld [vmem:[#allocation4 + $0x70] sm:$0xff] }
 0x271   : > { %3719 = vst.msk [vmem:[#allocation4 + $0x90] sm:$0xff] %vm339_vm0, %v3687_v62  ;;  %v4137_v32 = vadd.f32 %v4034_v18, %v3779_v47  ;;  %v10755_v58 = vpop.f32.mrb[116].mxu0  ;;  %v3342_v47 = vld [vmem:[#allocation4 + $0xf8] sm:$0xff] }
 0x272   : > { %4170 = vst.msk [vmem:[#allocation4 + $0x78] sm:$0xff] %vm339_vm0, %v4138_v11  ;;  %v3690_v20 = vadd.f32 %v10755_v58, %v3332_v34  ;;  %v3610_v19 = vpop.f32.mrb[117].mxu0  ;;  %v3341_v58 = vld [vmem:[#allocation4 + $0xf0] sm:$0xff] }
 0x273   : > { %v10808_v56 = vpop.f32.mrb[114].mxu1  ;;  %4169 = vst.msk [vmem:[#allocation4 + $0x70] sm:$0xff] %vm339_vm0, %v4137_v32  ;;  %v3689_v51 = vadd.f32 %v3610_v19, %v3331_v37  ;;  %v3782_v42 = vld [vmem:[#allocation4 + $0x88] sm:$0xff] }
 0x274   : > { %v4054_v49 = vpop.f32.mrb[115].mxu1  ;;  %3722 = vst.msk [vmem:[#allocation4 + $0xa8] sm:$0xff] %vm339_vm0, %v3690_v20  ;;  %v4140_v2 = vadd.f32 %v10805_v39, %v3782_v42  ;;  %v3781_v53 = vld [vmem:[#allocation4 + $0x80] sm:$0xff] }
 0x275   : > { %3721 = vst.msk [vmem:[#allocation4 + $0xa0] sm:$0xff] %vm339_vm0, %v3689_v51  ;;  %v4139_v22 = vadd.f32 %v4044_v9, %v3781_v53  ;;  %v10758_v26 = vpop.f32.mrb[118].mxu0  ;;  %v4220_v53 = vld [vmem:[#allocation4 + $0x8] sm:$0xff] }
 0x276   : > { %4172 = vst.msk [vmem:[#allocation4 + $0x88] sm:$0xff] %vm339_vm0, %v4140_v2  ;;  %v3692_v36 = vadd.f32 %v10758_v26, %v3334_v45  ;;  %v3620_v63 = vpop.f32.mrb[119].mxu0  ;;  %v4219_v26 = vld [vmem:[#allocation4] sm:$0xff] }
 0x277   : > { %v10811_v16 = vpop.f32.mrb[116].mxu1  ;;  %4171 = vst.msk [vmem:[#allocation4 + $0x80] sm:$0xff] %vm339_vm0, %v4139_v22  ;;  %v3691_v3 = vadd.f32 %v3620_v63, %v3333_v55  ;;  %v3784_v41 = vld [vmem:[#allocation4 + $0x98] sm:$0xff] }
 0x278   : > { %v4064_v30 = vpop.f32.mrb[117].mxu1  ;;  %3724 = vst.msk [vmem:[#allocation4 + $0xb8] sm:$0xff] %vm339_vm0, %v3692_v36  ;;  %v4142_v46 = vadd.f32 %v10808_v56, %v3784_v41  ;;  %v3783_v0 = vld [vmem:[#allocation4 + $0x90] sm:$0xff] }
 0x279   : > { %3723 = vst.msk [vmem:[#allocation4 + $0xb0] sm:$0xff] %vm339_vm0, %v3691_v3  ;;  %v4141_v38 = vadd.f32 %v4054_v49, %v3783_v0  ;;  %v10761_v40 = vpop.f32.mrb[120].mxu0 }
 0x27a   : > { %4174 = vst.msk [vmem:[#allocation4 + $0x98] sm:$0xff] %vm339_vm0, %v4142_v46  ;;  %v3694_v15 = vadd.f32 %v10761_v40, %v3336_v44  ;;  %v3630_v43 = vpop.f32.mrb[121].mxu0  ;;  %v4222_v46 = vld [vmem:[#allocation4 + $0x18] sm:$0xff] }
 0x27b   : > { %v10814_v50 = vpop.f32.mrb[118].mxu1  ;;  %4173 = vst.msk [vmem:[#allocation4 + $0x90] sm:$0xff] %vm339_vm0, %v4141_v38  ;;  %v3693_v57 = vadd.f32 %v3630_v43, %v3335_v48  ;;  %v3786_v60 = vld [vmem:[#allocation4 + $0xa8] sm:$0xff]  ;;  %v4221_v38 = vld [vmem:[#allocation4 + $0x10] sm:$0xff] }
 0x27c   : > { %v4074_v5 = vpop.f32.mrb[119].mxu1  ;;  %3726 = vst.msk [vmem:[#allocation4 + $0xc8] sm:$0xff] %vm339_vm0, %v3694_v15  ;;  %v4144_v6 = vadd.f32 %v10811_v16, %v3786_v60  ;;  %v3785_v33 = vld [vmem:[#allocation4 + $0xa0] sm:$0xff] }
 0x27d   : > { %3725 = vst.msk [vmem:[#allocation4 + $0xc0] sm:$0xff] %vm339_vm0, %v3693_v57  ;;  %v4143_v54 = vadd.f32 %v4064_v30, %v3785_v33  ;;  %v10764_v21 = vpop.f32.mrb[122].mxu0  ;;  %v4224_v57 = vld [vmem:[#allocation4 + $0x28] sm:$0xff] }
 0x27e   : > { %4176 = vst.msk [vmem:[#allocation4 + $0xa8] sm:$0xff] %vm339_vm0, %v4144_v6  ;;  %v3696_v10 = vadd.f32 %v10764_v21, %v3338_v17  ;;  %v3640_v18 = vpop.f32.mrb[123].mxu0  ;;  %v7151_v6 = vld [vmem:[#allocation11 + $0xa0] sm:$0xff]  ;;  %v7152_v33 = vld [vmem:[#allocation11 + $0xa8] sm:$0xff] }
 0x27f   : > { %v10817_v14 = vpop.f32.mrb[120].mxu1  ;;  %4175 = vst.msk [vmem:[#allocation4 + $0xa0] sm:$0xff] %vm339_vm0, %v4143_v54  ;;  %v3695_v24 = vadd.f32 %v3640_v18, %v3337_v23  ;;  %v3788_v61 = vld [vmem:[#allocation4 + $0xb8] sm:$0xff]  ;;  %v4223_v54 = vld [vmem:[#allocation4 + $0x20] sm:$0xff]  ;;  %v13415_v21 = vpack.c.bf16 %v7152_v33, %v7151_v6 }
 0x280   : > { %v4084_v13 = vpop.f32.mrb[121].mxu1  ;;  %3728 = vst.msk [vmem:[#allocation4 + $0xd8] sm:$0xff] %vm339_vm0, %v3696_v10  ;;  %v4146_v25 = vadd.f32 %v10814_v50, %v3788_v61  ;;  %v3787_v28 = vld [vmem:[#allocation4 + $0xb0] sm:$0xff] }
 0x281   : > { %3727 = vst.msk [vmem:[#allocation4 + $0xd0] sm:$0xff] %vm339_vm0, %v3695_v24  ;;  %v4145_v4 = vadd.f32 %v4074_v5, %v3787_v28  ;;  %v10767_v39 = vpop.f32.mrb[124].mxu0  ;;  %11500 = vmatprep.subr.bf16.mxu0 %v13415_v21  ;;  %v4226_v24 = vld [vmem:[#allocation4 + $0x38] sm:$0xff] }
 0x282   : > { %4178 = vst.msk [vmem:[#allocation4 + $0xb8] sm:$0xff] %vm339_vm0, %v4146_v25  ;;  %v3698_v29 = vadd.f32 %v10767_v39, %v3340_v52  ;;  %v3650_v9 = vpop.f32.mrb[125].mxu0 }
 0x283   : > { %v10820_v27 = vpop.f32.mrb[122].mxu1  ;;  %4177 = vst.msk [vmem:[#allocation4 + $0xb0] sm:$0xff] %vm339_vm0, %v4145_v4  ;;  %v3697_v8 = vadd.f32 %v3650_v9, %v3339_v7  ;;  %v3790_v12 = vld [vmem:[#allocation4 + $0xc8] sm:$0xff] }
 0x284   : > { %v4094_v1 = vpop.f32.mrb[123].mxu1  ;;  %3730 = vst.msk [vmem:[#allocation4 + $0xe8] sm:$0xff] %vm339_vm0, %v3698_v29  ;;  %v4148_v31 = vadd.f32 %v10817_v14, %v3790_v12  ;;  %v3789_v62 = vld [vmem:[#allocation4 + $0xc0] sm:$0xff]  ;;  %v4228_v7 = vld [vmem:[#allocation4 + $0x48] sm:$0xff] }
 0x285   : > { %3729 = vst.msk [vmem:[#allocation4 + $0xe0] sm:$0xff] %vm339_vm0, %v3697_v8  ;;  %v4147_v11 = vadd.f32 %v4084_v13, %v3789_v62  ;;  %v10770_v56 = vpop.f32.mrb[126].mxu0 }
 0x286   : > { %4180 = vst.msk [vmem:[#allocation4 + $0xc8] sm:$0xff] %vm339_vm0, %v4148_v31  ;;  %v3700_v34 = vadd.f32 %v10770_v56, %v3342_v47  ;;  %v3660_v49 = vpop.f32.mrb[127].mxu0  ;;  %v4227_v31 = vld [vmem:[#allocation4 + $0x40] sm:$0xff] }
 0x287   : > { %v10823_v59 = vpop.f32.mrb[124].mxu1  ;;  %4179 = vst.msk [vmem:[#allocation4 + $0xc0] sm:$0xff] %vm339_vm0, %v4147_v11  ;;  %v3699_v20 = vadd.f32 %v3660_v49, %v3341_v58  ;;  %v3792_v37 = vld [vmem:[#allocation4 + $0xd8] sm:$0xff]  ;;  %v4229_v58 = vld [vmem:[#allocation4 + $0x50] sm:$0xff] }
 0x288   : > { %v4104_v32 = vpop.f32.mrb[125].mxu1  ;;  %3732 = vst.msk [vmem:[#allocation4 + $0xf8] sm:$0xff] %vm339_vm0, %v3700_v34  ;;  %v4150_v19 = vadd.f32 %v10820_v27, %v3792_v37  ;;  %v3791_v51 = vld [vmem:[#allocation4 + $0xd0] sm:$0xff] }
 0x289   : > { %3731 = vst.msk [vmem:[#allocation4 + $0xf0] sm:$0xff] %vm339_vm0, %v3699_v20  ;;  %v4149_v2 = vadd.f32 %v4094_v1, %v3791_v51  ;;  %v10837_v16 = vpop.f32.mrb[128].mxu0  ;;  %v4225_v27 = vld [vmem:[#allocation4 + $0x30] sm:$0xff] }
 0x28a   : > { %4182 = vst.msk [vmem:[#allocation4 + $0xd8] sm:$0xff] %vm339_vm0, %v4150_v19  ;;  %v4578_v45 = vadd.f32 %v10837_v16, %v4220_v53  ;;  %v4418_v30 = vpop.f32.mrb[129].mxu0 }
 0x28b   : > { %v10826_v42 = vpop.f32.mrb[126].mxu1  ;;  %4181 = vst.msk [vmem:[#allocation4 + $0xd0] sm:$0xff] %vm339_vm0, %v4149_v2  ;;  %v4577_v36 = vadd.f32 %v4418_v30, %v4219_v26  ;;  %v3794_v55 = vld [vmem:[#allocation4 + $0xe8] sm:$0xff] }
 0x28c   : > { %v4114_v22 = vpop.f32.mrb[127].mxu1  ;;  %4610 = vst.msk [vmem:[#allocation4 + $0x8] sm:$0xff] %vm339_vm0, %v4578_v45  ;;  %v4152_v63 = vadd.f32 %v10823_v59, %v3794_v55  ;;  %v3793_v3 = vld [vmem:[#allocation4 + $0xe0] sm:$0xff]  ;;  %v4232_v26 = vld [vmem:[#allocation4 + $0x68] sm:$0xff] }
 0x28d   : > { %4609 = vst.msk [vmem:[#allocation4] sm:$0xff] %vm339_vm0, %v4577_v36  ;;  %v4151_v41 = vadd.f32 %v4104_v32, %v3793_v3  ;;  %v10840_v0 = vpop.f32.mrb[130].mxu0  ;;  %v4230_v32 = vld [vmem:[#allocation4 + $0x58] sm:$0xff]  ;;  %v4231_v36 = vld [vmem:[#allocation4 + $0x60] sm:$0xff] }
 0x28e   : > { %4184 = vst.msk [vmem:[#allocation4 + $0xe8] sm:$0xff] %vm339_vm0, %v4152_v63  ;;  %v4580_v50 = vadd.f32 %v10840_v0, %v4222_v46  ;;  %v4428_v44 = vpop.f32.mrb[131].mxu0 }
 0x28f   : > { %4183 = vst.msk [vmem:[#allocation4 + $0xe0] sm:$0xff] %vm339_vm0, %v4151_v41  ;;  %v4579_v40 = vadd.f32 %v4428_v44, %v4221_v38  ;;  %v3796_v5 = vld [vmem:[#allocation4 + $0xf8] sm:$0xff] }
 0x290   : > { %4612 = vst.msk [vmem:[#allocation4 + $0x18] sm:$0xff] %vm339_vm0, %v4580_v50  ;;  %v4154_v15 = vadd.f32 %v10826_v42, %v3796_v5  ;;  %v3795_v48 = vld [vmem:[#allocation4 + $0xf0] sm:$0xff] }
 0x291   : > { %4611 = vst.msk [vmem:[#allocation4 + $0x10] sm:$0xff] %vm339_vm0, %v4579_v40  ;;  %v4153_v43 = vadd.f32 %v4114_v22, %v3795_v48  ;;  %v10843_v60 = vpop.f32.mrb[132].mxu0 }
 0x292   : > { %4186 = vst.msk [vmem:[#allocation4 + $0xf8] sm:$0xff] %vm339_vm0, %v4154_v15  ;;  %v4582_v14 = vadd.f32 %v10843_v60, %v4224_v57  ;;  %v4438_v17 = vpop.f32.mrb[133].mxu0  ;;  %v4234_v15 = vld [vmem:[#allocation4 + $0x78] sm:$0xff] }
 0x293   : > { %v4642_v13 = vld [vmem:[#allocation4 + $0x8] sm:$0xff]  ;;  %4185 = vst.msk [vmem:[#allocation4 + $0xf0] sm:$0xff] %vm339_vm0, %v4153_v43  ;;  %v4581_v10 = vadd.f32 %v4438_v17, %v4223_v54  ;;  %v4233_v43 = vld [vmem:[#allocation4 + $0x70] sm:$0xff] }
 0x294   : > { %v4641_v23 = vld [vmem:[#allocation4] sm:$0xff]  ;;  %4614 = vst.msk [vmem:[#allocation4 + $0x28] sm:$0xff] %vm339_vm0, %v4582_v14  ;;  %v4674_v18 = vmax.f32 %v4642_v13, 0.0 }
 0x295   : > { %4613 = vst.msk [vmem:[#allocation4 + $0x20] sm:$0xff] %vm339_vm0, %v4581_v10  ;;  %v10846_v61 = vpop.f32.mrb[134].mxu0  ;;  %v4673_v25 = vmax.f32 %v4641_v23, 0.0 }
 0x296   : > { %v4584_v28 = vadd.f32 %v10846_v61, %v4226_v24  ;;  %v4448_v4 = vpop.f32.mrb[135].mxu0  ;;  %4747 = vst.msk [vmem:[#allocation3 + $0x21] sm:$0xff] %vm339_vm0, %v4674_v18  ;;  %v4236_v24 = vld [vmem:[#allocation4 + $0x88] sm:$0xff] }
 0x297   : > { %v4644_v52 = vld [vmem:[#allocation4 + $0x18] sm:$0xff]  ;;  %v4583_v39 = vadd.f32 %v4448_v4, %v4225_v27  ;;  %4746 = vst.msk [vmem:[#allocation3 + $0x19] sm:$0xff] %vm339_vm0, %v4673_v25  ;;  %v4235_v25 = vld [vmem:[#allocation4 + $0x80] sm:$0xff] }
 0x298   : > { %v4643_v1 = vld [vmem:[#allocation4 + $0x10] sm:$0xff]  ;;  %4616 = vst.msk [vmem:[#allocation4 + $0x38] sm:$0xff] %vm339_vm0, %v4584_v28  ;;  %v4676_v29 = vmax.f32 %v4644_v52, 0.0 }
 0x299   : > { %4615 = vst.msk [vmem:[#allocation4 + $0x30] sm:$0xff] %vm339_vm0, %v4583_v39  ;;  %v10849_v9 = vpop.f32.mrb[136].mxu0  ;;  %v4675_v8 = vmax.f32 %v4643_v1, 0.0 }
 0x29a   : > { %v4586_v12 = vadd.f32 %v10849_v9, %v4228_v7  ;;  %v4458_v62 = vpop.f32.mrb[137].mxu0  ;;  %4749 = vst.msk [vmem:[#allocation3 + $0x39] sm:$0xff] %vm339_vm0, %v4676_v29 }
 0x29b   : > { %v4646_v59 = vld [vmem:[#allocation4 + $0x28] sm:$0xff]  ;;  %v4585_v11 = vadd.f32 %v4458_v62, %v4227_v31  ;;  %4748 = vst.msk [vmem:[#allocation3 + $0x31] sm:$0xff] %vm339_vm0, %v4675_v8  ;;  %v4238_v31 = vld [vmem:[#allocation4 + $0x98] sm:$0xff] }
 0x29c   : > { %v4645_v47 = vld [vmem:[#allocation4 + $0x20] sm:$0xff]  ;;  %4618 = vst.msk [vmem:[#allocation4 + $0x48] sm:$0xff] %vm339_vm0, %v4586_v12  ;;  %v4678_v56 = vmax.f32 %v4646_v59, 0.0  ;;  %v4237_v59 = vld [vmem:[#allocation4 + $0x90] sm:$0xff] }
 0x29d   : > { %4617 = vst.msk [vmem:[#allocation4 + $0x40] sm:$0xff] %vm339_vm0, %v4585_v11  ;;  %v10852_v34 = vpop.f32.mrb[138].mxu0  ;;  %v4677_v49 = vmax.f32 %v4645_v47, 0.0  ;;  %v13440_v16 = vld [vmem:[#allocation3 + $0x21] sm:$0xff] }
 0x29e   : > { %v4588_v20 = vadd.f32 %v10852_v34, %v4230_v32  ;;  %v4468_v37 = vpop.f32.mrb[139].mxu0  ;;  %v13429_v19 = vld [vmem:[#allocation3 + $0x18] sm:$0xff]  ;;  %v13433_v42 = vld [vmem:[#allocation3 + $0x20] sm:$0xff]  ;;  %4751 = vst.msk [vmem:[#allocation3 + $0x51] sm:$0xff] %vm339_vm0, %v4678_v56 }
 0x29f   : > { %v13431_v51 = vld [vmem:[#allocation3 + $0x19] sm:$0xff]  ;;  %v4648_v2 = vld [vmem:[#allocation4 + $0x38] sm:$0xff]  ;;  %v4587_v53 = vadd.f32 %v4468_v37, %v4229_v58  ;;  %10894 = vmatprep.mubr.msk.f32.mxu1 %vm339_vm0, %v13429_v19  ;;  %4750 = vst.msk [vmem:[#allocation3 + $0x49] sm:$0xff] %vm339_vm0, %v4677_v49 }
 0x2a0   : > { %10950 = vmatprep.mubr.msk.f32.mxu0 %vm339_vm0, %v13431_v51  ;;  %v4647_v22 = vld [vmem:[#allocation4 + $0x30] sm:$0xff]  ;;  %4620 = vst.msk [vmem:[#allocation4 + $0x58] sm:$0xff] %vm339_vm0, %v4588_v20  ;;  %10895 = vmatmul.mubr.msk.f32.gmra.mrb[130].mxu1 %vm339_vm0, %v13433_v42  ;;  %v4680_v45 = vmax.f32 %v4648_v2, 0.0 }
 0x2a1   : > { %10951 = vmatmul.mubr.msk.f32.gmra.mrb[162].mxu0 %vm339_vm0, %v13440_v16  ;;  %4619 = vst.msk [vmem:[#allocation4 + $0x50] sm:$0xff] %vm339_vm0, %v4587_v53  ;;  %v10855_v30 = vpop.f32.mrb[140].mxu0  ;;  %v4679_v55 = vmax.f32 %v4647_v22, 0.0  ;;  %v13460_v44 = vld [vmem:[#allocation3 + $0x39] sm:$0xff] }
 0x2a2   : > { %v4590_v63 = vadd.f32 %v10855_v30, %v4232_v26  ;;  %v4478_v3 = vpop.f32.mrb[141].mxu0  ;;  %v13449_v41 = vld [vmem:[#allocation3 + $0x30] sm:$0xff]  ;;  %v13453_v0 = vld [vmem:[#allocation3 + $0x38] sm:$0xff]  ;;  %4753 = vst.msk [vmem:[#allocation3 + $0x69] sm:$0xff] %vm339_vm0, %v4680_v45 }
 0x2a3   : > { %v13451_v46 = vld [vmem:[#allocation3 + $0x31] sm:$0xff]  ;;  %v4589_v38 = vadd.f32 %v4478_v3, %v4231_v36  ;;  %10897 = vmatprep.mubr.msk.f32.mxu1 %vm339_vm0, %v13449_v41  ;;  %4752 = vst.msk [vmem:[#allocation3 + $0x61] sm:$0xff] %vm339_vm0, %v4679_v55 }
 0x2a4   : > { %v4650_v50 = vld [vmem:[#allocation4 + $0x48] sm:$0xff]  ;;  %10953 = vmatprep.mubr.msk.f32.mxu0 %vm339_vm0, %v13451_v46  ;;  %v4649_v40 = vld [vmem:[#allocation4 + $0x40] sm:$0xff]  ;;  %4622 = vst.msk [vmem:[#allocation4 + $0x68] sm:$0xff] %vm339_vm0, %v4590_v63  ;;  %10898 = vmatmul.mubr.msk.f32.gmra.mrb[132].mxu1 %vm339_vm0, %v13453_v0 }
 0x2a5   : > { %10954 = vmatmul.mubr.msk.f32.gmra.mrb[164].mxu0 %vm339_vm0, %v13460_v44  ;;  %v4682_v5 = vmax.f32 %v4650_v50, 0.0  ;;  %4621 = vst.msk [vmem:[#allocation4 + $0x60] sm:$0xff] %vm339_vm0, %v4589_v38  ;;  %v10858_v48 = vpop.f32.mrb[142].mxu0  ;;  %v4681_v57 = vmax.f32 %v4649_v40, 0.0  ;;  %v13480_v10 = vld [vmem:[#allocation3 + $0x51] sm:$0xff] }
 0x2a6   : > { %v4592_v60 = vadd.f32 %v10858_v48, %v4234_v15  ;;  %v4488_v6 = vpop.f32.mrb[143].mxu0  ;;  %v13469_v33 = vld [vmem:[#allocation3 + $0x48] sm:$0xff]  ;;  %v13473_v54 = vld [vmem:[#allocation3 + $0x50] sm:$0xff]  ;;  %v4240_v22 = vld [vmem:[#allocation4 + $0xa8] sm:$0xff] }
 0x2a7   : > { %v13471_v14 = vld [vmem:[#allocation3 + $0x49] sm:$0xff]  ;;  %4755 = vst.msk [vmem:[#allocation3 + $0x81] sm:$0xff] %vm339_vm0, %v4682_v5  ;;  %v4591_v13 = vadd.f32 %v4488_v6, %v4233_v43  ;;  %10900 = vmatprep.mubr.msk.f32.mxu1 %vm339_vm0, %v13469_v33  ;;  %4754 = vst.msk [vmem:[#allocation3 + $0x79] sm:$0xff] %vm339_vm0, %v4681_v57 }
 0x2a8   : > { %v4652_v17 = vld [vmem:[#allocation4 + $0x58] sm:$0xff]  ;;  %10956 = vmatprep.mubr.msk.f32.mxu0 %vm339_vm0, %v13471_v14  ;;  %v4651_v23 = vld [vmem:[#allocation4 + $0x50] sm:$0xff]  ;;  %4624 = vst.msk [vmem:[#allocation4 + $0x78] sm:$0xff] %vm339_vm0, %v4592_v60  ;;  %10901 = vmatmul.mubr.msk.f32.gmra.mrb[134].mxu1 %vm339_vm0, %v13473_v54  ;;  %v4239_v26 = vld [vmem:[#allocation4 + $0xa0] sm:$0xff] }
 0x2a9   : > { %10957 = vmatmul.mubr.msk.f32.gmra.mrb[166].mxu0 %vm339_vm0, %v13480_v10  ;;  %v4684_v18 = vmax.f32 %v4652_v17, 0.0  ;;  %4623 = vst.msk [vmem:[#allocation4 + $0x70] sm:$0xff] %vm339_vm0, %v4591_v13  ;;  %v10861_v61 = vpop.f32.mrb[144].mxu0  ;;  %v4683_v28 = vmax.f32 %v4651_v23, 0.0  ;;  %v13500_v9 = vld [vmem:[#allocation3 + $0x69] sm:$0xff]  ;;  %v4241_v60 = vld [vmem:[#allocation4 + $0xb0] sm:$0xff] }
 0x2aa   : > { %v4594_v27 = vadd.f32 %v10861_v61, %v4236_v24  ;;  %v4498_v4 = vpop.f32.mrb[145].mxu0  ;;  %v13489_v52 = vld [vmem:[#allocation3 + $0x60] sm:$0xff]  ;;  %v13493_v1 = vld [vmem:[#allocation3 + $0x68] sm:$0xff] }
 0x2ab   : > { %v13491_v39 = vld [vmem:[#allocation3 + $0x61] sm:$0xff]  ;;  %4757 = vst.msk [vmem:[#allocation3 + $0x99] sm:$0xff] %vm339_vm0, %v4684_v18  ;;  %v4654_v29 = vld [vmem:[#allocation4 + $0x68] sm:$0xff]  ;;  %v4593_v7 = vadd.f32 %v4498_v4, %v4235_v25  ;;  %10903 = vmatprep.mubr.msk.f32.mxu1 %vm339_vm0, %v13489_v52  ;;  %4756 = vst.msk [vmem:[#allocation3 + $0x91] sm:$0xff] %vm339_vm0, %v4683_v28 }
 0x2ac   : > { %10959 = vmatprep.mubr.msk.f32.mxu0 %vm339_vm0, %v13491_v39  ;;  %v4653_v8 = vld [vmem:[#allocation4 + $0x60] sm:$0xff]  ;;  %4626 = vst.msk [vmem:[#allocation4 + $0x88] sm:$0xff] %vm339_vm0, %v4594_v27  ;;  %10904 = vmatmul.mubr.msk.f32.gmra.mrb[136].mxu1 %vm339_vm0, %v13493_v1  ;;  %v4686_v12 = vmax.f32 %v4654_v29, 0.0  ;;  %v4242_v43 = vld [vmem:[#allocation4 + $0xb8] sm:$0xff]  ;;  %v4244_v29 = vld [vmem:[#allocation4 + $0xc8] sm:$0xff] }
 0x2ad   : > { %10960 = vmatmul.mubr.msk.f32.gmra.mrb[168].mxu0 %vm339_vm0, %v13500_v9  ;;  %4625 = vst.msk [vmem:[#allocation4 + $0x80] sm:$0xff] %vm339_vm0, %v4593_v7  ;;  %v10864_v62 = vpop.f32.mrb[146].mxu0  ;;  %v4685_v11 = vmax.f32 %v4653_v8, 0.0  ;;  %v4243_v8 = vld [vmem:[#allocation4 + $0xc0] sm:$0xff] }
 0x2ae   : > { %v4596_v47 = vadd.f32 %v10864_v62, %v4238_v31  ;;  %v4508_v56 = vpop.f32.mrb[147].mxu0  ;;  %v13509_v32 = vld [vmem:[#allocation3 + $0x78] sm:$0xff]  ;;  %v13513_v58 = vld [vmem:[#allocation3 + $0x80] sm:$0xff]  ;;  %4759 = vst.msk [vmem:[#allocation3 + $0xb1] sm:$0xff] %vm339_vm0, %v4686_v12 }
 0x2af   : > { %v13511_v34 = vld [vmem:[#allocation3 + $0x79] sm:$0xff]  ;;  %v4656_v49 = vld [vmem:[#allocation4 + $0x78] sm:$0xff]  ;;  %v4595_v20 = vadd.f32 %v4508_v56, %v4237_v59  ;;  %10906 = vmatprep.mubr.msk.f32.mxu1 %vm339_vm0, %v13509_v32  ;;  %4758 = vst.msk [vmem:[#allocation3 + $0xa9] sm:$0xff] %vm339_vm0, %v4685_v11 }
 0x2b0   : > { %10962 = vmatprep.mubr.msk.f32.mxu0 %vm339_vm0, %v13511_v34  ;;  %v13520_v37 = vld [vmem:[#allocation3 + $0x81] sm:$0xff]  ;;  %4628 = vst.msk [vmem:[#allocation4 + $0x98] sm:$0xff] %vm339_vm0, %v4596_v47  ;;  %10907 = vmatmul.mubr.msk.f32.gmra.mrb[138].mxu1 %vm339_vm0, %v13513_v58  ;;  %v4688_v53 = vmax.f32 %v4656_v49, 0.0 }
 0x2b1   : > { %v4655_v2 = vld [vmem:[#allocation4 + $0x70] sm:$0xff]  ;;  %10963 = vmatmul.mubr.msk.f32.gmra.mrb[170].mxu0 %vm339_vm0, %v13520_v37  ;;  %4627 = vst.msk [vmem:[#allocation4 + $0x90] sm:$0xff] %vm339_vm0, %v4595_v20  ;;  %v10867_v45 = vpop.f32.mrb[148].mxu0 }
 0x2b2   : > { %v4687_v30 = vmax.f32 %v4655_v2, 0.0  ;;  %v4598_v36 = vadd.f32 %v10867_v45, %v4240_v22  ;;  %v4518_v55 = vpop.f32.mrb[149].mxu0  ;;  %v13529_v63 = vld [vmem:[#allocation3 + $0x90] sm:$0xff]  ;;  %v13533_v50 = vld [vmem:[#allocation3 + $0x98] sm:$0xff]  ;;  %4761 = vst.msk [vmem:[#allocation3 + $0xc9] sm:$0xff] %vm339_vm0, %v4688_v53  ;;  %v4246_v22 = vld [vmem:[#allocation4 + $0xd8] sm:$0xff] }
 0x2b3   : > { %v13531_v3 = vld [vmem:[#allocation3 + $0x91] sm:$0xff]  ;;  %v4597_v40 = vadd.f32 %v4518_v55, %v4239_v26  ;;  %10909 = vmatprep.mubr.msk.f32.mxu1 %vm339_vm0, %v13529_v63  ;;  %v13540_v5 = vld [vmem:[#allocation3 + $0x99] sm:$0xff] }
 0x2b4   : > { %v4658_v38 = vld [vmem:[#allocation4 + $0x88] sm:$0xff]  ;;  %10965 = vmatprep.mubr.msk.f32.mxu0 %vm339_vm0, %v13531_v3  ;;  %4760 = vst.msk [vmem:[#allocation3 + $0xc1] sm:$0xff] %vm339_vm0, %v4687_v30  ;;  %v4657_v15 = vld [vmem:[#allocation4 + $0x80] sm:$0xff]  ;;  %4630 = vst.msk [vmem:[#allocation4 + $0xa8] sm:$0xff] %vm339_vm0, %v4598_v36  ;;  %10910 = vmatmul.mubr.msk.f32.gmra.mrb[140].mxu1 %vm339_vm0, %v13533_v50 }
 0x2b5   : > { %10966 = vmatmul.mubr.msk.f32.gmra.mrb[172].mxu0 %vm339_vm0, %v13540_v5  ;;  %v4690_v48 = vmax.f32 %v4658_v38, 0.0  ;;  %4629 = vst.msk [vmem:[#allocation4 + $0xa0] sm:$0xff] %vm339_vm0, %v4597_v40  ;;  %v10870_v57 = vpop.f32.mrb[150].mxu0  ;;  %v4689_v6 = vmax.f32 %v4657_v15, 0.0  ;;  %v13560_v28 = vld [vmem:[#allocation3 + $0xb1] sm:$0xff]  ;;  %v4245_v26 = vld [vmem:[#allocation4 + $0xd0] sm:$0xff] }
 0x2b6   : > { %v4600_v17 = vadd.f32 %v10870_v57, %v4242_v43  ;;  %v4528_v13 = vpop.f32.mrb[151].mxu0  ;;  %v13549_v23 = vld [vmem:[#allocation3 + $0xa8] sm:$0xff]  ;;  %v13553_v24 = vld [vmem:[#allocation3 + $0xb0] sm:$0xff] }
 0x2b7   : > { %v13551_v18 = vld [vmem:[#allocation3 + $0xa9] sm:$0xff]  ;;  %4763 = vst.msk [vmem:[#allocation3 + $0xe1] sm:$0xff] %vm339_vm0, %v4690_v48  ;;  %v4599_v25 = vadd.f32 %v4528_v13, %v4241_v60  ;;  %10912 = vmatprep.mubr.msk.f32.mxu1 %vm339_vm0, %v13549_v23  ;;  %4762 = vst.msk [vmem:[#allocation3 + $0xd9] sm:$0xff] %vm339_vm0, %v4689_v6 }
 0x2b8   : > { %v4660_v61 = vld [vmem:[#allocation4 + $0x98] sm:$0xff]  ;;  %10968 = vmatprep.mubr.msk.f32.mxu0 %vm339_vm0, %v13551_v18  ;;  %v4659_v27 = vld [vmem:[#allocation4 + $0x90] sm:$0xff]  ;;  %4632 = vst.msk [vmem:[#allocation4 + $0xb8] sm:$0xff] %vm339_vm0, %v4600_v17  ;;  %10913 = vmatmul.mubr.msk.f32.gmra.mrb[142].mxu1 %vm339_vm0, %v13553_v24  ;;  %v4248_v17 = vld [vmem:[#allocation4 + $0xe8] sm:$0xff] }
 0x2b9   : > { %10969 = vmatmul.mubr.msk.f32.gmra.mrb[174].mxu0 %vm339_vm0, %v13560_v28  ;;  %v4692_v4 = vmax.f32 %v4660_v61, 0.0  ;;  %4631 = vst.msk [vmem:[#allocation4 + $0xb0] sm:$0xff] %vm339_vm0, %v4599_v25  ;;  %v10873_v7 = vpop.f32.mrb[152].mxu0  ;;  %v4691_v12 = vmax.f32 %v4659_v27, 0.0  ;;  %v13580_v20 = vld [vmem:[#allocation3 + $0xc9] sm:$0xff] }
 0x2ba   : > { %v4602_v31 = vadd.f32 %v10873_v7, %v4244_v29  ;;  %v4538_v62 = vpop.f32.mrb[153].mxu0  ;;  %v4247_v61 = vld [vmem:[#allocation4 + $0xe0] sm:$0xff] }
 0x2bb   : > { %v13569_v59 = vld [vmem:[#allocation3 + $0xc0] sm:$0xff]  ;;  %v13573_v47 = vld [vmem:[#allocation3 + $0xc8] sm:$0xff]  ;;  %4765 = vst.msk [vmem:[#allocation3 + $0xf9] sm:$0xff] %vm339_vm0, %v4692_v4  ;;  %v4662_v56 = vld [vmem:[#allocation4 + $0xa8] sm:$0xff]  ;;  %v4601_v49 = vadd.f32 %v4538_v62, %v4243_v8 }
 0x2bc   : > { %v13571_v11 = vld [vmem:[#allocation3 + $0xc1] sm:$0xff]  ;;  %10915 = vmatprep.mubr.msk.f32.mxu1 %vm339_vm0, %v13569_v59  ;;  %4764 = vst.msk [vmem:[#allocation3 + $0xf1] sm:$0xff] %vm339_vm0, %v4691_v12  ;;  %v4661_v2 = vld [vmem:[#allocation4 + $0xa0] sm:$0xff]  ;;  %4634 = vst.msk [vmem:[#allocation4 + $0xc8] sm:$0xff] %vm339_vm0, %v4602_v31  ;;  %v4694_v53 = vmax.f32 %v4662_v56, 0.0 }
 0x2bd   : > { %10971 = vmatprep.mubr.msk.f32.mxu0 %vm339_vm0, %v13571_v11  ;;  %10916 = vmatmul.mubr.msk.f32.gmra.mrb[144].mxu1 %vm339_vm0, %v13573_v47  ;;  %4633 = vst.msk [vmem:[#allocation4 + $0xc0] sm:$0xff] %vm339_vm0, %v4601_v49  ;;  %v10876_v45 = vpop.f32.mrb[154].mxu0  ;;  %v4693_v30 = vmax.f32 %v4661_v2, 0.0  ;;  %v4250_v2 = vld [vmem:[#allocation4 + $0xf8] sm:$0xff] }
 0x2be   : > { %10972 = vmatmul.mubr.msk.f32.gmra.mrb[176].mxu0 %vm339_vm0, %v13580_v20  ;;  %v4604_v36 = vadd.f32 %v10876_v45, %v4246_v22  ;;  %v4548_v55 = vpop.f32.mrb[155].mxu0  ;;  %v13589_v38 = vld [vmem:[#allocation3 + $0xd8] sm:$0xff]  ;;  %v13593_v15 = vld [vmem:[#allocation3 + $0xe0] sm:$0xff]  ;;  %4767 = vst.msk [vmem:[#allocation3 + $0x111] sm:$0xff] %vm339_vm0, %v4694_v53 }
 0x2bf   : > { %v13591_v40 = vld [vmem:[#allocation3 + $0xd9] sm:$0xff]  ;;  %v4664_v48 = vld [vmem:[#allocation4 + $0xb8] sm:$0xff]  ;;  %v4603_v43 = vadd.f32 %v4548_v55, %v4245_v26  ;;  %10918 = vmatprep.mubr.msk.f32.mxu1 %vm339_vm0, %v13589_v38  ;;  %4766 = vst.msk [vmem:[#allocation3 + $0x109] sm:$0xff] %vm339_vm0, %v4693_v30 }
 0x2c0   : > { %10974 = vmatprep.mubr.msk.f32.mxu0 %vm339_vm0, %v13591_v40  ;;  %v13600_v57 = vld [vmem:[#allocation3 + $0xe1] sm:$0xff]  ;;  %4636 = vst.msk [vmem:[#allocation4 + $0xd8] sm:$0xff] %vm339_vm0, %v4604_v36  ;;  %v4696_v6 = vmax.f32 %v4664_v48, 0.0 }
 0x2c1   : > { %v4663_v60 = vld [vmem:[#allocation4 + $0xb0] sm:$0xff]  ;;  %10919 = vmatmul.mubr.msk.f32.gmra.mrb[146].mxu1 %vm339_vm0, %v13593_v15  ;;  %4635 = vst.msk [vmem:[#allocation4 + $0xd0] sm:$0xff] %vm339_vm0, %v4603_v43  ;;  %v10879_v13 = vpop.f32.mrb[156].mxu0 }
 0x2c2   : > { %10975 = vmatmul.mubr.msk.f32.gmra.mrb[178].mxu0 %vm339_vm0, %v13600_v57  ;;  %v4695_v25 = vmax.f32 %v4663_v60, 0.0  ;;  %v4606_v27 = vadd.f32 %v10879_v13, %v4248_v17  ;;  %v4558_v4 = vpop.f32.mrb[157].mxu0  ;;  %4769 = vst.msk [vmem:[#allocation3 + $0x129] sm:$0xff] %vm339_vm0, %v4696_v6  ;;  %v13620_v62 = vld [vmem:[#allocation3 + $0xf9] sm:$0xff] }
 0x2c3   : > { %v13609_v29 = vld [vmem:[#allocation3 + $0xf0] sm:$0xff]  ;;  %v13613_v8 = vld [vmem:[#allocation3 + $0xf8] sm:$0xff]  ;;  %v4605_v31 = vadd.f32 %v4558_v4, %v4247_v61  ;;  %14755 = vst [vmem:[#allocation38_spill] sm:$0xff] %v13620_v62  ;;  %v4249_v22 = vld [vmem:[#allocation4 + $0xf0] sm:$0xff] }
 0x2c4   : > { %v13611_v7 = vld [vmem:[#allocation3 + $0xf1] sm:$0xff]  ;;  %10921 = vmatprep.mubr.msk.f32.mxu1 %vm339_vm0, %v13609_v29  ;;  %4768 = vst.msk [vmem:[#allocation3 + $0x121] sm:$0xff] %vm339_vm0, %v4695_v25  ;;  %4638 = vst.msk [vmem:[#allocation4 + $0xe8] sm:$0xff] %vm339_vm0, %v4606_v27 }
 0x2c5   : > { %v4666_v12 = vld [vmem:[#allocation4 + $0xc8] sm:$0xff]  ;;  %10977 = vmatprep.mubr.msk.f32.mxu0 %vm339_vm0, %v13611_v7  ;;  %v4665_v56 = vld [vmem:[#allocation4 + $0xc0] sm:$0xff]  ;;  %10922 = vmatmul.mubr.msk.f32.gmra.mrb[148].mxu1 %vm339_vm0, %v13613_v8  ;;  %4637 = vst.msk [vmem:[#allocation4 + $0xe0] sm:$0xff] %vm339_vm0, %v4605_v31  ;;  %v10882_v53 = vpop.f32.mrb[158].mxu0 }
 0x2c6   : > { %10978 = vmatmul.mubr.msk.f32.gmra.mrb[180].mxu0 %vm339_vm0, %v13620_v62  ;;  %v4698_v49 = vmax.f32 %v4666_v12, 0.0  ;;  %v4697_v45 = vmax.f32 %v4665_v56, 0.0  ;;  %v4608_v26 = vadd.f32 %v10882_v53, %v4250_v2  ;;  %v4568_v30 = vpop.f32.mrb[159].mxu0  ;;  %v13629_v36 = vld [vmem:[#allocation3 + $0x108] sm:$0xff]  ;;  %v13633_v48 = vld [vmem:[#allocation3 + $0x110] sm:$0xff]  ;;  %v8061_v62 = vld [vmem:[#allocation11 + $0xe8] sm:$0xff] }
 0x2c7   : > { %v13631_v55 = vld [vmem:[#allocation3 + $0x109] sm:$0xff]  ;;  %v4607_v60 = vadd.f32 %v4568_v30, %v4249_v22  ;;  %10924 = vmatprep.mubr.msk.f32.mxu1 %vm339_vm0, %v13629_v36  ;;  %v13640_v6 = vld [vmem:[#allocation3 + $0x111] sm:$0xff] }
 0x2c8   : > { %14756 = vst [vmem:[#allocation39_spill] sm:$0xff] %v13631_v55  ;;  %4771 = vst.msk [vmem:[#allocation3 + $0x141] sm:$0xff] %vm339_vm0, %v4698_v49  ;;  %v4668_v43 = vld [vmem:[#allocation4 + $0xd8] sm:$0xff]  ;;  %10980 = vmatprep.mubr.msk.f32.mxu0 %vm339_vm0, %v13631_v55  ;;  %v4667_v17 = vld [vmem:[#allocation4 + $0xd0] sm:$0xff] }
 0x2c9   : > { %14757 = vst [vmem:[#allocation40_spill] sm:$0xff] %v13640_v6  ;;  %4770 = vst.msk [vmem:[#allocation3 + $0x139] sm:$0xff] %vm339_vm0, %v4697_v45  ;;  %10925 = vmatmul.mubr.msk.f32.gmra.mrb[150].mxu1 %vm339_vm0, %v13633_v48  ;;  %v4700_v13 = vmax.f32 %v4668_v43, 0.0  ;;  %v4699_v61 = vmax.f32 %v4667_v17, 0.0  ;;  %v13660_v31 = vld [vmem:[#allocation3 + $0x129] sm:$0xff]  ;;  %v13725_v55 = vld [vmem:[#allocation3 + $0x1a] sm:$0xff] }
 0x2ca   : > { %4640 = vst.msk [vmem:[#allocation4 + $0xf8] sm:$0xff] %vm339_vm0, %v4608_v26  ;;  %10981 = vmatmul.mubr.msk.f32.gmra.mrb[182].mxu0 %vm339_vm0, %v13640_v6  ;;  %4639 = vst.msk [vmem:[#allocation4 + $0xf0] sm:$0xff] %vm339_vm0, %v4607_v60  ;;  %v7607_v6 = vld [vmem:[#allocation11 + $0xc8] sm:$0xff] }
 0x2cb   : > { %v13649_v25 = vld [vmem:[#allocation3 + $0x120] sm:$0xff]  ;;  %v13653_v4 = vld [vmem:[#allocation3 + $0x128] sm:$0xff]  ;;  %4773 = vst.msk [vmem:[#allocation3 + $0x159] sm:$0xff] %vm339_vm0, %v4700_v13  ;;  %v4670_v12 = vld [vmem:[#allocation4 + $0xe8] sm:$0xff] }
 0x2cc   : > { %v13651_v27 = vld [vmem:[#allocation3 + $0x121] sm:$0xff]  ;;  %10927 = vmatprep.mubr.msk.f32.mxu1 %vm339_vm0, %v13649_v25  ;;  %14759 = vst [vmem:[#allocation42_spill] sm:$0xff] %v13660_v31  ;;  %4772 = vst.msk [vmem:[#allocation3 + $0x151] sm:$0xff] %vm339_vm0, %v4699_v61  ;;  %v4669_v56 = vld [vmem:[#allocation4 + $0xe0] sm:$0xff]  ;;  %v4702_v49 = vmax.f32 %v4670_v12, 0.0 }
 0x2cd   : > { %14758 = vst [vmem:[#allocation41_spill] sm:$0xff] %v13651_v27  ;;  %10983 = vmatprep.mubr.msk.f32.mxu0 %vm339_vm0, %v13651_v27  ;;  %10928 = vmatmul.mubr.msk.f32.gmra.mrb[152].mxu1 %vm339_vm0, %v13653_v4  ;;  %v4701_v2 = vmax.f32 %v4669_v56, 0.0  ;;  %v7606_v27 = vld [vmem:[#allocation11 + $0xc0] sm:$0xff] }
 0x2ce   : > { %10984 = vmatmul.mubr.msk.f32.gmra.mrb[184].mxu0 %vm339_vm0, %v13660_v31  ;;  %4775 = vst.msk [vmem:[#allocation3 + $0x171] sm:$0xff] %vm339_vm0, %v4702_v49  ;;  %v5724_v49 = vld [vmem:[#allocation3 + $0x2] sm:$0xff] }
 0x2cf   : > { %v13678_v30 = vld [vmem:[#allocation3 + $0x141] sm:$0xff]  ;;  %4774 = vst.msk [vmem:[#allocation3 + $0x169] sm:$0xff] %vm339_vm0, %v4701_v2 }
 0x2d0   : > { %v13667_v53 = vld [vmem:[#allocation3 + $0x138] sm:$0xff]  ;;  %v13671_v45 = vld [vmem:[#allocation3 + $0x140] sm:$0xff]  ;;  %14761 = vst [vmem:[#allocation46_spill] sm:$0xff] %v13678_v30 }
 0x2d1   : > { %v13669_v22 = vld [vmem:[#allocation3 + $0x139] sm:$0xff]  ;;  %v4672_v26 = vld [vmem:[#allocation4 + $0xf8] sm:$0xff]  ;;  %10930 = vmatprep.mubr.msk.f32.mxu1 %vm339_vm0, %v13667_v53 }
 0x2d2   : > { %14760 = vst [vmem:[#allocation44_spill] sm:$0xff] %v13669_v22  ;;  %10986 = vmatprep.mubr.msk.f32.mxu0 %vm339_vm0, %v13669_v22  ;;  %v4671_v43 = vld [vmem:[#allocation4 + $0xf0] sm:$0xff]  ;;  %10931 = vmatmul.mubr.msk.f32.gmra.mrb[154].mxu1 %vm339_vm0, %v13671_v45  ;;  %v4704_v60 = vmax.f32 %v4672_v26, 0.0  ;;  %v5725_v22 = vld [vmem:[#allocation3 + $0xa] sm:$0xff] }
 0x2d3   : > { %10987 = vmatmul.mubr.msk.f32.gmra.mrb[186].mxu0 %vm339_vm0, %v13678_v30  ;;  %v4703_v17 = vmax.f32 %v4671_v43, 0.0  ;;  %v13685_v13 = vld [vmem:[#allocation3 + $0x150] sm:$0xff]  ;;  %v13689_v12 = vld [vmem:[#allocation3 + $0x158] sm:$0xff]  ;;  %v7154_v30 = vld [vmem:[#allocation11 + $0xb8] sm:$0xff] }
 0x2d4   : > { %v13687_v61 = vld [vmem:[#allocation3 + $0x151] sm:$0xff]  ;;  %4777 = vst.msk [vmem:[#allocation3 + $0x189] sm:$0xff] %vm339_vm0, %v4704_v60  ;;  %10933 = vmatprep.mubr.msk.f32.mxu1 %vm339_vm0, %v13685_v13  ;;  %v13696_v56 = vld [vmem:[#allocation3 + $0x159] sm:$0xff] }
 0x2d5   : > { %14762 = vst [vmem:[#allocation19_spill] sm:$0xff] %v13687_v61  ;;  %10989 = vmatprep.mubr.msk.f32.mxu0 %vm339_vm0, %v13687_v61  ;;  %14763 = vst [vmem:[#allocation20_spill] sm:$0xff] %v13696_v56  ;;  %v13713_v60 = vld [vmem:[#allocation3 + $0x171] sm:$0xff]  ;;  %v7153_v61 = vld [vmem:[#allocation11 + $0xb0] sm:$0xff] }
 0x2d6   : > { %4776 = vst.msk [vmem:[#allocation3 + $0x181] sm:$0xff] %vm339_vm0, %v4703_v17  ;;  %10934 = vmatmul.mubr.msk.f32.gmra.mrb[156].mxu1 %vm339_vm0, %v13689_v12  ;;  %v13703_v2 = vld [vmem:[#allocation3 + $0x168] sm:$0xff]  ;;  %v13707_v43 = vld [vmem:[#allocation3 + $0x170] sm:$0xff]  ;;  %14765 = vst [vmem:[#allocation22_spill] sm:$0xff] %v13713_v60 }
 0x2d7   : > { %10990 = vmatmul.mubr.msk.f32.gmra.mrb[188].mxu0 %vm339_vm0, %v13696_v56  ;;  %v13705_v26 = vld [vmem:[#allocation3 + $0x169] sm:$0xff]  ;;  %10936 = vmatprep.mubr.msk.f32.mxu1 %vm339_vm0, %v13703_v2  ;;  %v6699_v17 = vld [vmem:[#allocation11 + $0x90] sm:$0xff] }
 0x2d8   : > { %14764 = vst [vmem:[#allocation21_spill] sm:$0xff] %v13705_v26  ;;  %10992 = vmatprep.mubr.msk.f32.mxu0 %vm339_vm0, %v13705_v26  ;;  %v6700_v56 = vld [vmem:[#allocation11 + $0x98] sm:$0xff]  ;;  %v11503_v26 = vpack.c.bf16 %v7154_v30, %v7153_v61  ;;  %v13743_v30 = vld [vmem:[#allocation3 + $0x32] sm:$0xff] }
 0x2d9   : > { %v11495_v31 = vpack.c.bf16 %v6700_v56, %v6699_v17 }
 0x2da   : > { %10937 = vmatmul.mubr.msk.f32.gmra.mrb[158].mxu1 %vm339_vm0, %v13707_v43 }
 0x2db   : > { %10993 = vmatmul.mubr.msk.f32.gmra.mrb[190].mxu0 %vm339_vm0, %v13713_v60  ;;  %11003 = vmatprep.mubr.msk.f32.mxu1 %vm339_vm0, %v5724_v49  ;;  %v8060_v60 = vld [vmem:[#allocation11 + $0xe0] sm:$0xff]  ;;  %v13834_v49 = vld [vmem:[#allocation3 + $0x9a] sm:$0xff] }
 0x2dc   : > { %11059 = vmatprep.mubr.msk.f32.mxu0 %vm339_vm0, %v13429_v19  ;;  %v13733_v19 = vld [vmem:[#allocation3 + $0x22] sm:$0xff] }
 0x2de   : > { %11004 = vmatmul.mubr.msk.f32.vlgmr.msra.gmra.mrb[160].mxu1 %vm339_vm0, %v5725_v22  ;;  %v13735_v22 = vpack.c.bf16 %v7607_v6, %v7606_v27  ;;  %v13828_v6 = vld [vmem:[#allocation3 + $0x92] sm:$0xff] }
 0x2df   : > { %11060 = vmatmul.mubr.msk.f32.vlgmr.msra.gmra.mrb[192].mxu0 %vm339_vm0, %v13433_v42  ;;  %11006 = vmatprep.mubr.msk.f32.mxu1 %vm339_vm0, %v13725_v55  ;;  %v13737_v42 = vpack.c.bf16 %v8061_v62, %v8060_v60  ;;  %v13860_v60 = vld [vmem:[#allocation3 + $0xca] sm:$0xff] }
 0x2e0   : > { %11062 = vmatprep.mubr.msk.f32.mxu0 %vm339_vm0, %v13449_v41  ;;  %11494 = vmatpush3.bf16.msra.mxu1 %v13359_v35  ;;  %v13749_v35 = vld [vmem:[#allocation3 + $0x3a] sm:$0xff]  ;;  %v13763_v41 = vld [vmem:[#allocation3 + $0x52] sm:$0xff] }
 0x2e1   : > { %11502 = vmatpush3.bf16.msra.mxu0 %v13415_v21  ;;  %11496 = vmatprep.subr.bf16.mxu1 %v11495_v31  ;;  %v13757_v21 = vld [vmem:[#allocation3 + $0x4a] sm:$0xff] }
 0x2e2   : > { %11504 = vmatprep.subr.bf16.mxu0 %v11503_v26  ;;  %11007 = vmatmul.mubr.msk.f32.gmra.mrb[162].mxu1 %vm339_vm0, %v13733_v19 }
 0x2e3   : > { %11063 = vmatmul.mubr.msk.f32.gmra.mrb[194].mxu0 %vm339_vm0, %v13453_v0  ;;  %11009 = vmatprep.mubr.msk.f32.mxu1 %vm339_vm0, %v13743_v30  ;;  %v13769_v0 = vld [vmem:[#allocation3 + $0x62] sm:$0xff] }
 0x2e4   : > { %11065 = vmatprep.mubr.msk.f32.mxu0 %vm339_vm0, %v13469_v33  ;;  %11498 = vmatpush3.bf16.msra.mxu1 %v11495_v31  ;;  %v9434_v33 = vld [vmem:[%s14625_s5] ss:$0 sm:$0xff] }
 0x2e5   : > { %11506 = vmatpush3.bf16.msra.mxu0 %v11503_v26  ;;  %11508 = vmatprep.subr.bf16.mxu1 %v13735_v22  ;;  %4786 = vst.msk [vmem:[#allocation4 + $0x8] sm:$0xff] %vm339_vm0, %v9434_v33  ;;  %4785 = vst.msk [vmem:[#allocation4] sm:$0xff] %vm339_vm0, %v9434_v33  ;;  %v13848_v26 = vld [vmem:[#allocation3 + $0xb2] sm:$0xff] }
 0x2e6   : > { %11516 = vmatprep.subr.bf16.mxu0 %v13737_v42  ;;  %11010 = vmatmul.mubr.msk.f32.gmra.mrb[164].mxu1 %vm339_vm0, %v13749_v35  ;;  %4787 = vst.msk [vmem:[#allocation4 + $0x10] sm:$0xff] %vm339_vm0, %v9434_v33  ;;  %4788 = vst.msk [vmem:[#allocation4 + $0x18] sm:$0xff] %vm339_vm0, %v9434_v33 }
 0x2e7   : > { %11066 = vmatmul.mubr.msk.f32.gmra.mrb[196].mxu0 %vm339_vm0, %v13473_v54  ;;  %11012 = vmatprep.mubr.msk.f32.mxu1 %vm339_vm0, %v13757_v21  ;;  %4789 = vst.msk [vmem:[#allocation4 + $0x20] sm:$0xff] %vm339_vm0, %v9434_v33  ;;  %4790 = vst.msk [vmem:[#allocation4 + $0x28] sm:$0xff] %vm339_vm0, %v9434_v33  ;;  %v13810_v54 = vld [vmem:[#allocation3 + $0x6a] sm:$0xff] }
 0x2e8   : > { %11068 = vmatprep.mubr.msk.f32.mxu0 %vm339_vm0, %v13489_v52  ;;  %4791 = vst.msk [vmem:[#allocation4 + $0x30] sm:$0xff] %vm339_vm0, %v9434_v33  ;;  %4792 = vst.msk [vmem:[#allocation4 + $0x38] sm:$0xff] %vm339_vm0, %v9434_v33  ;;  %v13816_v52 = vld [vmem:[#allocation3 + $0x7a] sm:$0xff] }
 0x2e9   : > { %4793 = vst.msk [vmem:[#allocation4 + $0x40] sm:$0xff] %vm339_vm0, %v9434_v33  ;;  %4794 = vst.msk [vmem:[#allocation4 + $0x48] sm:$0xff] %vm339_vm0, %v9434_v33 }
 0x2ea   : > { %11013 = vmatmul.mubr.msk.f32.gmra.mrb[166].mxu1 %vm339_vm0, %v13763_v41  ;;  %4795 = vst.msk [vmem:[#allocation4 + $0x50] sm:$0xff] %vm339_vm0, %v9434_v33  ;;  %4796 = vst.msk [vmem:[#allocation4 + $0x58] sm:$0xff] %vm339_vm0, %v9434_v33 }
 0x2eb   : > { %11069 = vmatmul.mubr.msk.f32.gmra.mrb[198].mxu0 %vm339_vm0, %v13493_v1  ;;  %11015 = vmatprep.mubr.msk.f32.mxu1 %vm339_vm0, %v13769_v0  ;;  %4797 = vst.msk [vmem:[#allocation4 + $0x60] sm:$0xff] %vm339_vm0, %v9434_v33  ;;  %4798 = vst.msk [vmem:[#allocation4 + $0x68] sm:$0xff] %vm339_vm0, %v9434_v33  ;;  %v10893_v1 = vpop.f32.mrb[128].mxu1 }
 0x2ec   : > { %11071 = vmatprep.mubr.msk.f32.mxu0 %vm339_vm0, %v13509_v32  ;;  %4799 = vst.msk [vmem:[#allocation4 + $0x70] sm:$0xff] %vm339_vm0, %v9434_v33  ;;  %4800 = vst.msk [vmem:[#allocation4 + $0x78] sm:$0xff] %vm339_vm0, %v9434_v33  ;;  %v13822_v32 = vld [vmem:[#allocation3 + $0x82] sm:$0xff]  ;;  %v5047_v62 = vpop.f32.mrb[129].mxu1  ;;  %v4849_v27 = vld [vmem:[#allocation4] sm:$0xff] }
 0x2ed   : > { %4801 = vst.msk [vmem:[#allocation4 + $0x80] sm:$0xff] %vm339_vm0, %v9434_v33  ;;  %4802 = vst.msk [vmem:[#allocation4 + $0x88] sm:$0xff] %vm339_vm0, %v9434_v33  ;;  %v5206_v56 = vadd.f32 %v5047_v62, %v4849_v27  ;;  %v13892_v62 = vld [vmem:[#allocation3 + $0x10a] sm:$0xff]  ;;  %v8062_v27 = vld [vmem:[#allocation11 + $0xf0] sm:$0xff] }
 0x2ee   : > { %4803 = vst.msk [vmem:[#allocation4 + $0x90] sm:$0xff] %vm339_vm0, %v9434_v33  ;;  %4804 = vst.msk [vmem:[#allocation4 + $0x98] sm:$0xff] %vm339_vm0, %v9434_v33  ;;  %11016 = vmatmul.mubr.msk.f32.gmra.mrb[168].mxu1 %vm339_vm0, %v13810_v54 }
 0x2ef   : > { %4805 = vst.msk [vmem:[#allocation4 + $0xa0] sm:$0xff] %vm339_vm0, %v9434_v33  ;;  %4806 = vst.msk [vmem:[#allocation4 + $0xa8] sm:$0xff] %vm339_vm0, %v9434_v33  ;;  %11072 = vmatmul.mubr.msk.f32.gmra.mrb[200].mxu0 %vm339_vm0, %v13513_v58  ;;  %11018 = vmatprep.mubr.msk.f32.mxu1 %vm339_vm0, %v13816_v52  ;;  %v10949_v58 = vpop.f32.mrb[160].mxu0 }
 0x2f0   : > { %4807 = vst.msk [vmem:[#allocation4 + $0xb0] sm:$0xff] %vm339_vm0, %v9434_v33  ;;  %4808 = vst.msk [vmem:[#allocation4 + $0xb8] sm:$0xff] %vm339_vm0, %v9434_v33  ;;  %11074 = vmatprep.mubr.msk.f32.mxu0 %vm339_vm0, %v13529_v63  ;;  %v4850_v63 = vld [vmem:[#allocation4 + $0x8] sm:$0xff]  ;;  %v5501_v31 = vpop.f32.mrb[161].mxu0 }
 0x2f1   : > { %4809 = vst.msk [vmem:[#allocation4 + $0xc0] sm:$0xff] %vm339_vm0, %v9434_v33  ;;  %4810 = vst.msk [vmem:[#allocation4 + $0xc8] sm:$0xff] %vm339_vm0, %v9434_v33  ;;  %v5207_v61 = vadd.f32 %v10893_v1, %v4850_v63  ;;  %v7608_v63 = vld [vmem:[#allocation11 + $0xd0] sm:$0xff] }
 0x2f2   : > { %4811 = vst.msk [vmem:[#allocation4 + $0xd0] sm:$0xff] %vm339_vm0, %v9434_v33  ;;  %4812 = vst.msk [vmem:[#allocation4 + $0xd8] sm:$0xff] %vm339_vm0, %v9434_v33  ;;  %11019 = vmatmul.mubr.msk.f32.gmra.mrb[170].mxu1 %vm339_vm0, %v13822_v32 }
 0x2f3   : > { %4813 = vst.msk [vmem:[#allocation4 + $0xe0] sm:$0xff] %vm339_vm0, %v9434_v33  ;;  %4814 = vst.msk [vmem:[#allocation4 + $0xe8] sm:$0xff] %vm339_vm0, %v9434_v33  ;;  %11075 = vmatmul.mubr.msk.f32.gmra.mrb[202].mxu0 %vm339_vm0, %v13533_v50  ;;  %11021 = vmatprep.mubr.msk.f32.mxu1 %vm339_vm0, %v13828_v6  ;;  %v13840_v50 = vld [vmem:[#allocation3 + $0xaa] sm:$0xff] }
 0x2f4   : > { %4815 = vst.msk [vmem:[#allocation4 + $0xf0] sm:$0xff] %vm339_vm0, %v9434_v33  ;;  %4816 = vst.msk [vmem:[#allocation4 + $0xf8] sm:$0xff] %vm339_vm0, %v9434_v33  ;;  %11077 = vmatprep.mubr.msk.f32.mxu0 %vm339_vm0, %v13549_v23  ;;  %v13866_v33 = vld [vmem:[#allocation3 + $0xda] sm:$0xff] }
 0x2f5   : > { %5239 = vst.msk [vmem:[#allocation4 + $0x8] sm:$0xff] %vm339_vm0, %v5207_v61  ;;  %5238 = vst.msk [vmem:[#allocation4] sm:$0xff] %vm339_vm0, %v5206_v56 }
 0x2f6   : > { %11022 = vmatmul.mubr.msk.f32.gmra.mrb[172].mxu1 %vm339_vm0, %v13834_v49 }
 0x2f7   : > { %11078 = vmatmul.mubr.msk.f32.gmra.mrb[204].mxu0 %vm339_vm0, %v13553_v24  ;;  %11024 = vmatprep.mubr.msk.f32.mxu1 %vm339_vm0, %v13840_v50  ;;  %v13854_v24 = vld [vmem:[#allocation3 + $0xc2] sm:$0xff] }
 0x2f8   : > { %11080 = vmatprep.mubr.msk.f32.mxu0 %vm339_vm0, %v13569_v59 }
 0x2fa   : > { %11025 = vmatmul.mubr.msk.f32.gmra.mrb[174].mxu1 %vm339_vm0, %v13848_v26 }
 0x2fb   : > { %11081 = vmatmul.mubr.msk.f32.gmra.mrb[206].mxu0 %vm339_vm0, %v13573_v47  ;;  %11027 = vmatprep.mubr.msk.f32.mxu1 %vm339_vm0, %v13854_v24 }
 0x2fc   : > { %11083 = vmatprep.mubr.msk.f32.mxu0 %vm339_vm0, %v13589_v38  ;;  %v5303_v17 = vld [vmem:[#allocation4 + $0x8] sm:$0xff]  ;;  %v5302_v59 = vld [vmem:[#allocation4] sm:$0xff]  ;;  %v13874_v38 = vld [vmem:[#allocation3 + $0xe2] sm:$0xff] }
 0x2fd   : > { %v5661_v47 = vadd.f32 %v10949_v58, %v5303_v17  ;;  %v5660_v1 = vadd.f32 %v5501_v31, %v5302_v59  ;;  %v13942_v58 = vld [vmem:[#allocation3 + $0x180] sm:$0xff]  ;;  %v8063_v31 = vld [vmem:[#allocation11 + $0xf8] sm:$0xff]  ;;  %v8514_v17 = vld [vmem:[#allocation11 + $0x100] sm:$0xff] }
 0x2fe   : > { %11028 = vmatmul.mubr.msk.f32.gmra.mrb[176].mxu1 %vm339_vm0, %v13860_v60  ;;  %v11519_v56 = vpack.c.bf16 %v8063_v31, %v8062_v27  ;;  %v8515_v59 = vld [vmem:[#allocation11 + $0x108] sm:$0xff]  ;;  %v4853_v27 = vld [vmem:[#allocation4 + $0x20] sm:$0xff] }
 0x2ff   : > { %11084 = vmatmul.mubr.msk.f32.gmra.mrb[208].mxu0 %vm339_vm0, %v13593_v15  ;;  %11030 = vmatprep.mubr.msk.f32.mxu1 %vm339_vm0, %v13866_v33  ;;  %5693 = vst.msk [vmem:[#allocation4 + $0x8] sm:$0xff] %vm339_vm0, %v5661_v47  ;;  %5692 = vst.msk [vmem:[#allocation4] sm:$0xff] %vm339_vm0, %v5660_v1  ;;  %v13880_v15 = vld [vmem:[#allocation3 + $0xf2] sm:$0xff] }
 0x300   : > { %11086 = vmatprep.mubr.msk.f32.mxu0 %vm339_vm0, %v13609_v29  ;;  %v13886_v29 = vld [vmem:[#allocation3 + $0xfa] sm:$0xff] }
 0x301   : > { %v7550_v47 = vld [vmem:[#allocation3 + $0x98] sm:$0xff] }
 0x302   : > { %11031 = vmatmul.mubr.msk.f32.gmra.mrb[178].mxu1 %vm339_vm0, %v13874_v38  ;;  %v8004_v1 = vld [vmem:[#allocation3 + $0x99] sm:$0xff] }
 0x303   : > { %11087 = vmatmul.mubr.msk.f32.gmra.mrb[210].mxu0 %vm339_vm0, %v13613_v8  ;;  %11033 = vmatprep.mubr.msk.f32.mxu1 %vm339_vm0, %v13880_v15  ;;  %v13898_v8 = vld [vmem:[#allocation3 + $0x112] sm:$0xff] }
 0x304   : > { %11089 = vmatprep.mubr.msk.f32.mxu0 %vm339_vm0, %v13629_v36  ;;  %v13904_v36 = vld [vmem:[#allocation3 + $0x122] sm:$0xff] }
 0x306   : > { %11034 = vmatmul.mubr.msk.f32.gmra.mrb[180].mxu1 %vm339_vm0, %v13886_v29 }
 0x307   : > { %11090 = vmatmul.mubr.msk.f32.gmra.mrb[212].mxu0 %vm339_vm0, %v13633_v48  ;;  %11036 = vmatprep.mubr.msk.f32.mxu1 %vm339_vm0, %v13892_v62  ;;  %v13910_v48 = vld [vmem:[#allocation3 + $0x12a] sm:$0xff] }
 0x308   : > { %11092 = vmatprep.mubr.msk.f32.mxu0 %vm339_vm0, %v13649_v25  ;;  %v13916_v25 = vld [vmem:[#allocation3 + $0x13a] sm:$0xff] }
 0x30a   : > { %11037 = vmatmul.mubr.msk.f32.gmra.mrb[182].mxu1 %vm339_vm0, %v13898_v8 }
 0x30b   : > { %11093 = vmatmul.mubr.msk.f32.gmra.mrb[214].mxu0 %vm339_vm0, %v13653_v4  ;;  %11039 = vmatprep.mubr.msk.f32.mxu1 %vm339_vm0, %v13904_v36  ;;  %v13922_v4 = vld [vmem:[#allocation3 + $0x142] sm:$0xff] }
 0x30c   : > { %11095 = vmatprep.mubr.msk.f32.mxu0 %vm339_vm0, %v13667_v53  ;;  %v13928_v53 = vld [vmem:[#allocation3 + $0x152] sm:$0xff] }
 0x30e   : > { %11040 = vmatmul.mubr.msk.f32.gmra.mrb[184].mxu1 %vm339_vm0, %v13910_v48 }
 0x30f   : > { %11096 = vmatmul.mubr.msk.f32.gmra.mrb[216].mxu0 %vm339_vm0, %v13671_v45  ;;  %11042 = vmatprep.mubr.msk.f32.mxu1 %vm339_vm0, %v13916_v25  ;;  %v13934_v45 = vld [vmem:[#allocation3 + $0x15a] sm:$0xff] }
 0x310   : > { %11098 = vmatprep.mubr.msk.f32.mxu0 %vm339_vm0, %v13685_v13  ;;  %v13940_v13 = vld [vmem:[#allocation3 + $0x16a] sm:$0xff] }
 0x312   : > { %11043 = vmatmul.mubr.msk.f32.gmra.mrb[186].mxu1 %vm339_vm0, %v13922_v4 }
 0x313   : > { %11099 = vmatmul.mubr.msk.f32.gmra.mrb[218].mxu0 %vm339_vm0, %v13689_v12  ;;  %11045 = vmatprep.mubr.msk.f32.mxu1 %vm339_vm0, %v13928_v53  ;;  %v13948_v12 = vld [vmem:[#allocation3 + $0x172] sm:$0xff] }
 0x314   : > { %11101 = vmatprep.mubr.msk.f32.mxu0 %vm339_vm0, %v13703_v2  ;;  %v13950_v2 = vld [vmem:[#allocation3 + $0x188] sm:$0xff] }
 0x316   : > { %11046 = vmatmul.mubr.msk.f32.gmra.mrb[188].mxu1 %vm339_vm0, %v13934_v45 }
 0x317   : > { %11102 = vmatmul.mubr.msk.f32.gmra.mrb[220].mxu0 %vm339_vm0, %v13707_v43  ;;  %11048 = vmatprep.mubr.msk.f32.mxu1 %vm339_vm0, %v13940_v13  ;;  %v7609_v43 = vld [vmem:[#allocation11 + $0xd8] sm:$0xff] }
 0x318   : > { %11104 = vmatprep.mubr.msk.f32.mxu0 %vm339_vm0, %v13942_v58  ;;  %v11511_v61 = vpack.c.bf16 %v7609_v43, %v7608_v63  ;;  %v4854_v43 = vld [vmem:[#allocation4 + $0x28] sm:$0xff] }
 0x31a   : > { %11049 = vmatmul.mubr.msk.f32.gmra.mrb[190].mxu1 %vm339_vm0, %v13948_v12 }
 0x31b   : > { %11105 = vmatmul.mubr.msk.f32.gmra.mrb[222].mxu0 %vm339_vm0, %v13950_v2  ;;  %11115 = vmatprep.mubr.msk.f32.mxu1 %vm339_vm0, %v13431_v51  ;;  %v13970_v51 = vpack.c.bf16 %v8515_v59, %v8514_v17  ;;  %v8010_v17 = vld [vmem:[#allocation3 + $0xe1] sm:$0xff] }
 0x31c   : > { %11171 = vmatprep.mubr.msk.f32.mxu0 %vm339_vm0, %v13725_v55  ;;  %v8516_v55 = vld [vmem:[#allocation11 + $0x110] sm:$0xff] }
 0x31e   : > { %11116 = vmatmul.mubr.msk.f32.vlgmr.msra.gmra.mrb[192].mxu1 %vm339_vm0, %v13440_v16  ;;  %v14766_v16 = vld [vmem:[#allocation38_spill] sm:$0xff] }
 0x31f   : > { %11172 = vmatmul.mubr.msk.f32.vlgmr.msra.gmra.mrb[224].mxu0 %vm339_vm0, %v13733_v19  ;;  %11118 = vmatprep.mubr.msk.f32.mxu1 %vm339_vm0, %v13451_v46  ;;  %v14767_v46 = vld [vmem:[#allocation39_spill] sm:$0xff]  ;;  %v8517_v19 = vld [vmem:[#allocation11 + $0x118] sm:$0xff] }
 0x320   : > { %11174 = vmatprep.mubr.msk.f32.mxu0 %vm339_vm0, %v13743_v30  ;;  %11510 = vmatpush3.bf16.msra.mxu1 %v13735_v22  ;;  %v7542_v22 = vld [vmem:[#allocation3 + $0x38] sm:$0xff]  ;;  %v11527_v30 = vpack.c.bf16 %v8517_v19, %v8516_v55 }
 0x321   : > { %11518 = vmatpush3.bf16.msra.mxu0 %v13737_v42  ;;  %11512 = vmatprep.subr.bf16.mxu1 %v11511_v61  ;;  %v7996_v42 = vld [vmem:[#allocation3 + $0x39] sm:$0xff] }
 0x322   : > { %11520 = vmatprep.subr.bf16.mxu0 %v11519_v56  ;;  %11119 = vmatmul.mubr.msk.f32.gmra.mrb[194].mxu1 %vm339_vm0, %v13460_v44  ;;  %v14768_v44 = vld [vmem:[#allocation40_spill] sm:$0xff] }
 0x323   : > { %11175 = vmatmul.mubr.msk.f32.gmra.mrb[226].mxu0 %vm339_vm0, %v13749_v35  ;;  %11121 = vmatprep.mubr.msk.f32.mxu1 %vm339_vm0, %v13471_v14  ;;  %v14769_v14 = vld [vmem:[#allocation41_spill] sm:$0xff]  ;;  %v7543_v35 = vld [vmem:[#allocation3 + $0x48] sm:$0xff] }
 0x324   : > { %11177 = vmatprep.mubr.msk.f32.mxu0 %vm339_vm0, %v13757_v21  ;;  %11514 = vmatpush3.bf16.msra.mxu1 %v11511_v61  ;;  %v7997_v21 = vld [vmem:[#allocation3 + $0x49] sm:$0xff] }
 0x325   : > { %11522 = vmatpush3.bf16.msra.mxu0 %v11519_v56  ;;  %11524 = vmatprep.subr.bf16.mxu1 %v13970_v51  ;;  %v7556_v56 = vld [vmem:[#allocation3 + $0xe0] sm:$0xff] }
 0x326   : > { %11122 = vmatmul.mubr.msk.f32.gmra.mrb[196].mxu1 %vm339_vm0, %v13480_v10  ;;  %v14770_v10 = vld [vmem:[#allocation42_spill] sm:$0xff] }
 0x327   : > { %11178 = vmatmul.mubr.msk.f32.gmra.mrb[228].mxu0 %vm339_vm0, %v13763_v41  ;;  %11124 = vmatprep.mubr.msk.f32.mxu1 %vm339_vm0, %v13491_v39  ;;  %v14771_v39 = vld [vmem:[#allocation44_spill] sm:$0xff]  ;;  %v7544_v41 = vld [vmem:[#allocation3 + $0x50] sm:$0xff] }
 0x328   : > { %11180 = vmatprep.mubr.msk.f32.mxu0 %vm339_vm0, %v13769_v0  ;;  %v7998_v0 = vld [vmem:[#allocation3 + $0x51] sm:$0xff] }
 0x32a   : > { %11125 = vmatmul.mubr.msk.f32.gmra.mrb[198].mxu1 %vm339_vm0, %v13500_v9  ;;  %v14772_v9 = vld [vmem:[#allocation46_spill] sm:$0xff] }
 0x32b   : > { %11181 = vmatmul.mubr.msk.f32.gmra.mrb[230].mxu0 %vm339_vm0, %v13810_v54  ;;  %11127 = vmatprep.mubr.msk.f32.mxu1 %vm339_vm0, %v13511_v34  ;;  %v14773_v34 = vld [vmem:[#allocation19_spill] sm:$0xff]  ;;  %v7545_v54 = vld [vmem:[#allocation3 + $0x60] sm:$0xff] }
 0x32c   : > { %11183 = vmatprep.mubr.msk.f32.mxu0 %vm339_vm0, %v13816_v52  ;;  %v7999_v52 = vld [vmem:[#allocation3 + $0x61] sm:$0xff] }
 0x32e   : > { %11128 = vmatmul.mubr.msk.f32.gmra.mrb[200].mxu1 %vm339_vm0, %v13520_v37  ;;  %v14774_v37 = vld [vmem:[#allocation20_spill] sm:$0xff] }
 0x32f   : > { %11184 = vmatmul.mubr.msk.f32.gmra.mrb[232].mxu0 %vm339_vm0, %v13822_v32  ;;  %11130 = vmatprep.mubr.msk.f32.mxu1 %vm339_vm0, %v13531_v3  ;;  %v14775_v3 = vld [vmem:[#allocation21_spill] sm:$0xff]  ;;  %v7546_v32 = vld [vmem:[#allocation3 + $0x68] sm:$0xff] }
 0x330   : > { %11186 = vmatprep.mubr.msk.f32.mxu0 %vm339_vm0, %v13828_v6  ;;  %v8000_v6 = vld [vmem:[#allocation3 + $0x69] sm:$0xff] }
 0x332   : > { %11131 = vmatmul.mubr.msk.f32.gmra.mrb[202].mxu1 %vm339_vm0, %v13540_v5  ;;  %v14776_v5 = vld [vmem:[#allocation22_spill] sm:$0xff] }
 0x333   : > { %11187 = vmatmul.mubr.msk.f32.gmra.mrb[234].mxu0 %vm339_vm0, %v13834_v49  ;;  %11133 = vmatprep.mubr.msk.f32.mxu1 %vm339_vm0, %v13551_v18  ;;  %v7547_v49 = vld [vmem:[#allocation3 + $0x78] sm:$0xff] }
 0x334   : > { %11189 = vmatprep.mubr.msk.f32.mxu0 %vm339_vm0, %v13840_v50  ;;  %v8001_v50 = vld [vmem:[#allocation3 + $0x79] sm:$0xff] }
 0x336   : > { %11134 = vmatmul.mubr.msk.f32.gmra.mrb[204].mxu1 %vm339_vm0, %v13560_v28  ;;  %v14081_v28 = vld [vmem:[#allocation3 + $0x181] sm:$0xff] }
 0x337   : > { %11190 = vmatmul.mubr.msk.f32.gmra.mrb[236].mxu0 %vm339_vm0, %v13848_v26  ;;  %11136 = vmatprep.mubr.msk.f32.mxu1 %vm339_vm0, %v13571_v11  ;;  %v7116_v11 = vld [vmem:[#allocation3 + $0x182] sm:$0xff] }
 0x338   : > { %11192 = vmatprep.mubr.msk.f32.mxu0 %vm339_vm0, %v13854_v24  ;;  %v7548_v26 = vld [vmem:[#allocation3 + $0x80] sm:$0xff] }
 0x339   : > { %v8002_v24 = vld [vmem:[#allocation3 + $0x81] sm:$0xff] }
 0x33a   : > { %11137 = vmatmul.mubr.msk.f32.gmra.mrb[206].mxu1 %vm339_vm0, %v13580_v20  ;;  %v14086_v20 = vld [vmem:[#allocation3 + $0x189] sm:$0xff] }
 0x33b   : > { %11193 = vmatmul.mubr.msk.f32.gmra.mrb[238].mxu0 %vm339_vm0, %v13860_v60  ;;  %11139 = vmatprep.mubr.msk.f32.mxu1 %vm339_vm0, %v13591_v40  ;;  %v7117_v40 = vld [vmem:[#allocation3 + $0x18a] sm:$0xff] }
 0x33c   : > { %11195 = vmatprep.mubr.msk.f32.mxu0 %vm339_vm0, %v13866_v33  ;;  %v7549_v60 = vld [vmem:[#allocation3 + $0x90] sm:$0xff] }
 0x33d   : > { %v8003_v33 = vld [vmem:[#allocation3 + $0x91] sm:$0xff] }
 0x33e   : > { %11140 = vmatmul.mubr.msk.f32.gmra.mrb[208].mxu1 %vm339_vm0, %v13600_v57  ;;  %v7541_v57 = vld [vmem:[#allocation3 + $0x30] sm:$0xff] }
 0x33f   : > { %11196 = vmatmul.mubr.msk.f32.gmra.mrb[240].mxu0 %vm339_vm0, %v13874_v38  ;;  %11142 = vmatprep.mubr.msk.f32.mxu1 %vm339_vm0, %v13611_v7  ;;  %v7995_v7 = vld [vmem:[#allocation3 + $0x31] sm:$0xff] }
 0x340   : > { %11198 = vmatprep.mubr.msk.f32.mxu0 %vm339_vm0, %v13880_v15  ;;  %v7552_v38 = vld [vmem:[#allocation3 + $0xb0] sm:$0xff] }
 0x341   : > { %v8006_v15 = vld [vmem:[#allocation3 + $0xb1] sm:$0xff] }
 0x342   : > { %11143 = vmatmul.mubr.msk.f32.gmra.mrb[210].mxu1 %vm339_vm0, %v14766_v16 }
 0x343   : > { %11199 = vmatmul.mubr.msk.f32.gmra.mrb[242].mxu0 %vm339_vm0, %v13886_v29  ;;  %11145 = vmatprep.mubr.msk.f32.mxu1 %vm339_vm0, %v14767_v46  ;;  %v7553_v29 = vld [vmem:[#allocation3 + $0xc0] sm:$0xff]  ;;  %v7557_v46 = vld [vmem:[#allocation3 + $0xf0] sm:$0xff] }
 0x344   : > { %11201 = vmatprep.mubr.msk.f32.mxu0 %vm339_vm0, %v13892_v62  ;;  %v8007_v62 = vld [vmem:[#allocation3 + $0xc1] sm:$0xff] }
 0x346   : > { %11146 = vmatmul.mubr.msk.f32.gmra.mrb[212].mxu1 %vm339_vm0, %v14768_v44  ;;  %v8011_v44 = vld [vmem:[#allocation3 + $0xf1] sm:$0xff] }
 0x347   : > { %11202 = vmatmul.mubr.msk.f32.gmra.mrb[244].mxu0 %vm339_vm0, %v13898_v8  ;;  %11148 = vmatprep.mubr.msk.f32.mxu1 %vm339_vm0, %v14769_v14  ;;  %v4852_v8 = vld [vmem:[#allocation4 + $0x18] sm:$0xff] }
 0x348   : > { %11204 = vmatprep.mubr.msk.f32.mxu0 %vm339_vm0, %v13904_v36  ;;  %v4851_v36 = vld [vmem:[#allocation4 + $0x10] sm:$0xff] }
 0x34a   : > { %11149 = vmatmul.mubr.msk.f32.gmra.mrb[214].mxu1 %vm339_vm0, %v14770_v10  ;;  %v4856_v10 = vld [vmem:[#allocation4 + $0x38] sm:$0xff] }
 0x34b   : > { %11205 = vmatmul.mubr.msk.f32.gmra.mrb[246].mxu0 %vm339_vm0, %v13910_v48  ;;  %11151 = vmatprep.mubr.msk.f32.mxu1 %vm339_vm0, %v14771_v39  ;;  %v4855_v39 = vld [vmem:[#allocation4 + $0x30] sm:$0xff] }
 0x34c   : > { %11207 = vmatprep.mubr.msk.f32.mxu0 %vm339_vm0, %v13916_v25 }
 0x34e   : > { %11152 = vmatmul.mubr.msk.f32.gmra.mrb[216].mxu1 %vm339_vm0, %v14772_v9 }
 0x34f   : > { %11208 = vmatmul.mubr.msk.f32.gmra.mrb[248].mxu0 %vm339_vm0, %v13922_v4  ;;  %11154 = vmatprep.mubr.msk.f32.mxu1 %vm339_vm0, %v14773_v34  ;;  %v8008_v4 = vld [vmem:[#allocation3 + $0xc9] sm:$0xff] }
 0x350   : > { %11210 = vmatprep.mubr.msk.f32.mxu0 %vm339_vm0, %v13928_v53 }
 0x352   : > { %11155 = vmatmul.mubr.msk.f32.gmra.mrb[218].mxu1 %vm339_vm0, %v14774_v37  ;;  %v7558_v37 = vld [vmem:[#allocation3 + $0xf8] sm:$0xff] }
 0x353   : > { %11211 = vmatmul.mubr.msk.f32.gmra.mrb[250].mxu0 %vm339_vm0, %v13934_v45  ;;  %11157 = vmatprep.mubr.msk.f32.mxu1 %vm339_vm0, %v14775_v3  ;;  %v8012_v3 = vld [vmem:[#allocation3 + $0xf9] sm:$0xff] }
 0x354   : > { %11213 = vmatprep.mubr.msk.f32.mxu0 %vm339_vm0, %v13940_v13  ;;  %v7555_v13 = vld [vmem:[#allocation3 + $0xd8] sm:$0xff] }
 0x356   : > { %11158 = vmatmul.mubr.msk.f32.gmra.mrb[220].mxu1 %vm339_vm0, %v14776_v5 }
 0x357   : > { %11214 = vmatmul.mubr.msk.f32.gmra.mrb[252].mxu0 %vm339_vm0, %v13948_v12  ;;  %11160 = vmatprep.mubr.msk.f32.mxu1 %vm339_vm0, %v14081_v28  ;;  %v8009_v12 = vld [vmem:[#allocation3 + $0xd9] sm:$0xff] }
 0x358   : > { %11216 = vmatprep.mubr.msk.f32.mxu0 %vm339_vm0, %v7116_v11 }
 0x35a   : > { %11161 = vmatmul.mubr.msk.f32.gmra.mrb[222].mxu1 %vm339_vm0, %v14086_v20 }
 0x35b   : > { %11217 = vmatmul.mubr.msk.f32.gmra.mrb[254].mxu0 %vm339_vm0, %v7117_v40  ;;  %11227 = vmatprep.mubr.msk.f32.mxu1 %vm339_vm0, %v7541_v57  ;;  %v7559_v57 = vld [vmem:[#allocation3 + $0x108] sm:$0xff] }
 0x35c   : > { %11283 = vmatprep.mubr.msk.f32.mxu0 %vm339_vm0, %v7995_v7  ;;  %v8013_v7 = vld [vmem:[#allocation3 + $0x109] sm:$0xff] }
 0x35e   : > { %11228 = vmatmul.mubr.msk.f32.vlgmr.msra.gmra.mrb[224].mxu1 %vm339_vm0, %v7542_v22  ;;  %v4858_v22 = vld [vmem:[#allocation4 + $0x48] sm:$0xff] }
 0x35f   : > { %11284 = vmatmul.mubr.msk.f32.vlgmr.msra.gmra.mrb[0].mxu0 %vm339_vm0, %v7996_v42  ;;  %11230 = vmatprep.mubr.msk.f32.mxu1 %vm339_vm0, %v7543_v35  ;;  %v4857_v35 = vld [vmem:[#allocation4 + $0x40] sm:$0xff] }
 0x360   : > { %11286 = vmatprep.mubr.msk.f32.mxu0 %vm339_vm0, %v7997_v21  ;;  %11526 = vmatpush3.bf16.msra.mxu1 %v13970_v51 }
 0x361   : > { %11528 = vmatprep.subr.bf16.mxu1 %v11527_v30 }
 0x362   : > { %11231 = vmatmul.mubr.msk.f32.gmra.mrb[226].mxu1 %vm339_vm0, %v7544_v41 }
 0x363   : > { %11287 = vmatmul.mubr.msk.f32.gmra.mrb[2].mxu0 %vm339_vm0, %v7998_v0  ;;  %11233 = vmatprep.mubr.msk.f32.mxu1 %vm339_vm0, %v7545_v54  ;;  %v7560_v54 = vld [vmem:[#allocation3 + $0x110] sm:$0xff] }
 0x364   : > { %11289 = vmatprep.mubr.msk.f32.mxu0 %vm339_vm0, %v7999_v52  ;;  %11530 = vmatpush3.bf16.msra.mxu1 %v11527_v30  ;;  %v8014_v52 = vld [vmem:[#allocation3 + $0x111] sm:$0xff] }
 0x366   : > { %11234 = vmatmul.mubr.msk.f32.gmra.mrb[228].mxu1 %vm339_vm0, %v7546_v32 }
 0x367   : > { %11290 = vmatmul.mubr.msk.f32.gmra.mrb[4].mxu0 %vm339_vm0, %v8000_v6  ;;  %11236 = vmatprep.mubr.msk.f32.mxu1 %vm339_vm0, %v7547_v49 }
 0x368   : > { %11292 = vmatprep.mubr.msk.f32.mxu0 %vm339_vm0, %v8001_v50  ;;  %v7561_v50 = vld [vmem:[#allocation3 + $0x120] sm:$0xff] }
 0x36a   : > { %11237 = vmatmul.mubr.msk.f32.gmra.mrb[230].mxu1 %vm339_vm0, %v7548_v26  ;;  %v8015_v26 = vld [vmem:[#allocation3 + $0x121] sm:$0xff] }
 0x36b   : > { %11293 = vmatmul.mubr.msk.f32.gmra.mrb[6].mxu0 %vm339_vm0, %v8002_v24  ;;  %11239 = vmatprep.mubr.msk.f32.mxu1 %vm339_vm0, %v7549_v60 }
 0x36c   : > { %11295 = vmatprep.mubr.msk.f32.mxu0 %vm339_vm0, %v8003_v33  ;;  %v4860_v33 = vld [vmem:[#allocation4 + $0x58] sm:$0xff] }
 0x36e   : > { %11240 = vmatmul.mubr.msk.f32.gmra.mrb[232].mxu1 %vm339_vm0, %v7550_v47 }
 0x36f   : > { %11296 = vmatmul.mubr.msk.f32.gmra.mrb[8].mxu0 %vm339_vm0, %v8004_v1  ;;  %11242 = vmatprep.mubr.msk.f32.mxu1 %vm339_vm0, %v13549_v23  ;;  %v7554_v23 = vld [vmem:[#allocation3 + $0xc8] sm:$0xff] }
 0x370   : > { %11298 = vmatprep.mubr.msk.f32.mxu0 %vm339_vm0, %v13551_v18 }
 0x372   : > { %11243 = vmatmul.mubr.msk.f32.gmra.mrb[234].mxu1 %vm339_vm0, %v7552_v38  ;;  %v4859_v38 = vld [vmem:[#allocation4 + $0x50] sm:$0xff] }
 0x373   : > { %11299 = vmatmul.mubr.msk.f32.gmra.mrb[10].mxu0 %vm339_vm0, %v8006_v15  ;;  %11245 = vmatprep.mubr.msk.f32.mxu1 %vm339_vm0, %v7553_v29  ;;  %v10896_v48 = vpop.f32.mrb[130].mxu1 }
 0x374   : > { %11301 = vmatprep.mubr.msk.f32.mxu0 %vm339_vm0, %v8007_v62  ;;  %v10952_v25 = vpop.f32.mrb[162].mxu0  ;;  %v5209_v53 = vadd.f32 %v10896_v48, %v4852_v8  ;;  %v5057_v18 = vpop.f32.mrb[131].mxu1  ;;  %v7562_v8 = vld [vmem:[#allocation3 + $0x128] sm:$0xff] }
 0x375   : > { %v5511_v45 = vpop.f32.mrb[163].mxu0  ;;  %v5208_v63 = vadd.f32 %v5057_v18, %v4851_v36  ;;  %v8016_v36 = vld [vmem:[#allocation3 + $0x129] sm:$0xff] }
 0x376   : > { %11246 = vmatmul.mubr.msk.f32.gmra.mrb[236].mxu1 %vm339_vm0, %v7554_v23  ;;  %5241 = vst.msk [vmem:[#allocation4 + $0x18] sm:$0xff] %vm339_vm0, %v5209_v53  ;;  %v8017_v53 = vld [vmem:[#allocation3 + $0x139] sm:$0xff] }
 0x377   : > { %11302 = vmatmul.mubr.msk.f32.gmra.mrb[12].mxu0 %vm339_vm0, %v8008_v4  ;;  %11248 = vmatprep.mubr.msk.f32.mxu1 %vm339_vm0, %v7555_v13  ;;  %5240 = vst.msk [vmem:[#allocation4 + $0x10] sm:$0xff] %vm339_vm0, %v5208_v63  ;;  %v10899_v31 = vpop.f32.mrb[132].mxu1  ;;  %v7563_v4 = vld [vmem:[#allocation3 + $0x138] sm:$0xff] }
 0x378   : > { %11304 = vmatprep.mubr.msk.f32.mxu0 %vm339_vm0, %v8009_v12  ;;  %v10955_v61 = vpop.f32.mrb[164].mxu0  ;;  %v5211_v59 = vadd.f32 %v10899_v31, %v4854_v43  ;;  %v5067_v51 = vpop.f32.mrb[133].mxu1  ;;  %v4862_v13 = vld [vmem:[#allocation4 + $0x68] sm:$0xff]  ;;  %v4861_v43 = vld [vmem:[#allocation4 + $0x60] sm:$0xff] }
 0x379   : > { %v5521_v16 = vpop.f32.mrb[165].mxu0  ;;  %v5210_v14 = vadd.f32 %v5067_v51, %v4853_v27 }
 0x37a   : > { %11249 = vmatmul.mubr.msk.f32.gmra.mrb[238].mxu1 %vm339_vm0, %v7556_v56  ;;  %5243 = vst.msk [vmem:[#allocation4 + $0x28] sm:$0xff] %vm339_vm0, %v5211_v59  ;;  %v7564_v56 = vld [vmem:[#allocation3 + $0x140] sm:$0xff] }
 0x37b   : > { %11305 = vmatmul.mubr.msk.f32.gmra.mrb[14].mxu0 %vm339_vm0, %v8010_v17  ;;  %11251 = vmatprep.mubr.msk.f32.mxu1 %vm339_vm0, %v7557_v46  ;;  %5242 = vst.msk [vmem:[#allocation4 + $0x20] sm:$0xff] %vm339_vm0, %v5210_v14  ;;  %v10902_v9 = vpop.f32.mrb[134].mxu1  ;;  %v8018_v17 = vld [vmem:[#allocation3 + $0x141] sm:$0xff]  ;;  %v7565_v46 = vld [vmem:[#allocation3 + $0x150] sm:$0xff] }
 0x37c   : > { %11307 = vmatprep.mubr.msk.f32.mxu0 %vm339_vm0, %v8011_v44  ;;  %v14132_v34 = vpop.f32.mrb[166].mxu0  ;;  %v5213_v5 = vadd.f32 %v10902_v9, %v4856_v10  ;;  %v5077_v11 = vpop.f32.mrb[135].mxu1  ;;  %v8019_v44 = vld [vmem:[#allocation3 + $0x151] sm:$0xff] }
 0x37d   : > { %v5531_v40 = vpop.f32.mrb[167].mxu0  ;;  %v5305_v55 = vld [vmem:[#allocation4 + $0x18] sm:$0xff]  ;;  %v5212_v19 = vadd.f32 %v5077_v11, %v4855_v39 }
 0x37e   : > { %11252 = vmatmul.mubr.msk.f32.gmra.mrb[240].mxu1 %vm339_vm0, %v7558_v37  ;;  %v5663_v42 = vadd.f32 %v10952_v25, %v5305_v55  ;;  %v5304_v30 = vld [vmem:[#allocation4 + $0x10] sm:$0xff]  ;;  %5245 = vst.msk [vmem:[#allocation4 + $0x38] sm:$0xff] %vm339_vm0, %v5213_v5  ;;  %v4864_v39 = vld [vmem:[#allocation4 + $0x78] sm:$0xff] }
 0x37f   : > { %11308 = vmatmul.mubr.msk.f32.gmra.mrb[16].mxu0 %vm339_vm0, %v8012_v3  ;;  %11254 = vmatprep.mubr.msk.f32.mxu1 %vm339_vm0, %v7559_v57  ;;  %v5662_v21 = vadd.f32 %v5511_v45, %v5304_v30  ;;  %5244 = vst.msk [vmem:[#allocation4 + $0x30] sm:$0xff] %vm339_vm0, %v5212_v19  ;;  %v10905_v41 = vpop.f32.mrb[136].mxu1  ;;  %v4863_v37 = vld [vmem:[#allocation4 + $0x70] sm:$0xff] }
 0x380   : > { %11310 = vmatprep.mubr.msk.f32.mxu0 %vm339_vm0, %v8013_v7  ;;  %v14140_v0 = vpop.f32.mrb[168].mxu0  ;;  %5695 = vst.msk [vmem:[#allocation4 + $0x18] sm:$0xff] %vm339_vm0, %v5663_v42  ;;  %v5215_v32 = vadd.f32 %v10905_v41, %v4858_v22  ;;  %v5087_v6 = vpop.f32.mrb[137].mxu1  ;;  %v8020_v57 = vld [vmem:[#allocation3 + $0x159] sm:$0xff]  ;;  %v7567_v22 = vld [vmem:[#allocation3 + $0x168] sm:$0xff] }
 0x381   : > { %v14143_v49 = vpop.f32.mrb[169].mxu0  ;;  %5694 = vst.msk [vmem:[#allocation4 + $0x10] sm:$0xff] %vm339_vm0, %v5662_v21  ;;  %v5307_v24 = vld [vmem:[#allocation4 + $0x28] sm:$0xff]  ;;  %v5214_v60 = vadd.f32 %v5087_v6, %v4857_v35  ;;  %v8021_v42 = vld [vmem:[#allocation3 + $0x169] sm:$0xff] }
 0x382   : > { %11255 = vmatmul.mubr.msk.f32.gmra.mrb[242].mxu1 %vm339_vm0, %v7560_v54  ;;  %v5665_v47 = vadd.f32 %v10955_v61, %v5307_v24  ;;  %v5306_v1 = vld [vmem:[#allocation4 + $0x20] sm:$0xff]  ;;  %5247 = vst.msk [vmem:[#allocation4 + $0x48] sm:$0xff] %vm339_vm0, %v5215_v32  ;;  %v4866_v21 = vld [vmem:[#allocation4 + $0x88] sm:$0xff] }
 0x383   : > { %11311 = vmatmul.mubr.msk.f32.gmra.mrb[18].mxu0 %vm339_vm0, %v8014_v52  ;;  %11257 = vmatprep.mubr.msk.f32.mxu1 %vm339_vm0, %v7561_v50  ;;  %v5664_v15 = vadd.f32 %v5521_v16, %v5306_v1  ;;  %5246 = vst.msk [vmem:[#allocation4 + $0x40] sm:$0xff] %vm339_vm0, %v5214_v60  ;;  %v10908_v29 = vpop.f32.mrb[138].mxu1  ;;  %v4865_v54 = vld [vmem:[#allocation4 + $0x80] sm:$0xff]  ;;  %v4868_v1 = vld [vmem:[#allocation4 + $0x98] sm:$0xff] }
 0x384   : > { %11313 = vmatprep.mubr.msk.f32.mxu0 %vm339_vm0, %v8015_v26  ;;  %v14152_v62 = vpop.f32.mrb[170].mxu0  ;;  %5697 = vst.msk [vmem:[#allocation4 + $0x28] sm:$0xff] %vm339_vm0, %v5665_v47  ;;  %v5217_v48 = vadd.f32 %v10908_v29, %v4860_v33  ;;  %v5097_v25 = vpop.f32.mrb[139].mxu1  ;;  %v8022_v50 = vld [vmem:[#allocation3 + $0x171] sm:$0xff] }
 0x385   : > { %v14155_v23 = vpop.f32.mrb[171].mxu0  ;;  %5696 = vst.msk [vmem:[#allocation4 + $0x20] sm:$0xff] %vm339_vm0, %v5664_v15  ;;  %v5309_v18 = vld [vmem:[#allocation4 + $0x38] sm:$0xff]  ;;  %v5216_v45 = vadd.f32 %v5097_v25, %v4859_v38  ;;  %v4867_v38 = vld [vmem:[#allocation4 + $0x90] sm:$0xff] }
 0x386   : > { %11258 = vmatmul.mubr.msk.f32.gmra.mrb[244].mxu1 %vm339_vm0, %v7562_v8  ;;  %v5667_v12 = vadd.f32 %v14132_v34, %v5309_v18  ;;  %v5308_v63 = vld [vmem:[#allocation4 + $0x30] sm:$0xff]  ;;  %5249 = vst.msk [vmem:[#allocation4 + $0x58] sm:$0xff] %vm339_vm0, %v5217_v48 }
 0x387   : > { %11314 = vmatmul.mubr.msk.f32.gmra.mrb[20].mxu0 %vm339_vm0, %v8016_v36  ;;  %11260 = vmatprep.mubr.msk.f32.mxu1 %vm339_vm0, %v7563_v4  ;;  %v5666_v27 = vadd.f32 %v5531_v40, %v5308_v63  ;;  %5248 = vst.msk [vmem:[#allocation4 + $0x50] sm:$0xff] %vm339_vm0, %v5216_v45  ;;  %v10911_v31 = vpop.f32.mrb[140].mxu1  ;;  %v7566_v40 = vld [vmem:[#allocation3 + $0x158] sm:$0xff]  ;;  %v7572_v45 = vld [vmem:[#allocation3 + $0x1a0] sm:$0xff] }
 0x388   : > { %11316 = vmatprep.mubr.msk.f32.mxu0 %vm339_vm0, %v8017_v53  ;;  %v14165_v61 = vpop.f32.mrb[172].mxu0  ;;  %5699 = vst.msk [vmem:[#allocation4 + $0x38] sm:$0xff] %vm339_vm0, %v5667_v12  ;;  %v5219_v59 = vadd.f32 %v10911_v31, %v4862_v13  ;;  %v5107_v51 = vpop.f32.mrb[141].mxu1  ;;  %v8025_v8 = vld [vmem:[#allocation3 + $0x199] sm:$0xff]  ;;  %v8026_v13 = vld [vmem:[#allocation3 + $0x1a1] sm:$0xff] }
 0x389   : > { %v14168_v16 = vpop.f32.mrb[173].mxu0  ;;  %5698 = vst.msk [vmem:[#allocation4 + $0x30] sm:$0xff] %vm339_vm0, %v5666_v27  ;;  %v5311_v14 = vld [vmem:[#allocation4 + $0x48] sm:$0xff]  ;;  %v5218_v10 = vadd.f32 %v5107_v51, %v4861_v43 }
 0x38a   : > { %11261 = vmatmul.mubr.msk.f32.gmra.mrb[246].mxu1 %vm339_vm0, %v7564_v56  ;;  %v5669_v9 = vadd.f32 %v14140_v0, %v5311_v14  ;;  %v5310_v34 = vld [vmem:[#allocation4 + $0x40] sm:$0xff]  ;;  %5251 = vst.msk [vmem:[#allocation4 + $0x68] sm:$0xff] %vm339_vm0, %v5219_v59  ;;  %v4870_v4 = vld [vmem:[#allocation4 + $0xa8] sm:$0xff]  ;;  %v4871_v14 = vld [vmem:[#allocation4 + $0xb0] sm:$0xff] }
 0x38b   : > { %11317 = vmatmul.mubr.msk.f32.gmra.mrb[22].mxu0 %vm339_vm0, %v8018_v17  ;;  %11263 = vmatprep.mubr.msk.f32.mxu1 %vm339_vm0, %v7565_v46  ;;  %v5668_v3 = vadd.f32 %v14143_v49, %v5310_v34  ;;  %5250 = vst.msk [vmem:[#allocation4 + $0x60] sm:$0xff] %vm339_vm0, %v5218_v10  ;;  %v10914_v5 = vpop.f32.mrb[142].mxu1  ;;  %v7568_v49 = vld [vmem:[#allocation3 + $0x170] sm:$0xff]  ;;  %v8450_v34 = vld [vmem:[#allocation3 + $0x3a] sm:$0xff] }
 0x38c   : > { %11319 = vmatprep.mubr.msk.f32.mxu0 %vm339_vm0, %v8019_v44  ;;  %v14179_v11 = vpop.f32.mrb[174].mxu0  ;;  %5701 = vst.msk [vmem:[#allocation4 + $0x48] sm:$0xff] %vm339_vm0, %v5669_v9  ;;  %v5221_v7 = vadd.f32 %v10914_v5, %v4864_v39  ;;  %v5117_v55 = vpop.f32.mrb[143].mxu1  ;;  %v8449_v17 = vld [vmem:[#allocation3 + $0x32] sm:$0xff] }
 0x38d   : > { %v5571_v19 = vpop.f32.mrb[175].mxu0  ;;  %5700 = vst.msk [vmem:[#allocation4 + $0x40] sm:$0xff] %vm339_vm0, %v5668_v3  ;;  %v5313_v30 = vld [vmem:[#allocation4 + $0x58] sm:$0xff]  ;;  %v5220_v35 = vadd.f32 %v5117_v55, %v4863_v37 }
 0x38e   : > { %11264 = vmatmul.mubr.msk.f32.gmra.mrb[248].mxu1 %vm339_vm0, %v7566_v40  ;;  %v5671_v41 = vadd.f32 %v14152_v62, %v5313_v30  ;;  %v5312_v0 = vld [vmem:[#allocation4 + $0x50] sm:$0xff]  ;;  %5253 = vst.msk [vmem:[#allocation4 + $0x78] sm:$0xff] %vm339_vm0, %v5221_v7  ;;  %v7571_v62 = vld [vmem:[#allocation3 + $0x198] sm:$0xff] }
 0x38f   : > { %11320 = vmatmul.mubr.msk.f32.gmra.mrb[24].mxu0 %vm339_vm0, %v8020_v57  ;;  %11266 = vmatprep.mubr.msk.f32.mxu1 %vm339_vm0, %v7567_v22  ;;  %v5670_v52 = vadd.f32 %v14155_v23, %v5312_v0  ;;  %5252 = vst.msk [vmem:[#allocation4 + $0x70] sm:$0xff] %vm339_vm0, %v5220_v35  ;;  %v4874_v7 = vld [vmem:[#allocation4 + $0xc8] sm:$0xff]  ;;  %v4873_v22 = vld [vmem:[#allocation4 + $0xc0] sm:$0xff] }
 0x390   : > { %11322 = vmatprep.mubr.msk.f32.mxu0 %vm339_vm0, %v8021_v42  ;;  %v10917_v32 = vpop.f32.mrb[144].mxu1  ;;  %5703 = vst.msk [vmem:[#allocation4 + $0x58] sm:$0xff] %vm339_vm0, %v5671_v41 }
 0x391   : > { %v10973_v6 = vpop.f32.mrb[176].mxu0  ;;  %v5223_v26 = vadd.f32 %v10917_v32, %v4866_v21  ;;  %v5127_v24 = vpop.f32.mrb[145].mxu1  ;;  %5702 = vst.msk [vmem:[#allocation4 + $0x50] sm:$0xff] %vm339_vm0, %v5670_v52  ;;  %v5315_v33 = vld [vmem:[#allocation4 + $0x68] sm:$0xff]  ;;  %v8453_v52 = vld [vmem:[#allocation3 + $0x62] sm:$0xff] }
 0x392   : > { %v5581_v60 = vpop.f32.mrb[177].mxu0  ;;  %11267 = vmatmul.mubr.msk.f32.gmra.mrb[250].mxu1 %vm339_vm0, %v7568_v49  ;;  %v5222_v47 = vadd.f32 %v5127_v24, %v4865_v54  ;;  %v5673_v15 = vadd.f32 %v14165_v61, %v5315_v33  ;;  %v5314_v29 = vld [vmem:[#allocation4 + $0x60] sm:$0xff]  ;;  %v4876_v49 = vld [vmem:[#allocation4 + $0xd8] sm:$0xff]  ;;  %v4875_v24 = vld [vmem:[#allocation4 + $0xd0] sm:$0xff] }
 0x393   : > { %11323 = vmatmul.mubr.msk.f32.gmra.mrb[26].mxu0 %vm339_vm0, %v8022_v50  ;;  %11269 = vmatprep.mubr.msk.f32.mxu1 %vm339_vm0, %v13942_v58  ;;  %5255 = vst.msk [vmem:[#allocation4 + $0x88] sm:$0xff] %vm339_vm0, %v5223_v26  ;;  %v5672_v36 = vadd.f32 %v14168_v16, %v5314_v29  ;;  %v4872_v16 = vld [vmem:[#allocation4 + $0xb8] sm:$0xff]  ;;  %v8452_v21 = vld [vmem:[#allocation3 + $0x52] sm:$0xff] }
 0x394   : > { %11325 = vmatprep.mubr.msk.f32.mxu0 %vm339_vm0, %v14081_v28  ;;  %5254 = vst.msk [vmem:[#allocation4 + $0x80] sm:$0xff] %vm339_vm0, %v5222_v47  ;;  %v10920_v48 = vpop.f32.mrb[146].mxu1  ;;  %5705 = vst.msk [vmem:[#allocation4 + $0x68] sm:$0xff] %vm339_vm0, %v5673_v15 }
 0x395   : > { %v10976_v25 = vpop.f32.mrb[178].mxu0  ;;  %v5225_v58 = vadd.f32 %v10920_v48, %v4868_v1  ;;  %v5137_v23 = vpop.f32.mrb[147].mxu1  ;;  %5704 = vst.msk [vmem:[#allocation4 + $0x60] sm:$0xff] %vm339_vm0, %v5672_v36  ;;  %v5317_v53 = vld [vmem:[#allocation4 + $0x78] sm:$0xff]  ;;  %v4878_v48 = vld [vmem:[#allocation4 + $0xe8] sm:$0xff] }
 0x396   : > { %v5591_v28 = vpop.f32.mrb[179].mxu0  ;;  %11270 = vmatmul.mubr.msk.f32.gmra.mrb[252].mxu1 %vm339_vm0, %v13950_v2  ;;  %v5224_v18 = vadd.f32 %v5137_v23, %v4867_v38  ;;  %v5675_v12 = vadd.f32 %v14179_v11, %v5317_v53  ;;  %v5316_v63 = vld [vmem:[#allocation4 + $0x70] sm:$0xff]  ;;  %v4869_v2 = vld [vmem:[#allocation4 + $0xa0] sm:$0xff] }
 0x397   : > { %11326 = vmatmul.mubr.msk.f32.gmra.mrb[28].mxu0 %vm339_vm0, %v14086_v20  ;;  %11272 = vmatprep.mubr.msk.f32.mxu1 %vm339_vm0, %v7571_v62  ;;  %5257 = vst.msk [vmem:[#allocation4 + $0x98] sm:$0xff] %vm339_vm0, %v5225_v58  ;;  %v5674_v43 = vadd.f32 %v5571_v19, %v5316_v63  ;;  %v8451_v11 = vld [vmem:[#allocation3 + $0x4a] sm:$0xff]  ;;  %v8455_v62 = vld [vmem:[#allocation3 + $0x7a] sm:$0xff]  ;;  %v8457_v63 = vld [vmem:[#allocation3 + $0x92] sm:$0xff] }
 0x398   : > { %11328 = vmatprep.mubr.msk.f32.mxu0 %vm339_vm0, %v8025_v8  ;;  %5256 = vst.msk [vmem:[#allocation4 + $0x90] sm:$0xff] %vm339_vm0, %v5224_v18  ;;  %v10923_v20 = vpop.f32.mrb[148].mxu1  ;;  %5707 = vst.msk [vmem:[#allocation4 + $0x78] sm:$0xff] %vm339_vm0, %v5675_v12  ;;  %v8454_v1 = vld [vmem:[#allocation3 + $0x6a] sm:$0xff]  ;;  %v8456_v18 = vld [vmem:[#allocation3 + $0x82] sm:$0xff] }
 0x399   : > { %v10979_v27 = vpop.f32.mrb[180].mxu0  ;;  %v5227_v31 = vadd.f32 %v10923_v20, %v4870_v4  ;;  %v5147_v61 = vpop.f32.mrb[149].mxu1  ;;  %5706 = vst.msk [vmem:[#allocation4 + $0x70] sm:$0xff] %vm339_vm0, %v5674_v43  ;;  %v4877_v23 = vld [vmem:[#allocation4 + $0xe0] sm:$0xff]  ;;  %v4880_v20 = vld [vmem:[#allocation4 + $0xf8] sm:$0xff] }
 0x39a   : > { %v5601_v56 = vpop.f32.mrb[181].mxu0  ;;  %11273 = vmatmul.mubr.msk.f32.gmra.mrb[254].mxu1 %vm339_vm0, %v7572_v45  ;;  %v5319_v59 = vld [vmem:[#allocation4 + $0x88] sm:$0xff]  ;;  %v5226_v51 = vadd.f32 %v5147_v61, %v4869_v2  ;;  %v4879_v61 = vld [vmem:[#allocation4 + $0xf0] sm:$0xff] }
 0x39b   : > { %11329 = vmatmul.mubr.msk.f32.gmra.mrb[30].mxu0 %vm339_vm0, %v8026_v13  ;;  %11339 = vmatprep.mubr.msk.f32.mxu1 %vm339_vm0, %v8449_v17  ;;  %v5677_v46 = vadd.f32 %v10973_v6, %v5319_v59  ;;  %v5318_v44 = vld [vmem:[#allocation4 + $0x80] sm:$0xff]  ;;  %5259 = vst.msk [vmem:[#allocation4 + $0xa8] sm:$0xff] %vm339_vm0, %v5227_v31 }
 0x39c   : > { %v5676_v10 = vadd.f32 %v5581_v60, %v5318_v44  ;;  %5258 = vst.msk [vmem:[#allocation4 + $0xa0] sm:$0xff] %vm339_vm0, %v5226_v51  ;;  %v10926_v39 = vpop.f32.mrb[150].mxu1  ;;  %v8458_v51 = vld [vmem:[#allocation3 + $0x9a] sm:$0xff] }
 0x39d   : > { %v10982_v9 = vpop.f32.mrb[182].mxu0  ;;  %5709 = vst.msk [vmem:[#allocation4 + $0x88] sm:$0xff] %vm339_vm0, %v5677_v46  ;;  %v5229_v37 = vadd.f32 %v10926_v39, %v4872_v16  ;;  %v5157_v3 = vpop.f32.mrb[151].mxu1 }
 0x39e   : > { %v5611_v5 = vpop.f32.mrb[183].mxu0  ;;  %11340 = vmatmul.mubr.msk.f32.vlgmr.msra.gmra.mrb[0].mxu1 %vm339_vm0, %v8450_v34  ;;  %5708 = vst.msk [vmem:[#allocation4 + $0x80] sm:$0xff] %vm339_vm0, %v5676_v10  ;;  %v5321_v40 = vld [vmem:[#allocation4 + $0x98] sm:$0xff]  ;;  %v5228_v57 = vadd.f32 %v5157_v3, %v4871_v14  ;;  %v5757_v3 = vld [vmem:[#allocation4 + $0x8] sm:$0xff] }
 0x39f   : > { %11342 = vmatprep.mubr.msk.f32.mxu1 %vm339_vm0, %v8451_v11  ;;  %v5679_v55 = vadd.f32 %v10976_v25, %v5321_v40  ;;  %v5320_v19 = vld [vmem:[#allocation4 + $0x90] sm:$0xff]  ;;  %5261 = vst.msk [vmem:[#allocation4 + $0xb8] sm:$0xff] %vm339_vm0, %v5229_v37  ;;  %v8459_v14 = vld [vmem:[#allocation3 + $0xaa] sm:$0xff]  ;;  %v8460_v40 = vld [vmem:[#allocation3 + $0xb2] sm:$0xff] }
 0x3a0   : > { %v5678_v42 = vadd.f32 %v5591_v28, %v5320_v19  ;;  %5260 = vst.msk [vmem:[#allocation4 + $0xb0] sm:$0xff] %vm339_vm0, %v5228_v57  ;;  %v10929_v30 = vpop.f32.mrb[152].mxu1 }
 0x3a1   : > { %v10985_v35 = vpop.f32.mrb[184].mxu0  ;;  %5711 = vst.msk [vmem:[#allocation4 + $0x98] sm:$0xff] %vm339_vm0, %v5679_v55  ;;  %v5231_v41 = vadd.f32 %v10929_v30, %v4874_v7  ;;  %v5167_v0 = vpop.f32.mrb[153].mxu1  ;;  %v5756_v7 = vld [vmem:[#allocation4] sm:$0xff] }
 0x3a2   : > { %v5621_v54 = vpop.f32.mrb[185].mxu0  ;;  %11343 = vmatmul.mubr.msk.f32.gmra.mrb[2].mxu1 %vm339_vm0, %v8452_v21  ;;  %5710 = vst.msk [vmem:[#allocation4 + $0x90] sm:$0xff] %vm339_vm0, %v5678_v42  ;;  %v5323_v32 = vld [vmem:[#allocation4 + $0xa8] sm:$0xff]  ;;  %v5230_v6 = vadd.f32 %v5167_v0, %v4873_v22  ;;  %v8461_v22 = vld [vmem:[#allocation3 + $0xc2] sm:$0xff] }
 0x3a3   : > { %11345 = vmatprep.mubr.msk.f32.mxu1 %vm339_vm0, %v8453_v52  ;;  %v5681_v50 = vadd.f32 %v10979_v27, %v5323_v32  ;;  %v5322_v26 = vld [vmem:[#allocation4 + $0xa0] sm:$0xff]  ;;  %5263 = vst.msk [vmem:[#allocation4 + $0xc8] sm:$0xff] %vm339_vm0, %v5231_v41  ;;  %v5759_v0 = vld [vmem:[#allocation4 + $0x18] sm:$0xff] }
 0x3a4   : > { %v5680_v60 = vadd.f32 %v5601_v56, %v5322_v26  ;;  %5262 = vst.msk [vmem:[#allocation4 + $0xc0] sm:$0xff] %vm339_vm0, %v5230_v6  ;;  %v8462_v32 = vld [vmem:[#allocation3 + $0xca] sm:$0xff] }
 0x3a5   : > { %v10932_v33 = vpop.f32.mrb[154].mxu1  ;;  %5713 = vst.msk [vmem:[#allocation4 + $0xa8] sm:$0xff] %vm339_vm0, %v5681_v50 }
 0x3a6   : > { %v10988_v47 = vpop.f32.mrb[186].mxu0  ;;  %v5233_v38 = vadd.f32 %v10932_v33, %v4876_v49  ;;  %v5177_v15 = vpop.f32.mrb[155].mxu1  ;;  %11346 = vmatmul.mubr.msk.f32.gmra.mrb[4].mxu1 %vm339_vm0, %v8454_v1  ;;  %5712 = vst.msk [vmem:[#allocation4 + $0xa0] sm:$0xff] %vm339_vm0, %v5680_v60  ;;  %v5325_v8 = vld [vmem:[#allocation4 + $0xb8] sm:$0xff]  ;;  %v5758_v49 = vld [vmem:[#allocation4 + $0x10] sm:$0xff] }
 0x3a7   : > { %v5631_v29 = vpop.f32.mrb[187].mxu0  ;;  %v5232_v36 = vadd.f32 %v5177_v15, %v4875_v24  ;;  %11348 = vmatprep.mubr.msk.f32.mxu1 %vm339_vm0, %v8455_v62  ;;  %v5683_v25 = vadd.f32 %v10982_v9, %v5325_v8  ;;  %v5324_v58 = vld [vmem:[#allocation4 + $0xb0] sm:$0xff]  ;;  %v5761_v15 = vld [vmem:[#allocation4 + $0x28] sm:$0xff] }
 0x3a8   : > { %5265 = vst.msk [vmem:[#allocation4 + $0xd8] sm:$0xff] %vm339_vm0, %v5233_v38  ;;  %v5682_v28 = vadd.f32 %v5611_v5, %v5324_v58  ;;  %v8463_v24 = vld [vmem:[#allocation3 + $0xda] sm:$0xff]  ;;  %v8464_v8 = vld [vmem:[#allocation3 + $0xe2] sm:$0xff] }
 0x3a9   : > { %5264 = vst.msk [vmem:[#allocation4 + $0xd0] sm:$0xff] %vm339_vm0, %v5232_v36  ;;  %v10935_v4 = vpop.f32.mrb[156].mxu1  ;;  %5715 = vst.msk [vmem:[#allocation4 + $0xb8] sm:$0xff] %vm339_vm0, %v5683_v25 }
 0x3aa   : > { %v10991_v53 = vpop.f32.mrb[188].mxu0  ;;  %v5235_v45 = vadd.f32 %v10935_v4, %v4878_v48  ;;  %v5187_v13 = vpop.f32.mrb[157].mxu1  ;;  %11349 = vmatmul.mubr.msk.f32.gmra.mrb[6].mxu1 %vm339_vm0, %v8456_v18  ;;  %5714 = vst.msk [vmem:[#allocation4 + $0xb0] sm:$0xff] %vm339_vm0, %v5682_v28  ;;  %v5327_v2 = vld [vmem:[#allocation4 + $0xc8] sm:$0xff]  ;;  %v5760_v48 = vld [vmem:[#allocation4 + $0x20] sm:$0xff] }
 0x3ab   : > { %v5641_v12 = vpop.f32.mrb[189].mxu0  ;;  %v5234_v43 = vadd.f32 %v5187_v13, %v4877_v23  ;;  %11351 = vmatprep.mubr.msk.f32.mxu1 %vm339_vm0, %v8457_v63  ;;  %v5685_v27 = vadd.f32 %v10985_v35, %v5327_v2  ;;  %v5326_v31 = vld [vmem:[#allocation4 + $0xc0] sm:$0xff]  ;;  %v5763_v13 = vld [vmem:[#allocation4 + $0x38] sm:$0xff]  ;;  %v8466_v2 = vld [vmem:[#allocation3 + $0xfa] sm:$0xff] }
 0x3ac   : > { %5267 = vst.msk [vmem:[#allocation4 + $0xe8] sm:$0xff] %vm339_vm0, %v5235_v45  ;;  %v5684_v56 = vadd.f32 %v5621_v54, %v5326_v31  ;;  %v8465_v23 = vld [vmem:[#allocation3 + $0xf2] sm:$0xff] }
 0x3ad   : > { %5266 = vst.msk [vmem:[#allocation4 + $0xe0] sm:$0xff] %vm339_vm0, %v5234_v43  ;;  %v10938_v17 = vpop.f32.mrb[158].mxu1  ;;  %5717 = vst.msk [vmem:[#allocation4 + $0xc8] sm:$0xff] %vm339_vm0, %v5685_v27 }
 0x3ae   : > { %v10994_v59 = vpop.f32.mrb[190].mxu0  ;;  %v5237_v16 = vadd.f32 %v10938_v17, %v4880_v20  ;;  %v5197_v46 = vpop.f32.mrb[159].mxu1  ;;  %11352 = vmatmul.mubr.msk.f32.gmra.mrb[8].mxu1 %vm339_vm0, %v8458_v51  ;;  %5716 = vst.msk [vmem:[#allocation4 + $0xc0] sm:$0xff] %vm339_vm0, %v5684_v56  ;;  %v5762_v20 = vld [vmem:[#allocation4 + $0x30] sm:$0xff] }
 0x3af   : > { %v5651_v44 = vpop.f32.mrb[191].mxu0  ;;  %v5329_v10 = vld [vmem:[#allocation4 + $0xd8] sm:$0xff]  ;;  %v5236_v39 = vadd.f32 %v5197_v46, %v4879_v61  ;;  %11354 = vmatprep.mubr.msk.f32.mxu1 %vm339_vm0, %v8459_v14  ;;  %v5765_v46 = vld [vmem:[#allocation4 + $0x48] sm:$0xff] }
 0x3b0   : > { %v5687_v9 = vadd.f32 %v10988_v47, %v5329_v10  ;;  %v5328_v34 = vld [vmem:[#allocation4 + $0xd0] sm:$0xff]  ;;  %5269 = vst.msk [vmem:[#allocation4 + $0xf8] sm:$0xff] %vm339_vm0, %v5237_v16  ;;  %v8467_v61 = vld [vmem:[#allocation3 + $0x10a] sm:$0xff]  ;;  %v8468_v10 = vld [vmem:[#allocation3 + $0x112] sm:$0xff] }
 0x3b1   : > { %v5686_v37 = vadd.f32 %v5631_v29, %v5328_v34  ;;  %5268 = vst.msk [vmem:[#allocation4 + $0xf0] sm:$0xff] %vm339_vm0, %v5236_v39  ;;  %v11005_v5 = vpop.f32.mrb[160].mxu1 }
 0x3b2   : > { %v11061_v11 = vpop.f32.mrb[192].mxu0  ;;  %5719 = vst.msk [vmem:[#allocation4 + $0xd8] sm:$0xff] %vm339_vm0, %v5687_v9  ;;  %v6115_v57 = vadd.f32 %v11005_v5, %v5757_v3  ;;  %v5955_v55 = vpop.f32.mrb[161].mxu1  ;;  %11355 = vmatmul.mubr.msk.f32.gmra.mrb[10].mxu1 %vm339_vm0, %v8460_v40  ;;  %v5764_v9 = vld [vmem:[#allocation4 + $0x40] sm:$0xff]  ;;  %v8469_v3 = vld [vmem:[#allocation3 + $0x122] sm:$0xff] }
 0x3b3   : > { %v6409_v19 = vpop.f32.mrb[193].mxu0  ;;  %5718 = vst.msk [vmem:[#allocation4 + $0xd0] sm:$0xff] %vm339_vm0, %v5686_v37  ;;  %v5331_v42 = vld [vmem:[#allocation4 + $0xe8] sm:$0xff]  ;;  %v6114_v30 = vadd.f32 %v5955_v55, %v5756_v7  ;;  %11357 = vmatprep.mubr.msk.f32.mxu1 %vm339_vm0, %v8461_v22  ;;  %v5767_v55 = vld [vmem:[#allocation4 + $0x58] sm:$0xff] }
 0x3b4   : > { %v5689_v35 = vadd.f32 %v10991_v53, %v5331_v42  ;;  %v5330_v21 = vld [vmem:[#allocation4 + $0xe0] sm:$0xff]  ;;  %6147 = vst.msk [vmem:[#allocation4 + $0x8] sm:$0xff] %vm339_vm0, %v6115_v57 }
 0x3b5   : > { %v5688_v41 = vadd.f32 %v5641_v12, %v5330_v21  ;;  %6146 = vst.msk [vmem:[#allocation4] sm:$0xff] %vm339_vm0, %v6114_v30  ;;  %v11008_v54 = vpop.f32.mrb[162].mxu1  ;;  %v8470_v42 = vld [vmem:[#allocation3 + $0x12a] sm:$0xff] }
 0x3b6   : > { %v11064_v52 = vpop.f32.mrb[194].mxu0  ;;  %5721 = vst.msk [vmem:[#allocation4 + $0xe8] sm:$0xff] %vm339_vm0, %v5689_v35  ;;  %v6117_v6 = vadd.f32 %v11008_v54, %v5759_v0  ;;  %v5965_v50 = vpop.f32.mrb[163].mxu1  ;;  %11358 = vmatmul.mubr.msk.f32.gmra.mrb[12].mxu1 %vm339_vm0, %v8462_v32  ;;  %v5766_v35 = vld [vmem:[#allocation4 + $0x50] sm:$0xff] }
 0x3b7   : > { %v6419_v26 = vpop.f32.mrb[195].mxu0  ;;  %5720 = vst.msk [vmem:[#allocation4 + $0xe0] sm:$0xff] %vm339_vm0, %v5688_v41  ;;  %v5333_v60 = vld [vmem:[#allocation4 + $0xf8] sm:$0xff]  ;;  %v6116_v33 = vadd.f32 %v5965_v50, %v5758_v49  ;;  %11360 = vmatprep.mubr.msk.f32.mxu1 %vm339_vm0, %v8463_v24  ;;  %v8471_v0 = vld [vmem:[#allocation3 + $0x13a] sm:$0xff] }
 0x3b8   : > { %v5691_v47 = vadd.f32 %v10994_v59, %v5333_v60  ;;  %v5332_v1 = vld [vmem:[#allocation4 + $0xf0] sm:$0xff]  ;;  %6149 = vst.msk [vmem:[#allocation4 + $0x18] sm:$0xff] %vm339_vm0, %v6117_v6  ;;  %v5769_v50 = vld [vmem:[#allocation4 + $0x68] sm:$0xff] }
 0x3b9   : > { %v5690_v38 = vadd.f32 %v5651_v44, %v5332_v1  ;;  %6148 = vst.msk [vmem:[#allocation4 + $0x10] sm:$0xff] %vm339_vm0, %v6116_v33  ;;  %v11011_v29 = vpop.f32.mrb[164].mxu1  ;;  %v8472_v60 = vld [vmem:[#allocation3 + $0x142] sm:$0xff] }
 0x3ba   : > { %v11067_v62 = vpop.f32.mrb[196].mxu0  ;;  %5723 = vst.msk [vmem:[#allocation4 + $0xf8] sm:$0xff] %vm339_vm0, %v5691_v47  ;;  %v6119_v36 = vadd.f32 %v11011_v29, %v5761_v15  ;;  %v5975_v25 = vpop.f32.mrb[165].mxu1  ;;  %11361 = vmatmul.mubr.msk.f32.gmra.mrb[14].mxu1 %vm339_vm0, %v8464_v8  ;;  %v5768_v47 = vld [vmem:[#allocation4 + $0x60] sm:$0xff] }
 0x3bb   : > { %v6429_v58 = vpop.f32.mrb[197].mxu0  ;;  %5722 = vst.msk [vmem:[#allocation4 + $0xf0] sm:$0xff] %vm339_vm0, %v5690_v38  ;;  %v6211_v28 = vld [vmem:[#allocation4 + $0x8] sm:$0xff]  ;;  %v6118_v4 = vadd.f32 %v5975_v25, %v5760_v48  ;;  %11363 = vmatprep.mubr.msk.f32.mxu1 %vm339_vm0, %v8465_v23  ;;  %v5771_v25 = vld [vmem:[#allocation4 + $0x78] sm:$0xff] }
 0x3bc   : > { %v6569_v53 = vadd.f32 %v11061_v11, %v6211_v28  ;;  %v6210_v18 = vld [vmem:[#allocation4] sm:$0xff]  ;;  %6151 = vst.msk [vmem:[#allocation4 + $0x28] sm:$0xff] %vm339_vm0, %v6119_v36  ;;  %v8474_v28 = vld [vmem:[#allocation3 + $0x15a] sm:$0xff] }
 0x3bd   : > { %v6568_v45 = vadd.f32 %v6409_v19, %v6210_v18  ;;  %6150 = vst.msk [vmem:[#allocation4 + $0x20] sm:$0xff] %vm339_vm0, %v6118_v4  ;;  %v11014_v12 = vpop.f32.mrb[166].mxu1  ;;  %v8473_v15 = vld [vmem:[#allocation3 + $0x152] sm:$0xff] }
 0x3be   : > { %v11070_v63 = vpop.f32.mrb[198].mxu0  ;;  %6601 = vst.msk [vmem:[#allocation4 + $0x8] sm:$0xff] %vm339_vm0, %v6569_v53  ;;  %v6121_v43 = vadd.f32 %v11014_v12, %v5763_v13  ;;  %v5985_v27 = vpop.f32.mrb[167].mxu1  ;;  %11364 = vmatmul.mubr.msk.f32.gmra.mrb[16].mxu1 %vm339_vm0, %v8466_v2  ;;  %v5770_v53 = vld [vmem:[#allocation4 + $0x70] sm:$0xff]  ;;  %v8475_v13 = vld [vmem:[#allocation3 + $0x16a] sm:$0xff] }
 0x3bf   : > { %v6439_v31 = vpop.f32.mrb[199].mxu0  ;;  %6600 = vst.msk [vmem:[#allocation4] sm:$0xff] %vm339_vm0, %v6568_v45  ;;  %v6213_v56 = vld [vmem:[#allocation4 + $0x18] sm:$0xff]  ;;  %v6120_v17 = vadd.f32 %v5985_v27, %v5762_v20  ;;  %11366 = vmatprep.mubr.msk.f32.mxu1 %vm339_vm0, %v8467_v61  ;;  %v5773_v27 = vld [vmem:[#allocation4 + $0x88] sm:$0xff] }
 0x3c0   : > { %v6571_v59 = vadd.f32 %v11064_v52, %v6213_v56  ;;  %v6212_v51 = vld [vmem:[#allocation4 + $0x10] sm:$0xff]  ;;  %6153 = vst.msk [vmem:[#allocation4 + $0x38] sm:$0xff] %vm339_vm0, %v6121_v43  ;;  %v8476_v56 = vld [vmem:[#allocation3 + $0x172] sm:$0xff] }
 0x3c1   : > { %v6570_v16 = vadd.f32 %v6419_v26, %v6212_v51  ;;  %6152 = vst.msk [vmem:[#allocation4 + $0x30] sm:$0xff] %vm339_vm0, %v6120_v17  ;;  %v11017_v44 = vpop.f32.mrb[168].mxu1 }
 0x3c2   : > { %v11073_v14 = vpop.f32.mrb[200].mxu0  ;;  %6603 = vst.msk [vmem:[#allocation4 + $0x18] sm:$0xff] %vm339_vm0, %v6571_v59  ;;  %v6123_v39 = vadd.f32 %v11017_v44, %v5765_v46  ;;  %v5995_v34 = vpop.f32.mrb[169].mxu1  ;;  %11367 = vmatmul.mubr.msk.f32.gmra.mrb[18].mxu1 %vm339_vm0, %v8468_v10  ;;  %v5772_v59 = vld [vmem:[#allocation4 + $0x80] sm:$0xff]  ;;  %v8477_v46 = vld [vmem:[#allocation3 + $0x182] sm:$0xff] }
 0x3c3   : > { %v6449_v37 = vpop.f32.mrb[201].mxu0  ;;  %6602 = vst.msk [vmem:[#allocation4 + $0x10] sm:$0xff] %vm339_vm0, %v6570_v16  ;;  %v6215_v5 = vld [vmem:[#allocation4 + $0x28] sm:$0xff]  ;;  %v6122_v11 = vadd.f32 %v5995_v34, %v5764_v9  ;;  %11369 = vmatprep.mubr.msk.f32.mxu1 %vm339_vm0, %v8469_v3 }
 0x3c4   : > { %v6573_v40 = vadd.f32 %v11067_v62, %v6215_v5  ;;  %v6214_v57 = vld [vmem:[#allocation4 + $0x20] sm:$0xff]  ;;  %6155 = vst.msk [vmem:[#allocation4 + $0x48] sm:$0xff] %vm339_vm0, %v6123_v39  ;;  %v8479_v9 = vld [vmem:[#allocation3 + $0x19a] sm:$0xff] }
 0x3c5   : > { %v6572_v7 = vadd.f32 %v6429_v58, %v6214_v57  ;;  %6154 = vst.msk [vmem:[#allocation4 + $0x40] sm:$0xff] %vm339_vm0, %v6122_v11  ;;  %v11020_v19 = vpop.f32.mrb[170].mxu1  ;;  %v8478_v11 = vld [vmem:[#allocation3 + $0x18a] sm:$0xff]  ;;  %v5774_v57 = vld [vmem:[#allocation4 + $0x90] sm:$0xff] }
 0x3c6   : > { %v11076_v22 = vpop.f32.mrb[202].mxu0  ;;  %6605 = vst.msk [vmem:[#allocation4 + $0x28] sm:$0xff] %vm339_vm0, %v6573_v40  ;;  %v6125_v30 = vadd.f32 %v11020_v19, %v5767_v55  ;;  %v6005_v21 = vpop.f32.mrb[171].mxu1  ;;  %11370 = vmatmul.mubr.msk.f32.gmra.mrb[20].mxu1 %vm339_vm0, %v8470_v42  ;;  %v8480_v42 = vld [vmem:[#allocation3 + $0x1a2] sm:$0xff] }
 0x3c7   : > { %v6459_v41 = vpop.f32.mrb[203].mxu0  ;;  %6604 = vst.msk [vmem:[#allocation4 + $0x20] sm:$0xff] %vm339_vm0, %v6572_v7  ;;  %v6217_v54 = vld [vmem:[#allocation4 + $0x38] sm:$0xff]  ;;  %v6124_v52 = vadd.f32 %v6005_v21, %v5766_v35  ;;  %11372 = vmatprep.mubr.msk.f32.mxu1 %vm339_vm0, %v8471_v0 }
 0x3c8   : > { %v6575_v32 = vadd.f32 %v11070_v63, %v6217_v54  ;;  %v6216_v6 = vld [vmem:[#allocation4 + $0x30] sm:$0xff]  ;;  %6157 = vst.msk [vmem:[#allocation4 + $0x58] sm:$0xff] %vm339_vm0, %v6125_v30 }
 0x3c9   : > { %v6574_v49 = vadd.f32 %v6439_v31, %v6216_v6  ;;  %6156 = vst.msk [vmem:[#allocation4 + $0x50] sm:$0xff] %vm339_vm0, %v6124_v52  ;;  %v11023_v26 = vpop.f32.mrb[172].mxu1 }
 0x3ca   : > { %v11079_v24 = vpop.f32.mrb[204].mxu0  ;;  %6607 = vst.msk [vmem:[#allocation4 + $0x38] sm:$0xff] %vm339_vm0, %v6575_v32  ;;  %v6127_v33 = vadd.f32 %v11023_v26, %v5769_v50  ;;  %v6015_v1 = vpop.f32.mrb[173].mxu1  ;;  %11373 = vmatmul.mubr.msk.f32.gmra.mrb[22].mxu1 %vm339_vm0, %v8472_v60  ;;  %v5776_v32 = vld [vmem:[#allocation4 + $0xa0] sm:$0xff] }
 0x3cb   : > { %v6469_v38 = vpop.f32.mrb[205].mxu0  ;;  %6606 = vst.msk [vmem:[#allocation4 + $0x30] sm:$0xff] %vm339_vm0, %v6574_v49  ;;  %v6219_v29 = vld [vmem:[#allocation4 + $0x48] sm:$0xff]  ;;  %v6126_v62 = vadd.f32 %v6015_v1, %v5768_v47  ;;  %11375 = vmatprep.mubr.msk.f32.mxu1 %vm339_vm0, %v8473_v15  ;;  %v5779_v47 = vld [vmem:[#allocation4 + $0xb8] sm:$0xff] }
 0x3cc   : > { %v6577_v8 = vadd.f32 %v11073_v14, %v6219_v29  ;;  %v6218_v36 = vld [vmem:[#allocation4 + $0x40] sm:$0xff]  ;;  %6159 = vst.msk [vmem:[#allocation4 + $0x68] sm:$0xff] %vm339_vm0, %v6127_v33  ;;  %v5778_v29 = vld [vmem:[#allocation4 + $0xb0] sm:$0xff] }
 0x3cd   : > { %v6576_v48 = vadd.f32 %v6449_v37, %v6218_v36  ;;  %6158 = vst.msk [vmem:[#allocation4 + $0x60] sm:$0xff] %vm339_vm0, %v6126_v62  ;;  %v11026_v58 = vpop.f32.mrb[174].mxu1  ;;  %v5775_v37 = vld [vmem:[#allocation4 + $0x98] sm:$0xff] }
 0x3ce   : > { %v11082_v23 = vpop.f32.mrb[206].mxu0  ;;  %6609 = vst.msk [vmem:[#allocation4 + $0x48] sm:$0xff] %vm339_vm0, %v6577_v8  ;;  %v6129_v4 = vadd.f32 %v11026_v58, %v5771_v25  ;;  %v6025_v18 = vpop.f32.mrb[175].mxu1  ;;  %11376 = vmatmul.mubr.msk.f32.gmra.mrb[24].mxu1 %vm339_vm0, %v8474_v28  ;;  %v5781_v28 = vld [vmem:[#allocation4 + $0xc8] sm:$0xff] }
 0x3cf   : > { %v6479_v45 = vpop.f32.mrb[207].mxu0  ;;  %6608 = vst.msk [vmem:[#allocation4 + $0x40] sm:$0xff] %vm339_vm0, %v6576_v48  ;;  %v6221_v12 = vld [vmem:[#allocation4 + $0x58] sm:$0xff]  ;;  %v6128_v63 = vadd.f32 %v6025_v18, %v5770_v53  ;;  %11378 = vmatprep.mubr.msk.f32.mxu1 %vm339_vm0, %v8475_v13 }
 0x3d0   : > { %v6579_v2 = vadd.f32 %v11076_v22, %v6221_v12  ;;  %v6220_v43 = vld [vmem:[#allocation4 + $0x50] sm:$0xff]  ;;  %6161 = vst.msk [vmem:[#allocation4 + $0x78] sm:$0xff] %vm339_vm0, %v6129_v4 }
 0x3d1   : > { %v6578_v20 = vadd.f32 %v6459_v41, %v6220_v43  ;;  %6160 = vst.msk [vmem:[#allocation4 + $0x70] sm:$0xff] %vm339_vm0, %v6128_v63  ;;  %v11029_v31 = vpop.f32.mrb[176].mxu1  ;;  %v5777_v41 = vld [vmem:[#allocation4 + $0xa8] sm:$0xff] }
 0x3d2   : > { %v11085_v61 = vpop.f32.mrb[208].mxu0  ;;  %6611 = vst.msk [vmem:[#allocation4 + $0x58] sm:$0xff] %vm339_vm0, %v6579_v2  ;;  %v6131_v17 = vadd.f32 %v11029_v31, %v5773_v27  ;;  %v6035_v51 = vpop.f32.mrb[177].mxu1  ;;  %11379 = vmatmul.mubr.msk.f32.gmra.mrb[26].mxu1 %vm339_vm0, %v8476_v56  ;;  %v5783_v31 = vld [vmem:[#allocation4 + $0xd8] sm:$0xff] }
 0x3d3   : > { %v6489_v16 = vpop.f32.mrb[209].mxu0  ;;  %6610 = vst.msk [vmem:[#allocation4 + $0x50] sm:$0xff] %vm339_vm0, %v6578_v20  ;;  %v6223_v44 = vld [vmem:[#allocation4 + $0x68] sm:$0xff]  ;;  %v6130_v14 = vadd.f32 %v6035_v51, %v5772_v59  ;;  %11381 = vmatprep.mubr.msk.f32.mxu1 %vm339_vm0, %v8477_v46  ;;  %v5782_v59 = vld [vmem:[#allocation4 + $0xd0] sm:$0xff] }
 0x3d4   : > { %v6581_v10 = vadd.f32 %v11079_v24, %v6223_v44  ;;  %v6222_v39 = vld [vmem:[#allocation4 + $0x60] sm:$0xff]  ;;  %6163 = vst.msk [vmem:[#allocation4 + $0x88] sm:$0xff] %vm339_vm0, %v6131_v17 }
 0x3d5   : > { %v6580_v34 = vadd.f32 %v6469_v38, %v6222_v39  ;;  %6162 = vst.msk [vmem:[#allocation4 + $0x80] sm:$0xff] %vm339_vm0, %v6130_v14  ;;  %v11032_v3 = vpop.f32.mrb[178].mxu1 }
 0x3d6   : > { %v11088_v5 = vpop.f32.mrb[210].mxu0  ;;  %6613 = vst.msk [vmem:[#allocation4 + $0x68] sm:$0xff] %vm339_vm0, %v6581_v10  ;;  %v6133_v40 = vadd.f32 %v11032_v3, %v5775_v37  ;;  %v6045_v7 = vpop.f32.mrb[179].mxu1  ;;  %11382 = vmatmul.mubr.msk.f32.gmra.mrb[28].mxu1 %vm339_vm0, %v8478_v11 }
 0x3d7   : > { %v6499_v55 = vpop.f32.mrb[211].mxu0  ;;  %6612 = vst.msk [vmem:[#allocation4 + $0x60] sm:$0xff] %vm339_vm0, %v6580_v34  ;;  %v6225_v19 = vld [vmem:[#allocation4 + $0x78] sm:$0xff]  ;;  %v6132_v22 = vadd.f32 %v6045_v7, %v5774_v57  ;;  %11384 = vmatprep.mubr.msk.f32.mxu1 %vm339_vm0, %v8479_v9  ;;  %v5785_v9 = vld [vmem:[#allocation4 + $0xe8] sm:$0xff] }
 0x3d8   : > { %v6583_v30 = vadd.f32 %v11082_v23, %v6225_v19  ;;  %v6224_v35 = vld [vmem:[#allocation4 + $0x70] sm:$0xff]  ;;  %6165 = vst.msk [vmem:[#allocation4 + $0x98] sm:$0xff] %vm339_vm0, %v6133_v40 }
 0x3d9   : > { %v6582_v21 = vadd.f32 %v6479_v45, %v6224_v35  ;;  %6164 = vst.msk [vmem:[#allocation4 + $0x90] sm:$0xff] %vm339_vm0, %v6132_v22  ;;  %v11035_v0 = vpop.f32.mrb[180].mxu1  ;;  %v5780_v45 = vld [vmem:[#allocation4 + $0xc0] sm:$0xff] }
 0x3da   : > { %v11091_v54 = vpop.f32.mrb[212].mxu0  ;;  %6615 = vst.msk [vmem:[#allocation4 + $0x78] sm:$0xff] %vm339_vm0, %v6583_v30  ;;  %v6135_v52 = vadd.f32 %v11035_v0, %v5777_v41  ;;  %v6055_v6 = vpop.f32.mrb[181].mxu1  ;;  %11385 = vmatmul.mubr.msk.f32.gmra.mrb[30].mxu1 %vm339_vm0, %v8480_v42  ;;  %v5787_v42 = vld [vmem:[#allocation4 + $0xf8] sm:$0xff]  ;;  %v5786_v41 = vld [vmem:[#allocation4 + $0xf0] sm:$0xff] }
 0x3db   : > { %v6509_v49 = vpop.f32.mrb[213].mxu0  ;;  %6614 = vst.msk [vmem:[#allocation4 + $0x70] sm:$0xff] %vm339_vm0, %v6582_v21  ;;  %v6227_v50 = vld [vmem:[#allocation4 + $0x88] sm:$0xff]  ;;  %v6134_v26 = vadd.f32 %v6055_v6, %v5776_v32 }
 0x3dc   : > { %v6585_v24 = vadd.f32 %v11085_v61, %v6227_v50  ;;  %v6226_v60 = vld [vmem:[#allocation4 + $0x80] sm:$0xff]  ;;  %6167 = vst.msk [vmem:[#allocation4 + $0xa8] sm:$0xff] %vm339_vm0, %v6135_v52 }
 0x3dd   : > { %v6584_v33 = vadd.f32 %v6489_v16, %v6226_v60  ;;  %6166 = vst.msk [vmem:[#allocation4 + $0xa0] sm:$0xff] %vm339_vm0, %v6134_v26  ;;  %v11038_v1 = vpop.f32.mrb[182].mxu1  ;;  %v6665_v26 = vld [vmem:[#allocation4 + $0x8] sm:$0xff] }
 0x3de   : > { %v11094_v38 = vpop.f32.mrb[214].mxu0  ;;  %6617 = vst.msk [vmem:[#allocation4 + $0x88] sm:$0xff] %vm339_vm0, %v6585_v24  ;;  %v6137_v15 = vadd.f32 %v11038_v1, %v5779_v47  ;;  %v6065_v62 = vpop.f32.mrb[183].mxu1  ;;  %v6664_v47 = vld [vmem:[#allocation4] sm:$0xff] }
 0x3df   : > { %v6519_v8 = vpop.f32.mrb[215].mxu0  ;;  %6616 = vst.msk [vmem:[#allocation4 + $0x80] sm:$0xff] %vm339_vm0, %v6584_v33  ;;  %v6229_v36 = vld [vmem:[#allocation4 + $0x98] sm:$0xff]  ;;  %v6136_v48 = vadd.f32 %v6065_v62, %v5778_v29 }
 0x3e0   : > { %v6587_v25 = vadd.f32 %v11088_v5, %v6229_v36  ;;  %v6228_v58 = vld [vmem:[#allocation4 + $0x90] sm:$0xff]  ;;  %6169 = vst.msk [vmem:[#allocation4 + $0xb8] sm:$0xff] %vm339_vm0, %v6137_v15  ;;  %v5784_v5 = vld [vmem:[#allocation4 + $0xe0] sm:$0xff] }
 0x3e1   : > { %v6586_v23 = vadd.f32 %v6499_v55, %v6228_v58  ;;  %6168 = vst.msk [vmem:[#allocation4 + $0xb0] sm:$0xff] %vm339_vm0, %v6136_v48  ;;  %v11041_v4 = vpop.f32.mrb[184].mxu1  ;;  %v6667_v48 = vld [vmem:[#allocation4 + $0x18] sm:$0xff] }
 0x3e2   : > { %v11097_v53 = vpop.f32.mrb[216].mxu0  ;;  %6619 = vst.msk [vmem:[#allocation4 + $0x98] sm:$0xff] %vm339_vm0, %v6587_v25  ;;  %v6139_v18 = vadd.f32 %v11041_v4, %v5781_v28  ;;  %v6075_v13 = vpop.f32.mrb[185].mxu1  ;;  %v6666_v28 = vld [vmem:[#allocation4 + $0x10] sm:$0xff] }
 0x3e3   : > { %v6529_v12 = vpop.f32.mrb[217].mxu0  ;;  %6618 = vst.msk [vmem:[#allocation4 + $0x90] sm:$0xff] %vm339_vm0, %v6586_v23  ;;  %v6231_v63 = vld [vmem:[#allocation4 + $0xa8] sm:$0xff]  ;;  %v6138_v2 = vadd.f32 %v6075_v13, %v5780_v45 }
 0x3e4   : > { %v6589_v43 = vadd.f32 %v11091_v54, %v6231_v63  ;;  %v6230_v20 = vld [vmem:[#allocation4 + $0xa0] sm:$0xff]  ;;  %6171 = vst.msk [vmem:[#allocation4 + $0xc8] sm:$0xff] %vm339_vm0, %v6139_v18 }
 0x3e5   : > { %v6588_v27 = vadd.f32 %v6509_v49, %v6230_v20  ;;  %6170 = vst.msk [vmem:[#allocation4 + $0xc0] sm:$0xff] %vm339_vm0, %v6138_v2  ;;  %v11044_v61 = vpop.f32.mrb[186].mxu1  ;;  %v6669_v2 = vld [vmem:[#allocation4 + $0x28] sm:$0xff] }
 0x3e6   : > { %v11100_v56 = vpop.f32.mrb[218].mxu0  ;;  %6621 = vst.msk [vmem:[#allocation4 + $0xa8] sm:$0xff] %vm339_vm0, %v6589_v43  ;;  %v6141_v17 = vadd.f32 %v11044_v61, %v5783_v31  ;;  %v6085_v51 = vpop.f32.mrb[187].mxu1  ;;  %v6668_v31 = vld [vmem:[#allocation4 + $0x20] sm:$0xff] }
 0x3e7   : > { %v6539_v16 = vpop.f32.mrb[219].mxu0  ;;  %6620 = vst.msk [vmem:[#allocation4 + $0xa0] sm:$0xff] %vm339_vm0, %v6588_v27  ;;  %v6233_v46 = vld [vmem:[#allocation4 + $0xb8] sm:$0xff]  ;;  %v6140_v44 = vadd.f32 %v6085_v51, %v5782_v59 }
 0x3e8   : > { %v6591_v14 = vadd.f32 %v11094_v38, %v6233_v46  ;;  %v6232_v10 = vld [vmem:[#allocation4 + $0xb0] sm:$0xff]  ;;  %6173 = vst.msk [vmem:[#allocation4 + $0xd8] sm:$0xff] %vm339_vm0, %v6141_v17 }
 0x3e9   : > { %v6590_v39 = vadd.f32 %v6519_v8, %v6232_v10  ;;  %6172 = vst.msk [vmem:[#allocation4 + $0xd0] sm:$0xff] %vm339_vm0, %v6140_v44  ;;  %v11047_v34 = vpop.f32.mrb[188].mxu1  ;;  %v6671_v44 = vld [vmem:[#allocation4 + $0x38] sm:$0xff] }
 0x3ea   : > { %v11103_v37 = vpop.f32.mrb[220].mxu0  ;;  %6623 = vst.msk [vmem:[#allocation4 + $0xb8] sm:$0xff] %vm339_vm0, %v6591_v14  ;;  %v6143_v3 = vadd.f32 %v11047_v34, %v5785_v9  ;;  %v6095_v11 = vpop.f32.mrb[189].mxu1  ;;  %v6670_v9 = vld [vmem:[#allocation4 + $0x30] sm:$0xff] }
 0x3eb   : > { %v6549_v40 = vpop.f32.mrb[221].mxu0  ;;  %6622 = vst.msk [vmem:[#allocation4 + $0xb0] sm:$0xff] %vm339_vm0, %v6590_v39  ;;  %v6235_v57 = vld [vmem:[#allocation4 + $0xc8] sm:$0xff]  ;;  %v6142_v7 = vadd.f32 %v6095_v11, %v5784_v5 }
 0x3ec   : > { %v6593_v55 = vadd.f32 %v11097_v53, %v6235_v57  ;;  %v6234_v19 = vld [vmem:[#allocation4 + $0xc0] sm:$0xff]  ;;  %6175 = vst.msk [vmem:[#allocation4 + $0xe8] sm:$0xff] %vm339_vm0, %v6143_v3 }
 0x3ed   : > { %v6592_v22 = vadd.f32 %v6529_v12, %v6234_v19  ;;  %6174 = vst.msk [vmem:[#allocation4 + $0xe0] sm:$0xff] %vm339_vm0, %v6142_v7  ;;  %v11050_v30 = vpop.f32.mrb[190].mxu1  ;;  %v6673_v7 = vld [vmem:[#allocation4 + $0x48] sm:$0xff] }
 0x3ee   : > { %v11106_v35 = vpop.f32.mrb[222].mxu0  ;;  %6625 = vst.msk [vmem:[#allocation4 + $0xc8] sm:$0xff] %vm339_vm0, %v6593_v55  ;;  %v6145_v21 = vadd.f32 %v11050_v30, %v5787_v42  ;;  %v6105_v0 = vpop.f32.mrb[191].mxu1  ;;  %v6672_v42 = vld [vmem:[#allocation4 + $0x40] sm:$0xff] }
 0x3ef   : > { %v6559_v54 = vpop.f32.mrb[223].mxu0  ;;  %6624 = vst.msk [vmem:[#allocation4 + $0xc0] sm:$0xff] %vm339_vm0, %v6592_v22  ;;  %v6237_v52 = vld [vmem:[#allocation4 + $0xd8] sm:$0xff]  ;;  %v6144_v32 = vadd.f32 %v6105_v0, %v5786_v41 }
 0x3f0   : > { %v6595_v6 = vadd.f32 %v11100_v56, %v6237_v52  ;;  %v6236_v49 = vld [vmem:[#allocation4 + $0xd0] sm:$0xff]  ;;  %6177 = vst.msk [vmem:[#allocation4 + $0xf8] sm:$0xff] %vm339_vm0, %v6145_v21 }
 0x3f1   : > { %v6594_v50 = vadd.f32 %v6539_v16, %v6236_v49  ;;  %6176 = vst.msk [vmem:[#allocation4 + $0xf0] sm:$0xff] %vm339_vm0, %v6144_v32  ;;  %v11117_v24 = vpop.f32.mrb[192].mxu1  ;;  %v6675_v32 = vld [vmem:[#allocation4 + $0x58] sm:$0xff] }
 0x3f2   : > { %v11173_v60 = vpop.f32.mrb[224].mxu0  ;;  %6627 = vst.msk [vmem:[#allocation4 + $0xd8] sm:$0xff] %vm339_vm0, %v6595_v6  ;;  %v7023_v33 = vadd.f32 %v11117_v24, %v6665_v26  ;;  %v6863_v1 = vpop.f32.mrb[193].mxu1  ;;  %v6674_v26 = vld [vmem:[#allocation4 + $0x50] sm:$0xff] }
 0x3f3   : > { %v7317_v38 = vpop.f32.mrb[225].mxu0  ;;  %6626 = vst.msk [vmem:[#allocation4 + $0xd0] sm:$0xff] %vm339_vm0, %v6594_v50  ;;  %v6239_v15 = vld [vmem:[#allocation4 + $0xe8] sm:$0xff]  ;;  %v7022_v29 = vadd.f32 %v6863_v1, %v6664_v47 }
 0x3f4   : > { %v6597_v62 = vadd.f32 %v11103_v37, %v6239_v15  ;;  %v6238_v8 = vld [vmem:[#allocation4 + $0xe0] sm:$0xff]  ;;  %7055 = vst.msk [vmem:[#allocation4 + $0x8] sm:$0xff] %vm339_vm0, %v7023_v33 }
 0x3f5   : > { %v6596_v36 = vadd.f32 %v6549_v40, %v6238_v8  ;;  %7054 = vst.msk [vmem:[#allocation4] sm:$0xff] %vm339_vm0, %v7022_v29  ;;  %v11120_v25 = vpop.f32.mrb[194].mxu1  ;;  %v6677_v29 = vld [vmem:[#allocation4 + $0x68] sm:$0xff] }
 0x3f6   : > { %v11176_v58 = vpop.f32.mrb[226].mxu0  ;;  %6629 = vst.msk [vmem:[#allocation4 + $0xe8] sm:$0xff] %vm339_vm0, %v6597_v62  ;;  %v7025_v23 = vadd.f32 %v11120_v25, %v6667_v48  ;;  %v6873_v4 = vpop.f32.mrb[195].mxu1  ;;  %v6676_v48 = vld [vmem:[#allocation4 + $0x60] sm:$0xff] }
 0x3f7   : > { %v7327_v53 = vpop.f32.mrb[227].mxu0  ;;  %6628 = vst.msk [vmem:[#allocation4 + $0xe0] sm:$0xff] %vm339_vm0, %v6596_v36  ;;  %v6241_v18 = vld [vmem:[#allocation4 + $0xf8] sm:$0xff]  ;;  %v7024_v45 = vadd.f32 %v6873_v4, %v6666_v28 }
 0x3f8   : > { %v6599_v13 = vadd.f32 %v11106_v35, %v6241_v18  ;;  %v6240_v12 = vld [vmem:[#allocation4 + $0xf0] sm:$0xff]  ;;  %7057 = vst.msk [vmem:[#allocation4 + $0x18] sm:$0xff] %vm339_vm0, %v7025_v23 }
 0x3f9   : > { %v6598_v63 = vadd.f32 %v6559_v54, %v6240_v12  ;;  %7056 = vst.msk [vmem:[#allocation4 + $0x10] sm:$0xff] %vm339_vm0, %v7024_v45  ;;  %v11123_v43 = vpop.f32.mrb[196].mxu1  ;;  %v6679_v45 = vld [vmem:[#allocation4 + $0x78] sm:$0xff] }
 0x3fa   : > { %v11179_v20 = vpop.f32.mrb[228].mxu0  ;;  %6631 = vst.msk [vmem:[#allocation4 + $0xf8] sm:$0xff] %vm339_vm0, %v6599_v13  ;;  %v7027_v27 = vadd.f32 %v11123_v43, %v6669_v2  ;;  %v6883_v61 = vpop.f32.mrb[197].mxu1  ;;  %v6678_v2 = vld [vmem:[#allocation4 + $0x70] sm:$0xff] }
 0x3fb   : > { %v7337_v56 = vpop.f32.mrb[229].mxu0  ;;  %6630 = vst.msk [vmem:[#allocation4 + $0xf0] sm:$0xff] %vm339_vm0, %v6598_v63  ;;  %v7119_v17 = vld [vmem:[#allocation4 + $0x8] sm:$0xff]  ;;  %v7026_v59 = vadd.f32 %v6883_v61, %v6668_v31 }
 0x3fc   : > { %v7477_v51 = vadd.f32 %v11173_v60, %v7119_v17  ;;  %v7118_v16 = vld [vmem:[#allocation4] sm:$0xff]  ;;  %7059 = vst.msk [vmem:[#allocation4 + $0x28] sm:$0xff] %vm339_vm0, %v7027_v27 }
 0x3fd   : > { %v7476_v46 = vadd.f32 %v7317_v38, %v7118_v16  ;;  %7058 = vst.msk [vmem:[#allocation4 + $0x20] sm:$0xff] %vm339_vm0, %v7026_v59  ;;  %v11126_v14 = vpop.f32.mrb[198].mxu1  ;;  %v6681_v59 = vld [vmem:[#allocation4 + $0x88] sm:$0xff] }
 0x3fe   : > { %v11182_v10 = vpop.f32.mrb[230].mxu0  ;;  %7509 = vst.msk [vmem:[#allocation4 + $0x8] sm:$0xff] %vm339_vm0, %v7477_v51  ;;  %v7029_v39 = vadd.f32 %v11126_v14, %v6671_v44  ;;  %v6893_v34 = vpop.f32.mrb[199].mxu1  ;;  %v6680_v44 = vld [vmem:[#allocation4 + $0x80] sm:$0xff] }
 0x3ff   : > { %v7347_v37 = vpop.f32.mrb[231].mxu0  ;;  %7508 = vst.msk [vmem:[#allocation4] sm:$0xff] %vm339_vm0, %v7476_v46  ;;  %v7121_v3 = vld [vmem:[#allocation4 + $0x18] sm:$0xff]  ;;  %v7028_v5 = vadd.f32 %v6893_v34, %v6670_v9 }
 0x400   : > { %v7479_v11 = vadd.f32 %v11176_v58, %v7121_v3  ;;  %v7120_v40 = vld [vmem:[#allocation4 + $0x10] sm:$0xff]  ;;  %7061 = vst.msk [vmem:[#allocation4 + $0x38] sm:$0xff] %vm339_vm0, %v7029_v39 }
 0x401   : > { %v7478_v57 = vadd.f32 %v7327_v53, %v7120_v40  ;;  %7060 = vst.msk [vmem:[#allocation4 + $0x30] sm:$0xff] %vm339_vm0, %v7028_v5  ;;  %v11129_v55 = vpop.f32.mrb[200].mxu1  ;;  %v6683_v5 = vld [vmem:[#allocation4 + $0x98] sm:$0xff] }
 0x402   : > { %v11185_v19 = vpop.f32.mrb[232].mxu0  ;;  %7511 = vst.msk [vmem:[#allocation4 + $0x18] sm:$0xff] %vm339_vm0, %v7479_v11  ;;  %v7031_v22 = vadd.f32 %v11129_v55, %v6673_v7  ;;  %v6903_v30 = vpop.f32.mrb[201].mxu1  ;;  %v6682_v7 = vld [vmem:[#allocation4 + $0x90] sm:$0xff] }
 0x403   : > { %v7357_v35 = vpop.f32.mrb[233].mxu0  ;;  %7510 = vst.msk [vmem:[#allocation4 + $0x10] sm:$0xff] %vm339_vm0, %v7478_v57  ;;  %v7123_v21 = vld [vmem:[#allocation4 + $0x28] sm:$0xff]  ;;  %v7030_v41 = vadd.f32 %v6903_v30, %v6672_v42 }
 0x404   : > { %v7481_v0 = vadd.f32 %v11179_v20, %v7123_v21  ;;  %v7122_v54 = vld [vmem:[#allocation4 + $0x20] sm:$0xff]  ;;  %7063 = vst.msk [vmem:[#allocation4 + $0x48] sm:$0xff] %vm339_vm0, %v7031_v22 }
 0x405   : > { %v7480_v52 = vadd.f32 %v7337_v56, %v7122_v54  ;;  %7062 = vst.msk [vmem:[#allocation4 + $0x40] sm:$0xff] %vm339_vm0, %v7030_v41  ;;  %v11132_v6 = vpop.f32.mrb[202].mxu1  ;;  %v6685_v41 = vld [vmem:[#allocation4 + $0xa8] sm:$0xff] }
 0x406   : > { %v11188_v49 = vpop.f32.mrb[234].mxu0  ;;  %7513 = vst.msk [vmem:[#allocation4 + $0x28] sm:$0xff] %vm339_vm0, %v7481_v0  ;;  %v7033_v50 = vadd.f32 %v11132_v6, %v6675_v32  ;;  %v6913_v24 = vpop.f32.mrb[203].mxu1  ;;  %v6684_v32 = vld [vmem:[#allocation4 + $0xa0] sm:$0xff] }
 0x407   : > { %v7367_v60 = vpop.f32.mrb[235].mxu0  ;;  %7512 = vst.msk [vmem:[#allocation4 + $0x20] sm:$0xff] %vm339_vm0, %v7480_v52  ;;  %v7125_v33 = vld [vmem:[#allocation4 + $0x38] sm:$0xff]  ;;  %v7032_v47 = vadd.f32 %v6913_v24, %v6674_v26 }
 0x408   : > { %v7483_v1 = vadd.f32 %v11182_v10, %v7125_v33  ;;  %v7124_v38 = vld [vmem:[#allocation4 + $0x30] sm:$0xff]  ;;  %7065 = vst.msk [vmem:[#allocation4 + $0x58] sm:$0xff] %vm339_vm0, %v7033_v50 }
 0x409   : > { %v7482_v15 = vadd.f32 %v7347_v37, %v7124_v38  ;;  %7064 = vst.msk [vmem:[#allocation4 + $0x50] sm:$0xff] %vm339_vm0, %v7032_v47  ;;  %v11135_v62 = vpop.f32.mrb[204].mxu1  ;;  %v6687_v47 = vld [vmem:[#allocation4 + $0xb8] sm:$0xff] }
 0x40a   : > { %v11191_v8 = vpop.f32.mrb[236].mxu0  ;;  %7515 = vst.msk [vmem:[#allocation4 + $0x38] sm:$0xff] %vm339_vm0, %v7483_v1  ;;  %v7035_v36 = vadd.f32 %v11135_v62, %v6677_v29  ;;  %v6923_v25 = vpop.f32.mrb[205].mxu1  ;;  %v6686_v29 = vld [vmem:[#allocation4 + $0xb0] sm:$0xff] }
 0x40b   : > { %v7377_v58 = vpop.f32.mrb[237].mxu0  ;;  %7514 = vst.msk [vmem:[#allocation4 + $0x30] sm:$0xff] %vm339_vm0, %v7482_v15  ;;  %v7127_v23 = vld [vmem:[#allocation4 + $0x48] sm:$0xff]  ;;  %v7034_v28 = vadd.f32 %v6923_v25, %v6676_v48 }
 0x40c   : > { %v7485_v4 = vadd.f32 %v11185_v19, %v7127_v23  ;;  %v7126_v53 = vld [vmem:[#allocation4 + $0x40] sm:$0xff]  ;;  %7067 = vst.msk [vmem:[#allocation4 + $0x68] sm:$0xff] %vm339_vm0, %v7035_v36 }
 0x40d   : > { %v7484_v18 = vadd.f32 %v7357_v35, %v7126_v53  ;;  %7066 = vst.msk [vmem:[#allocation4 + $0x60] sm:$0xff] %vm339_vm0, %v7034_v28  ;;  %v11138_v13 = vpop.f32.mrb[206].mxu1  ;;  %v6689_v28 = vld [vmem:[#allocation4 + $0xc8] sm:$0xff] }
 0x40e   : > { %v11194_v12 = vpop.f32.mrb[238].mxu0  ;;  %7517 = vst.msk [vmem:[#allocation4 + $0x48] sm:$0xff] %vm339_vm0, %v7485_v4  ;;  %v7037_v63 = vadd.f32 %v11138_v13, %v6679_v45  ;;  %v6933_v43 = vpop.f32.mrb[207].mxu1  ;;  %v6688_v45 = vld [vmem:[#allocation4 + $0xc0] sm:$0xff] }
 0x40f   : > { %v7387_v20 = vpop.f32.mrb[239].mxu0  ;;  %7516 = vst.msk [vmem:[#allocation4 + $0x40] sm:$0xff] %vm339_vm0, %v7484_v18  ;;  %v7129_v27 = vld [vmem:[#allocation4 + $0x58] sm:$0xff]  ;;  %v7036_v31 = vadd.f32 %v6933_v43, %v6678_v2 }
 0x410   : > { %v7487_v61 = vadd.f32 %v11188_v49, %v7129_v27  ;;  %v7128_v56 = vld [vmem:[#allocation4 + $0x50] sm:$0xff]  ;;  %7069 = vst.msk [vmem:[#allocation4 + $0x78] sm:$0xff] %vm339_vm0, %v7037_v63 }
 0x411   : > { %v7486_v17 = vadd.f32 %v7367_v60, %v7128_v56  ;;  %7068 = vst.msk [vmem:[#allocation4 + $0x70] sm:$0xff] %vm339_vm0, %v7036_v31  ;;  %v11141_v51 = vpop.f32.mrb[208].mxu1  ;;  %v6691_v31 = vld [vmem:[#allocation4 + $0xd8] sm:$0xff] }
 0x412   : > { %v11197_v16 = vpop.f32.mrb[240].mxu0  ;;  %7519 = vst.msk [vmem:[#allocation4 + $0x58] sm:$0xff] %vm339_vm0, %v7487_v61  ;;  %v7039_v46 = vadd.f32 %v11141_v51, %v6681_v59  ;;  %v6943_v14 = vpop.f32.mrb[209].mxu1  ;;  %v6690_v59 = vld [vmem:[#allocation4 + $0xd0] sm:$0xff] }
 0x413   : > { %v7397_v10 = vpop.f32.mrb[241].mxu0  ;;  %7518 = vst.msk [vmem:[#allocation4 + $0x50] sm:$0xff] %vm339_vm0, %v7486_v17  ;;  %v7131_v39 = vld [vmem:[#allocation4 + $0x68] sm:$0xff]  ;;  %v7038_v9 = vadd.f32 %v6943_v14, %v6680_v44 }
 0x414   : > { %v7489_v34 = vadd.f32 %v11191_v8, %v7131_v39  ;;  %v7130_v37 = vld [vmem:[#allocation4 + $0x60] sm:$0xff]  ;;  %7071 = vst.msk [vmem:[#allocation4 + $0x88] sm:$0xff] %vm339_vm0, %v7039_v46 }
 0x415   : > { %v7488_v3 = vadd.f32 %v7377_v58, %v7130_v37  ;;  %7070 = vst.msk [vmem:[#allocation4 + $0x80] sm:$0xff] %vm339_vm0, %v7038_v9  ;;  %v11144_v11 = vpop.f32.mrb[210].mxu1  ;;  %v6693_v9 = vld [vmem:[#allocation4 + $0xe8] sm:$0xff] }
 0x416   : > { %v11200_v40 = vpop.f32.mrb[242].mxu0  ;;  %7521 = vst.msk [vmem:[#allocation4 + $0x68] sm:$0xff] %vm339_vm0, %v7489_v34  ;;  %v7041_v57 = vadd.f32 %v11144_v11, %v6683_v5  ;;  %v6953_v55 = vpop.f32.mrb[211].mxu1  ;;  %v6692_v5 = vld [vmem:[#allocation4 + $0xe0] sm:$0xff] }
 0x417   : > { %v7407_v19 = vpop.f32.mrb[243].mxu0  ;;  %7520 = vst.msk [vmem:[#allocation4 + $0x60] sm:$0xff] %vm339_vm0, %v7488_v3  ;;  %v7133_v22 = vld [vmem:[#allocation4 + $0x78] sm:$0xff]  ;;  %v7040_v42 = vadd.f32 %v6953_v55, %v6682_v7 }
 0x418   : > { %v7491_v30 = vadd.f32 %v11194_v12, %v7133_v22  ;;  %v7132_v35 = vld [vmem:[#allocation4 + $0x70] sm:$0xff]  ;;  %7073 = vst.msk [vmem:[#allocation4 + $0x98] sm:$0xff] %vm339_vm0, %v7041_v57 }
 0x419   : > { %v7490_v21 = vadd.f32 %v7387_v20, %v7132_v35  ;;  %7072 = vst.msk [vmem:[#allocation4 + $0x90] sm:$0xff] %vm339_vm0, %v7040_v42  ;;  %v11147_v0 = vpop.f32.mrb[212].mxu1  ;;  %v6695_v42 = vld [vmem:[#allocation4 + $0xf8] sm:$0xff] }
 0x41a   : > { %v11203_v54 = vpop.f32.mrb[244].mxu0  ;;  %7523 = vst.msk [vmem:[#allocation4 + $0x78] sm:$0xff] %vm339_vm0, %v7491_v30  ;;  %v7043_v52 = vadd.f32 %v11147_v0, %v6685_v41  ;;  %v6963_v6 = vpop.f32.mrb[213].mxu1  ;;  %v6694_v41 = vld [vmem:[#allocation4 + $0xf0] sm:$0xff] }
 0x41b   : > { %v7417_v49 = vpop.f32.mrb[245].mxu0  ;;  %7522 = vst.msk [vmem:[#allocation4 + $0x70] sm:$0xff] %vm339_vm0, %v7490_v21  ;;  %v7135_v50 = vld [vmem:[#allocation4 + $0x88] sm:$0xff]  ;;  %v7042_v26 = vadd.f32 %v6963_v6, %v6684_v32 }
 0x41c   : > { %v7493_v24 = vadd.f32 %v11197_v16, %v7135_v50  ;;  %v7134_v60 = vld [vmem:[#allocation4 + $0x80] sm:$0xff]  ;;  %7075 = vst.msk [vmem:[#allocation4 + $0xa8] sm:$0xff] %vm339_vm0, %v7043_v52 }
 0x41d   : > { %v7492_v33 = vadd.f32 %v7397_v10, %v7134_v60  ;;  %7074 = vst.msk [vmem:[#allocation4 + $0xa0] sm:$0xff] %vm339_vm0, %v7042_v26  ;;  %v11150_v1 = vpop.f32.mrb[214].mxu1  ;;  %v7574_v26 = vld [vmem:[#allocation4 + $0x8] sm:$0xff] }
 0x41e   : > { %v11206_v38 = vpop.f32.mrb[246].mxu0  ;;  %7525 = vst.msk [vmem:[#allocation4 + $0x88] sm:$0xff] %vm339_vm0, %v7493_v24  ;;  %v7045_v15 = vadd.f32 %v11150_v1, %v6687_v47  ;;  %v6973_v62 = vpop.f32.mrb[215].mxu1  ;;  %v7573_v47 = vld [vmem:[#allocation4] sm:$0xff] }
 0x41f   : > { %v7427_v8 = vpop.f32.mrb[247].mxu0  ;;  %7524 = vst.msk [vmem:[#allocation4 + $0x80] sm:$0xff] %vm339_vm0, %v7492_v33  ;;  %v7137_v36 = vld [vmem:[#allocation4 + $0x98] sm:$0xff]  ;;  %v7044_v48 = vadd.f32 %v6973_v62, %v6686_v29 }
 0x420   : > { %v7495_v25 = vadd.f32 %v11200_v40, %v7137_v36  ;;  %v7136_v58 = vld [vmem:[#allocation4 + $0x90] sm:$0xff]  ;;  %7077 = vst.msk [vmem:[#allocation4 + $0xb8] sm:$0xff] %vm339_vm0, %v7045_v15 }
 0x421   : > { %v7494_v23 = vadd.f32 %v7407_v19, %v7136_v58  ;;  %7076 = vst.msk [vmem:[#allocation4 + $0xb0] sm:$0xff] %vm339_vm0, %v7044_v48  ;;  %v11153_v4 = vpop.f32.mrb[216].mxu1  ;;  %v7576_v48 = vld [vmem:[#allocation4 + $0x18] sm:$0xff] }
 0x422   : > { %v11209_v53 = vpop.f32.mrb[248].mxu0  ;;  %7527 = vst.msk [vmem:[#allocation4 + $0x98] sm:$0xff] %vm339_vm0, %v7495_v25  ;;  %v7047_v18 = vadd.f32 %v11153_v4, %v6689_v28  ;;  %v6983_v13 = vpop.f32.mrb[217].mxu1  ;;  %v7575_v28 = vld [vmem:[#allocation4 + $0x10] sm:$0xff] }
 0x423   : > { %v7437_v12 = vpop.f32.mrb[249].mxu0  ;;  %7526 = vst.msk [vmem:[#allocation4 + $0x90] sm:$0xff] %vm339_vm0, %v7494_v23  ;;  %v7139_v63 = vld [vmem:[#allocation4 + $0xa8] sm:$0xff]  ;;  %v7046_v2 = vadd.f32 %v6983_v13, %v6688_v45 }
 0x424   : > { %v7497_v43 = vadd.f32 %v11203_v54, %v7139_v63  ;;  %v7138_v20 = vld [vmem:[#allocation4 + $0xa0] sm:$0xff]  ;;  %7079 = vst.msk [vmem:[#allocation4 + $0xc8] sm:$0xff] %vm339_vm0, %v7047_v18 }
 0x425   : > { %v7496_v27 = vadd.f32 %v7417_v49, %v7138_v20  ;;  %7078 = vst.msk [vmem:[#allocation4 + $0xc0] sm:$0xff] %vm339_vm0, %v7046_v2  ;;  %v11156_v61 = vpop.f32.mrb[218].mxu1  ;;  %v7578_v2 = vld [vmem:[#allocation4 + $0x28] sm:$0xff] }
 0x426   : > { %v11212_v56 = vpop.f32.mrb[250].mxu0  ;;  %7529 = vst.msk [vmem:[#allocation4 + $0xa8] sm:$0xff] %vm339_vm0, %v7497_v43  ;;  %v7049_v17 = vadd.f32 %v11156_v61, %v6691_v31  ;;  %v6993_v51 = vpop.f32.mrb[219].mxu1  ;;  %v7577_v31 = vld [vmem:[#allocation4 + $0x20] sm:$0xff] }
 0x427   : > { %v7447_v16 = vpop.f32.mrb[251].mxu0  ;;  %7528 = vst.msk [vmem:[#allocation4 + $0xa0] sm:$0xff] %vm339_vm0, %v7496_v27  ;;  %v7141_v46 = vld [vmem:[#allocation4 + $0xb8] sm:$0xff]  ;;  %v7048_v44 = vadd.f32 %v6993_v51, %v6690_v59 }
 0x428   : > { %v7499_v14 = vadd.f32 %v11206_v38, %v7141_v46  ;;  %v7140_v10 = vld [vmem:[#allocation4 + $0xb0] sm:$0xff]  ;;  %7081 = vst.msk [vmem:[#allocation4 + $0xd8] sm:$0xff] %vm339_vm0, %v7049_v17 }
 0x429   : > { %v7498_v39 = vadd.f32 %v7427_v8, %v7140_v10  ;;  %7080 = vst.msk [vmem:[#allocation4 + $0xd0] sm:$0xff] %vm339_vm0, %v7048_v44  ;;  %v11159_v34 = vpop.f32.mrb[220].mxu1  ;;  %v7580_v44 = vld [vmem:[#allocation4 + $0x38] sm:$0xff] }
 0x42a   : > { %v11215_v37 = vpop.f32.mrb[252].mxu0  ;;  %7531 = vst.msk [vmem:[#allocation4 + $0xb8] sm:$0xff] %vm339_vm0, %v7499_v14  ;;  %v7051_v3 = vadd.f32 %v11159_v34, %v6693_v9  ;;  %v7003_v11 = vpop.f32.mrb[221].mxu1  ;;  %v7579_v9 = vld [vmem:[#allocation4 + $0x30] sm:$0xff] }
 0x42b   : > { %v7457_v40 = vpop.f32.mrb[253].mxu0  ;;  %7530 = vst.msk [vmem:[#allocation4 + $0xb0] sm:$0xff] %vm339_vm0, %v7498_v39  ;;  %v7143_v57 = vld [vmem:[#allocation4 + $0xc8] sm:$0xff]  ;;  %v7050_v7 = vadd.f32 %v7003_v11, %v6692_v5 }
 0x42c   : > { %v7501_v55 = vadd.f32 %v11209_v53, %v7143_v57  ;;  %v7142_v19 = vld [vmem:[#allocation4 + $0xc0] sm:$0xff]  ;;  %7083 = vst.msk [vmem:[#allocation4 + $0xe8] sm:$0xff] %vm339_vm0, %v7051_v3 }
 0x42d   : > { %v7500_v22 = vadd.f32 %v7437_v12, %v7142_v19  ;;  %7082 = vst.msk [vmem:[#allocation4 + $0xe0] sm:$0xff] %vm339_vm0, %v7050_v7  ;;  %v11162_v30 = vpop.f32.mrb[222].mxu1  ;;  %v7582_v7 = vld [vmem:[#allocation4 + $0x48] sm:$0xff] }
 0x42e   : > { %v11218_v35 = vpop.f32.mrb[254].mxu0  ;;  %7533 = vst.msk [vmem:[#allocation4 + $0xc8] sm:$0xff] %vm339_vm0, %v7501_v55  ;;  %v7053_v21 = vadd.f32 %v11162_v30, %v6695_v42  ;;  %v7013_v0 = vpop.f32.mrb[223].mxu1  ;;  %v7581_v42 = vld [vmem:[#allocation4 + $0x40] sm:$0xff] }
 0x42f   : > { %v7467_v54 = vpop.f32.mrb[255].mxu0  ;;  %7532 = vst.msk [vmem:[#allocation4 + $0xc0] sm:$0xff] %vm339_vm0, %v7500_v22  ;;  %v7145_v52 = vld [vmem:[#allocation4 + $0xd8] sm:$0xff]  ;;  %v7052_v32 = vadd.f32 %v7013_v0, %v6694_v41 }
 0x430   : > { %v7503_v6 = vadd.f32 %v11212_v56, %v7145_v52  ;;  %v7144_v49 = vld [vmem:[#allocation4 + $0xd0] sm:$0xff]  ;;  %7085 = vst.msk [vmem:[#allocation4 + $0xf8] sm:$0xff] %vm339_vm0, %v7053_v21 }
 0x431   : > { %v7502_v50 = vadd.f32 %v7447_v16, %v7144_v49  ;;  %7084 = vst.msk [vmem:[#allocation4 + $0xf0] sm:$0xff] %vm339_vm0, %v7052_v32  ;;  %v11229_v24 = vpop.f32.mrb[224].mxu1  ;;  %v7584_v32 = vld [vmem:[#allocation4 + $0x58] sm:$0xff] }
 0x432   : > { %v11285_v60 = vpop.f32.mrb[0].mxu0  ;;  %7535 = vst.msk [vmem:[#allocation4 + $0xd8] sm:$0xff] %vm339_vm0, %v7503_v6  ;;  %v7932_v33 = vadd.f32 %v11229_v24, %v7574_v26  ;;  %v7772_v1 = vpop.f32.mrb[225].mxu1  ;;  %v7583_v26 = vld [vmem:[#allocation4 + $0x50] sm:$0xff] }
 0x433   : > { %v8226_v38 = vpop.f32.mrb[1].mxu0  ;;  %7534 = vst.msk [vmem:[#allocation4 + $0xd0] sm:$0xff] %vm339_vm0, %v7502_v50  ;;  %v7147_v15 = vld [vmem:[#allocation4 + $0xe8] sm:$0xff]  ;;  %v7931_v29 = vadd.f32 %v7772_v1, %v7573_v47 }
 0x434   : > { %v7505_v62 = vadd.f32 %v11215_v37, %v7147_v15  ;;  %v7146_v8 = vld [vmem:[#allocation4 + $0xe0] sm:$0xff]  ;;  %7964 = vst.msk [vmem:[#allocation4 + $0x8] sm:$0xff] %vm339_vm0, %v7932_v33 }
 0x435   : > { %v7504_v36 = vadd.f32 %v7457_v40, %v7146_v8  ;;  %7963 = vst.msk [vmem:[#allocation4] sm:$0xff] %vm339_vm0, %v7931_v29  ;;  %v11232_v25 = vpop.f32.mrb[226].mxu1  ;;  %v7586_v29 = vld [vmem:[#allocation4 + $0x68] sm:$0xff] }
 0x436   : > { %v11288_v58 = vpop.f32.mrb[2].mxu0  ;;  %7537 = vst.msk [vmem:[#allocation4 + $0xe8] sm:$0xff] %vm339_vm0, %v7505_v62  ;;  %v7934_v23 = vadd.f32 %v11232_v25, %v7576_v48  ;;  %v7782_v4 = vpop.f32.mrb[227].mxu1  ;;  %v7585_v48 = vld [vmem:[#allocation4 + $0x60] sm:$0xff] }
 0x437   : > { %v8236_v53 = vpop.f32.mrb[3].mxu0  ;;  %7536 = vst.msk [vmem:[#allocation4 + $0xe0] sm:$0xff] %vm339_vm0, %v7504_v36  ;;  %v7149_v18 = vld [vmem:[#allocation4 + $0xf8] sm:$0xff]  ;;  %v7933_v45 = vadd.f32 %v7782_v4, %v7575_v28 }
 0x438   : > { %v7507_v13 = vadd.f32 %v11218_v35, %v7149_v18  ;;  %v7148_v12 = vld [vmem:[#allocation4 + $0xf0] sm:$0xff]  ;;  %7966 = vst.msk [vmem:[#allocation4 + $0x18] sm:$0xff] %vm339_vm0, %v7934_v23 }
 0x439   : > { %v7506_v63 = vadd.f32 %v7467_v54, %v7148_v12  ;;  %7965 = vst.msk [vmem:[#allocation4 + $0x10] sm:$0xff] %vm339_vm0, %v7933_v45  ;;  %v11235_v43 = vpop.f32.mrb[228].mxu1  ;;  %v7588_v45 = vld [vmem:[#allocation4 + $0x78] sm:$0xff] }
 0x43a   : > { %v11291_v20 = vpop.f32.mrb[4].mxu0  ;;  %7539 = vst.msk [vmem:[#allocation4 + $0xf8] sm:$0xff] %vm339_vm0, %v7507_v13  ;;  %v7936_v27 = vadd.f32 %v11235_v43, %v7578_v2  ;;  %v7792_v61 = vpop.f32.mrb[229].mxu1  ;;  %v7587_v2 = vld [vmem:[#allocation4 + $0x70] sm:$0xff] }
 0x43b   : > { %v8246_v56 = vpop.f32.mrb[5].mxu0  ;;  %7538 = vst.msk [vmem:[#allocation4 + $0xf0] sm:$0xff] %vm339_vm0, %v7506_v63  ;;  %v8028_v17 = vld [vmem:[#allocation4 + $0x8] sm:$0xff]  ;;  %v7935_v59 = vadd.f32 %v7792_v61, %v7577_v31 }
 0x43c   : > { %v8386_v51 = vadd.f32 %v11285_v60, %v8028_v17  ;;  %v8027_v16 = vld [vmem:[#allocation4] sm:$0xff]  ;;  %7968 = vst.msk [vmem:[#allocation4 + $0x28] sm:$0xff] %vm339_vm0, %v7936_v27 }
 0x43d   : > { %v8385_v46 = vadd.f32 %v8226_v38, %v8027_v16  ;;  %7967 = vst.msk [vmem:[#allocation4 + $0x20] sm:$0xff] %vm339_vm0, %v7935_v59  ;;  %v11238_v14 = vpop.f32.mrb[230].mxu1  ;;  %v7590_v59 = vld [vmem:[#allocation4 + $0x88] sm:$0xff] }
 0x43e   : > { %v11294_v10 = vpop.f32.mrb[6].mxu0  ;;  %8418 = vst.msk [vmem:[#allocation4 + $0x8] sm:$0xff] %vm339_vm0, %v8386_v51  ;;  %v7938_v39 = vadd.f32 %v11238_v14, %v7580_v44  ;;  %v7802_v34 = vpop.f32.mrb[231].mxu1  ;;  %v7589_v44 = vld [vmem:[#allocation4 + $0x80] sm:$0xff] }
 0x43f   : > { %v8256_v37 = vpop.f32.mrb[7].mxu0  ;;  %8417 = vst.msk [vmem:[#allocation4] sm:$0xff] %vm339_vm0, %v8385_v46  ;;  %v8030_v3 = vld [vmem:[#allocation4 + $0x18] sm:$0xff]  ;;  %v7937_v5 = vadd.f32 %v7802_v34, %v7579_v9 }
 0x440   : > { %v8388_v11 = vadd.f32 %v11288_v58, %v8030_v3  ;;  %v8029_v40 = vld [vmem:[#allocation4 + $0x10] sm:$0xff]  ;;  %7970 = vst.msk [vmem:[#allocation4 + $0x38] sm:$0xff] %vm339_vm0, %v7938_v39 }
 0x441   : > { %v8387_v57 = vadd.f32 %v8236_v53, %v8029_v40  ;;  %7969 = vst.msk [vmem:[#allocation4 + $0x30] sm:$0xff] %vm339_vm0, %v7937_v5  ;;  %v11241_v55 = vpop.f32.mrb[232].mxu1  ;;  %v7592_v5 = vld [vmem:[#allocation4 + $0x98] sm:$0xff] }
 0x442   : > { %v11297_v19 = vpop.f32.mrb[8].mxu0  ;;  %8420 = vst.msk [vmem:[#allocation4 + $0x18] sm:$0xff] %vm339_vm0, %v8388_v11  ;;  %v7940_v22 = vadd.f32 %v11241_v55, %v7582_v7  ;;  %v7812_v30 = vpop.f32.mrb[233].mxu1  ;;  %v7591_v7 = vld [vmem:[#allocation4 + $0x90] sm:$0xff] }
 0x443   : > { %v8266_v35 = vpop.f32.mrb[9].mxu0  ;;  %8419 = vst.msk [vmem:[#allocation4 + $0x10] sm:$0xff] %vm339_vm0, %v8387_v57  ;;  %v8032_v21 = vld [vmem:[#allocation4 + $0x28] sm:$0xff]  ;;  %v7939_v41 = vadd.f32 %v7812_v30, %v7581_v42 }
 0x444   : > { %v8390_v0 = vadd.f32 %v11291_v20, %v8032_v21  ;;  %v8031_v54 = vld [vmem:[#allocation4 + $0x20] sm:$0xff]  ;;  %7972 = vst.msk [vmem:[#allocation4 + $0x48] sm:$0xff] %vm339_vm0, %v7940_v22 }
 0x445   : > { %v8389_v52 = vadd.f32 %v8246_v56, %v8031_v54  ;;  %7971 = vst.msk [vmem:[#allocation4 + $0x40] sm:$0xff] %vm339_vm0, %v7939_v41  ;;  %v11244_v6 = vpop.f32.mrb[234].mxu1  ;;  %v7594_v41 = vld [vmem:[#allocation4 + $0xa8] sm:$0xff] }
 0x446   : > { %v11300_v49 = vpop.f32.mrb[10].mxu0  ;;  %8422 = vst.msk [vmem:[#allocation4 + $0x28] sm:$0xff] %vm339_vm0, %v8390_v0  ;;  %v7942_v50 = vadd.f32 %v11244_v6, %v7584_v32  ;;  %v7822_v24 = vpop.f32.mrb[235].mxu1  ;;  %v7593_v32 = vld [vmem:[#allocation4 + $0xa0] sm:$0xff] }
 0x447   : > { %v8276_v60 = vpop.f32.mrb[11].mxu0  ;;  %8421 = vst.msk [vmem:[#allocation4 + $0x20] sm:$0xff] %vm339_vm0, %v8389_v52  ;;  %v8034_v33 = vld [vmem:[#allocation4 + $0x38] sm:$0xff]  ;;  %v7941_v47 = vadd.f32 %v7822_v24, %v7583_v26 }
 0x448   : > { %v8392_v1 = vadd.f32 %v11294_v10, %v8034_v33  ;;  %v8033_v38 = vld [vmem:[#allocation4 + $0x30] sm:$0xff]  ;;  %7974 = vst.msk [vmem:[#allocation4 + $0x58] sm:$0xff] %vm339_vm0, %v7942_v50 }
 0x449   : > { %v8391_v15 = vadd.f32 %v8256_v37, %v8033_v38  ;;  %7973 = vst.msk [vmem:[#allocation4 + $0x50] sm:$0xff] %vm339_vm0, %v7941_v47  ;;  %v11247_v62 = vpop.f32.mrb[236].mxu1  ;;  %v7596_v47 = vld [vmem:[#allocation4 + $0xb8] sm:$0xff] }
 0x44a   : > { %v11303_v8 = vpop.f32.mrb[12].mxu0  ;;  %8424 = vst.msk [vmem:[#allocation4 + $0x38] sm:$0xff] %vm339_vm0, %v8392_v1  ;;  %v7944_v36 = vadd.f32 %v11247_v62, %v7586_v29  ;;  %v7832_v25 = vpop.f32.mrb[237].mxu1  ;;  %v7595_v29 = vld [vmem:[#allocation4 + $0xb0] sm:$0xff] }
 0x44b   : > { %v8286_v58 = vpop.f32.mrb[13].mxu0  ;;  %8423 = vst.msk [vmem:[#allocation4 + $0x30] sm:$0xff] %vm339_vm0, %v8391_v15  ;;  %v8036_v23 = vld [vmem:[#allocation4 + $0x48] sm:$0xff]  ;;  %v7943_v28 = vadd.f32 %v7832_v25, %v7585_v48 }
 0x44c   : > { %v8394_v4 = vadd.f32 %v11297_v19, %v8036_v23  ;;  %v8035_v53 = vld [vmem:[#allocation4 + $0x40] sm:$0xff]  ;;  %7976 = vst.msk [vmem:[#allocation4 + $0x68] sm:$0xff] %vm339_vm0, %v7944_v36 }
 0x44d   : > { %v8393_v18 = vadd.f32 %v8266_v35, %v8035_v53  ;;  %7975 = vst.msk [vmem:[#allocation4 + $0x60] sm:$0xff] %vm339_vm0, %v7943_v28  ;;  %v11250_v13 = vpop.f32.mrb[238].mxu1  ;;  %v7598_v28 = vld [vmem:[#allocation4 + $0xc8] sm:$0xff] }
 0x44e   : > { %v11306_v12 = vpop.f32.mrb[14].mxu0  ;;  %8426 = vst.msk [vmem:[#allocation4 + $0x48] sm:$0xff] %vm339_vm0, %v8394_v4  ;;  %v7946_v63 = vadd.f32 %v11250_v13, %v7588_v45  ;;  %v7842_v43 = vpop.f32.mrb[239].mxu1  ;;  %v7597_v45 = vld [vmem:[#allocation4 + $0xc0] sm:$0xff] }
 0x44f   : > { %v8296_v20 = vpop.f32.mrb[15].mxu0  ;;  %8425 = vst.msk [vmem:[#allocation4 + $0x40] sm:$0xff] %vm339_vm0, %v8393_v18  ;;  %v8038_v27 = vld [vmem:[#allocation4 + $0x58] sm:$0xff]  ;;  %v7945_v31 = vadd.f32 %v7842_v43, %v7587_v2 }
 0x450   : > { %v8396_v61 = vadd.f32 %v11300_v49, %v8038_v27  ;;  %v8037_v56 = vld [vmem:[#allocation4 + $0x50] sm:$0xff]  ;;  %7978 = vst.msk [vmem:[#allocation4 + $0x78] sm:$0xff] %vm339_vm0, %v7946_v63 }
 0x451   : > { %v8395_v17 = vadd.f32 %v8276_v60, %v8037_v56  ;;  %7977 = vst.msk [vmem:[#allocation4 + $0x70] sm:$0xff] %vm339_vm0, %v7945_v31  ;;  %v11253_v51 = vpop.f32.mrb[240].mxu1  ;;  %v7600_v31 = vld [vmem:[#allocation4 + $0xd8] sm:$0xff] }
 0x452   : > { %v11309_v16 = vpop.f32.mrb[16].mxu0  ;;  %8428 = vst.msk [vmem:[#allocation4 + $0x58] sm:$0xff] %vm339_vm0, %v8396_v61  ;;  %v7948_v46 = vadd.f32 %v11253_v51, %v7590_v59  ;;  %v7852_v14 = vpop.f32.mrb[241].mxu1  ;;  %v7599_v59 = vld [vmem:[#allocation4 + $0xd0] sm:$0xff] }
 0x453   : > { %v8306_v10 = vpop.f32.mrb[17].mxu0  ;;  %8427 = vst.msk [vmem:[#allocation4 + $0x50] sm:$0xff] %vm339_vm0, %v8395_v17  ;;  %v8040_v39 = vld [vmem:[#allocation4 + $0x68] sm:$0xff]  ;;  %v7947_v9 = vadd.f32 %v7852_v14, %v7589_v44 }
 0x454   : > { %v8398_v34 = vadd.f32 %v11303_v8, %v8040_v39  ;;  %v8039_v37 = vld [vmem:[#allocation4 + $0x60] sm:$0xff]  ;;  %7980 = vst.msk [vmem:[#allocation4 + $0x88] sm:$0xff] %vm339_vm0, %v7948_v46 }
 0x455   : > { %v8397_v3 = vadd.f32 %v8286_v58, %v8039_v37  ;;  %7979 = vst.msk [vmem:[#allocation4 + $0x80] sm:$0xff] %vm339_vm0, %v7947_v9  ;;  %v11256_v11 = vpop.f32.mrb[242].mxu1  ;;  %v7602_v9 = vld [vmem:[#allocation4 + $0xe8] sm:$0xff] }
 0x456   : > { %v11312_v40 = vpop.f32.mrb[18].mxu0  ;;  %8430 = vst.msk [vmem:[#allocation4 + $0x68] sm:$0xff] %vm339_vm0, %v8398_v34  ;;  %v7950_v57 = vadd.f32 %v11256_v11, %v7592_v5  ;;  %v7862_v55 = vpop.f32.mrb[243].mxu1  ;;  %v7601_v5 = vld [vmem:[#allocation4 + $0xe0] sm:$0xff] }
 0x457   : > { %v8316_v19 = vpop.f32.mrb[19].mxu0  ;;  %8429 = vst.msk [vmem:[#allocation4 + $0x60] sm:$0xff] %vm339_vm0, %v8397_v3  ;;  %v8042_v22 = vld [vmem:[#allocation4 + $0x78] sm:$0xff]  ;;  %v7949_v42 = vadd.f32 %v7862_v55, %v7591_v7 }
 0x458   : > { %v8400_v30 = vadd.f32 %v11306_v12, %v8042_v22  ;;  %v8041_v35 = vld [vmem:[#allocation4 + $0x70] sm:$0xff]  ;;  %7982 = vst.msk [vmem:[#allocation4 + $0x98] sm:$0xff] %vm339_vm0, %v7950_v57 }
 0x459   : > { %v8399_v21 = vadd.f32 %v8296_v20, %v8041_v35  ;;  %7981 = vst.msk [vmem:[#allocation4 + $0x90] sm:$0xff] %vm339_vm0, %v7949_v42  ;;  %v11259_v0 = vpop.f32.mrb[244].mxu1  ;;  %v7604_v42 = vld [vmem:[#allocation4 + $0xf8] sm:$0xff] }
 0x45a   : > { %v11315_v54 = vpop.f32.mrb[20].mxu0  ;;  %8432 = vst.msk [vmem:[#allocation4 + $0x78] sm:$0xff] %vm339_vm0, %v8400_v30  ;;  %v7952_v52 = vadd.f32 %v11259_v0, %v7594_v41  ;;  %v7872_v6 = vpop.f32.mrb[245].mxu1  ;;  %v7603_v41 = vld [vmem:[#allocation4 + $0xf0] sm:$0xff] }
 0x45b   : > { %v8326_v49 = vpop.f32.mrb[21].mxu0  ;;  %8431 = vst.msk [vmem:[#allocation4 + $0x70] sm:$0xff] %vm339_vm0, %v8399_v21  ;;  %v8044_v50 = vld [vmem:[#allocation4 + $0x88] sm:$0xff]  ;;  %v7951_v26 = vadd.f32 %v7872_v6, %v7593_v32 }
 0x45c   : > { %v8402_v24 = vadd.f32 %v11309_v16, %v8044_v50  ;;  %v8043_v60 = vld [vmem:[#allocation4 + $0x80] sm:$0xff]  ;;  %7984 = vst.msk [vmem:[#allocation4 + $0xa8] sm:$0xff] %vm339_vm0, %v7952_v52 }
 0x45d   : > { %v8401_v33 = vadd.f32 %v8306_v10, %v8043_v60  ;;  %7983 = vst.msk [vmem:[#allocation4 + $0xa0] sm:$0xff] %vm339_vm0, %v7951_v26  ;;  %v11262_v1 = vpop.f32.mrb[246].mxu1  ;;  %v8482_v26 = vld [vmem:[#allocation4 + $0x8] sm:$0xff] }
 0x45e   : > { %v11318_v38 = vpop.f32.mrb[22].mxu0  ;;  %8434 = vst.msk [vmem:[#allocation4 + $0x88] sm:$0xff] %vm339_vm0, %v8402_v24  ;;  %v7954_v15 = vadd.f32 %v11262_v1, %v7596_v47  ;;  %v7882_v62 = vpop.f32.mrb[247].mxu1 }
 0x45f   : > { %v8336_v8 = vpop.f32.mrb[23].mxu0  ;;  %8433 = vst.msk [vmem:[#allocation4 + $0x80] sm:$0xff] %vm339_vm0, %v8401_v33  ;;  %v8046_v36 = vld [vmem:[#allocation4 + $0x98] sm:$0xff]  ;;  %v7953_v48 = vadd.f32 %v7882_v62, %v7595_v29  ;;  %v8481_v33 = vld [vmem:[#allocation4] sm:$0xff] }
 0x460   : > { %v8404_v25 = vadd.f32 %v11312_v40, %v8046_v36  ;;  %v8045_v58 = vld [vmem:[#allocation4 + $0x90] sm:$0xff]  ;;  %7986 = vst.msk [vmem:[#allocation4 + $0xb8] sm:$0xff] %vm339_vm0, %v7954_v15 }
 0x461   : > { %v8403_v23 = vadd.f32 %v8316_v19, %v8045_v58  ;;  %7985 = vst.msk [vmem:[#allocation4 + $0xb0] sm:$0xff] %vm339_vm0, %v7953_v48  ;;  %v11265_v4 = vpop.f32.mrb[248].mxu1 }
 0x462   : > { %v11321_v53 = vpop.f32.mrb[24].mxu0  ;;  %8436 = vst.msk [vmem:[#allocation4 + $0x98] sm:$0xff] %vm339_vm0, %v8404_v25  ;;  %v7956_v18 = vadd.f32 %v11265_v4, %v7598_v28  ;;  %v7892_v13 = vpop.f32.mrb[249].mxu1  ;;  %v8483_v25 = vld [vmem:[#allocation4 + $0x10] sm:$0xff] }
 0x463   : > { %v8346_v12 = vpop.f32.mrb[25].mxu0  ;;  %8435 = vst.msk [vmem:[#allocation4 + $0x90] sm:$0xff] %vm339_vm0, %v8403_v23  ;;  %v8048_v63 = vld [vmem:[#allocation4 + $0xa8] sm:$0xff]  ;;  %v7955_v2 = vadd.f32 %v7892_v13, %v7597_v45 }
 0x464   : > { %v8406_v43 = vadd.f32 %v11315_v54, %v8048_v63  ;;  %v8047_v20 = vld [vmem:[#allocation4 + $0xa0] sm:$0xff]  ;;  %7988 = vst.msk [vmem:[#allocation4 + $0xc8] sm:$0xff] %vm339_vm0, %v7956_v18  ;;  %v8486_v45 = vld [vmem:[#allocation4 + $0x28] sm:$0xff] }
 0x465   : > { %v8405_v27 = vadd.f32 %v8326_v49, %v8047_v20  ;;  %7987 = vst.msk [vmem:[#allocation4 + $0xc0] sm:$0xff] %vm339_vm0, %v7955_v2  ;;  %v11268_v61 = vpop.f32.mrb[250].mxu1  ;;  %v8485_v63 = vld [vmem:[#allocation4 + $0x20] sm:$0xff] }
 0x466   : > { %v11324_v56 = vpop.f32.mrb[26].mxu0  ;;  %8438 = vst.msk [vmem:[#allocation4 + $0xa8] sm:$0xff] %vm339_vm0, %v8406_v43  ;;  %v7958_v17 = vadd.f32 %v11268_v61, %v7600_v31  ;;  %v7902_v51 = vpop.f32.mrb[251].mxu1 }
 0x467   : > { %v8356_v16 = vpop.f32.mrb[27].mxu0  ;;  %8437 = vst.msk [vmem:[#allocation4 + $0xa0] sm:$0xff] %vm339_vm0, %v8405_v27  ;;  %v8050_v46 = vld [vmem:[#allocation4 + $0xb8] sm:$0xff]  ;;  %v7957_v44 = vadd.f32 %v7902_v51, %v7599_v59  ;;  %v8487_v51 = vld [vmem:[#allocation4 + $0x30] sm:$0xff] }
 0x468   : > { %v8408_v14 = vadd.f32 %v11318_v38, %v8050_v46  ;;  %v8049_v10 = vld [vmem:[#allocation4 + $0xb0] sm:$0xff]  ;;  %7990 = vst.msk [vmem:[#allocation4 + $0xd8] sm:$0xff] %vm339_vm0, %v7958_v17 }
 0x469   : > { %v8407_v39 = vadd.f32 %v8336_v8, %v8049_v10  ;;  %7989 = vst.msk [vmem:[#allocation4 + $0xd0] sm:$0xff] %vm339_vm0, %v7957_v44  ;;  %v11271_v34 = vpop.f32.mrb[252].mxu1  ;;  %v8484_v8 = vld [vmem:[#allocation4 + $0x18] sm:$0xff] }
 0x46a   : > { %v11327_v37 = vpop.f32.mrb[28].mxu0  ;;  %8440 = vst.msk [vmem:[#allocation4 + $0xb8] sm:$0xff] %vm339_vm0, %v8408_v14  ;;  %v7960_v3 = vadd.f32 %v11271_v34, %v7602_v9  ;;  %v7912_v11 = vpop.f32.mrb[253].mxu1  ;;  %v8490_v9 = vld [vmem:[#allocation4 + $0x48] sm:$0xff] }
 0x46b   : > { %v8366_v40 = vpop.f32.mrb[29].mxu0  ;;  %8439 = vst.msk [vmem:[#allocation4 + $0xb0] sm:$0xff] %vm339_vm0, %v8407_v39  ;;  %v8052_v57 = vld [vmem:[#allocation4 + $0xc8] sm:$0xff]  ;;  %v7959_v7 = vadd.f32 %v7912_v11, %v7601_v5 }
 0x46c   : > { %v8410_v55 = vadd.f32 %v11321_v53, %v8052_v57  ;;  %v8051_v19 = vld [vmem:[#allocation4 + $0xc0] sm:$0xff]  ;;  %7992 = vst.msk [vmem:[#allocation4 + $0xe8] sm:$0xff] %vm339_vm0, %v7960_v3 }
 0x46d   : > { %v8409_v22 = vadd.f32 %v8346_v12, %v8051_v19  ;;  %7991 = vst.msk [vmem:[#allocation4 + $0xe0] sm:$0xff] %vm339_vm0, %v7959_v7  ;;  %v11274_v30 = vpop.f32.mrb[254].mxu1  ;;  %v8489_v3 = vld [vmem:[#allocation4 + $0x40] sm:$0xff]  ;;  %v8492_v19 = vld [vmem:[#allocation4 + $0x58] sm:$0xff] }
 0x46e   : > { %v11330_v35 = vpop.f32.mrb[30].mxu0  ;;  %8442 = vst.msk [vmem:[#allocation4 + $0xc8] sm:$0xff] %vm339_vm0, %v8410_v55  ;;  %v7962_v21 = vadd.f32 %v11274_v30, %v7604_v42  ;;  %v7922_v0 = vpop.f32.mrb[255].mxu1  ;;  %v8491_v30 = vld [vmem:[#allocation4 + $0x50] sm:$0xff] }
 0x46f   : > { %v8376_v54 = vpop.f32.mrb[31].mxu0  ;;  %8441 = vst.msk [vmem:[#allocation4 + $0xc0] sm:$0xff] %vm339_vm0, %v8409_v22  ;;  %v8054_v52 = vld [vmem:[#allocation4 + $0xd8] sm:$0xff]  ;;  %v7961_v32 = vadd.f32 %v7922_v0, %v7603_v41 }
 0x470   : > { %v8412_v6 = vadd.f32 %v11324_v56, %v8054_v52  ;;  %v8053_v49 = vld [vmem:[#allocation4 + $0xd0] sm:$0xff]  ;;  %7994 = vst.msk [vmem:[#allocation4 + $0xf8] sm:$0xff] %vm339_vm0, %v7962_v21  ;;  %v8488_v56 = vld [vmem:[#allocation4 + $0x38] sm:$0xff] }
 0x471   : > { %v8411_v50 = vadd.f32 %v8356_v16, %v8053_v49  ;;  %7993 = vst.msk [vmem:[#allocation4 + $0xf0] sm:$0xff] %vm339_vm0, %v7961_v32  ;;  %v11341_v24 = vpop.f32.mrb[0].mxu1  ;;  %v8494_v32 = vld [vmem:[#allocation4 + $0x68] sm:$0xff] }
 0x472   : > { %8444 = vst.msk [vmem:[#allocation4 + $0xd8] sm:$0xff] %vm339_vm0, %v8412_v6  ;;  %v8840_v60 = vadd.f32 %v11341_v24, %v8482_v26  ;;  %v8680_v47 = vpop.f32.mrb[1].mxu1 }
 0x473   : > { %8443 = vst.msk [vmem:[#allocation4 + $0xd0] sm:$0xff] %vm339_vm0, %v8411_v50  ;;  %v8056_v1 = vld [vmem:[#allocation4 + $0xe8] sm:$0xff]  ;;  %v8839_v38 = vadd.f32 %v8680_v47, %v8481_v33  ;;  %v8493_v50 = vld [vmem:[#allocation4 + $0x60] sm:$0xff] }
 0x474   : > { %v8414_v15 = vadd.f32 %v11327_v37, %v8056_v1  ;;  %v8055_v29 = vld [vmem:[#allocation4 + $0xe0] sm:$0xff]  ;;  %8872 = vst.msk [vmem:[#allocation4 + $0x8] sm:$0xff] %vm339_vm0, %v8840_v60 }
 0x475   : > { %v8413_v62 = vadd.f32 %v8366_v40, %v8055_v29  ;;  %8871 = vst.msk [vmem:[#allocation4] sm:$0xff] %vm339_vm0, %v8839_v38  ;;  %v11344_v36 = vpop.f32.mrb[2].mxu1  ;;  %v8496_v38 = vld [vmem:[#allocation4 + $0x78] sm:$0xff] }
 0x476   : > { %8446 = vst.msk [vmem:[#allocation4 + $0xe8] sm:$0xff] %vm339_vm0, %v8414_v15  ;;  %v8842_v48 = vadd.f32 %v11344_v36, %v8484_v8  ;;  %v8690_v58 = vpop.f32.mrb[3].mxu1 }
 0x477   : > { %8445 = vst.msk [vmem:[#allocation4 + $0xe0] sm:$0xff] %vm339_vm0, %v8413_v62  ;;  %v8841_v23 = vadd.f32 %v8690_v58, %v8483_v25  ;;  %v8058_v28 = vld [vmem:[#allocation4 + $0xf8] sm:$0xff]  ;;  %v8495_v62 = vld [vmem:[#allocation4 + $0x70] sm:$0xff] }
 0x478   : > { %8874 = vst.msk [vmem:[#allocation4 + $0x18] sm:$0xff] %vm339_vm0, %v8842_v48  ;;  %v8416_v4 = vadd.f32 %v11330_v35, %v8058_v28  ;;  %v8057_v53 = vld [vmem:[#allocation4 + $0xf0] sm:$0xff]  ;;  %v8498_v28 = vld [vmem:[#allocation4 + $0x88] sm:$0xff] }
 0x479   : > { %8873 = vst.msk [vmem:[#allocation4 + $0x10] sm:$0xff] %vm339_vm0, %v8841_v23  ;;  %v8415_v18 = vadd.f32 %v8376_v54, %v8057_v53  ;;  %v11347_v13 = vpop.f32.mrb[4].mxu1 }
 0x47a   : > { %8448 = vst.msk [vmem:[#allocation4 + $0xf8] sm:$0xff] %vm339_vm0, %v8416_v4  ;;  %v8844_v12 = vadd.f32 %v11347_v13, %v8486_v45  ;;  %v8700_v2 = vpop.f32.mrb[5].mxu1 }
 0x47b   : > { %v8904_v43 = vld [vmem:[#allocation4 + $0x8] sm:$0xff]  ;;  %8447 = vst.msk [vmem:[#allocation4 + $0xf0] sm:$0xff] %vm339_vm0, %v8415_v18  ;;  %v8843_v20 = vadd.f32 %v8700_v2, %v8485_v63  ;;  %v8497_v18 = vld [vmem:[#allocation4 + $0x80] sm:$0xff] }
 0x47c   : > { %v8936_v27 = vmax.f32 %v8904_v43, 0.0  ;;  %v8903_v31 = vld [vmem:[#allocation4] sm:$0xff]  ;;  %8876 = vst.msk [vmem:[#allocation4 + $0x28] sm:$0xff] %vm339_vm0, %v8844_v12 }
 0x47d   : > { %v8935_v61 = vmax.f32 %v8903_v31, 0.0  ;;  %8875 = vst.msk [vmem:[#allocation4 + $0x20] sm:$0xff] %vm339_vm0, %v8843_v20  ;;  %v11350_v17 = vpop.f32.mrb[6].mxu1  ;;  %v8500_v20 = vld [vmem:[#allocation4 + $0x98] sm:$0xff] }
 0x47e   : > { %8968 = vst.msk [vmem:[%s14477_s2 + $0x8] sm:$0xff] %vm339_vm0, %v8936_v27  ;;  %v8846_v59 = vadd.f32 %v11350_v17, %v8488_v56  ;;  %v8710_v16 = vpop.f32.mrb[7].mxu1 }
 0x47f   : > { %8967 = vst.msk [vmem:[%s14477_s2] sm:$0xff] %vm339_vm0, %v8935_v61  ;;  %v8906_v46 = vld [vmem:[#allocation4 + $0x18] sm:$0xff]  ;;  %v8845_v44 = vadd.f32 %v8710_v16, %v8487_v51  ;;  %v8499_v61 = vld [vmem:[#allocation4 + $0x90] sm:$0xff] }
 0x480   : > { %v8938_v14 = vmax.f32 %v8906_v46, 0.0  ;;  %v8905_v10 = vld [vmem:[#allocation4 + $0x10] sm:$0xff]  ;;  %8878 = vst.msk [vmem:[#allocation4 + $0x38] sm:$0xff] %vm339_vm0, %v8846_v59 }
 0x481   : > { %v8937_v39 = vmax.f32 %v8905_v10, 0.0  ;;  %8877 = vst.msk [vmem:[#allocation4 + $0x30] sm:$0xff] %vm339_vm0, %v8845_v44  ;;  %v11353_v34 = vpop.f32.mrb[8].mxu1  ;;  %v8502_v44 = vld [vmem:[#allocation4 + $0xa8] sm:$0xff] }
 0x482   : > { %8970 = vst.msk [vmem:[%s14477_s2 + $0x18] sm:$0xff] %vm339_vm0, %v8938_v14  ;;  %v8848_v37 = vadd.f32 %v11353_v34, %v8490_v9  ;;  %v8720_v5 = vpop.f32.mrb[9].mxu1 }
 0x483   : > { %8969 = vst.msk [vmem:[%s14477_s2 + $0x10] sm:$0xff] %vm339_vm0, %v8937_v39  ;;  %v8908_v11 = vld [vmem:[#allocation4 + $0x28] sm:$0xff]  ;;  %v8847_v40 = vadd.f32 %v8720_v5, %v8489_v3  ;;  %v8501_v39 = vld [vmem:[#allocation4 + $0xa0] sm:$0xff] }
 0x484   : > { %v8940_v57 = vmax.f32 %v8908_v11, 0.0  ;;  %v8907_v7 = vld [vmem:[#allocation4 + $0x20] sm:$0xff]  ;;  %8880 = vst.msk [vmem:[#allocation4 + $0x48] sm:$0xff] %vm339_vm0, %v8848_v37 }
 0x485   : > { %v8939_v55 = vmax.f32 %v8907_v7, 0.0  ;;  %8879 = vst.msk [vmem:[#allocation4 + $0x40] sm:$0xff] %vm339_vm0, %v8847_v40  ;;  %v11356_v22 = vpop.f32.mrb[10].mxu1  ;;  %v8504_v40 = vld [vmem:[#allocation4 + $0xb8] sm:$0xff] }
 0x486   : > { %8972 = vst.msk [vmem:[%s14477_s2 + $0x28] sm:$0xff] %vm339_vm0, %v8940_v57  ;;  %v8850_v42 = vadd.f32 %v11356_v22, %v8492_v19  ;;  %v8730_v35 = vpop.f32.mrb[11].mxu1 }
 0x487   : > { %8971 = vst.msk [vmem:[%s14477_s2 + $0x20] sm:$0xff] %vm339_vm0, %v8939_v55  ;;  %v8910_v21 = vld [vmem:[#allocation4 + $0x38] sm:$0xff]  ;;  %v8849_v41 = vadd.f32 %v8730_v35, %v8491_v30  ;;  %v8503_v55 = vld [vmem:[#allocation4 + $0xb0] sm:$0xff] }
 0x488   : > { %v8942_v0 = vmax.f32 %v8910_v21, 0.0  ;;  %v8909_v54 = vld [vmem:[#allocation4 + $0x30] sm:$0xff]  ;;  %8882 = vst.msk [vmem:[#allocation4 + $0x58] sm:$0xff] %vm339_vm0, %v8850_v42 }
 0x489   : > { %v8941_v52 = vmax.f32 %v8909_v54, 0.0  ;;  %8881 = vst.msk [vmem:[#allocation4 + $0x50] sm:$0xff] %vm339_vm0, %v8849_v41  ;;  %v11359_v6 = vpop.f32.mrb[12].mxu1  ;;  %v8506_v41 = vld [vmem:[#allocation4 + $0xc8] sm:$0xff] }
 0x48a   : > { %8974 = vst.msk [vmem:[%s14477_s2 + $0x38] sm:$0xff] %vm339_vm0, %v8942_v0  ;;  %v8852_v49 = vadd.f32 %v11359_v6, %v8494_v32  ;;  %v8740_v26 = vpop.f32.mrb[13].mxu1 }
 0x48b   : > { %8973 = vst.msk [vmem:[%s14477_s2 + $0x30] sm:$0xff] %vm339_vm0, %v8941_v52  ;;  %v8912_v24 = vld [vmem:[#allocation4 + $0x48] sm:$0xff]  ;;  %v8851_v60 = vadd.f32 %v8740_v26, %v8493_v50  ;;  %v8505_v52 = vld [vmem:[#allocation4 + $0xc0] sm:$0xff] }
 0x48c   : > { %v8944_v33 = vmax.f32 %v8912_v24, 0.0  ;;  %v8911_v47 = vld [vmem:[#allocation4 + $0x40] sm:$0xff]  ;;  %8884 = vst.msk [vmem:[#allocation4 + $0x68] sm:$0xff] %vm339_vm0, %v8852_v49 }
 0x48d   : > { %v8943_v1 = vmax.f32 %v8911_v47, 0.0  ;;  %8883 = vst.msk [vmem:[#allocation4 + $0x60] sm:$0xff] %vm339_vm0, %v8851_v60  ;;  %v11362_v15 = vpop.f32.mrb[14].mxu1  ;;  %v8508_v60 = vld [vmem:[#allocation4 + $0xd8] sm:$0xff] }
 0x48e   : > { %8976 = vst.msk [vmem:[%s14477_s2 + $0x48] sm:$0xff] %vm339_vm0, %v8944_v33  ;;  %v8854_v29 = vadd.f32 %v11362_v15, %v8496_v38  ;;  %v8750_v8 = vpop.f32.mrb[15].mxu1 }
 0x48f   : > { %8975 = vst.msk [vmem:[%s14477_s2 + $0x40] sm:$0xff] %vm339_vm0, %v8943_v1  ;;  %v8914_v36 = vld [vmem:[#allocation4 + $0x58] sm:$0xff]  ;;  %v8853_v48 = vadd.f32 %v8750_v8, %v8495_v62  ;;  %v8507_v1 = vld [vmem:[#allocation4 + $0xd0] sm:$0xff] }
 0x490   : > { %v8946_v25 = vmax.f32 %v8914_v36, 0.0  ;;  %v8913_v58 = vld [vmem:[#allocation4 + $0x50] sm:$0xff]  ;;  %8886 = vst.msk [vmem:[#allocation4 + $0x78] sm:$0xff] %vm339_vm0, %v8854_v29 }
 0x491   : > { %v8945_v23 = vmax.f32 %v8913_v58, 0.0  ;;  %8885 = vst.msk [vmem:[#allocation4 + $0x70] sm:$0xff] %vm339_vm0, %v8853_v48  ;;  %v11365_v4 = vpop.f32.mrb[16].mxu1  ;;  %v8510_v48 = vld [vmem:[#allocation4 + $0xe8] sm:$0xff] }
 0x492   : > { %8978 = vst.msk [vmem:[%s14477_s2 + $0x58] sm:$0xff] %vm339_vm0, %v8946_v25  ;;  %v8856_v53 = vadd.f32 %v11365_v4, %v8498_v28  ;;  %v8760_v45 = vpop.f32.mrb[17].mxu1 }
 0x493   : > { %8977 = vst.msk [vmem:[%s14477_s2 + $0x50] sm:$0xff] %vm339_vm0, %v8945_v23  ;;  %v8916_v13 = vld [vmem:[#allocation4 + $0x68] sm:$0xff]  ;;  %v8855_v12 = vadd.f32 %v8760_v45, %v8497_v18  ;;  %v8509_v23 = vld [vmem:[#allocation4 + $0xe0] sm:$0xff] }
 0x494   : > { %v8948_v63 = vmax.f32 %v8916_v13, 0.0  ;;  %v8915_v2 = vld [vmem:[#allocation4 + $0x60] sm:$0xff]  ;;  %8888 = vst.msk [vmem:[#allocation4 + $0x88] sm:$0xff] %vm339_vm0, %v8856_v53 }
 0x495   : > { %v8947_v43 = vmax.f32 %v8915_v2, 0.0  ;;  %8887 = vst.msk [vmem:[#allocation4 + $0x80] sm:$0xff] %vm339_vm0, %v8855_v12  ;;  %v11368_v27 = vpop.f32.mrb[18].mxu1  ;;  %v8512_v12 = vld [vmem:[#allocation4 + $0xf8] sm:$0xff] }
 0x496   : > { %8980 = vst.msk [vmem:[%s14477_s2 + $0x68] sm:$0xff] %vm339_vm0, %v8948_v63  ;;  %v8858_v31 = vadd.f32 %v11368_v27, %v8500_v20  ;;  %v8770_v56 = vpop.f32.mrb[19].mxu1 }
 0x497   : > { %8979 = vst.msk [vmem:[%s14477_s2 + $0x60] sm:$0xff] %vm339_vm0, %v8947_v43  ;;  %v8918_v17 = vld [vmem:[#allocation4 + $0x78] sm:$0xff]  ;;  %v8857_v59 = vadd.f32 %v8770_v56, %v8499_v61  ;;  %v8511_v43 = vld [vmem:[#allocation4 + $0xf0] sm:$0xff] }
 0x498   : > { %v8950_v51 = vmax.f32 %v8918_v17, 0.0  ;;  %v8917_v16 = vld [vmem:[#allocation4 + $0x70] sm:$0xff]  ;;  %8890 = vst.msk [vmem:[#allocation4 + $0x98] sm:$0xff] %vm339_vm0, %v8858_v31 }
 0x499   : > { %v8949_v46 = vmax.f32 %v8917_v16, 0.0  ;;  %8889 = vst.msk [vmem:[#allocation4 + $0x90] sm:$0xff] %vm339_vm0, %v8857_v59  ;;  %v11371_v14 = vpop.f32.mrb[20].mxu1 }
 0x49a   : > { %8982 = vst.msk [vmem:[%s14477_s2 + $0x78] sm:$0xff] %vm339_vm0, %v8950_v51  ;;  %v8860_v10 = vadd.f32 %v11371_v14, %v8502_v44  ;;  %v8780_v9 = vpop.f32.mrb[21].mxu1 }
 0x49b   : > { %8981 = vst.msk [vmem:[%s14477_s2 + $0x70] sm:$0xff] %vm339_vm0, %v8949_v46  ;;  %v8920_v34 = vld [vmem:[#allocation4 + $0x88] sm:$0xff]  ;;  %v8859_v37 = vadd.f32 %v8780_v9, %v8501_v39 }
 0x49c   : > { %v8952_v3 = vmax.f32 %v8920_v34, 0.0  ;;  %v8919_v5 = vld [vmem:[#allocation4 + $0x80] sm:$0xff]  ;;  %8892 = vst.msk [vmem:[#allocation4 + $0xa8] sm:$0xff] %vm339_vm0, %v8860_v10 }
 0x49d   : > { %v8951_v11 = vmax.f32 %v8919_v5, 0.0  ;;  %8891 = vst.msk [vmem:[#allocation4 + $0xa0] sm:$0xff] %vm339_vm0, %v8859_v37  ;;  %v11374_v57 = vpop.f32.mrb[22].mxu1 }
 0x49e   : > { %8984 = vst.msk [vmem:[%s14477_s2 + $0x88] sm:$0xff] %vm339_vm0, %v8952_v3  ;;  %v8862_v7 = vadd.f32 %v11374_v57, %v8504_v40  ;;  %v8790_v19 = vpop.f32.mrb[23].mxu1 }
 0x49f   : > { %8983 = vst.msk [vmem:[%s14477_s2 + $0x80] sm:$0xff] %vm339_vm0, %v8951_v11  ;;  %v8922_v22 = vld [vmem:[#allocation4 + $0x98] sm:$0xff]  ;;  %v8861_v42 = vadd.f32 %v8790_v19, %v8503_v55 }
 0x4a0   : > { %v8954_v30 = vmax.f32 %v8922_v22, 0.0  ;;  %v8921_v35 = vld [vmem:[#allocation4 + $0x90] sm:$0xff]  ;;  %8894 = vst.msk [vmem:[#allocation4 + $0xb8] sm:$0xff] %vm339_vm0, %v8862_v7 }
 0x4a1   : > { %v8953_v21 = vmax.f32 %v8921_v35, 0.0  ;;  %8893 = vst.msk [vmem:[#allocation4 + $0xb0] sm:$0xff] %vm339_vm0, %v8861_v42  ;;  %v11377_v0 = vpop.f32.mrb[24].mxu1 }
 0x4a2   : > { %8986 = vst.msk [vmem:[%s14477_s2 + $0x98] sm:$0xff] %vm339_vm0, %v8954_v30  ;;  %v8864_v54 = vadd.f32 %v11377_v0, %v8506_v41  ;;  %v8800_v32 = vpop.f32.mrb[25].mxu1 }
 0x4a3   : > { %8985 = vst.msk [vmem:[%s14477_s2 + $0x90] sm:$0xff] %vm339_vm0, %v8953_v21  ;;  %v8924_v6 = vld [vmem:[#allocation4 + $0xa8] sm:$0xff]  ;;  %v8863_v49 = vadd.f32 %v8800_v32, %v8505_v52 }
 0x4a4   : > { %v8956_v50 = vmax.f32 %v8924_v6, 0.0  ;;  %v8923_v26 = vld [vmem:[#allocation4 + $0xa0] sm:$0xff]  ;;  %8896 = vst.msk [vmem:[#allocation4 + $0xc8] sm:$0xff] %vm339_vm0, %v8864_v54 }
 0x4a5   : > { %v8955_v24 = vmax.f32 %v8923_v26, 0.0  ;;  %8895 = vst.msk [vmem:[#allocation4 + $0xc0] sm:$0xff] %vm339_vm0, %v8863_v49  ;;  %v11380_v33 = vpop.f32.mrb[26].mxu1 }
 0x4a6   : > { %8988 = vst.msk [vmem:[%s14477_s2 + $0xa8] sm:$0xff] %vm339_vm0, %v8956_v50  ;;  %v8866_v47 = vadd.f32 %v11380_v33, %v8508_v60  ;;  %v8810_v38 = vpop.f32.mrb[27].mxu1 }
 0x4a7   : > { %8987 = vst.msk [vmem:[%s14477_s2 + $0xa0] sm:$0xff] %vm339_vm0, %v8955_v24  ;;  %v8926_v15 = vld [vmem:[#allocation4 + $0xb8] sm:$0xff]  ;;  %v8865_v29 = vadd.f32 %v8810_v38, %v8507_v1 }
 0x4a8   : > { %v8958_v62 = vmax.f32 %v8926_v15, 0.0  ;;  %v8925_v8 = vld [vmem:[#allocation4 + $0xb0] sm:$0xff]  ;;  %8898 = vst.msk [vmem:[#allocation4 + $0xd8] sm:$0xff] %vm339_vm0, %v8866_v47 }
 0x4a9   : > { %v8957_v36 = vmax.f32 %v8925_v8, 0.0  ;;  %8897 = vst.msk [vmem:[#allocation4 + $0xd0] sm:$0xff] %vm339_vm0, %v8865_v29  ;;  %v11383_v25 = vpop.f32.mrb[28].mxu1 }
 0x4aa   : > { %8990 = vst.msk [vmem:[%s14477_s2 + $0xb8] sm:$0xff] %vm339_vm0, %v8958_v62  ;;  %v8868_v58 = vadd.f32 %v11383_v25, %v8510_v48  ;;  %v8820_v28 = vpop.f32.mrb[29].mxu1 }
 0x4ab   : > { %8989 = vst.msk [vmem:[%s14477_s2 + $0xb0] sm:$0xff] %vm339_vm0, %v8957_v36  ;;  %v8928_v4 = vld [vmem:[#allocation4 + $0xc8] sm:$0xff]  ;;  %v8867_v53 = vadd.f32 %v8820_v28, %v8509_v23 }
 0x4ac   : > { %v8960_v18 = vmax.f32 %v8928_v4, 0.0  ;;  %v8927_v45 = vld [vmem:[#allocation4 + $0xc0] sm:$0xff]  ;;  %8900 = vst.msk [vmem:[#allocation4 + $0xe8] sm:$0xff] %vm339_vm0, %v8868_v58 }
 0x4ad   : > { %v8959_v13 = vmax.f32 %v8927_v45, 0.0  ;;  %8899 = vst.msk [vmem:[#allocation4 + $0xe0] sm:$0xff] %vm339_vm0, %v8867_v53  ;;  %v11386_v63 = vpop.f32.mrb[30].mxu1 }
 0x4ae   : > { %8992 = vst.msk [vmem:[%s14477_s2 + $0xc8] sm:$0xff] %vm339_vm0, %v8960_v18  ;;  %v8870_v2 = vadd.f32 %v11386_v63, %v8512_v12  ;;  %v8830_v20 = vpop.f32.mrb[31].mxu1 }
 0x4af   : > { %8991 = vst.msk [vmem:[%s14477_s2 + $0xc0] sm:$0xff] %vm339_vm0, %v8959_v13  ;;  %v8930_v27 = vld [vmem:[#allocation4 + $0xd8] sm:$0xff]  ;;  %v8869_v31 = vadd.f32 %v8830_v20, %v8511_v43 }
 0x4b0   : > { %v8962_v61 = vmax.f32 %v8930_v27, 0.0  ;;  %v8929_v56 = vld [vmem:[#allocation4 + $0xd0] sm:$0xff]  ;;  %8902 = vst.msk [vmem:[#allocation4 + $0xf8] sm:$0xff] %vm339_vm0, %v8870_v2 }
 0x4b1   : > { %v8961_v17 = vmax.f32 %v8929_v56, 0.0  ;;  %8901 = vst.msk [vmem:[#allocation4 + $0xf0] sm:$0xff] %vm339_vm0, %v8869_v31 }
 0x4b2   : > { %8994 = vst.msk [vmem:[%s14477_s2 + $0xd8] sm:$0xff] %vm339_vm0, %v8962_v61 }
 0x4b3   : > { %8993 = vst.msk [vmem:[%s14477_s2 + $0xd0] sm:$0xff] %vm339_vm0, %v8961_v17  ;;  %v8932_v59 = vld [vmem:[#allocation4 + $0xe8] sm:$0xff] }
 0x4b4   : > { %v8964_v51 = vmax.f32 %v8932_v59, 0.0  ;;  %v8931_v16 = vld [vmem:[#allocation4 + $0xe0] sm:$0xff] }
 0x4b5   : > { %v8963_v46 = vmax.f32 %v8931_v16, 0.0 }
 0x4b6   : > { %8996 = vst.msk [vmem:[%s14477_s2 + $0xe8] sm:$0xff] %vm339_vm0, %v8964_v51 }
 0x4b7   : > { %8995 = vst.msk [vmem:[%s14477_s2 + $0xe0] sm:$0xff] %vm339_vm0, %v8963_v46  ;;  %v8934_v44 = vld [vmem:[#allocation4 + $0xf8] sm:$0xff] }
 0x4b8   : > { %v8966_v14 = vmax.f32 %v8934_v44, 0.0  ;;  %v8933_v10 = vld [vmem:[#allocation4 + $0xf0] sm:$0xff] }
 0x4b9   : > { %v8965_v39 = vmax.f32 %v8933_v10, 0.0 }
 0x4ba   : > { %8998 = vst.msk [vmem:[%s14477_s2 + $0xf8] sm:$0xff] %vm339_vm0, %v8966_v14 }
 0x4bb   : > { %8997 = vst.msk [vmem:[%s14477_s2 + $0xf0] sm:$0xff] %vm339_vm0, %v8965_v39 }
 0x4bc   : > { %11737 = shalt.err (!%p11734_p7)
}
 0x4bd   : > { %s11738_s29 = scalar_lea.hbm %s14570_s17, 4096  ;;  %s11742_s27 = scalar_lea.hbm %s14626_s6, 8192 }
 0x4be   : > { %p11739_p9 = scmp.ne.s32.totalorder %s14570_s17, %s11738_s29  ;;  %p11743_p11 = scmp.lt.u32.totalorder %s14570_s17, %s14626_s6 }
 0x4bf   : > { %p11744_p2 = scmp.lt.u32.totalorder %s11742_s27, %s11738_s29  ;;  %p11746_p1 = scmp.lt.u32.totalorder %s11738_s29, %s14570_s17 }
 0x4c0   : > { %p11740_p0 = pnand %p11739_p9, %p14777_p13 }
 0x4c1   : > { %p11745_p12 = por %p11744_p2, %p11743_p11 }
 0x4c2   : > { %p11741_p8 = pneg %p11740_p0 }
 0x4c3   : > { %p11747_p6 = por %p11746_p1, %p11745_p12 }
 0x4c5   : > { %p11748_p10 = pnand %p11747_p6, %p11741_p8 }
 0x4c7   : > { %11751 = shalt.err (!%p11748_p10)
}
 0x4c8   : > { %s11812_s30 = smov 128   ;;  %s11813_s2 = smov 8  }
 0x4c9   : > { %11543 = dma.vmem_to_hbm [thread:$0]  (%p14777_p13), %s14572_s13, 4096, %s14570_s17, %s9000_s25, %s11812_s30, %s11812_s30, %s11813_s2  }
 0x4ca PF: > { %s9028_s4 = sand.u32 1, %s11790_s21   ;;  %p14778_p4 = scmp.ne.s32.totalorder %s14680_s28, 0 }
 0x4cb   : > { %p14779_p5 = scmp.ge.s32.totalorder %s11802_s24, 2  ;;  %s9029_s20 = scalar_lea.sflag [#allocation7], %s9028_s4 }
 0x4cd   : > { %p11560_p3 = pnand %p14779_p5, %p14778_p4 }
 0x4cf   : > { %11785 = dma.done.wait (!%p11560_p3), %s9029_s20, 4096  }
 0x4d0   : > { %11787 = vsyncadd (!%p11560_p3), %s9029_s20, 4294963200  ;;  %p23_p7 = scmp.ge.s32.totalorder %s11965_s8, 4   ;;  %s14780_s21 = smov %s11794_s22 }
 0x4d1   : > { %s14781_s22 = smov %s11798_s23  ;;  %s14782_s23 = smov %s11981_s11 }
 0x4d2   : > { %s14783_s24 = smov %s11965_s8  ;;  %25 = sbr.rel (!%p23_p7) target bundleno = 12 (0xc), region = 132 }
 0x4d9   :  { %9034 = vsyncpa [#allocation6], 1 }
 0x4da   :  { %9036 = vsyncpa [#allocation6 + $0x1], 1 }
 0x4db   :  { %9037 = vsyncpa [#allocation9], 1 }
 0x4dc   :  { %9039 = vsyncpa [#allocation9 + $0x1], 1 }
 0x4dd   :  { %9040 = vsyncpa [#allocation12], 1 }
 0x4de   :  { %9041 = vsyncpa [#allocation7], 1 }
 0x4df   :  { %9043 = vsyncpa [#allocation7 + $0x1], 1 }

</bundles_post_ra>
